<compile_context>
chip_gen: v7x
topology: tpu7x:2x2x1
jax: 0.10.0
libtpu: 0.0.40
codegen_flags: <defaults>
</compile_context>

<pallas_src>
import functools

import jax
import jax.numpy as jnp
from jax.experimental import pallas as pl
from jax.experimental.pallas import tpu as pltpu

NEG_SLOPE = 0.2
ACT_DTYPE = jnp.bfloat16          # activation / weight storage dtype


def _vmem_limit_bytes():
    """Per-generation VMEM budget (v7x: 64 MiB physical, v5e/v6e: 128 MiB)."""
    try:
        cap = pltpu.get_tpu_info().vmem_capacity_bytes
    except Exception:                       # noqa: BLE001 - conservative fallback
        cap = 64 * 1024 * 1024
    return int(cap * 3 // 4)


_VMEM_LIMIT = _vmem_limit_bytes()


# ----------------------------------------------------------------------------
# In-kernel helper: 3x3 same conv as 9 accumulating MXU dots on the flat
# padded plane.  The scratch holds (channels, margin | padded-plane | margin)
# with zero margins and a zero border ring, so every tap is a lane-shifted
# static slice.
# ----------------------------------------------------------------------------
def _conv3x3_dots(scr, cin, Wp, margin, Lp, w_ref, b_ref, lrelu):
    """scr: VMEM ref (>=cin, 2*margin + Lp); w_ref: (cout, 9*cin) bf16;
    b_ref: (cout, 1) f32.  Returns (cout, Lp) float32."""
    acc = None
    for t in range(9):
        dy, dx = divmod(t, 3)
        off = margin + (dy - 1) * Wp + (dx - 1)
        tap = scr[0:cin, off:off + Lp]                     # (cin, Lp) bf16
        w_t = w_ref[:, t * cin:(t + 1) * cin]              # (cout, cin) bf16
        d = jax.lax.dot_general(
            w_t, tap, dimension_numbers=(((1,), (0,)), ((), ())),
            preferred_element_type=jnp.float32)            # (cout, Lp) f32
        acc = d if acc is None else acc + d
    acc = acc + b_ref[...]                                 # lane-broadcast bias
    if lrelu:
        acc = jnp.where(acc >= 0, acc, NEG_SLOPE * acc)
    return acc


def _zero_margins(scr, margin, Lp):
    zeros_m = jnp.zeros((scr.shape[0], margin), scr.dtype)
    scr[:, 0:margin] = zeros_m
    scr[:, margin + Lp:margin + Lp + margin] = zeros_m


# ----------------------------------------------------------------------------
# Fused conv-chain kernel: N sequential 3x3 convs (+ optional LeakyReLU per
# stage, optional residual on the last stage) through ONE VMEM scratch.
# ----------------------------------------------------------------------------
def _conv_chain_kernel(*refs, chs, lrelus, Wp, margin, res_scale):
    n_stage = len(lrelus)
    has_res = res_scale is not None
    idx = 0
    keep_ref = refs[idx]; idx += 1
    x_ref = refs[idx]; idx += 1
    res_ref = None
    if has_res:
        res_ref = refs[idx]; idx += 1
    w_refs = refs[idx:idx + n_stage]; idx += n_stage
    b_refs = refs[idx:idx + n_stage]; idx += n_stage
    o_ref = refs[idx]; idx += 1
    scr = refs[idx]

    Lp = o_ref.shape[-1]
    keep = keep_ref[...]                       # (1, Lp) bf16: 0 on ring, 1 inside
    keep_f32 = keep.astype(jnp.float32)

    _zero_margins(scr, margin, Lp)
    scr[0:chs[0], margin:margin + Lp] = x_ref[...] * keep

    y = None
    for s in range(n_stage):
        y = _conv3x3_dots(scr, chs[s], Wp, margin, Lp,
                          w_refs[s], b_refs[s], lrelus[s])
        if s + 1 < n_stage:
            # re-zero the ring (it acts as conv zero padding for the next stage)
            scr[0:chs[s + 1], margin:margin + Lp] = (y * keep_f32).astype(scr.dtype)

    if has_res:
        y = y + res_scale * res_ref[...].astype(jnp.float32)
    o_ref[...] = y.astype(o_ref.dtype)


def conv_chain(x, keep, stages, *, Hp, Wp, residual=None, residual_scale=None,
               alias_residual=False):
    """Chain of fused same-padded 3x3 convs on flat padded activations.

    x        : (N, C0, Lp) ACT_DTYPE, Lp = Hp*Wp (ring content is don't-care)
    keep     : (1, Lp) ACT_DTYPE ring mask
    stages   : list of (w_flat (Cout, 9*Cin) bf16, bias (Cout, 1) f32, lrelu)
    residual : optional (N, C_last, Lp) added to the last stage output
    """
    N, c0, Lp = x.shape
    assert Lp == Hp * Wp, (Lp, Hp, Wp)
    chs = [c0] + [w.shape[0] for (w, _, _) in stages]
    for (w, _, _), cin in zip(stages, chs[:-1]):
        assert w.shape[1] == 9 * cin, (w.shape, cin)
    lrelus = tuple(bool(a) for (_, _, a) in stages)
    margin = Wp + 1
    scr_ch = max(chs[:-1])
    has_res = residual is not None

    inputs = [keep, x]
    in_specs = [pl.BlockSpec((1, Lp), lambda n: (0, 0)),
                pl.BlockSpec((None, c0, Lp), lambda n: (n, 0, 0))]
    if has_res:
        inputs.append(residual)
        in_specs.append(pl.BlockSpec((None, chs[-1], Lp), lambda n: (n, 0, 0)))
    for w, _, _ in stages:
        inputs.append(w)
        in_specs.append(pl.BlockSpec(w.shape, lambda n: (0, 0)))
    for _, b, _ in stages:
        inputs.append(b)
        in_specs.append(pl.BlockSpec(b.shape, lambda n: (0, 0)))

    io_aliases = {}
    if has_res and alias_residual:
        io_aliases = {2: 0}          # residual input buffer becomes the output

    kern = functools.partial(
        _conv_chain_kernel, chs=tuple(chs), lrelus=lrelus, Wp=Wp,
        margin=margin,
        res_scale=(float(residual_scale) if has_res else None))

    return pl.pallas_call(
        kern,
        out_shape=jax.ShapeDtypeStruct((N, chs[-1], Lp), x.dtype),
        grid=(N,),
        in_specs=in_specs,
        out_specs=pl.BlockSpec((None, chs[-1], Lp), lambda n: (n, 0, 0)),
        scratch_shapes=[pltpu.VMEM((scr_ch, Lp + 2 * margin), x.dtype)],
        input_output_aliases=io_aliases,
        compiler_params=pltpu.CompilerParams(
            dimension_semantics=("parallel",),
            vmem_limit_bytes=_VMEM_LIMIT),
    )(*inputs)


# ----------------------------------------------------------------------------
# Fused ResidualDenseBlock kernel: 5 convs, dense concat (channel-growing
# scratch, sublane-aligned appends), LeakyReLUs and residual epilogue.
# ----------------------------------------------------------------------------
def _rdb_kernel(*refs, nf, gc, Wp, margin, conv_scale, x_scale, has_extra):
    idx = 0
    keep_ref = refs[idx]; idx += 1
    x_ref = refs[idx]; idx += 1
    res_ref = None
    if has_extra:
        res_ref = refs[idx]; idx += 1
    w_refs = refs[idx:idx + 5]; idx += 5
    b_refs = refs[idx:idx + 5]; idx += 5
    o_ref = refs[idx]; idx += 1
    scr = refs[idx]

    Lp = o_ref.shape[-1]
    keep = keep_ref[...]
    keep_f32 = keep.astype(jnp.float32)

    _zero_margins(scr, margin, Lp)
    x = x_ref[...] * keep                               # ring-zeroed input
    scr[0:nf, margin:margin + Lp] = x

    # conv1..conv4 with LeakyReLU; outputs appended as new channel rows so
    # torch.cat((x, x1, ..., xk)) is just "use the first cin_k rows".
    off = nf
    for k in range(4):
        cin = nf + k * gc
        xk = _conv3x3_dots(scr, cin, Wp, margin, Lp,
                           w_refs[k], b_refs[k], lrelu=True)
        scr[off:off + gc, margin:margin + Lp] = (xk * keep_f32).astype(scr.dtype)
        off += gc

    # conv5 (no activation) + fused residual epilogue
    x5 = _conv3x3_dots(scr, nf + 4 * gc, Wp, margin, Lp,
                       w_refs[4], b_refs[4], lrelu=False)
    out = conv_scale * x5 + x_scale * x.astype(jnp.float32)
    if has_extra:
        out = out + res_ref[...].astype(jnp.float32)
    o_ref[...] = out.astype(o_ref.dtype)


def rdb_block(x, keep, rdb_params, *, Hp, Wp, conv_scale=0.2, x_scale=1.0,
              extra_res=None):
    """One fused ResidualDenseBlock.  Epilogue: conv_scale*x5 + x_scale*x
    (+ extra_res) — covers both the plain RDB residual and, for the last RDB
    of an RRDB, the folded RRDB-level x + 0.2*out residual."""
    N, nf, Lp = x.shape
    assert Lp == Hp * Wp
    gc = rdb_params["c1"][0].shape[0]
    ws = [rdb_params["c%d" % k][0] for k in range(1, 6)]
    bs = [rdb_params["c%d" % k][1] for k in range(1, 6)]
    has_extra = extra_res is not None
    margin = Wp + 1

    inputs = [keep, x]
    in_specs = [pl.BlockSpec((1, Lp), lambda n: (0, 0)),
                pl.BlockSpec((None, nf, Lp), lambda n: (n, 0, 0))]
    if has_extra:
        inputs.append(extra_res)
        in_specs.append(pl.BlockSpec((None, nf, Lp), lambda n: (n, 0, 0)))
    for w in ws:
        inputs.append(w)
        in_specs.append(pl.BlockSpec(w.shape, lambda n: (0, 0)))
    for b in bs:
        inputs.append(b)
        in_specs.append(pl.BlockSpec(b.shape, lambda n: (0, 0)))

    kern = functools.partial(_rdb_kernel, nf=nf, gc=gc, Wp=Wp, margin=margin,
                             conv_scale=float(conv_scale),
                             x_scale=float(x_scale), has_extra=has_extra)

    return pl.pallas_call(
        kern,
        out_shape=jax.ShapeDtypeStruct((N, nf, Lp), x.dtype),
        grid=(N,),
        in_specs=in_specs,
        out_specs=pl.BlockSpec((None, nf, Lp), lambda n: (n, 0, 0)),
        scratch_shapes=[pltpu.VMEM((nf + 4 * gc, Lp + 2 * margin), x.dtype)],
        compiler_params=pltpu.CompilerParams(
            dimension_semantics=("parallel",),
            vmem_limit_bytes=_VMEM_LIMIT),
    )(*inputs)


# ----------------------------------------------------------------------------
# Deterministic parameter init (xavier_normal gain=0.2), (Cout, 9*Cin) bf16
# ----------------------------------------------------------------------------
def _conv_params(key, cin, cout):
    kw, kb = jax.random.split(key)
    fan_in, fan_out = cin * 9, cout * 9
    std = 0.2 * (2.0 / (fan_in + fan_out)) ** 0.5
    w = std * jax.random.normal(kw, (cout, 3, 3, cin), jnp.float32)
    k = 1.0 / (cin * 9) ** 0.5
    b = jax.random.uniform(kb, (cout, 1), jnp.float32, minval=-k, maxval=k)
    # (Cout, 3, 3, Cin) -> (Cout, 9*Cin): tap-major / channel-minor columns,
    # matching the per-tap (Cout, Cin) slices taken in _conv3x3_dots.
    w_flat = w.reshape(cout, 9 * cin).astype(ACT_DTYPE)
    return (w_flat, b)


def init_rrdb_model_params(key, in_nc, out_nc, nf, nb, gc, num_rdb):
    n_conv = 7 + nb * num_rdb * 5
    keys = iter(jax.random.split(key, n_conv))
    params = {"conv1": _conv_params(next(keys), in_nc, nf)}
    rrdbs = []
    for _ in range(nb):
        rdbs = []
        for _ in range(num_rdb):
            rdbs.append({
                "c1": _conv_params(next(keys), nf, gc),
                "c2": _conv_params(next(keys), nf + gc, gc),
                "c3": _conv_params(next(keys), nf + 2 * gc, gc),
                "c4": _conv_params(next(keys), nf + 3 * gc, gc),
                "c5": _conv_params(next(keys), nf + 4 * gc, nf),
            })
        rrdbs.append(rdbs)
    params["rrdbs"] = rrdbs
    for name, cin, cout in (("conv2", nf, nf), ("upconv1", nf, nf),
                            ("conv3", nf, nf), ("conv4", nf, nf),
                            ("HRconv", nf, nf), ("conv_last", nf, out_nc)):
        params[name] = _conv_params(next(keys), cin, cout)
    # upconv2 exists in the torch module but is unused by forward; omitted.
    return params


# ----------------------------------------------------------------------------
# Forward pass (eval-mode semantics of the PyTorch module)
# ----------------------------------------------------------------------------
def _make_keep_mask(H, W):
    Hp, Wp = H + 2, W + 2
    m = jnp.zeros((Hp, Wp), jnp.float32).at[1:H + 1, 1:W + 1].set(1.0)
    return m.reshape(1, Hp * Wp).astype(ACT_DTYPE)


def rrdb_model_forward(x_nchw, params, *, scale_factor):
    N, in_nc, H, W = x_nchw.shape
    nf = params["conv1"][0].shape[0]
    out_nc = params["conv_last"][0].shape[0]
    Hp, Wp = H + 2, W + 2
    Lp = Hp * Wp

    # NCHW -> flat padded-plane layout (N, C, (H+2)*(W+2)), bf16.
    keep_lr = _make_keep_mask(H, W)
    x = jnp.pad(x_nchw.astype(ACT_DTYPE), ((0, 0), (0, 0), (1, 1), (1, 1)))
    x = x.reshape(N, in_nc, Lp)

    fea = conv_chain(x, keep_lr, [(*params["conv1"], False)], Hp=Hp, Wp=Wp)

    body = fea
    for rdbs in params["rrdbs"]:
        rrdb_in = body
        n_rdb = len(rdbs)
        for i, p in enumerate(rdbs):
            if i == n_rdb - 1:
                # fold the RRDB residual x + 0.2*out into the last RDB:
                # out = 0.04*x5 + 0.2*x_last + rrdb_in
                body = rdb_block(body, keep_lr, p, Hp=Hp, Wp=Wp,
                                 conv_scale=0.2 * 0.2, x_scale=0.2,
                                 extra_res=rrdb_in)
            else:
                body = rdb_block(body, keep_lr, p, Hp=Hp, Wp=Wp)  # 0.2*x5 + x

    # fea = fea + conv2(body); residual fused + aliased onto the output.
    fea = conv_chain(body, keep_lr, [(*params["conv2"], False)], Hp=Hp, Wp=Wp,
                     residual=fea, residual_scale=1.0, alias_residual=True)

    # F.interpolate(..., mode='nearest') with integer scale == pixel repeat.
    # TODO(synk): fuse this expand into the HR tail kernel (repeat in VMEM).
    s = int(scale_factor)
    sH, sW = H * s, W * s
    img = fea.reshape(N, nf, Hp, Wp)[:, :, 1:H + 1, 1:W + 1]
    img = jnp.repeat(jnp.repeat(img, s, axis=2), s, axis=3)
    img = jnp.pad(img, ((0, 0), (0, 0), (1, 1), (1, 1)))
    fea_hr = img.reshape(N, nf, (sH + 2) * (sW + 2))

    # Entire HR tail fused into one pallas_call (no HBM intermediates).
    keep_hr = _make_keep_mask(sH, sW)
    tail = [(*params["upconv1"], True), (*params["conv3"], True),
            (*params["conv4"], True), (*params["HRconv"], True),
            (*params["conv_last"], False)]
    out = conv_chain(fea_hr, keep_hr, tail, Hp=sH + 2, Wp=sW + 2)

    # flat padded plane -> NCHW interior, back to f32
    out = out.reshape(N, out_nc, sH + 2, sW + 2)[:, :, 1:sH + 1, 1:sW + 1]
    return out.astype(jnp.float32)


# ----------------------------------------------------------------------------
if __name__ == "__main__":
    in_nc, out_nc = 3, 3
    nf, nb, gc = 16, 2, 8
    num_rdb = 2
    scale_factor = 2

    key = jax.random.PRNGKey(0)
    k_params, k_x = jax.random.split(key)
    params = init_rrdb_model_params(k_params, in_nc, out_nc, nf, nb, gc,
                                    num_rdb)

    N, H, W = 2, 8, 8
    x = jax.random.normal(k_x, (N, in_nc, H, W), jnp.float32)  # NCHW like torch

    fwd = jax.jit(functools.partial(rrdb_model_forward,
                                    scale_factor=scale_factor))
    out = jax.block_until_ready(fwd(x, params))

    expected_shape = (N, out_nc, H * scale_factor, W * scale_factor)
    assert out.shape == expected_shape, (out.shape, expected_shape)
    assert bool(jnp.all(jnp.isfinite(out)))
    print("KERNEL_OK")
</pallas_src>

<mosaic_0001>
module attributes {stable_mosaic.version = 11 : i64} {
  func.func @_conv_chain_kernel(%arg0: i32, %arg1: memref<1x100xbf16, #tpu.memory_space<vmem>>, %arg2: memref<1x3x100xbf16, #tpu.memory_space<vmem>>, %arg3: memref<16x27xbf16, #tpu.memory_space<vmem>>, %arg4: memref<16x1xf32, #tpu.memory_space<vmem>>, %arg5: memref<1x16x100xbf16, #tpu.memory_space<vmem>>, %arg6: memref<3x122xbf16, #tpu.memory_space<vmem>>) attributes {dimension_semantics = [#tpu.dimension_semantics<parallel>], iteration_bounds = array<i64: 2>, scalar_prefetch = 0 : i64, scratch_operands = 1 : i64, tpu.core_type = #tpu.core_type<tc>, window_params = [{pipeline_mode = #tpu.pipeline_mode<synchronous>, transform_indices = @transform_0, window_bounds = array<i64: 1, 100>}, {transform_indices = @transform_1, window_bounds = array<i64: 1, 3, 100>}, {pipeline_mode = #tpu.pipeline_mode<synchronous>, transform_indices = @transform_2, window_bounds = array<i64: 16, 27>}, {pipeline_mode = #tpu.pipeline_mode<synchronous>, transform_indices = @transform_3, window_bounds = array<i64: 16, 1>}, {transform_indices = @transform_4, window_bounds = array<i64: 1, 16, 100>}]} {
    %c0 = arith.constant 0 : index
    %c0_0 = arith.constant 0 : index
    %0 = vector.load %arg1[%c0, %c0_0] : memref<1x100xbf16, #tpu.memory_space<vmem>>, vector<1x100xbf16>
    %cst = arith.constant 0.000000e+00 : bf16
    %1 = vector.broadcast %cst : bf16 to vector<3x11xbf16>
    %c0_1 = arith.constant 0 : index
    %c0_2 = arith.constant 0 : index
    %2 = vector.load %arg6[%c0_1, %c0_2] : memref<3x122xbf16, #tpu.memory_space<vmem>>, vector<3x11xbf16>
    tpu.vector_store %arg6[%c0_1, %c0_2], %1 {strides = array<i32>} : memref<3x122xbf16, #tpu.memory_space<vmem>>, vector<3x11xbf16>,
    %c0_3 = arith.constant 0 : index
    %c111 = arith.constant 111 : index
    %3 = vector.load %arg6[%c0_3, %c111] : memref<3x122xbf16, #tpu.memory_space<vmem>>, vector<3x11xbf16>
    tpu.vector_store %arg6[%c0_3, %c111], %1 {strides = array<i32>} : memref<3x122xbf16, #tpu.memory_space<vmem>>, vector<3x11xbf16>,
    %c0_4 = arith.constant 0 : index
    %c0_5 = arith.constant 0 : index
    %c0_6 = arith.constant 0 : index
    %4 = vector.load %arg2[%c0_4, %c0_5, %c0_6] : memref<1x3x100xbf16, #tpu.memory_space<vmem>>, vector<1x3x100xbf16>
    %5 = vector.shape_cast %4 : vector<1x3x100xbf16> to vector<3x100xbf16>
    %6 = vector.broadcast %0 : vector<1x100xbf16> to vector<3x100xbf16>
    %7 = arith.mulf %5, %6 : vector<3x100xbf16>
    %c0_7 = arith.constant 0 : index
    %c11 = arith.constant 11 : index
    %8 = vector.load %arg6[%c0_7, %c11] : memref<3x122xbf16, #tpu.memory_space<vmem>>, vector<3x100xbf16>
    tpu.vector_store %arg6[%c0_7, %c11], %7 {strides = array<i32>} : memref<3x122xbf16, #tpu.memory_space<vmem>>, vector<3x100xbf16>,
    %c0_8 = arith.constant 0 : index
    %c0_9 = arith.constant 0 : index
    %9 = vector.load %arg6[%c0_8, %c0_9] : memref<3x122xbf16, #tpu.memory_space<vmem>>, vector<3x100xbf16>
    %c0_10 = arith.constant 0 : index
    %c0_11 = arith.constant 0 : index
    %10 = vector.load %arg3[%c0_10, %c0_11] : memref<16x27xbf16, #tpu.memory_space<vmem>>, vector<16x3xbf16>
    %cst_12 = arith.constant dense<0.000000e+00> : vector<16x100xf32>
    %11 = tpu.matmul %10, %9, %cst_12 {dimension_numbers = #tpu.dot_dimension_numbers<[1], [0], [0], [1], [0, 0, 1, 1], [], []>} : vector<16x3xbf16>, vector<3x100xbf16>, vector<16x100xf32> -> vector<16x100xf32>
    %c0_13 = arith.constant 0 : index
    %c1 = arith.constant 1 : index
    %12 = vector.load %arg6[%c0_13, %c1] : memref<3x122xbf16, #tpu.memory_space<vmem>>, vector<3x100xbf16>
    %c0_14 = arith.constant 0 : index
    %c3 = arith.constant 3 : index
    %13 = vector.load %arg3[%c0_14, %c3] : memref<16x27xbf16, #tpu.memory_space<vmem>>, vector<16x3xbf16>
    %cst_15 = arith.constant dense<0.000000e+00> : vector<16x100xf32>
    %14 = tpu.matmul %13, %12, %cst_15 {dimension_numbers = #tpu.dot_dimension_numbers<[1], [0], [0], [1], [0, 0, 1, 1], [], []>} : vector<16x3xbf16>, vector<3x100xbf16>, vector<16x100xf32> -> vector<16x100xf32>
    %15 = arith.addf %11, %14 : vector<16x100xf32>
    %c0_16 = arith.constant 0 : index
    %c2 = arith.constant 2 : index
    %16 = vector.load %arg6[%c0_16, %c2] : memref<3x122xbf16, #tpu.memory_space<vmem>>, vector<3x100xbf16>
    %c0_17 = arith.constant 0 : index
    %c6 = arith.constant 6 : index
    %17 = vector.load %arg3[%c0_17, %c6] : memref<16x27xbf16, #tpu.memory_space<vmem>>, vector<16x3xbf16>
    %cst_18 = arith.constant dense<0.000000e+00> : vector<16x100xf32>
    %18 = tpu.matmul %17, %16, %cst_18 {dimension_numbers = #tpu.dot_dimension_numbers<[1], [0], [0], [1], [0, 0, 1, 1], [], []>} : vector<16x3xbf16>, vector<3x100xbf16>, vector<16x100xf32> -> vector<16x100xf32>
    %19 = arith.addf %15, %18 : vector<16x100xf32>
    %c0_19 = arith.constant 0 : index
    %c10 = arith.constant 10 : index
    %20 = vector.load %arg6[%c0_19, %c10] : memref<3x122xbf16, #tpu.memory_space<vmem>>, vector<3x100xbf16>
    %c0_20 = arith.constant 0 : index
    %c9 = arith.constant 9 : index
    %21 = vector.load %arg3[%c0_20, %c9] : memref<16x27xbf16, #tpu.memory_space<vmem>>, vector<16x3xbf16>
    %cst_21 = arith.constant dense<0.000000e+00> : vector<16x100xf32>
    %22 = tpu.matmul %21, %20, %cst_21 {dimension_numbers = #tpu.dot_dimension_numbers<[1], [0], [0], [1], [0, 0, 1, 1], [], []>} : vector<16x3xbf16>, vector<3x100xbf16>, vector<16x100xf32> -> vector<16x100xf32>
    %23 = arith.addf %19, %22 : vector<16x100xf32>
    %c0_22 = arith.constant 0 : index
    %c11_23 = arith.constant 11 : index
    %24 = vector.load %arg6[%c0_22, %c11_23] : memref<3x122xbf16, #tpu.memory_space<vmem>>, vector<3x100xbf16>
    %c0_24 = arith.constant 0 : index
    %c12 = arith.constant 12 : index
    %25 = vector.load %arg3[%c0_24, %c12] : memref<16x27xbf16, #tpu.memory_space<vmem>>, vector<16x3xbf16>
    %cst_25 = arith.constant dense<0.000000e+00> : vector<16x100xf32>
    %26 = tpu.matmul %25, %24, %cst_25 {dimension_numbers = #tpu.dot_dimension_numbers<[1], [0], [0], [1], [0, 0, 1, 1], [], []>} : vector<16x3xbf16>, vector<3x100xbf16>, vector<16x100xf32> -> vector<16x100xf32>
    %27 = arith.addf %23, %26 : vector<16x100xf32>
    %c0_26 = arith.constant 0 : index
    %c12_27 = arith.constant 12 : index
    %28 = vector.load %arg6[%c0_26, %c12_27] : memref<3x122xbf16, #tpu.memory_space<vmem>>, vector<3x100xbf16>
    %c0_28 = arith.constant 0 : index
    %c15 = arith.constant 15 : index
    %29 = vector.load %arg3[%c0_28, %c15] : memref<16x27xbf16, #tpu.memory_space<vmem>>, vector<16x3xbf16>
    %cst_29 = arith.constant dense<0.000000e+00> : vector<16x100xf32>
    %30 = tpu.matmul %29, %28, %cst_29 {dimension_numbers = #tpu.dot_dimension_numbers<[1], [0], [0], [1], [0, 0, 1, 1], [], []>} : vector<16x3xbf16>, vector<3x100xbf16>, vector<16x100xf32> -> vector<16x100xf32>
    %31 = arith.addf %27, %30 : vector<16x100xf32>
    %c0_30 = arith.constant 0 : index
    %c20 = arith.constant 20 : index
    %32 = vector.load %arg6[%c0_30, %c20] : memref<3x122xbf16, #tpu.memory_space<vmem>>, vector<3x100xbf16>
    %c0_31 = arith.constant 0 : index
    %c18 = arith.constant 18 : index
    %33 = vector.load %arg3[%c0_31, %c18] : memref<16x27xbf16, #tpu.memory_space<vmem>>, vector<16x3xbf16>
    %cst_32 = arith.constant dense<0.000000e+00> : vector<16x100xf32>
    %34 = tpu.matmul %33, %32, %cst_32 {dimension_numbers = #tpu.dot_dimension_numbers<[1], [0], [0], [1], [0, 0, 1, 1], [], []>} : vector<16x3xbf16>, vector<3x100xbf16>, vector<16x100xf32> -> vector<16x100xf32>
    %35 = arith.addf %31, %34 : vector<16x100xf32>
    %c0_33 = arith.constant 0 : index
    %c21 = arith.constant 21 : index
    %36 = vector.load %arg6[%c0_33, %c21] : memref<3x122xbf16, #tpu.memory_space<vmem>>, vector<3x100xbf16>
    %c0_34 = arith.constant 0 : index
    %c21_35 = arith.constant 21 : index
    %37 = vector.load %arg3[%c0_34, %c21_35] : memref<16x27xbf16, #tpu.memory_space<vmem>>, vector<16x3xbf16>
    %cst_36 = arith.constant dense<0.000000e+00> : vector<16x100xf32>
    %38 = tpu.matmul %37, %36, %cst_36 {dimension_numbers = #tpu.dot_dimension_numbers<[1], [0], [0], [1], [0, 0, 1, 1], [], []>} : vector<16x3xbf16>, vector<3x100xbf16>, vector<16x100xf32> -> vector<16x100xf32>
    %39 = arith.addf %35, %38 : vector<16x100xf32>
    %c0_37 = arith.constant 0 : index
    %c22 = arith.constant 22 : index
    %40 = vector.load %arg6[%c0_37, %c22] : memref<3x122xbf16, #tpu.memory_space<vmem>>, vector<3x100xbf16>
    %c0_38 = arith.constant 0 : index
    %c24 = arith.constant 24 : index
    %41 = vector.load %arg3[%c0_38, %c24] : memref<16x27xbf16, #tpu.memory_space<vmem>>, vector<16x3xbf16>
    %cst_39 = arith.constant dense<0.000000e+00> : vector<16x100xf32>
    %42 = tpu.matmul %41, %40, %cst_39 {dimension_numbers = #tpu.dot_dimension_numbers<[1], [0], [0], [1], [0, 0, 1, 1], [], []>} : vector<16x3xbf16>, vector<3x100xbf16>, vector<16x100xf32> -> vector<16x100xf32>
    %43 = arith.addf %39, %42 : vector<16x100xf32>
    %c0_40 = arith.constant 0 : index
    %c0_41 = arith.constant 0 : index
    %44 = vector.load %arg4[%c0_40, %c0_41] : memref<16x1xf32, #tpu.memory_space<vmem>>, vector<16x1xf32>
    %45 = vector.broadcast %44 : vector<16x1xf32> to vector<16x100xf32>
    %46 = arith.addf %43, %45 : vector<16x100xf32>
    %47 = arith.truncf %46 : vector<16x100xf32> to vector<16x100xbf16>
    %c0_42 = arith.constant 0 : index
    %c0_43 = arith.constant 0 : index
    %c0_44 = arith.constant 0 : index
    %48 = vector.load %arg5[%c0_42, %c0_43, %c0_44] : memref<1x16x100xbf16, #tpu.memory_space<vmem>>, vector<1x16x100xbf16>
    %49 = vector.shape_cast %48 : vector<1x16x100xbf16> to vector<16x100xbf16>
    %50 = vector.shape_cast %47 : vector<16x100xbf16> to vector<1x16x100xbf16>
    tpu.vector_store %arg5[%c0_42, %c0_43, %c0_44], %50 {strides = array<i32>} : memref<1x16x100xbf16, #tpu.memory_space<vmem>>, vector<1x16x100xbf16>,
    return
  }
  func.func @transform_0(%arg0: i32) -> (i32, i32) {
    %c0_i32 = arith.constant 0 : i32
    %c0_i32_0 = arith.constant 0 : i32
    %c0_i32_1 = arith.constant 0 : i32
    return %c0_i32, %c0_i32_0 : i32, i32
  }
  func.func @transform_1(%arg0: i32) -> (i32, i32, i32) {
    %c0_i32 = arith.constant 0 : i32
    %c0_i32_0 = arith.constant 0 : i32
    %c0_i32_1 = arith.constant 0 : i32
    return %arg0, %c0_i32, %c0_i32_0 : i32, i32, i32
  }
  func.func @transform_2(%arg0: i32) -> (i32, i32) {
    %c0_i32 = arith.constant 0 : i32
    %c0_i32_0 = arith.constant 0 : i32
    %c0_i32_1 = arith.constant 0 : i32
    return %c0_i32, %c0_i32_0 : i32, i32
  }
  func.func @transform_3(%arg0: i32) -> (i32, i32) {
    %c0_i32 = arith.constant 0 : i32
    %c0_i32_0 = arith.constant 0 : i32
    %c0_i32_1 = arith.constant 0 : i32
    return %c0_i32, %c0_i32_0 : i32, i32
  }
  func.func @transform_4(%arg0: i32) -> (i32, i32, i32) {
    %c0_i32 = arith.constant 0 : i32
    %c0_i32_0 = arith.constant 0 : i32
    %c0_i32_1 = arith.constant 0 : i32
    return %arg0, %c0_i32, %c0_i32_0 : i32, i32, i32
  }
}

module attributes {stable_mosaic.version = 11 : i64} {
  func.func @_rdb_kernel(%arg0: i32, %arg1: memref<1x100xbf16, #tpu.memory_space<vmem>>, %arg2: memref<1x16x100xbf16, #tpu.memory_space<vmem>>, %arg3: memref<8x144xbf16, #tpu.memory_space<vmem>>, %arg4: memref<8x216xbf16, #tpu.memory_space<vmem>>, %arg5: memref<8x288xbf16, #tpu.memory_space<vmem>>, %arg6: memref<8x360xbf16, #tpu.memory_space<vmem>>, %arg7: memref<16x432xbf16, #tpu.memory_space<vmem>>, %arg8: memref<8x1xf32, #tpu.memory_space<vmem>>, %arg9: memref<8x1xf32, #tpu.memory_space<vmem>>, %arg10: memref<8x1xf32, #tpu.memory_space<vmem>>, %arg11: memref<8x1xf32, #tpu.memory_space<vmem>>, %arg12: memref<16x1xf32, #tpu.memory_space<vmem>>, %arg13: memref<1x16x100xbf16, #tpu.memory_space<vmem>>, %arg14: memref<48x122xbf16, #tpu.memory_space<vmem>>) attributes {dimension_semantics = [#tpu.dimension_semantics<parallel>], iteration_bounds = array<i64: 2>, scalar_prefetch = 0 : i64, scratch_operands = 1 : i64, tpu.core_type = #tpu.core_type<tc>, window_params = [{pipeline_mode = #tpu.pipeline_mode<synchronous>, transform_indices = @transform_0, window_bounds = array<i64: 1, 100>}, {transform_indices = @transform_1, window_bounds = array<i64: 1, 16, 100>}, {pipeline_mode = #tpu.pipeline_mode<synchronous>, transform_indices = @transform_2, window_bounds = array<i64: 8, 144>}, {pipeline_mode = #tpu.pipeline_mode<synchronous>, transform_indices = @transform_3, window_bounds = array<i64: 8, 216>}, {pipeline_mode = #tpu.pipeline_mode<synchronous>, transform_indices = @transform_4, window_bounds = array<i64: 8, 288>}, {pipeline_mode = #tpu.pipeline_mode<synchronous>, transform_indices = @transform_5, window_bounds = array<i64: 8, 360>}, {pipeline_mode = #tpu.pipeline_mode<synchronous>, transform_indices = @transform_6, window_bounds = array<i64: 16, 432>}, {pipeline_mode = #tpu.pipeline_mode<synchronous>, transform_indices = @transform_7, window_bounds = array<i64: 8, 1>}, {pipeline_mode = #tpu.pipeline_mode<synchronous>, transform_indices = @transform_8, window_bounds = array<i64: 8, 1>}, {pipeline_mode = #tpu.pipeline_mode<synchronous>, transform_indices = @transform_9, window_bounds = array<i64: 8, 1>}, {pipeline_mode = #tpu.pipeline_mode<synchronous>, transform_indices = @transform_10, window_bounds = array<i64: 8, 1>}, {pipeline_mode = #tpu.pipeline_mode<synchronous>, transform_indices = @transform_11, window_bounds = array<i64: 16, 1>}, {transform_indices = @transform_12, window_bounds = array<i64: 1, 16, 100>}]} {
    %c0 = arith.constant 0 : index
    %c0_0 = arith.constant 0 : index
    %0 = vector.load %arg1[%c0, %c0_0] : memref<1x100xbf16, #tpu.memory_space<vmem>>, vector<1x100xbf16>
    %1 = arith.extf %0 : vector<1x100xbf16> to vector<1x100xf32>
    %cst = arith.constant 0.000000e+00 : bf16
    %2 = vector.broadcast %cst : bf16 to vector<48x11xbf16>
    %c0_1 = arith.constant 0 : index
    %c0_2 = arith.constant 0 : index
    %3 = vector.load %arg14[%c0_1, %c0_2] : memref<48x122xbf16, #tpu.memory_space<vmem>>, vector<48x11xbf16>
    tpu.vector_store %arg14[%c0_1, %c0_2], %2 {strides = array<i32>} : memref<48x122xbf16, #tpu.memory_space<vmem>>, vector<48x11xbf16>,
    %c0_3 = arith.constant 0 : index
    %c111 = arith.constant 111 : index
    %4 = vector.load %arg14[%c0_3, %c111] : memref<48x122xbf16, #tpu.memory_space<vmem>>, vector<48x11xbf16>
    tpu.vector_store %arg14[%c0_3, %c111], %2 {strides = array<i32>} : memref<48x122xbf16, #tpu.memory_space<vmem>>, vector<48x11xbf16>,
    %c0_4 = arith.constant 0 : index
    %c0_5 = arith.constant 0 : index
    %c0_6 = arith.constant 0 : index
    %5 = vector.load %arg2[%c0_4, %c0_5, %c0_6] : memref<1x16x100xbf16, #tpu.memory_space<vmem>>, vector<1x16x100xbf16>
    %6 = vector.shape_cast %5 : vector<1x16x100xbf16> to vector<16x100xbf16>
    %7 = vector.broadcast %0 : vector<1x100xbf16> to vector<16x100xbf16>
    %8 = arith.mulf %6, %7 : vector<16x100xbf16>
    %c0_7 = arith.constant 0 : index
    %c11 = arith.constant 11 : index
    %9 = vector.load %arg14[%c0_7, %c11] : memref<48x122xbf16, #tpu.memory_space<vmem>>, vector<16x100xbf16>
    tpu.vector_store %arg14[%c0_7, %c11], %8 {strides = array<i32>} : memref<48x122xbf16, #tpu.memory_space<vmem>>, vector<16x100xbf16>,
    %c0_8 = arith.constant 0 : index
    %c0_9 = arith.constant 0 : index
    %10 = vector.load %arg14[%c0_8, %c0_9] : memref<48x122xbf16, #tpu.memory_space<vmem>>, vector<16x100xbf16>
    %c0_10 = arith.constant 0 : index
    %c0_11 = arith.constant 0 : index
    %11 = vector.load %arg3[%c0_10, %c0_11] : memref<8x144xbf16, #tpu.memory_space<vmem>>, vector<8x16xbf16>
    %cst_12 = arith.constant dense<0.000000e+00> : vector<8x100xf32>
    %12 = tpu.matmul %11, %10, %cst_12 {dimension_numbers = #tpu.dot_dimension_numbers<[1], [0], [0], [1], [0, 0, 1, 1], [], []>} : vector<8x16xbf16>, vector<16x100xbf16>, vector<8x100xf32> -> vector<8x100xf32>
    %c0_13 = arith.constant 0 : index
    %c1 = arith.constant 1 : index
    %13 = vector.load %arg14[%c0_13, %c1] : memref<48x122xbf16, #tpu.memory_space<vmem>>, vector<16x100xbf16>
    %c0_14 = arith.constant 0 : index
    %c16 = arith.constant 16 : index
    %14 = vector.load %arg3[%c0_14, %c16] : memref<8x144xbf16, #tpu.memory_space<vmem>>, vector<8x16xbf16>
    %cst_15 = arith.constant dense<0.000000e+00> : vector<8x100xf32>
    %15 = tpu.matmul %14, %13, %cst_15 {dimension_numbers = #tpu.dot_dimension_numbers<[1], [0], [0], [1], [0, 0, 1, 1], [], []>} : vector<8x16xbf16>, vector<16x100xbf16>, vector<8x100xf32> -> vector<8x100xf32>
    %16 = arith.addf %12, %15 : vector<8x100xf32>
    %c0_16 = arith.constant 0 : index
    %c2 = arith.constant 2 : index
    %17 = vector.load %arg14[%c0_16, %c2] : memref<48x122xbf16, #tpu.memory_space<vmem>>, vector<16x100xbf16>
    %c0_17 = arith.constant 0 : index
    %c32 = arith.constant 32 : index
    %18 = vector.load %arg3[%c0_17, %c32] : memref<8x144xbf16, #tpu.memory_space<vmem>>, vector<8x16xbf16>
    %cst_18 = arith.constant dense<0.000000e+00> : vector<8x100xf32>
    %19 = tpu.matmul %18, %17, %cst_18 {dimension_numbers = #tpu.dot_dimension_numbers<[1], [0], [0], [1], [0, 0, 1, 1], [], []>} : vector<8x16xbf16>, vector<16x100xbf16>, vector<8x100xf32> -> vector<8x100xf32>
    %20 = arith.addf %16, %19 : vector<8x100xf32>
    %c0_19 = arith.constant 0 : index
    %c10 = arith.constant 10 : index
    %21 = vector.load %arg14[%c0_19, %c10] : memref<48x122xbf16, #tpu.memory_space<vmem>>, vector<16x100xbf16>
    %c0_20 = arith.constant 0 : index
    %c48 = arith.constant 48 : index
    %22 = vector.load %arg3[%c0_20, %c48] : memref<8x144xbf16, #tpu.memory_space<vmem>>, vector<8x16xbf16>
    %cst_21 = arith.constant dense<0.000000e+00> : vector<8x100xf32>
    %23 = tpu.matmul %22, %21, %cst_21 {dimension_numbers = #tpu.dot_dimension_numbers<[1], [0], [0], [1], [0, 0, 1, 1], [], []>} : vector<8x16xbf16>, vector<16x100xbf16>, vector<8x100xf32> -> vector<8x100xf32>
    %24 = arith.addf %20, %23 : vector<8x100xf32>
    %c0_22 = arith.constant 0 : index
    %c11_23 = arith.constant 11 : index
    %25 = vector.load %arg14[%c0_22, %c11_23] : memref<48x122xbf16, #tpu.memory_space<vmem>>, vector<16x100xbf16>
    %c0_24 = arith.constant 0 : index
    %c64 = arith.constant 64 : index
    %26 = vector.load %arg3[%c0_24, %c64] : memref<8x144xbf16, #tpu.memory_space<vmem>>, vector<8x16xbf16>
    %cst_25 = arith.constant dense<0.000000e+00> : vector<8x100xf32>
    %27 = tpu.matmul %26, %25, %cst_25 {dimension_numbers = #tpu.dot_dimension_numbers<[1], [0], [0], [1], [0, 0, 1, 1], [], []>} : vector<8x16xbf16>, vector<16x100xbf16>, vector<8x100xf32> -> vector<8x100xf32>
    %28 = arith.addf %24, %27 : vector<8x100xf32>
    %c0_26 = arith.constant 0 : index
    %c12 = arith.constant 12 : index
    %29 = vector.load %arg14[%c0_26, %c12] : memref<48x122xbf16, #tpu.memory_space<vmem>>, vector<16x100xbf16>
    %c0_27 = arith.constant 0 : index
    %c80 = arith.constant 80 : index
    %30 = vector.load %arg3[%c0_27, %c80] : memref<8x144xbf16, #tpu.memory_space<vmem>>, vector<8x16xbf16>
    %cst_28 = arith.constant dense<0.000000e+00> : vector<8x100xf32>
    %31 = tpu.matmul %30, %29, %cst_28 {dimension_numbers = #tpu.dot_dimension_numbers<[1], [0], [0], [1], [0, 0, 1, 1], [], []>} : vector<8x16xbf16>, vector<16x100xbf16>, vector<8x100xf32> -> vector<8x100xf32>
    %32 = arith.addf %28, %31 : vector<8x100xf32>
    %c0_29 = arith.constant 0 : index
    %c20 = arith.constant 20 : index
    %33 = vector.load %arg14[%c0_29, %c20] : memref<48x122xbf16, #tpu.memory_space<vmem>>, vector<16x100xbf16>
    %c0_30 = arith.constant 0 : index
    %c96 = arith.constant 96 : index
    %34 = vector.load %arg3[%c0_30, %c96] : memref<8x144xbf16, #tpu.memory_space<vmem>>, vector<8x16xbf16>
    %cst_31 = arith.constant dense<0.000000e+00> : vector<8x100xf32>
    %35 = tpu.matmul %34, %33, %cst_31 {dimension_numbers = #tpu.dot_dimension_numbers<[1], [0], [0], [1], [0, 0, 1, 1], [], []>} : vector<8x16xbf16>, vector<16x100xbf16>, vector<8x100xf32> -> vector<8x100xf32>
    %36 = arith.addf %32, %35 : vector<8x100xf32>
    %c0_32 = arith.constant 0 : index
    %c21 = arith.constant 21 : index
    %37 = vector.load %arg14[%c0_32, %c21] : memref<48x122xbf16, #tpu.memory_space<vmem>>, vector<16x100xbf16>
    %c0_33 = arith.constant 0 : index
    %c112 = arith.constant 112 : index
    %38 = vector.load %arg3[%c0_33, %c112] : memref<8x144xbf16, #tpu.memory_space<vmem>>, vector<8x16xbf16>
    %cst_34 = arith.constant dense<0.000000e+00> : vector<8x100xf32>
    %39 = tpu.matmul %38, %37, %cst_34 {dimension_numbers = #tpu.dot_dimension_numbers<[1], [0], [0], [1], [0, 0, 1, 1], [], []>} : vector<8x16xbf16>, vector<16x100xbf16>, vector<8x100xf32> -> vector<8x100xf32>
    %40 = arith.addf %36, %39 : vector<8x100xf32>
    %c0_35 = arith.constant 0 : index
    %c22 = arith.constant 22 : index
    %41 = vector.load %arg14[%c0_35, %c22] : memref<48x122xbf16, #tpu.memory_space<vmem>>, vector<16x100xbf16>
    %c0_36 = arith.constant 0 : index
    %c128 = arith.constant 128 : index
    %42 = vector.load %arg3[%c0_36, %c128] : memref<8x144xbf16, #tpu.memory_space<vmem>>, vector<8x16xbf16>
    %cst_37 = arith.constant dense<0.000000e+00> : vector<8x100xf32>
    %43 = tpu.matmul %42, %41, %cst_37 {dimension_numbers = #tpu.dot_dimension_numbers<[1], [0], [0], [1], [0, 0, 1, 1], [], []>} : vector<8x16xbf16>, vector<16x100xbf16>, vector<8x100xf32> -> vector<8x100xf32>
    %44 = arith.addf %40, %43 : vector<8x100xf32>
    %c0_38 = arith.constant 0 : index
    %c0_39 = arith.constant 0 : index
    %45 = vector.load %arg8[%c0_38, %c0_39] : memref<8x1xf32, #tpu.memory_space<vmem>>, vector<8x1xf32>
    %46 = vector.broadcast %45 : vector<8x1xf32> to vector<8x100xf32>
    %47 = arith.addf %44, %46 : vector<8x100xf32>
    %cst_40 = arith.constant 0.000000e+00 : f32
    %48 = vector.broadcast %cst_40 : f32 to vector<8x100xf32>
    %49 = arith.cmpf oge, %47, %48 : vector<8x100xf32>
    %cst_41 = arith.constant 2.000000e-01 : f32
    %50 = vector.broadcast %cst_41 : f32 to vector<8x100xf32>
    %51 = arith.mulf %50, %47 : vector<8x100xf32>
    %52 = arith.select %49, %47, %51 : vector<8x100xi1>, vector<8x100xf32>
    %53 = vector.broadcast %1 : vector<1x100xf32> to vector<8x100xf32>
    %54 = arith.mulf %52, %53 : vector<8x100xf32>
    %55 = arith.truncf %54 : vector<8x100xf32> to vector<8x100xbf16>
    %c16_42 = arith.constant 16 : index
    %c11_43 = arith.constant 11 : index
    %56 = vector.load %arg14[%c16_42, %c11_43] : memref<48x122xbf16, #tpu.memory_space<vmem>>, vector<8x100xbf16>
    tpu.vector_store %arg14[%c16_42, %c11_43], %55 {strides = array<i32>} : memref<48x122xbf16, #tpu.memory_space<vmem>>, vector<8x100xbf16>,
    %c0_44 = arith.constant 0 : index
    %c0_45 = arith.constant 0 : index
    %57 = vector.load %arg14[%c0_44, %c0_45] : memref<48x122xbf16, #tpu.memory_space<vmem>>, vector<24x100xbf16>
    %c0_46 = arith.constant 0 : index
    %c0_47 = arith.constant 0 : index
    %58 = vector.load %arg4[%c0_46, %c0_47] : memref<8x216xbf16, #tpu.memory_space<vmem>>, vector<8x24xbf16>
    %cst_48 = arith.constant dense<0.000000e+00> : vector<8x100xf32>
    %59 = tpu.matmul %58, %57, %cst_48 {dimension_numbers = #tpu.dot_dimension_numbers<[1], [0], [0], [1], [0, 0, 1, 1], [], []>} : vector<8x24xbf16>, vector<24x100xbf16>, vector<8x100xf32> -> vector<8x100xf32>
    %c0_49 = arith.constant 0 : index
    %c1_50 = arith.constant 1 : index
    %60 = vector.load %arg14[%c0_49, %c1_50] : memref<48x122xbf16, #tpu.memory_space<vmem>>, vector<24x100xbf16>
    %c0_51 = arith.constant 0 : index
    %c24 = arith.constant 24 : index
    %61 = vector.load %arg4[%c0_51, %c24] : memref<8x216xbf16, #tpu.memory_space<vmem>>, vector<8x24xbf16>
    %cst_52 = arith.constant dense<0.000000e+00> : vector<8x100xf32>
    %62 = tpu.matmul %61, %60, %cst_52 {dimension_numbers = #tpu.dot_dimension_numbers<[1], [0], [0], [1], [0, 0, 1, 1], [], []>} : vector<8x24xbf16>, vector<24x100xbf16>, vector<8x100xf32> -> vector<8x100xf32>
    %63 = arith.addf %59, %62 : vector<8x100xf32>
    %c0_53 = arith.constant 0 : index
    %c2_54 = arith.constant 2 : index
    %64 = vector.load %arg14[%c0_53, %c2_54] : memref<48x122xbf16, #tpu.memory_space<vmem>>, vector<24x100xbf16>
    %c0_55 = arith.constant 0 : index
    %c48_56 = arith.constant 48 : index
    %65 = vector.load %arg4[%c0_55, %c48_56] : memref<8x216xbf16, #tpu.memory_space<vmem>>, vector<8x24xbf16>
    %cst_57 = arith.constant dense<0.000000e+00> : vector<8x100xf32>
    %66 = tpu.matmul %65, %64, %cst_57 {dimension_numbers = #tpu.dot_dimension_numbers<[1], [0], [0], [1], [0, 0, 1, 1], [], []>} : vector<8x24xbf16>, vector<24x100xbf16>, vector<8x100xf32> -> vector<8x100xf32>
    %67 = arith.addf %63, %66 : vector<8x100xf32>
    %c0_58 = arith.constant 0 : index
    %c10_59 = arith.constant 10 : index
    %68 = vector.load %arg14[%c0_58, %c10_59] : memref<48x122xbf16, #tpu.memory_space<vmem>>, vector<24x100xbf16>
    %c0_60 = arith.constant 0 : index
    %c72 = arith.constant 72 : index
    %69 = vector.load %arg4[%c0_60, %c72] : memref<8x216xbf16, #tpu.memory_space<vmem>>, vector<8x24xbf16>
    %cst_61 = arith.constant dense<0.000000e+00> : vector<8x100xf32>
    %70 = tpu.matmul %69, %68, %cst_61 {dimension_numbers = #tpu.dot_dimension_numbers<[1], [0], [0], [1], [0, 0, 1, 1], [], []>} : vector<8x24xbf16>, vector<24x100xbf16>, vector<8x100xf32> -> vector<8x100xf32>
    %71 = arith.addf %67, %70 : vector<8x100xf32>
    %c0_62 = arith.constant 0 : index
    %c11_63 = arith.constant 11 : index
    %72 = vector.load %arg14[%c0_62, %c11_63] : memref<48x122xbf16, #tpu.memory_space<vmem>>, vector<24x100xbf16>
    %c0_64 = arith.constant 0 : index
    %c96_65 = arith.constant 96 : index
    %73 = vector.load %arg4[%c0_64, %c96_65] : memref<8x216xbf16, #tpu.memory_space<vmem>>, vector<8x24xbf16>
    %cst_66 = arith.constant dense<0.000000e+00> : vector<8x100xf32>
    %74 = tpu.matmul %73, %72, %cst_66 {dimension_numbers = #tpu.dot_dimension_numbers<[1], [0], [0], [1], [0, 0, 1, 1], [], []>} : vector<8x24xbf16>, vector<24x100xbf16>, vector<8x100xf32> -> vector<8x100xf32>
    %75 = arith.addf %71, %74 : vector<8x100xf32>
    %c0_67 = arith.constant 0 : index
    %c12_68 = arith.constant 12 : index
    %76 = vector.load %arg14[%c0_67, %c12_68] : memref<48x122xbf16, #tpu.memory_space<vmem>>, vector<24x100xbf16>
    %c0_69 = arith.constant 0 : index
    %c120 = arith.constant 120 : index
    %77 = vector.load %arg4[%c0_69, %c120] : memref<8x216xbf16, #tpu.memory_space<vmem>>, vector<8x24xbf16>
    %cst_70 = arith.constant dense<0.000000e+00> : vector<8x100xf32>
    %78 = tpu.matmul %77, %76, %cst_70 {dimension_numbers = #tpu.dot_dimension_numbers<[1], [0], [0], [1], [0, 0, 1, 1], [], []>} : vector<8x24xbf16>, vector<24x100xbf16>, vector<8x100xf32> -> vector<8x100xf32>
    %79 = arith.addf %75, %78 : vector<8x100xf32>
    %c0_71 = arith.constant 0 : index
    %c20_72 = arith.constant 20 : index
    %80 = vector.load %arg14[%c0_71, %c20_72] : memref<48x122xbf16, #tpu.memory_space<vmem>>, vector<24x100xbf16>
    %c0_73 = arith.constant 0 : index
    %c144 = arith.constant 144 : index
    %81 = vector.load %arg4[%c0_73, %c144] : memref<8x216xbf16, #tpu.memory_space<vmem>>, vector<8x24xbf16>
    %cst_74 = arith.constant dense<0.000000e+00> : vector<8x100xf32>
    %82 = tpu.matmul %81, %80, %cst_74 {dimension_numbers = #tpu.dot_dimension_numbers<[1], [0], [0], [1], [0, 0, 1, 1], [], []>} : vector<8x24xbf16>, vector<24x100xbf16>, vector<8x100xf32> -> vector<8x100xf32>
    %83 = arith.addf %79, %82 : vector<8x100xf32>
    %c0_75 = arith.constant 0 : index
    %c21_76 = arith.constant 21 : index
    %84 = vector.load %arg14[%c0_75, %c21_76] : memref<48x122xbf16, #tpu.memory_space<vmem>>, vector<24x100xbf16>
    %c0_77 = arith.constant 0 : index
    %c168 = arith.constant 168 : index
    %85 = vector.load %arg4[%c0_77, %c168] : memref<8x216xbf16, #tpu.memory_space<vmem>>, vector<8x24xbf16>
    %cst_78 = arith.constant dense<0.000000e+00> : vector<8x100xf32>
    %86 = tpu.matmul %85, %84, %cst_78 {dimension_numbers = #tpu.dot_dimension_numbers<[1], [0], [0], [1], [0, 0, 1, 1], [], []>} : vector<8x24xbf16>, vector<24x100xbf16>, vector<8x100xf32> -> vector<8x100xf32>
    %87 = arith.addf %83, %86 : vector<8x100xf32>
    %c0_79 = arith.constant 0 : index
    %c22_80 = arith.constant 22 : index
    %88 = vector.load %arg14[%c0_79, %c22_80] : memref<48x122xbf16, #tpu.memory_space<vmem>>, vector<24x100xbf16>
    %c0_81 = arith.constant 0 : index
    %c192 = arith.constant 192 : index
    %89 = vector.load %arg4[%c0_81, %c192] : memref<8x216xbf16, #tpu.memory_space<vmem>>, vector<8x24xbf16>
    %cst_82 = arith.constant dense<0.000000e+00> : vector<8x100xf32>
    %90 = tpu.matmul %89, %88, %cst_82 {dimension_numbers = #tpu.dot_dimension_numbers<[1], [0], [0], [1], [0, 0, 1, 1], [], []>} : vector<8x24xbf16>, vector<24x100xbf16>, vector<8x100xf32> -> vector<8x100xf32>
    %91 = arith.addf %87, %90 : vector<8x100xf32>
    %c0_83 = arith.constant 0 : index
    %c0_84 = arith.constant 0 : index
    %92 = vector.load %arg9[%c0_83, %c0_84] : memref<8x1xf32, #tpu.memory_space<vmem>>, vector<8x1xf32>
    %93 = vector.broadcast %92 : vector<8x1xf32> to vector<8x100xf32>
    %94 = arith.addf %91, %93 : vector<8x100xf32>
    %cst_85 = arith.constant 0.000000e+00 : f32
    %95 = vector.broadcast %cst_85 : f32 to vector<8x100xf32>
    %96 = arith.cmpf oge, %94, %95 : vector<8x100xf32>
    %cst_86 = arith.constant 2.000000e-01 : f32
    %97 = vector.broadcast %cst_86 : f32 to vector<8x100xf32>
    %98 = arith.mulf %97, %94 : vector<8x100xf32>
    %99 = arith.select %96, %94, %98 : vector<8x100xi1>, vector<8x100xf32>
    %100 = vector.broadcast %1 : vector<1x100xf32> to vector<8x100xf32>
    %101 = arith.mulf %99, %100 : vector<8x100xf32>
    %102 = arith.truncf %101 : vector<8x100xf32> to vector<8x100xbf16>
    %c24_87 = arith.constant 24 : index
    %c11_88 = arith.constant 11 : index
    %103 = vector.load %arg14[%c24_87, %c11_88] : memref<48x122xbf16, #tpu.memory_space<vmem>>, vector<8x100xbf16>
    tpu.vector_store %arg14[%c24_87, %c11_88], %102 {strides = array<i32>} : memref<48x122xbf16, #tpu.memory_space<vmem>>, vector<8x100xbf16>,
    %c0_89 = arith.constant 0 : index
    %c0_90 = arith.constant 0 : index
    %104 = vector.load %arg14[%c0_89, %c0_90] : memref<48x122xbf16, #tpu.memory_space<vmem>>, vector<32x100xbf16>
    %c0_91 = arith.constant 0 : index
    %c0_92 = arith.constant 0 : index
    %105 = vector.load %arg5[%c0_91, %c0_92] : memref<8x288xbf16, #tpu.memory_space<vmem>>, vector<8x32xbf16>
    %cst_93 = arith.constant dense<0.000000e+00> : vector<8x100xf32>
    %106 = tpu.matmul %105, %104, %cst_93 {dimension_numbers = #tpu.dot_dimension_numbers<[1], [0], [0], [1], [0, 0, 1, 1], [], []>} : vector<8x32xbf16>, vector<32x100xbf16>, vector<8x100xf32> -> vector<8x100xf32>
    %c0_94 = arith.constant 0 : index
    %c1_95 = arith.constant 1 : index
    %107 = vector.load %arg14[%c0_94, %c1_95] : memref<48x122xbf16, #tpu.memory_space<vmem>>, vector<32x100xbf16>
    %c0_96 = arith.constant 0 : index
    %c32_97 = arith.constant 32 : index
    %108 = vector.load %arg5[%c0_96, %c32_97] : memref<8x288xbf16, #tpu.memory_space<vmem>>, vector<8x32xbf16>
    %cst_98 = arith.constant dense<0.000000e+00> : vector<8x100xf32>
    %109 = tpu.matmul %108, %107, %cst_98 {dimension_numbers = #tpu.dot_dimension_numbers<[1], [0], [0], [1], [0, 0, 1, 1], [], []>} : vector<8x32xbf16>, vector<32x100xbf16>, vector<8x100xf32> -> vector<8x100xf32>
    %110 = arith.addf %106, %109 : vector<8x100xf32>
    %c0_99 = arith.constant 0 : index
    %c2_100 = arith.constant 2 : index
    %111 = vector.load %arg14[%c0_99, %c2_100] : memref<48x122xbf16, #tpu.memory_space<vmem>>, vector<32x100xbf16>
    %c0_101 = arith.constant 0 : index
    %c64_102 = arith.constant 64 : index
    %112 = vector.load %arg5[%c0_101, %c64_102] : memref<8x288xbf16, #tpu.memory_space<vmem>>, vector<8x32xbf16>
    %cst_103 = arith.constant dense<0.000000e+00> : vector<8x100xf32>
    %113 = tpu.matmul %112, %111, %cst_103 {dimension_numbers = #tpu.dot_dimension_numbers<[1], [0], [0], [1], [0, 0, 1, 1], [], []>} : vector<8x32xbf16>, vector<32x100xbf16>, vector<8x100xf32> -> vector<8x100xf32>
    %114 = arith.addf %110, %113 : vector<8x100xf32>
    %c0_104 = arith.constant 0 : index
    %c10_105 = arith.constant 10 : index
    %115 = vector.load %arg14[%c0_104, %c10_105] : memref<48x122xbf16, #tpu.memory_space<vmem>>, vector<32x100xbf16>
    %c0_106 = arith.constant 0 : index
    %c96_107 = arith.constant 96 : index
    %116 = vector.load %arg5[%c0_106, %c96_107] : memref<8x288xbf16, #tpu.memory_space<vmem>>, vector<8x32xbf16>
    %cst_108 = arith.constant dense<0.000000e+00> : vector<8x100xf32>
    %117 = tpu.matmul %116, %115, %cst_108 {dimension_numbers = #tpu.dot_dimension_numbers<[1], [0], [0], [1], [0, 0, 1, 1], [], []>} : vector<8x32xbf16>, vector<32x100xbf16>, vector<8x100xf32> -> vector<8x100xf32>
    %118 = arith.addf %114, %117 : vector<8x100xf32>
    %c0_109 = arith.constant 0 : index
    %c11_110 = arith.constant 11 : index
    %119 = vector.load %arg14[%c0_109, %c11_110] : memref<48x122xbf16, #tpu.memory_space<vmem>>, vector<32x100xbf16>
    %c0_111 = arith.constant 0 : index
    %c128_112 = arith.constant 128 : index
    %120 = vector.load %arg5[%c0_111, %c128_112] : memref<8x288xbf16, #tpu.memory_space<vmem>>, vector<8x32xbf16>
    %cst_113 = arith.constant dense<0.000000e+00> : vector<8x100xf32>
    %121 = tpu.matmul %120, %119, %cst_113 {dimension_numbers = #tpu.dot_dimension_numbers<[1], [0], [0], [1], [0, 0, 1, 1], [], []>} : vector<8x32xbf16>, vector<32x100xbf16>, vector<8x100xf32> -> vector<8x100xf32>
    %122 = arith.addf %118, %121 : vector<8x100xf32>
    %c0_114 = arith.constant 0 : index
    %c12_115 = arith.constant 12 : index
    %123 = vector.load %arg14[%c0_114, %c12_115] : memref<48x122xbf16, #tpu.memory_space<vmem>>, vector<32x100xbf16>
    %c0_116 = arith.constant 0 : index
    %c160 = arith.constant 160 : index
    %124 = vector.load %arg5[%c0_116, %c160] : memref<8x288xbf16, #tpu.memory_space<vmem>>, vector<8x32xbf16>
    %cst_117 = arith.constant dense<0.000000e+00> : vector<8x100xf32>
    %125 = tpu.matmul %124, %123, %cst_117 {dimension_numbers = #tpu.dot_dimension_numbers<[1], [0], [0], [1], [0, 0, 1, 1], [], []>} : vector<8x32xbf16>, vector<32x100xbf16>, vector<8x100xf32> -> vector<8x100xf32>
    %126 = arith.addf %122, %125 : vector<8x100xf32>
    %c0_118 = arith.constant 0 : index
    %c20_119 = arith.constant 20 : index
    %127 = vector.load %arg14[%c0_118, %c20_119] : memref<48x122xbf16, #tpu.memory_space<vmem>>, vector<32x100xbf16>
    %c0_120 = arith.constant 0 : index
    %c192_121 = arith.constant 192 : index
    %128 = vector.load %arg5[%c0_120, %c192_121] : memref<8x288xbf16, #tpu.memory_space<vmem>>, vector<8x32xbf16>
    %cst_122 = arith.constant dense<0.000000e+00> : vector<8x100xf32>
    %129 = tpu.matmul %128, %127, %cst_122 {dimension_numbers = #tpu.dot_dimension_numbers<[1], [0], [0], [1], [0, 0, 1, 1], [], []>} : vector<8x32xbf16>, vector<32x100xbf16>, vector<8x100xf32> -> vector<8x100xf32>
    %130 = arith.addf %126, %129 : vector<8x100xf32>
    %c0_123 = arith.constant 0 : index
    %c21_124 = arith.constant 21 : index
    %131 = vector.load %arg14[%c0_123, %c21_124] : memref<48x122xbf16, #tpu.memory_space<vmem>>, vector<32x100xbf16>
    %c0_125 = arith.constant 0 : index
    %c224 = arith.constant 224 : index
    %132 = vector.load %arg5[%c0_125, %c224] : memref<8x288xbf16, #tpu.memory_space<vmem>>, vector<8x32xbf16>
    %cst_126 = arith.constant dense<0.000000e+00> : vector<8x100xf32>
    %133 = tpu.matmul %132, %131, %cst_126 {dimension_numbers = #tpu.dot_dimension_numbers<[1], [0], [0], [1], [0, 0, 1, 1], [], []>} : vector<8x32xbf16>, vector<32x100xbf16>, vector<8x100xf32> -> vector<8x100xf32>
    %134 = arith.addf %130, %133 : vector<8x100xf32>
    %c0_127 = arith.constant 0 : index
    %c22_128 = arith.constant 22 : index
    %135 = vector.load %arg14[%c0_127, %c22_128] : memref<48x122xbf16, #tpu.memory_space<vmem>>, vector<32x100xbf16>
    %c0_129 = arith.constant 0 : index
    %c256 = arith.constant 256 : index
    %136 = vector.load %arg5[%c0_129, %c256] : memref<8x288xbf16, #tpu.memory_space<vmem>>, vector<8x32xbf16>
    %cst_130 = arith.constant dense<0.000000e+00> : vector<8x100xf32>
    %137 = tpu.matmul %136, %135, %cst_130 {dimension_numbers = #tpu.dot_dimension_numbers<[1], [0], [0], [1], [0, 0, 1, 1], [], []>} : vector<8x32xbf16>, vector<32x100xbf16>, vector<8x100xf32> -> vector<8x100xf32>
    %138 = arith.addf %134, %137 : vector<8x100xf32>
    %c0_131 = arith.constant 0 : index
    %c0_132 = arith.constant 0 : index
    %139 = vector.load %arg10[%c0_131, %c0_132] : memref<8x1xf32, #tpu.memory_space<vmem>>, vector<8x1xf32>
    %140 = vector.broadcast %139 : vector<8x1xf32> to vector<8x100xf32>
    %141 = arith.addf %138, %140 : vector<8x100xf32>
    %cst_133 = arith.constant 0.000000e+00 : f32
    %142 = vector.broadcast %cst_133 : f32 to vector<8x100xf32>
    %143 = arith.cmpf oge, %141, %142 : vector<8x100xf32>
    %cst_134 = arith.constant 2.000000e-01 : f32
    %144 = vector.broadcast %cst_134 : f32 to vector<8x100xf32>
    %145 = arith.mulf %144, %141 : vector<8x100xf32>
    %146 = arith.select %143, %141, %145 : vector<8x100xi1>, vector<8x100xf32>
    %147 = vector.broadcast %1 : vector<1x100xf32> to vector<8x100xf32>
    %148 = arith.mulf %146, %147 : vector<8x100xf32>
    %149 = arith.truncf %148 : vector<8x100xf32> to vector<8x100xbf16>
    %c32_135 = arith.constant 32 : index
    %c11_136 = arith.constant 11 : index
    %150 = vector.load %arg14[%c32_135, %c11_136] : memref<48x122xbf16, #tpu.memory_space<vmem>>, vector<8x100xbf16>
    tpu.vector_store %arg14[%c32_135, %c11_136], %149 {strides = array<i32>} : memref<48x122xbf16, #tpu.memory_space<vmem>>, vector<8x100xbf16>,
    %c0_137 = arith.constant 0 : index
    %c0_138 = arith.constant 0 : index
    %151 = vector.load %arg14[%c0_137, %c0_138] : memref<48x122xbf16, #tpu.memory_space<vmem>>, vector<40x100xbf16>
    %c0_139 = arith.constant 0 : index
    %c0_140 = arith.constant 0 : index
    %152 = vector.load %arg6[%c0_139, %c0_140] : memref<8x360xbf16, #tpu.memory_space<vmem>>, vector<8x40xbf16>
    %cst_141 = arith.constant dense<0.000000e+00> : vector<8x100xf32>
    %153 = tpu.matmul %152, %151, %cst_141 {dimension_numbers = #tpu.dot_dimension_numbers<[1], [0], [0], [1], [0, 0, 1, 1], [], []>} : vector<8x40xbf16>, vector<40x100xbf16>, vector<8x100xf32> -> vector<8x100xf32>
    %c0_142 = arith.constant 0 : index
    %c1_143 = arith.constant 1 : index
    %154 = vector.load %arg14[%c0_142, %c1_143] : memref<48x122xbf16, #tpu.memory_space<vmem>>, vector<40x100xbf16>
    %c0_144 = arith.constant 0 : index
    %c40 = arith.constant 40 : index
    %155 = vector.load %arg6[%c0_144, %c40] : memref<8x360xbf16, #tpu.memory_space<vmem>>, vector<8x40xbf16>
    %cst_145 = arith.constant dense<0.000000e+00> : vector<8x100xf32>
    %156 = tpu.matmul %155, %154, %cst_145 {dimension_numbers = #tpu.dot_dimension_numbers<[1], [0], [0], [1], [0, 0, 1, 1], [], []>} : vector<8x40xbf16>, vector<40x100xbf16>, vector<8x100xf32> -> vector<8x100xf32>
    %157 = arith.addf %153, %156 : vector<8x100xf32>
    %c0_146 = arith.constant 0 : index
    %c2_147 = arith.constant 2 : index
    %158 = vector.load %arg14[%c0_146, %c2_147] : memref<48x122xbf16, #tpu.memory_space<vmem>>, vector<40x100xbf16>
    %c0_148 = arith.constant 0 : index
    %c80_149 = arith.constant 80 : index
    %159 = vector.load %arg6[%c0_148, %c80_149] : memref<8x360xbf16, #tpu.memory_space<vmem>>, vector<8x40xbf16>
    %cst_150 = arith.constant dense<0.000000e+00> : vector<8x100xf32>
    %160 = tpu.matmul %159, %158, %cst_150 {dimension_numbers = #tpu.dot_dimension_numbers<[1], [0], [0], [1], [0, 0, 1, 1], [], []>} : vector<8x40xbf16>, vector<40x100xbf16>, vector<8x100xf32> -> vector<8x100xf32>
    %161 = arith.addf %157, %160 : vector<8x100xf32>
    %c0_151 = arith.constant 0 : index
    %c10_152 = arith.constant 10 : index
    %162 = vector.load %arg14[%c0_151, %c10_152] : memref<48x122xbf16, #tpu.memory_space<vmem>>, vector<40x100xbf16>
    %c0_153 = arith.constant 0 : index
    %c120_154 = arith.constant 120 : index
    %163 = vector.load %arg6[%c0_153, %c120_154] : memref<8x360xbf16, #tpu.memory_space<vmem>>, vector<8x40xbf16>
    %cst_155 = arith.constant dense<0.000000e+00> : vector<8x100xf32>
    %164 = tpu.matmul %163, %162, %cst_155 {dimension_numbers = #tpu.dot_dimension_numbers<[1], [0], [0], [1], [0, 0, 1, 1], [], []>} : vector<8x40xbf16>, vector<40x100xbf16>, vector<8x100xf32> -> vector<8x100xf32>
    %165 = arith.addf %161, %164 : vector<8x100xf32>
    %c0_156 = arith.constant 0 : index
    %c11_157 = arith.constant 11 : index
    %166 = vector.load %arg14[%c0_156, %c11_157] : memref<48x122xbf16, #tpu.memory_space<vmem>>, vector<40x100xbf16>
    %c0_158 = arith.constant 0 : index
    %c160_159 = arith.constant 160 : index
    %167 = vector.load %arg6[%c0_158, %c160_159] : memref<8x360xbf16, #tpu.memory_space<vmem>>, vector<8x40xbf16>
    %cst_160 = arith.constant dense<0.000000e+00> : vector<8x100xf32>
    %168 = tpu.matmul %167, %166, %cst_160 {dimension_numbers = #tpu.dot_dimension_numbers<[1], [0], [0], [1], [0, 0, 1, 1], [], []>} : vector<8x40xbf16>, vector<40x100xbf16>, vector<8x100xf32> -> vector<8x100xf32>
    %169 = arith.addf %165, %168 : vector<8x100xf32>
    %c0_161 = arith.constant 0 : index
    %c12_162 = arith.constant 12 : index
    %170 = vector.load %arg14[%c0_161, %c12_162] : memref<48x122xbf16, #tpu.memory_space<vmem>>, vector<40x100xbf16>
    %c0_163 = arith.constant 0 : index
    %c200 = arith.constant 200 : index
    %171 = vector.load %arg6[%c0_163, %c200] : memref<8x360xbf16, #tpu.memory_space<vmem>>, vector<8x40xbf16>
    %cst_164 = arith.constant dense<0.000000e+00> : vector<8x100xf32>
    %172 = tpu.matmul %171, %170, %cst_164 {dimension_numbers = #tpu.dot_dimension_numbers<[1], [0], [0], [1], [0, 0, 1, 1], [], []>} : vector<8x40xbf16>, vector<40x100xbf16>, vector<8x100xf32> -> vector<8x100xf32>
    %173 = arith.addf %169, %172 : vector<8x100xf32>
    %c0_165 = arith.constant 0 : index
    %c20_166 = arith.constant 20 : index
    %174 = vector.load %arg14[%c0_165, %c20_166] : memref<48x122xbf16, #tpu.memory_space<vmem>>, vector<40x100xbf16>
    %c0_167 = arith.constant 0 : index
    %c240 = arith.constant 240 : index
    %175 = vector.load %arg6[%c0_167, %c240] : memref<8x360xbf16, #tpu.memory_space<vmem>>, vector<8x40xbf16>
    %cst_168 = arith.constant dense<0.000000e+00> : vector<8x100xf32>
    %176 = tpu.matmul %175, %174, %cst_168 {dimension_numbers = #tpu.dot_dimension_numbers<[1], [0], [0], [1], [0, 0, 1, 1], [], []>} : vector<8x40xbf16>, vector<40x100xbf16>, vector<8x100xf32> -> vector<8x100xf32>
    %177 = arith.addf %173, %176 : vector<8x100xf32>
    %c0_169 = arith.constant 0 : index
    %c21_170 = arith.constant 21 : index
    %178 = vector.load %arg14[%c0_169, %c21_170] : memref<48x122xbf16, #tpu.memory_space<vmem>>, vector<40x100xbf16>
    %c0_171 = arith.constant 0 : index
    %c280 = arith.constant 280 : index
    %179 = vector.load %arg6[%c0_171, %c280] : memref<8x360xbf16, #tpu.memory_space<vmem>>, vector<8x40xbf16>
    %cst_172 = arith.constant dense<0.000000e+00> : vector<8x100xf32>
    %180 = tpu.matmul %179, %178, %cst_172 {dimension_numbers = #tpu.dot_dimension_numbers<[1], [0], [0], [1], [0, 0, 1, 1], [], []>} : vector<8x40xbf16>, vector<40x100xbf16>, vector<8x100xf32> -> vector<8x100xf32>
    %181 = arith.addf %177, %180 : vector<8x100xf32>
    %c0_173 = arith.constant 0 : index
    %c22_174 = arith.constant 22 : index
    %182 = vector.load %arg14[%c0_173, %c22_174] : memref<48x122xbf16, #tpu.memory_space<vmem>>, vector<40x100xbf16>
    %c0_175 = arith.constant 0 : index
    %c320 = arith.constant 320 : index
    %183 = vector.load %arg6[%c0_175, %c320] : memref<8x360xbf16, #tpu.memory_space<vmem>>, vector<8x40xbf16>
    %cst_176 = arith.constant dense<0.000000e+00> : vector<8x100xf32>
    %184 = tpu.matmul %183, %182, %cst_176 {dimension_numbers = #tpu.dot_dimension_numbers<[1], [0], [0], [1], [0, 0, 1, 1], [], []>} : vector<8x40xbf16>, vector<40x100xbf16>, vector<8x100xf32> -> vector<8x100xf32>
    %185 = arith.addf %181, %184 : vector<8x100xf32>
    %c0_177 = arith.constant 0 : index
    %c0_178 = arith.constant 0 : index
    %186 = vector.load %arg11[%c0_177, %c0_178] : memref<8x1xf32, #tpu.memory_space<vmem>>, vector<8x1xf32>
    %187 = vector.broadcast %186 : vector<8x1xf32> to vector<8x100xf32>
    %188 = arith.addf %185, %187 : vector<8x100xf32>
    %cst_179 = arith.constant 0.000000e+00 : f32
    %189 = vector.broadcast %cst_179 : f32 to vector<8x100xf32>
    %190 = arith.cmpf oge, %188, %189 : vector<8x100xf32>
    %cst_180 = arith.constant 2.000000e-01 : f32
    %191 = vector.broadcast %cst_180 : f32 to vector<8x100xf32>
    %192 = arith.mulf %191, %188 : vector<8x100xf32>
    %193 = arith.select %190, %188, %192 : vector<8x100xi1>, vector<8x100xf32>
    %194 = vector.broadcast %1 : vector<1x100xf32> to vector<8x100xf32>
    %195 = arith.mulf %193, %194 : vector<8x100xf32>
    %196 = arith.truncf %195 : vector<8x100xf32> to vector<8x100xbf16>
    %c40_181 = arith.constant 40 : index
    %c11_182 = arith.constant 11 : index
    %197 = vector.load %arg14[%c40_181, %c11_182] : memref<48x122xbf16, #tpu.memory_space<vmem>>, vector<8x100xbf16>
    tpu.vector_store %arg14[%c40_181, %c11_182], %196 {strides = array<i32>} : memref<48x122xbf16, #tpu.memory_space<vmem>>, vector<8x100xbf16>,
    %c0_183 = arith.constant 0 : index
    %c0_184 = arith.constant 0 : index
    %198 = vector.load %arg14[%c0_183, %c0_184] : memref<48x122xbf16, #tpu.memory_space<vmem>>, vector<48x100xbf16>
    %c0_185 = arith.constant 0 : index
    %c0_186 = arith.constant 0 : index
    %199 = vector.load %arg7[%c0_185, %c0_186] : memref<16x432xbf16, #tpu.memory_space<vmem>>, vector<16x48xbf16>
    %cst_187 = arith.constant dense<0.000000e+00> : vector<16x100xf32>
    %200 = tpu.matmul %199, %198, %cst_187 {dimension_numbers = #tpu.dot_dimension_numbers<[1], [0], [0], [1], [0, 0, 1, 1], [], []>} : vector<16x48xbf16>, vector<48x100xbf16>, vector<16x100xf32> -> vector<16x100xf32>
    %c0_188 = arith.constant 0 : index
    %c1_189 = arith.constant 1 : index
    %201 = vector.load %arg14[%c0_188, %c1_189] : memref<48x122xbf16, #tpu.memory_space<vmem>>, vector<48x100xbf16>
    %c0_190 = arith.constant 0 : index
    %c48_191 = arith.constant 48 : index
    %202 = vector.load %arg7[%c0_190, %c48_191] : memref<16x432xbf16, #tpu.memory_space<vmem>>, vector<16x48xbf16>
    %cst_192 = arith.constant dense<0.000000e+00> : vector<16x100xf32>
    %203 = tpu.matmul %202, %201, %cst_192 {dimension_numbers = #tpu.dot_dimension_numbers<[1], [0], [0], [1], [0, 0, 1, 1], [], []>} : vector<16x48xbf16>, vector<48x100xbf16>, vector<16x100xf32> -> vector<16x100xf32>
    %204 = arith.addf %200, %203 : vector<16x100xf32>
    %c0_193 = arith.constant 0 : index
    %c2_194 = arith.constant 2 : index
    %205 = vector.load %arg14[%c0_193, %c2_194] : memref<48x122xbf16, #tpu.memory_space<vmem>>, vector<48x100xbf16>
    %c0_195 = arith.constant 0 : index
    %c96_196 = arith.constant 96 : index
    %206 = vector.load %arg7[%c0_195, %c96_196] : memref<16x432xbf16, #tpu.memory_space<vmem>>, vector<16x48xbf16>
    %cst_197 = arith.constant dense<0.000000e+00> : vector<16x100xf32>
    %207 = tpu.matmul %206, %205, %cst_197 {dimension_numbers = #tpu.dot_dimension_numbers<[1], [0], [0], [1], [0, 0, 1, 1], [], []>} : vector<16x48xbf16>, vector<48x100xbf16>, vector<16x100xf32> -> vector<16x100xf32>
    %208 = arith.addf %204, %207 : vector<16x100xf32>
    %c0_198 = arith.constant 0 : index
    %c10_199 = arith.constant 10 : index
    %209 = vector.load %arg14[%c0_198, %c10_199] : memref<48x122xbf16, #tpu.memory_space<vmem>>, vector<48x100xbf16>
    %c0_200 = arith.constant 0 : index
    %c144_201 = arith.constant 144 : index
    %210 = vector.load %arg7[%c0_200, %c144_201] : memref<16x432xbf16, #tpu.memory_space<vmem>>, vector<16x48xbf16>
    %cst_202 = arith.constant dense<0.000000e+00> : vector<16x100xf32>
    %211 = tpu.matmul %210, %209, %cst_202 {dimension_numbers = #tpu.dot_dimension_numbers<[1], [0], [0], [1], [0, 0, 1, 1], [], []>} : vector<16x48xbf16>, vector<48x100xbf16>, vector<16x100xf32> -> vector<16x100xf32>
    %212 = arith.addf %208, %211 : vector<16x100xf32>
    %c0_203 = arith.constant 0 : index
    %c11_204 = arith.constant 11 : index
    %213 = vector.load %arg14[%c0_203, %c11_204] : memref<48x122xbf16, #tpu.memory_space<vmem>>, vector<48x100xbf16>
    %c0_205 = arith.constant 0 : index
    %c192_206 = arith.constant 192 : index
    %214 = vector.load %arg7[%c0_205, %c192_206] : memref<16x432xbf16, #tpu.memory_space<vmem>>, vector<16x48xbf16>
    %cst_207 = arith.constant dense<0.000000e+00> : vector<16x100xf32>
    %215 = tpu.matmul %214, %213, %cst_207 {dimension_numbers = #tpu.dot_dimension_numbers<[1], [0], [0], [1], [0, 0, 1, 1], [], []>} : vector<16x48xbf16>, vector<48x100xbf16>, vector<16x100xf32> -> vector<16x100xf32>
    %216 = arith.addf %212, %215 : vector<16x100xf32>
    %c0_208 = arith.constant 0 : index
    %c12_209 = arith.constant 12 : index
    %217 = vector.load %arg14[%c0_208, %c12_209] : memref<48x122xbf16, #tpu.memory_space<vmem>>, vector<48x100xbf16>
    %c0_210 = arith.constant 0 : index
    %c240_211 = arith.constant 240 : index
    %218 = vector.load %arg7[%c0_210, %c240_211] : memref<16x432xbf16, #tpu.memory_space<vmem>>, vector<16x48xbf16>
    %cst_212 = arith.constant dense<0.000000e+00> : vector<16x100xf32>
    %219 = tpu.matmul %218, %217, %cst_212 {dimension_numbers = #tpu.dot_dimension_numbers<[1], [0], [0], [1], [0, 0, 1, 1], [], []>} : vector<16x48xbf16>, vector<48x100xbf16>, vector<16x100xf32> -> vector<16x100xf32>
    %220 = arith.addf %216, %219 : vector<16x100xf32>
    %c0_213 = arith.constant 0 : index
    %c20_214 = arith.constant 20 : index
    %221 = vector.load %arg14[%c0_213, %c20_214] : memref<48x122xbf16, #tpu.memory_space<vmem>>, vector<48x100xbf16>
    %c0_215 = arith.constant 0 : index
    %c288 = arith.constant 288 : index
    %222 = vector.load %arg7[%c0_215, %c288] : memref<16x432xbf16, #tpu.memory_space<vmem>>, vector<16x48xbf16>
    %cst_216 = arith.constant dense<0.000000e+00> : vector<16x100xf32>
    %223 = tpu.matmul %222, %221, %cst_216 {dimension_numbers = #tpu.dot_dimension_numbers<[1], [0], [0], [1], [0, 0, 1, 1], [], []>} : vector<16x48xbf16>, vector<48x100xbf16>, vector<16x100xf32> -> vector<16x100xf32>
    %224 = arith.addf %220, %223 : vector<16x100xf32>
    %c0_217 = arith.constant 0 : index
    %c21_218 = arith.constant 21 : index
    %225 = vector.load %arg14[%c0_217, %c21_218] : memref<48x122xbf16, #tpu.memory_space<vmem>>, vector<48x100xbf16>
    %c0_219 = arith.constant 0 : index
    %c336 = arith.constant 336 : index
    %226 = vector.load %arg7[%c0_219, %c336] : memref<16x432xbf16, #tpu.memory_space<vmem>>, vector<16x48xbf16>
    %cst_220 = arith.constant dense<0.000000e+00> : vector<16x100xf32>
    %227 = tpu.matmul %226, %225, %cst_220 {dimension_numbers = #tpu.dot_dimension_numbers<[1], [0], [0], [1], [0, 0, 1, 1], [], []>} : vector<16x48xbf16>, vector<48x100xbf16>, vector<16x100xf32> -> vector<16x100xf32>
    %228 = arith.addf %224, %227 : vector<16x100xf32>
    %c0_221 = arith.constant 0 : index
    %c22_222 = arith.constant 22 : index
    %229 = vector.load %arg14[%c0_221, %c22_222] : memref<48x122xbf16, #tpu.memory_space<vmem>>, vector<48x100xbf16>
    %c0_223 = arith.constant 0 : index
    %c384 = arith.constant 384 : index
    %230 = vector.load %arg7[%c0_223, %c384] : memref<16x432xbf16, #tpu.memory_space<vmem>>, vector<16x48xbf16>
    %cst_224 = arith.constant dense<0.000000e+00> : vector<16x100xf32>
    %231 = tpu.matmul %230, %229, %cst_224 {dimension_numbers = #tpu.dot_dimension_numbers<[1], [0], [0], [1], [0, 0, 1, 1], [], []>} : vector<16x48xbf16>, vector<48x100xbf16>, vector<16x100xf32> -> vector<16x100xf32>
    %232 = arith.addf %228, %231 : vector<16x100xf32>
    %c0_225 = arith.constant 0 : index
    %c0_226 = arith.constant 0 : index
    %233 = vector.load %arg12[%c0_225, %c0_226] : memref<16x1xf32, #tpu.memory_space<vmem>>, vector<16x1xf32>
    %234 = vector.broadcast %233 : vector<16x1xf32> to vector<16x100xf32>
    %235 = arith.addf %232, %234 : vector<16x100xf32>
    %cst_227 = arith.constant 2.000000e-01 : f32
    %236 = vector.broadcast %cst_227 : f32 to vector<16x100xf32>
    %237 = arith.mulf %236, %235 : vector<16x100xf32>
    %238 = arith.extf %8 : vector<16x100xbf16> to vector<16x100xf32>
    %cst_228 = arith.constant 1.000000e+00 : f32
    %239 = vector.broadcast %cst_228 : f32 to vector<16x100xf32>
    %240 = arith.mulf %239, %238 : vector<16x100xf32>
    %241 = arith.addf %237, %240 : vector<16x100xf32>
    %242 = arith.truncf %241 : vector<16x100xf32> to vector<16x100xbf16>
    %c0_229 = arith.constant 0 : index
    %c0_230 = arith.constant 0 : index
    %c0_231 = arith.constant 0 : index
    %243 = vector.load %arg13[%c0_229, %c0_230, %c0_231] : memref<1x16x100xbf16, #tpu.memory_space<vmem>>, vector<1x16x100xbf16>
    %244 = vector.shape_cast %243 : vector<1x16x100xbf16> to vector<16x100xbf16>
    %245 = vector.shape_cast %242 : vector<16x100xbf16> to vector<1x16x100xbf16>
    tpu.vector_store %arg13[%c0_229, %c0_230, %c0_231], %245 {strides = array<i32>} : memref<1x16x100xbf16, #tpu.memory_space<vmem>>, vector<1x16x100xbf16>,
    return
  }
  func.func @transform_0(%arg0: i32) -> (i32, i32) {
    %c0_i32 = arith.constant 0 : i32
    %c0_i32_0 = arith.constant 0 : i32
    %c0_i32_1 = arith.constant 0 : i32
    return %c0_i32, %c0_i32_0 : i32, i32
  }
  func.func @transform_1(%arg0: i32) -> (i32, i32, i32) {
    %c0_i32 = arith.constant 0 : i32
    %c0_i32_0 = arith.constant 0 : i32
    %c0_i32_1 = arith.constant 0 : i32
    return %arg0, %c0_i32, %c0_i32_0 : i32, i32, i32
  }
  func.func @transform_2(%arg0: i32) -> (i32, i32) {
    %c0_i32 = arith.constant 0 : i32
    %c0_i32_0 = arith.constant 0 : i32
    %c0_i32_1 = arith.constant 0 : i32
    return %c0_i32, %c0_i32_0 : i32, i32
  }
  func.func @transform_3(%arg0: i32) -> (i32, i32) {
    %c0_i32 = arith.constant 0 : i32
    %c0_i32_0 = arith.constant 0 : i32
    %c0_i32_1 = arith.constant 0 : i32
    return %c0_i32, %c0_i32_0 : i32, i32
  }
  func.func @transform_4(%arg0: i32) -> (i32, i32) {
    %c0_i32 = arith.constant 0 : i32
    %c0_i32_0 = arith.constant 0 : i32
    %c0_i32_1 = arith.constant 0 : i32
    return %c0_i32, %c0_i32_0 : i32, i32
  }
  func.func @transform_5(%arg0: i32) -> (i32, i32) {
    %c0_i32 = arith.constant 0 : i32
    %c0_i32_0 = arith.constant 0 : i32
    %c0_i32_1 = arith.constant 0 : i32
    return %c0_i32, %c0_i32_0 : i32, i32
  }
  func.func @transform_6(%arg0: i32) -> (i32, i32) {
    %c0_i32 = arith.constant 0 : i32
    %c0_i32_0 = arith.constant 0 : i32
    %c0_i32_1 = arith.constant 0 : i32
    return %c0_i32, %c0_i32_0 : i32, i32
  }
  func.func @transform_7(%arg0: i32) -> (i32, i32) {
    %c0_i32 = arith.constant 0 : i32
    %c0_i32_0 = arith.constant 0 : i32
    %c0_i32_1 = arith.constant 0 : i32
    return %c0_i32, %c0_i32_0 : i32, i32
  }
  func.func @transform_8(%arg0: i32) -> (i32, i32) {
    %c0_i32 = arith.constant 0 : i32
    %c0_i32_0 = arith.constant 0 : i32
    %c0_i32_1 = arith.constant 0 : i32
    return %c0_i32, %c0_i32_0 : i32, i32
  }
  func.func @transform_9(%arg0: i32) -> (i32, i32) {
    %c0_i32 = arith.constant 0 : i32
    %c0_i32_0 = arith.constant 0 : i32
    %c0_i32_1 = arith.constant 0 : i32
    return %c0_i32, %c0_i32_0 : i32, i32
  }
  func.func @transform_10(%arg0: i32) -> (i32, i32) {
    %c0_i32 = arith.constant 0 : i32
    %c0_i32_0 = arith.constant 0 : i32
    %c0_i32_1 = arith.constant 0 : i32
    return %c0_i32, %c0_i32_0 : i32, i32
  }
  func.func @transform_11(%arg0: i32) -> (i32, i32) {
    %c0_i32 = arith.constant 0 : i32
    %c0_i32_0 = arith.constant 0 : i32
    %c0_i32_1 = arith.constant 0 : i32
    return %c0_i32, %c0_i32_0 : i32, i32
  }
  func.func @transform_12(%arg0: i32) -> (i32, i32, i32) {
    %c0_i32 = arith.constant 0 : i32
    %c0_i32_0 = arith.constant 0 : i32
    %c0_i32_1 = arith.constant 0 : i32
    return %arg0, %c0_i32, %c0_i32_0 : i32, i32, i32
  }
}

module attributes {stable_mosaic.version = 11 : i64} {
  func.func @_conv_chain_kernel(%arg0: i32, %arg1: memref<1x100xbf16, #tpu.memory_space<vmem>>, %arg2: memref<1x16x100xbf16, #tpu.memory_space<vmem>>, %arg3: memref<1x16x100xbf16, #tpu.memory_space<vmem>>, %arg4: memref<16x144xbf16, #tpu.memory_space<vmem>>, %arg5: memref<16x1xf32, #tpu.memory_space<vmem>>, %arg6: memref<1x16x100xbf16, #tpu.memory_space<vmem>>, %arg7: memref<16x122xbf16, #tpu.memory_space<vmem>>) attributes {dimension_semantics = [#tpu.dimension_semantics<parallel>], iteration_bounds = array<i64: 2>, scalar_prefetch = 0 : i64, scratch_operands = 1 : i64, tpu.core_type = #tpu.core_type<tc>, window_params = [{pipeline_mode = #tpu.pipeline_mode<synchronous>, transform_indices = @transform_0, window_bounds = array<i64: 1, 100>}, {transform_indices = @transform_1, window_bounds = array<i64: 1, 16, 100>}, {transform_indices = @transform_2, window_bounds = array<i64: 1, 16, 100>}, {pipeline_mode = #tpu.pipeline_mode<synchronous>, transform_indices = @transform_3, window_bounds = array<i64: 16, 144>}, {pipeline_mode = #tpu.pipeline_mode<synchronous>, transform_indices = @transform_4, window_bounds = array<i64: 16, 1>}, {transform_indices = @transform_5, window_bounds = array<i64: 1, 16, 100>}]} {
    %c0 = arith.constant 0 : index
    %c0_0 = arith.constant 0 : index
    %0 = vector.load %arg1[%c0, %c0_0] : memref<1x100xbf16, #tpu.memory_space<vmem>>, vector<1x100xbf16>
    %cst = arith.constant 0.000000e+00 : bf16
    %1 = vector.broadcast %cst : bf16 to vector<16x11xbf16>
    %c0_1 = arith.constant 0 : index
    %c0_2 = arith.constant 0 : index
    %2 = vector.load %arg7[%c0_1, %c0_2] : memref<16x122xbf16, #tpu.memory_space<vmem>>, vector<16x11xbf16>
    tpu.vector_store %arg7[%c0_1, %c0_2], %1 {strides = array<i32>} : memref<16x122xbf16, #tpu.memory_space<vmem>>, vector<16x11xbf16>,
    %c0_3 = arith.constant 0 : index
    %c111 = arith.constant 111 : index
    %3 = vector.load %arg7[%c0_3, %c111] : memref<16x122xbf16, #tpu.memory_space<vmem>>, vector<16x11xbf16>
    tpu.vector_store %arg7[%c0_3, %c111], %1 {strides = array<i32>} : memref<16x122xbf16, #tpu.memory_space<vmem>>, vector<16x11xbf16>,
    %c0_4 = arith.constant 0 : index
    %c0_5 = arith.constant 0 : index
    %c0_6 = arith.constant 0 : index
    %4 = vector.load %arg2[%c0_4, %c0_5, %c0_6] : memref<1x16x100xbf16, #tpu.memory_space<vmem>>, vector<1x16x100xbf16>
    %5 = vector.shape_cast %4 : vector<1x16x100xbf16> to vector<16x100xbf16>
    %6 = vector.broadcast %0 : vector<1x100xbf16> to vector<16x100xbf16>
    %7 = arith.mulf %5, %6 : vector<16x100xbf16>
    %c0_7 = arith.constant 0 : index
    %c11 = arith.constant 11 : index
    %8 = vector.load %arg7[%c0_7, %c11] : memref<16x122xbf16, #tpu.memory_space<vmem>>, vector<16x100xbf16>
    tpu.vector_store %arg7[%c0_7, %c11], %7 {strides = array<i32>} : memref<16x122xbf16, #tpu.memory_space<vmem>>, vector<16x100xbf16>,
    %c0_8 = arith.constant 0 : index
    %c0_9 = arith.constant 0 : index
    %9 = vector.load %arg7[%c0_8, %c0_9] : memref<16x122xbf16, #tpu.memory_space<vmem>>, vector<16x100xbf16>
    %c0_10 = arith.constant 0 : index
    %c0_11 = arith.constant 0 : index
    %10 = vector.load %arg4[%c0_10, %c0_11] : memref<16x144xbf16, #tpu.memory_space<vmem>>, vector<16x16xbf16>
    %cst_12 = arith.constant dense<0.000000e+00> : vector<16x100xf32>
    %11 = tpu.matmul %10, %9, %cst_12 {dimension_numbers = #tpu.dot_dimension_numbers<[1], [0], [0], [1], [0, 0, 1, 1], [], []>} : vector<16x16xbf16>, vector<16x100xbf16>, vector<16x100xf32> -> vector<16x100xf32>
    %c0_13 = arith.constant 0 : index
    %c1 = arith.constant 1 : index
    %12 = vector.load %arg7[%c0_13, %c1] : memref<16x122xbf16, #tpu.memory_space<vmem>>, vector<16x100xbf16>
    %c0_14 = arith.constant 0 : index
    %c16 = arith.constant 16 : index
    %13 = vector.load %arg4[%c0_14, %c16] : memref<16x144xbf16, #tpu.memory_space<vmem>>, vector<16x16xbf16>
    %cst_15 = arith.constant dense<0.000000e+00> : vector<16x100xf32>
    %14 = tpu.matmul %13, %12, %cst_15 {dimension_numbers = #tpu.dot_dimension_numbers<[1], [0], [0], [1], [0, 0, 1, 1], [], []>} : vector<16x16xbf16>, vector<16x100xbf16>, vector<16x100xf32> -> vector<16x100xf32>
    %15 = arith.addf %11, %14 : vector<16x100xf32>
    %c0_16 = arith.constant 0 : index
    %c2 = arith.constant 2 : index
    %16 = vector.load %arg7[%c0_16, %c2] : memref<16x122xbf16, #tpu.memory_space<vmem>>, vector<16x100xbf16>
    %c0_17 = arith.constant 0 : index
    %c32 = arith.constant 32 : index
    %17 = vector.load %arg4[%c0_17, %c32] : memref<16x144xbf16, #tpu.memory_space<vmem>>, vector<16x16xbf16>
    %cst_18 = arith.constant dense<0.000000e+00> : vector<16x100xf32>
    %18 = tpu.matmul %17, %16, %cst_18 {dimension_numbers = #tpu.dot_dimension_numbers<[1], [0], [0], [1], [0, 0, 1, 1], [], []>} : vector<16x16xbf16>, vector<16x100xbf16>, vector<16x100xf32> -> vector<16x100xf32>
    %19 = arith.addf %15, %18 : vector<16x100xf32>
    %c0_19 = arith.constant 0 : index
    %c10 = arith.constant 10 : index
    %20 = vector.load %arg7[%c0_19, %c10] : memref<16x122xbf16, #tpu.memory_space<vmem>>, vector<16x100xbf16>
    %c0_20 = arith.constant 0 : index
    %c48 = arith.constant 48 : index
    %21 = vector.load %arg4[%c0_20, %c48] : memref<16x144xbf16, #tpu.memory_space<vmem>>, vector<16x16xbf16>
    %cst_21 = arith.constant dense<0.000000e+00> : vector<16x100xf32>
    %22 = tpu.matmul %21, %20, %cst_21 {dimension_numbers = #tpu.dot_dimension_numbers<[1], [0], [0], [1], [0, 0, 1, 1], [], []>} : vector<16x16xbf16>, vector<16x100xbf16>, vector<16x100xf32> -> vector<16x100xf32>
    %23 = arith.addf %19, %22 : vector<16x100xf32>
    %c0_22 = arith.constant 0 : index
    %c11_23 = arith.constant 11 : index
    %24 = vector.load %arg7[%c0_22, %c11_23] : memref<16x122xbf16, #tpu.memory_space<vmem>>, vector<16x100xbf16>
    %c0_24 = arith.constant 0 : index
    %c64 = arith.constant 64 : index
    %25 = vector.load %arg4[%c0_24, %c64] : memref<16x144xbf16, #tpu.memory_space<vmem>>, vector<16x16xbf16>
    %cst_25 = arith.constant dense<0.000000e+00> : vector<16x100xf32>
    %26 = tpu.matmul %25, %24, %cst_25 {dimension_numbers = #tpu.dot_dimension_numbers<[1], [0], [0], [1], [0, 0, 1, 1], [], []>} : vector<16x16xbf16>, vector<16x100xbf16>, vector<16x100xf32> -> vector<16x100xf32>
    %27 = arith.addf %23, %26 : vector<16x100xf32>
    %c0_26 = arith.constant 0 : index
    %c12 = arith.constant 12 : index
    %28 = vector.load %arg7[%c0_26, %c12] : memref<16x122xbf16, #tpu.memory_space<vmem>>, vector<16x100xbf16>
    %c0_27 = arith.constant 0 : index
    %c80 = arith.constant 80 : index
    %29 = vector.load %arg4[%c0_27, %c80] : memref<16x144xbf16, #tpu.memory_space<vmem>>, vector<16x16xbf16>
    %cst_28 = arith.constant dense<0.000000e+00> : vector<16x100xf32>
    %30 = tpu.matmul %29, %28, %cst_28 {dimension_numbers = #tpu.dot_dimension_numbers<[1], [0], [0], [1], [0, 0, 1, 1], [], []>} : vector<16x16xbf16>, vector<16x100xbf16>, vector<16x100xf32> -> vector<16x100xf32>
    %31 = arith.addf %27, %30 : vector<16x100xf32>
    %c0_29 = arith.constant 0 : index
    %c20 = arith.constant 20 : index
    %32 = vector.load %arg7[%c0_29, %c20] : memref<16x122xbf16, #tpu.memory_space<vmem>>, vector<16x100xbf16>
    %c0_30 = arith.constant 0 : index
    %c96 = arith.constant 96 : index
    %33 = vector.load %arg4[%c0_30, %c96] : memref<16x144xbf16, #tpu.memory_space<vmem>>, vector<16x16xbf16>
    %cst_31 = arith.constant dense<0.000000e+00> : vector<16x100xf32>
    %34 = tpu.matmul %33, %32, %cst_31 {dimension_numbers = #tpu.dot_dimension_numbers<[1], [0], [0], [1], [0, 0, 1, 1], [], []>} : vector<16x16xbf16>, vector<16x100xbf16>, vector<16x100xf32> -> vector<16x100xf32>
    %35 = arith.addf %31, %34 : vector<16x100xf32>
    %c0_32 = arith.constant 0 : index
    %c21 = arith.constant 21 : index
    %36 = vector.load %arg7[%c0_32, %c21] : memref<16x122xbf16, #tpu.memory_space<vmem>>, vector<16x100xbf16>
    %c0_33 = arith.constant 0 : index
    %c112 = arith.constant 112 : index
    %37 = vector.load %arg4[%c0_33, %c112] : memref<16x144xbf16, #tpu.memory_space<vmem>>, vector<16x16xbf16>
    %cst_34 = arith.constant dense<0.000000e+00> : vector<16x100xf32>
    %38 = tpu.matmul %37, %36, %cst_34 {dimension_numbers = #tpu.dot_dimension_numbers<[1], [0], [0], [1], [0, 0, 1, 1], [], []>} : vector<16x16xbf16>, vector<16x100xbf16>, vector<16x100xf32> -> vector<16x100xf32>
    %39 = arith.addf %35, %38 : vector<16x100xf32>
    %c0_35 = arith.constant 0 : index
    %c22 = arith.constant 22 : index
    %40 = vector.load %arg7[%c0_35, %c22] : memref<16x122xbf16, #tpu.memory_space<vmem>>, vector<16x100xbf16>
    %c0_36 = arith.constant 0 : index
    %c128 = arith.constant 128 : index
    %41 = vector.load %arg4[%c0_36, %c128] : memref<16x144xbf16, #tpu.memory_space<vmem>>, vector<16x16xbf16>
    %cst_37 = arith.constant dense<0.000000e+00> : vector<16x100xf32>
    %42 = tpu.matmul %41, %40, %cst_37 {dimension_numbers = #tpu.dot_dimension_numbers<[1], [0], [0], [1], [0, 0, 1, 1], [], []>} : vector<16x16xbf16>, vector<16x100xbf16>, vector<16x100xf32> -> vector<16x100xf32>
    %43 = arith.addf %39, %42 : vector<16x100xf32>
    %c0_38 = arith.constant 0 : index
    %c0_39 = arith.constant 0 : index
    %44 = vector.load %arg5[%c0_38, %c0_39] : memref<16x1xf32, #tpu.memory_space<vmem>>, vector<16x1xf32>
    %45 = vector.broadcast %44 : vector<16x1xf32> to vector<16x100xf32>
    %46 = arith.addf %43, %45 : vector<16x100xf32>
    %c0_40 = arith.constant 0 : index
    %c0_41 = arith.constant 0 : index
    %c0_42 = arith.constant 0 : index
    %47 = vector.load %arg3[%c0_40, %c0_41, %c0_42] : memref<1x16x100xbf16, #tpu.memory_space<vmem>>, vector<1x16x100xbf16>
    %48 = vector.shape_cast %47 : vector<1x16x100xbf16> to vector<16x100xbf16>
    %49 = arith.extf %48 : vector<16x100xbf16> to vector<16x100xf32>
    %cst_43 = arith.constant 1.000000e+00 : f32
    %50 = vector.broadcast %cst_43 : f32 to vector<16x100xf32>
    %51 = arith.mulf %50, %49 : vector<16x100xf32>
    %52 = arith.addf %46, %51 : vector<16x100xf32>
    %53 = arith.truncf %52 : vector<16x100xf32> to vector<16x100xbf16>
    %c0_44 = arith.constant 0 : index
    %c0_45 = arith.constant 0 : index
    %c0_46 = arith.constant 0 : index
    %54 = vector.load %arg6[%c0_44, %c0_45, %c0_46] : memref<1x16x100xbf16, #tpu.memory_space<vmem>>, vector<1x16x100xbf16>
    %55 = vector.shape_cast %54 : vector<1x16x100xbf16> to vector<16x100xbf16>
    %56 = vector.shape_cast %53 : vector<16x100xbf16> to vector<1x16x100xbf16>
    tpu.vector_store %arg6[%c0_44, %c0_45, %c0_46], %56 {strides = array<i32>} : memref<1x16x100xbf16, #tpu.memory_space<vmem>>, vector<1x16x100xbf16>,
    return
  }
  func.func @transform_0(%arg0: i32) -> (i32, i32) {
    %c0_i32 = arith.constant 0 : i32
    %c0_i32_0 = arith.constant 0 : i32
    %c0_i32_1 = arith.constant 0 : i32
    return %c0_i32, %c0_i32_0 : i32, i32
  }
  func.func @transform_1(%arg0: i32) -> (i32, i32, i32) {
    %c0_i32 = arith.constant 0 : i32
    %c0_i32_0 = arith.constant 0 : i32
    %c0_i32_1 = arith.constant 0 : i32
    return %arg0, %c0_i32, %c0_i32_0 : i32, i32, i32
  }
  func.func @transform_2(%arg0: i32) -> (i32, i32, i32) {
    %c0_i32 = arith.constant 0 : i32
    %c0_i32_0 = arith.constant 0 : i32
    %c0_i32_1 = arith.constant 0 : i32
    return %arg0, %c0_i32, %c0_i32_0 : i32, i32, i32
  }
  func.func @transform_3(%arg0: i32) -> (i32, i32) {
    %c0_i32 = arith.constant 0 : i32
    %c0_i32_0 = arith.constant 0 : i32
    %c0_i32_1 = arith.constant 0 : i32
    return %c0_i32, %c0_i32_0 : i32, i32
  }
  func.func @transform_4(%arg0: i32) -> (i32, i32) {
    %c0_i32 = arith.constant 0 : i32
    %c0_i32_0 = arith.constant 0 : i32
    %c0_i32_1 = arith.constant 0 : i32
    return %c0_i32, %c0_i32_0 : i32, i32
  }
  func.func @transform_5(%arg0: i32) -> (i32, i32, i32) {
    %c0_i32 = arith.constant 0 : i32
    %c0_i32_0 = arith.constant 0 : i32
    %c0_i32_1 = arith.constant 0 : i32
    return %arg0, %c0_i32, %c0_i32_0 : i32, i32, i32
  }
}

module attributes {stable_mosaic.version = 11 : i64} {
  func.func @_rdb_kernel(%arg0: i32, %arg1: memref<1x100xbf16, #tpu.memory_space<vmem>>, %arg2: memref<1x16x100xbf16, #tpu.memory_space<vmem>>, %arg3: memref<1x16x100xbf16, #tpu.memory_space<vmem>>, %arg4: memref<8x144xbf16, #tpu.memory_space<vmem>>, %arg5: memref<8x216xbf16, #tpu.memory_space<vmem>>, %arg6: memref<8x288xbf16, #tpu.memory_space<vmem>>, %arg7: memref<8x360xbf16, #tpu.memory_space<vmem>>, %arg8: memref<16x432xbf16, #tpu.memory_space<vmem>>, %arg9: memref<8x1xf32, #tpu.memory_space<vmem>>, %arg10: memref<8x1xf32, #tpu.memory_space<vmem>>, %arg11: memref<8x1xf32, #tpu.memory_space<vmem>>, %arg12: memref<8x1xf32, #tpu.memory_space<vmem>>, %arg13: memref<16x1xf32, #tpu.memory_space<vmem>>, %arg14: memref<1x16x100xbf16, #tpu.memory_space<vmem>>, %arg15: memref<48x122xbf16, #tpu.memory_space<vmem>>) attributes {dimension_semantics = [#tpu.dimension_semantics<parallel>], iteration_bounds = array<i64: 2>, scalar_prefetch = 0 : i64, scratch_operands = 1 : i64, tpu.core_type = #tpu.core_type<tc>, window_params = [{pipeline_mode = #tpu.pipeline_mode<synchronous>, transform_indices = @transform_0, window_bounds = array<i64: 1, 100>}, {transform_indices = @transform_1, window_bounds = array<i64: 1, 16, 100>}, {transform_indices = @transform_2, window_bounds = array<i64: 1, 16, 100>}, {pipeline_mode = #tpu.pipeline_mode<synchronous>, transform_indices = @transform_3, window_bounds = array<i64: 8, 144>}, {pipeline_mode = #tpu.pipeline_mode<synchronous>, transform_indices = @transform_4, window_bounds = array<i64: 8, 216>}, {pipeline_mode = #tpu.pipeline_mode<synchronous>, transform_indices = @transform_5, window_bounds = array<i64: 8, 288>}, {pipeline_mode = #tpu.pipeline_mode<synchronous>, transform_indices = @transform_6, window_bounds = array<i64: 8, 360>}, {pipeline_mode = #tpu.pipeline_mode<synchronous>, transform_indices = @transform_7, window_bounds = array<i64: 16, 432>}, {pipeline_mode = #tpu.pipeline_mode<synchronous>, transform_indices = @transform_8, window_bounds = array<i64: 8, 1>}, {pipeline_mode = #tpu.pipeline_mode<synchronous>, transform_indices = @transform_9, window_bounds = array<i64: 8, 1>}, {pipeline_mode = #tpu.pipeline_mode<synchronous>, transform_indices = @transform_10, window_bounds = array<i64: 8, 1>}, {pipeline_mode = #tpu.pipeline_mode<synchronous>, transform_indices = @transform_11, window_bounds = array<i64: 8, 1>}, {pipeline_mode = #tpu.pipeline_mode<synchronous>, transform_indices = @transform_12, window_bounds = array<i64: 16, 1>}, {transform_indices = @transform_13, window_bounds = array<i64: 1, 16, 100>}]} {
    %c0 = arith.constant 0 : index
    %c0_0 = arith.constant 0 : index
    %0 = vector.load %arg1[%c0, %c0_0] : memref<1x100xbf16, #tpu.memory_space<vmem>>, vector<1x100xbf16>
    %1 = arith.extf %0 : vector<1x100xbf16> to vector<1x100xf32>
    %cst = arith.constant 0.000000e+00 : bf16
    %2 = vector.broadcast %cst : bf16 to vector<48x11xbf16>
    %c0_1 = arith.constant 0 : index
    %c0_2 = arith.constant 0 : index
    %3 = vector.load %arg15[%c0_1, %c0_2] : memref<48x122xbf16, #tpu.memory_space<vmem>>, vector<48x11xbf16>
    tpu.vector_store %arg15[%c0_1, %c0_2], %2 {strides = array<i32>} : memref<48x122xbf16, #tpu.memory_space<vmem>>, vector<48x11xbf16>,
    %c0_3 = arith.constant 0 : index
    %c111 = arith.constant 111 : index
    %4 = vector.load %arg15[%c0_3, %c111] : memref<48x122xbf16, #tpu.memory_space<vmem>>, vector<48x11xbf16>
    tpu.vector_store %arg15[%c0_3, %c111], %2 {strides = array<i32>} : memref<48x122xbf16, #tpu.memory_space<vmem>>, vector<48x11xbf16>,
    %c0_4 = arith.constant 0 : index
    %c0_5 = arith.constant 0 : index
    %c0_6 = arith.constant 0 : index
    %5 = vector.load %arg2[%c0_4, %c0_5, %c0_6] : memref<1x16x100xbf16, #tpu.memory_space<vmem>>, vector<1x16x100xbf16>
    %6 = vector.shape_cast %5 : vector<1x16x100xbf16> to vector<16x100xbf16>
    %7 = vector.broadcast %0 : vector<1x100xbf16> to vector<16x100xbf16>
    %8 = arith.mulf %6, %7 : vector<16x100xbf16>
    %c0_7 = arith.constant 0 : index
    %c11 = arith.constant 11 : index
    %9 = vector.load %arg15[%c0_7, %c11] : memref<48x122xbf16, #tpu.memory_space<vmem>>, vector<16x100xbf16>
    tpu.vector_store %arg15[%c0_7, %c11], %8 {strides = array<i32>} : memref<48x122xbf16, #tpu.memory_space<vmem>>, vector<16x100xbf16>,
    %c0_8 = arith.constant 0 : index
    %c0_9 = arith.constant 0 : index
    %10 = vector.load %arg15[%c0_8, %c0_9] : memref<48x122xbf16, #tpu.memory_space<vmem>>, vector<16x100xbf16>
    %c0_10 = arith.constant 0 : index
    %c0_11 = arith.constant 0 : index
    %11 = vector.load %arg4[%c0_10, %c0_11] : memref<8x144xbf16, #tpu.memory_space<vmem>>, vector<8x16xbf16>
    %cst_12 = arith.constant dense<0.000000e+00> : vector<8x100xf32>
    %12 = tpu.matmul %11, %10, %cst_12 {dimension_numbers = #tpu.dot_dimension_numbers<[1], [0], [0], [1], [0, 0, 1, 1], [], []>} : vector<8x16xbf16>, vector<16x100xbf16>, vector<8x100xf32> -> vector<8x100xf32>
    %c0_13 = arith.constant 0 : index
    %c1 = arith.constant 1 : index
    %13 = vector.load %arg15[%c0_13, %c1] : memref<48x122xbf16, #tpu.memory_space<vmem>>, vector<16x100xbf16>
    %c0_14 = arith.constant 0 : index
    %c16 = arith.constant 16 : index
    %14 = vector.load %arg4[%c0_14, %c16] : memref<8x144xbf16, #tpu.memory_space<vmem>>, vector<8x16xbf16>
    %cst_15 = arith.constant dense<0.000000e+00> : vector<8x100xf32>
    %15 = tpu.matmul %14, %13, %cst_15 {dimension_numbers = #tpu.dot_dimension_numbers<[1], [0], [0], [1], [0, 0, 1, 1], [], []>} : vector<8x16xbf16>, vector<16x100xbf16>, vector<8x100xf32> -> vector<8x100xf32>
    %16 = arith.addf %12, %15 : vector<8x100xf32>
    %c0_16 = arith.constant 0 : index
    %c2 = arith.constant 2 : index
    %17 = vector.load %arg15[%c0_16, %c2] : memref<48x122xbf16, #tpu.memory_space<vmem>>, vector<16x100xbf16>
    %c0_17 = arith.constant 0 : index
    %c32 = arith.constant 32 : index
    %18 = vector.load %arg4[%c0_17, %c32] : memref<8x144xbf16, #tpu.memory_space<vmem>>, vector<8x16xbf16>
    %cst_18 = arith.constant dense<0.000000e+00> : vector<8x100xf32>
    %19 = tpu.matmul %18, %17, %cst_18 {dimension_numbers = #tpu.dot_dimension_numbers<[1], [0], [0], [1], [0, 0, 1, 1], [], []>} : vector<8x16xbf16>, vector<16x100xbf16>, vector<8x100xf32> -> vector<8x100xf32>
    %20 = arith.addf %16, %19 : vector<8x100xf32>
    %c0_19 = arith.constant 0 : index
    %c10 = arith.constant 10 : index
    %21 = vector.load %arg15[%c0_19, %c10] : memref<48x122xbf16, #tpu.memory_space<vmem>>, vector<16x100xbf16>
    %c0_20 = arith.constant 0 : index
    %c48 = arith.constant 48 : index
    %22 = vector.load %arg4[%c0_20, %c48] : memref<8x144xbf16, #tpu.memory_space<vmem>>, vector<8x16xbf16>
    %cst_21 = arith.constant dense<0.000000e+00> : vector<8x100xf32>
    %23 = tpu.matmul %22, %21, %cst_21 {dimension_numbers = #tpu.dot_dimension_numbers<[1], [0], [0], [1], [0, 0, 1, 1], [], []>} : vector<8x16xbf16>, vector<16x100xbf16>, vector<8x100xf32> -> vector<8x100xf32>
    %24 = arith.addf %20, %23 : vector<8x100xf32>
    %c0_22 = arith.constant 0 : index
    %c11_23 = arith.constant 11 : index
    %25 = vector.load %arg15[%c0_22, %c11_23] : memref<48x122xbf16, #tpu.memory_space<vmem>>, vector<16x100xbf16>
    %c0_24 = arith.constant 0 : index
    %c64 = arith.constant 64 : index
    %26 = vector.load %arg4[%c0_24, %c64] : memref<8x144xbf16, #tpu.memory_space<vmem>>, vector<8x16xbf16>
    %cst_25 = arith.constant dense<0.000000e+00> : vector<8x100xf32>
    %27 = tpu.matmul %26, %25, %cst_25 {dimension_numbers = #tpu.dot_dimension_numbers<[1], [0], [0], [1], [0, 0, 1, 1], [], []>} : vector<8x16xbf16>, vector<16x100xbf16>, vector<8x100xf32> -> vector<8x100xf32>
    %28 = arith.addf %24, %27 : vector<8x100xf32>
    %c0_26 = arith.constant 0 : index
    %c12 = arith.constant 12 : index
    %29 = vector.load %arg15[%c0_26, %c12] : memref<48x122xbf16, #tpu.memory_space<vmem>>, vector<16x100xbf16>
    %c0_27 = arith.constant 0 : index
    %c80 = arith.constant 80 : index
    %30 = vector.load %arg4[%c0_27, %c80] : memref<8x144xbf16, #tpu.memory_space<vmem>>, vector<8x16xbf16>
    %cst_28 = arith.constant dense<0.000000e+00> : vector<8x100xf32>
    %31 = tpu.matmul %30, %29, %cst_28 {dimension_numbers = #tpu.dot_dimension_numbers<[1], [0], [0], [1], [0, 0, 1, 1], [], []>} : vector<8x16xbf16>, vector<16x100xbf16>, vector<8x100xf32> -> vector<8x100xf32>
    %32 = arith.addf %28, %31 : vector<8x100xf32>
    %c0_29 = arith.constant 0 : index
    %c20 = arith.constant 20 : index
    %33 = vector.load %arg15[%c0_29, %c20] : memref<48x122xbf16, #tpu.memory_space<vmem>>, vector<16x100xbf16>
    %c0_30 = arith.constant 0 : index
    %c96 = arith.constant 96 : index
    %34 = vector.load %arg4[%c0_30, %c96] : memref<8x144xbf16, #tpu.memory_space<vmem>>, vector<8x16xbf16>
    %cst_31 = arith.constant dense<0.000000e+00> : vector<8x100xf32>
    %35 = tpu.matmul %34, %33, %cst_31 {dimension_numbers = #tpu.dot_dimension_numbers<[1], [0], [0], [1], [0, 0, 1, 1], [], []>} : vector<8x16xbf16>, vector<16x100xbf16>, vector<8x100xf32> -> vector<8x100xf32>
    %36 = arith.addf %32, %35 : vector<8x100xf32>
    %c0_32 = arith.constant 0 : index
    %c21 = arith.constant 21 : index
    %37 = vector.load %arg15[%c0_32, %c21] : memref<48x122xbf16, #tpu.memory_space<vmem>>, vector<16x100xbf16>
    %c0_33 = arith.constant 0 : index
    %c112 = arith.constant 112 : index
    %38 = vector.load %arg4[%c0_33, %c112] : memref<8x144xbf16, #tpu.memory_space<vmem>>, vector<8x16xbf16>
    %cst_34 = arith.constant dense<0.000000e+00> : vector<8x100xf32>
    %39 = tpu.matmul %38, %37, %cst_34 {dimension_numbers = #tpu.dot_dimension_numbers<[1], [0], [0], [1], [0, 0, 1, 1], [], []>} : vector<8x16xbf16>, vector<16x100xbf16>, vector<8x100xf32> -> vector<8x100xf32>
    %40 = arith.addf %36, %39 : vector<8x100xf32>
    %c0_35 = arith.constant 0 : index
    %c22 = arith.constant 22 : index
    %41 = vector.load %arg15[%c0_35, %c22] : memref<48x122xbf16, #tpu.memory_space<vmem>>, vector<16x100xbf16>
    %c0_36 = arith.constant 0 : index
    %c128 = arith.constant 128 : index
    %42 = vector.load %arg4[%c0_36, %c128] : memref<8x144xbf16, #tpu.memory_space<vmem>>, vector<8x16xbf16>
    %cst_37 = arith.constant dense<0.000000e+00> : vector<8x100xf32>
    %43 = tpu.matmul %42, %41, %cst_37 {dimension_numbers = #tpu.dot_dimension_numbers<[1], [0], [0], [1], [0, 0, 1, 1], [], []>} : vector<8x16xbf16>, vector<16x100xbf16>, vector<8x100xf32> -> vector<8x100xf32>
    %44 = arith.addf %40, %43 : vector<8x100xf32>
    %c0_38 = arith.constant 0 : index
    %c0_39 = arith.constant 0 : index
    %45 = vector.load %arg9[%c0_38, %c0_39] : memref<8x1xf32, #tpu.memory_space<vmem>>, vector<8x1xf32>
    %46 = vector.broadcast %45 : vector<8x1xf32> to vector<8x100xf32>
    %47 = arith.addf %44, %46 : vector<8x100xf32>
    %cst_40 = arith.constant 0.000000e+00 : f32
    %48 = vector.broadcast %cst_40 : f32 to vector<8x100xf32>
    %49 = arith.cmpf oge, %47, %48 : vector<8x100xf32>
    %cst_41 = arith.constant 2.000000e-01 : f32
    %50 = vector.broadcast %cst_41 : f32 to vector<8x100xf32>
    %51 = arith.mulf %50, %47 : vector<8x100xf32>
    %52 = arith.select %49, %47, %51 : vector<8x100xi1>, vector<8x100xf32>
    %53 = vector.broadcast %1 : vector<1x100xf32> to vector<8x100xf32>
    %54 = arith.mulf %52, %53 : vector<8x100xf32>
    %55 = arith.truncf %54 : vector<8x100xf32> to vector<8x100xbf16>
    %c16_42 = arith.constant 16 : index
    %c11_43 = arith.constant 11 : index
    %56 = vector.load %arg15[%c16_42, %c11_43] : memref<48x122xbf16, #tpu.memory_space<vmem>>, vector<8x100xbf16>
    tpu.vector_store %arg15[%c16_42, %c11_43], %55 {strides = array<i32>} : memref<48x122xbf16, #tpu.memory_space<vmem>>, vector<8x100xbf16>,
    %c0_44 = arith.constant 0 : index
    %c0_45 = arith.constant 0 : index
    %57 = vector.load %arg15[%c0_44, %c0_45] : memref<48x122xbf16, #tpu.memory_space<vmem>>, vector<24x100xbf16>
    %c0_46 = arith.constant 0 : index
    %c0_47 = arith.constant 0 : index
    %58 = vector.load %arg5[%c0_46, %c0_47] : memref<8x216xbf16, #tpu.memory_space<vmem>>, vector<8x24xbf16>
    %cst_48 = arith.constant dense<0.000000e+00> : vector<8x100xf32>
    %59 = tpu.matmul %58, %57, %cst_48 {dimension_numbers = #tpu.dot_dimension_numbers<[1], [0], [0], [1], [0, 0, 1, 1], [], []>} : vector<8x24xbf16>, vector<24x100xbf16>, vector<8x100xf32> -> vector<8x100xf32>
    %c0_49 = arith.constant 0 : index
    %c1_50 = arith.constant 1 : index
    %60 = vector.load %arg15[%c0_49, %c1_50] : memref<48x122xbf16, #tpu.memory_space<vmem>>, vector<24x100xbf16>
    %c0_51 = arith.constant 0 : index
    %c24 = arith.constant 24 : index
    %61 = vector.load %arg5[%c0_51, %c24] : memref<8x216xbf16, #tpu.memory_space<vmem>>, vector<8x24xbf16>
    %cst_52 = arith.constant dense<0.000000e+00> : vector<8x100xf32>
    %62 = tpu.matmul %61, %60, %cst_52 {dimension_numbers = #tpu.dot_dimension_numbers<[1], [0], [0], [1], [0, 0, 1, 1], [], []>} : vector<8x24xbf16>, vector<24x100xbf16>, vector<8x100xf32> -> vector<8x100xf32>
    %63 = arith.addf %59, %62 : vector<8x100xf32>
    %c0_53 = arith.constant 0 : index
    %c2_54 = arith.constant 2 : index
    %64 = vector.load %arg15[%c0_53, %c2_54] : memref<48x122xbf16, #tpu.memory_space<vmem>>, vector<24x100xbf16>
    %c0_55 = arith.constant 0 : index
    %c48_56 = arith.constant 48 : index
    %65 = vector.load %arg5[%c0_55, %c48_56] : memref<8x216xbf16, #tpu.memory_space<vmem>>, vector<8x24xbf16>
    %cst_57 = arith.constant dense<0.000000e+00> : vector<8x100xf32>
    %66 = tpu.matmul %65, %64, %cst_57 {dimension_numbers = #tpu.dot_dimension_numbers<[1], [0], [0], [1], [0, 0, 1, 1], [], []>} : vector<8x24xbf16>, vector<24x100xbf16>, vector<8x100xf32> -> vector<8x100xf32>
    %67 = arith.addf %63, %66 : vector<8x100xf32>
    %c0_58 = arith.constant 0 : index
    %c10_59 = arith.constant 10 : index
    %68 = vector.load %arg15[%c0_58, %c10_59] : memref<48x122xbf16, #tpu.memory_space<vmem>>, vector<24x100xbf16>
    %c0_60 = arith.constant 0 : index
    %c72 = arith.constant 72 : index
    %69 = vector.load %arg5[%c0_60, %c72] : memref<8x216xbf16, #tpu.memory_space<vmem>>, vector<8x24xbf16>
    %cst_61 = arith.constant dense<0.000000e+00> : vector<8x100xf32>
    %70 = tpu.matmul %69, %68, %cst_61 {dimension_numbers = #tpu.dot_dimension_numbers<[1], [0], [0], [1], [0, 0, 1, 1], [], []>} : vector<8x24xbf16>, vector<24x100xbf16>, vector<8x100xf32> -> vector<8x100xf32>
    %71 = arith.addf %67, %70 : vector<8x100xf32>
    %c0_62 = arith.constant 0 : index
    %c11_63 = arith.constant 11 : index
    %72 = vector.load %arg15[%c0_62, %c11_63] : memref<48x122xbf16, #tpu.memory_space<vmem>>, vector<24x100xbf16>
    %c0_64 = arith.constant 0 : index
    %c96_65 = arith.constant 96 : index
    %73 = vector.load %arg5[%c0_64, %c96_65] : memref<8x216xbf16, #tpu.memory_space<vmem>>, vector<8x24xbf16>
    %cst_66 = arith.constant dense<0.000000e+00> : vector<8x100xf32>
    %74 = tpu.matmul %73, %72, %cst_66 {dimension_numbers = #tpu.dot_dimension_numbers<[1], [0], [0], [1], [0, 0, 1, 1], [], []>} : vector<8x24xbf16>, vector<24x100xbf16>, vector<8x100xf32> -> vector<8x100xf32>
    %75 = arith.addf %71, %74 : vector<8x100xf32>
    %c0_67 = arith.constant 0 : index
    %c12_68 = arith.constant 12 : index
    %76 = vector.load %arg15[%c0_67, %c12_68] : memref<48x122xbf16, #tpu.memory_space<vmem>>, vector<24x100xbf16>
    %c0_69 = arith.constant 0 : index
    %c120 = arith.constant 120 : index
    %77 = vector.load %arg5[%c0_69, %c120] : memref<8x216xbf16, #tpu.memory_space<vmem>>, vector<8x24xbf16>
    %cst_70 = arith.constant dense<0.000000e+00> : vector<8x100xf32>
    %78 = tpu.matmul %77, %76, %cst_70 {dimension_numbers = #tpu.dot_dimension_numbers<[1], [0], [0], [1], [0, 0, 1, 1], [], []>} : vector<8x24xbf16>, vector<24x100xbf16>, vector<8x100xf32> -> vector<8x100xf32>
    %79 = arith.addf %75, %78 : vector<8x100xf32>
    %c0_71 = arith.constant 0 : index
    %c20_72 = arith.constant 20 : index
    %80 = vector.load %arg15[%c0_71, %c20_72] : memref<48x122xbf16, #tpu.memory_space<vmem>>, vector<24x100xbf16>
    %c0_73 = arith.constant 0 : index
    %c144 = arith.constant 144 : index
    %81 = vector.load %arg5[%c0_73, %c144] : memref<8x216xbf16, #tpu.memory_space<vmem>>, vector<8x24xbf16>
    %cst_74 = arith.constant dense<0.000000e+00> : vector<8x100xf32>
    %82 = tpu.matmul %81, %80, %cst_74 {dimension_numbers = #tpu.dot_dimension_numbers<[1], [0], [0], [1], [0, 0, 1, 1], [], []>} : vector<8x24xbf16>, vector<24x100xbf16>, vector<8x100xf32> -> vector<8x100xf32>
    %83 = arith.addf %79, %82 : vector<8x100xf32>
    %c0_75 = arith.constant 0 : index
    %c21_76 = arith.constant 21 : index
    %84 = vector.load %arg15[%c0_75, %c21_76] : memref<48x122xbf16, #tpu.memory_space<vmem>>, vector<24x100xbf16>
    %c0_77 = arith.constant 0 : index
    %c168 = arith.constant 168 : index
    %85 = vector.load %arg5[%c0_77, %c168] : memref<8x216xbf16, #tpu.memory_space<vmem>>, vector<8x24xbf16>
    %cst_78 = arith.constant dense<0.000000e+00> : vector<8x100xf32>
    %86 = tpu.matmul %85, %84, %cst_78 {dimension_numbers = #tpu.dot_dimension_numbers<[1], [0], [0], [1], [0, 0, 1, 1], [], []>} : vector<8x24xbf16>, vector<24x100xbf16>, vector<8x100xf32> -> vector<8x100xf32>
    %87 = arith.addf %83, %86 : vector<8x100xf32>
    %c0_79 = arith.constant 0 : index
    %c22_80 = arith.constant 22 : index
    %88 = vector.load %arg15[%c0_79, %c22_80] : memref<48x122xbf16, #tpu.memory_space<vmem>>, vector<24x100xbf16>
    %c0_81 = arith.constant 0 : index
    %c192 = arith.constant 192 : index
    %89 = vector.load %arg5[%c0_81, %c192] : memref<8x216xbf16, #tpu.memory_space<vmem>>, vector<8x24xbf16>
    %cst_82 = arith.constant dense<0.000000e+00> : vector<8x100xf32>
    %90 = tpu.matmul %89, %88, %cst_82 {dimension_numbers = #tpu.dot_dimension_numbers<[1], [0], [0], [1], [0, 0, 1, 1], [], []>} : vector<8x24xbf16>, vector<24x100xbf16>, vector<8x100xf32> -> vector<8x100xf32>
    %91 = arith.addf %87, %90 : vector<8x100xf32>
    %c0_83 = arith.constant 0 : index
    %c0_84 = arith.constant 0 : index
    %92 = vector.load %arg10[%c0_83, %c0_84] : memref<8x1xf32, #tpu.memory_space<vmem>>, vector<8x1xf32>
    %93 = vector.broadcast %92 : vector<8x1xf32> to vector<8x100xf32>
    %94 = arith.addf %91, %93 : vector<8x100xf32>
    %cst_85 = arith.constant 0.000000e+00 : f32
    %95 = vector.broadcast %cst_85 : f32 to vector<8x100xf32>
    %96 = arith.cmpf oge, %94, %95 : vector<8x100xf32>
    %cst_86 = arith.constant 2.000000e-01 : f32
    %97 = vector.broadcast %cst_86 : f32 to vector<8x100xf32>
    %98 = arith.mulf %97, %94 : vector<8x100xf32>
    %99 = arith.select %96, %94, %98 : vector<8x100xi1>, vector<8x100xf32>
    %100 = vector.broadcast %1 : vector<1x100xf32> to vector<8x100xf32>
    %101 = arith.mulf %99, %100 : vector<8x100xf32>
    %102 = arith.truncf %101 : vector<8x100xf32> to vector<8x100xbf16>
    %c24_87 = arith.constant 24 : index
    %c11_88 = arith.constant 11 : index
    %103 = vector.load %arg15[%c24_87, %c11_88] : memref<48x122xbf16, #tpu.memory_space<vmem>>, vector<8x100xbf16>
    tpu.vector_store %arg15[%c24_87, %c11_88], %102 {strides = array<i32>} : memref<48x122xbf16, #tpu.memory_space<vmem>>, vector<8x100xbf16>,
    %c0_89 = arith.constant 0 : index
    %c0_90 = arith.constant 0 : index
    %104 = vector.load %arg15[%c0_89, %c0_90] : memref<48x122xbf16, #tpu.memory_space<vmem>>, vector<32x100xbf16>
    %c0_91 = arith.constant 0 : index
    %c0_92 = arith.constant 0 : index
    %105 = vector.load %arg6[%c0_91, %c0_92] : memref<8x288xbf16, #tpu.memory_space<vmem>>, vector<8x32xbf16>
    %cst_93 = arith.constant dense<0.000000e+00> : vector<8x100xf32>
    %106 = tpu.matmul %105, %104, %cst_93 {dimension_numbers = #tpu.dot_dimension_numbers<[1], [0], [0], [1], [0, 0, 1, 1], [], []>} : vector<8x32xbf16>, vector<32x100xbf16>, vector<8x100xf32> -> vector<8x100xf32>
    %c0_94 = arith.constant 0 : index
    %c1_95 = arith.constant 1 : index
    %107 = vector.load %arg15[%c0_94, %c1_95] : memref<48x122xbf16, #tpu.memory_space<vmem>>, vector<32x100xbf16>
    %c0_96 = arith.constant 0 : index
    %c32_97 = arith.constant 32 : index
    %108 = vector.load %arg6[%c0_96, %c32_97] : memref<8x288xbf16, #tpu.memory_space<vmem>>, vector<8x32xbf16>
    %cst_98 = arith.constant dense<0.000000e+00> : vector<8x100xf32>
    %109 = tpu.matmul %108, %107, %cst_98 {dimension_numbers = #tpu.dot_dimension_numbers<[1], [0], [0], [1], [0, 0, 1, 1], [], []>} : vector<8x32xbf16>, vector<32x100xbf16>, vector<8x100xf32> -> vector<8x100xf32>
    %110 = arith.addf %106, %109 : vector<8x100xf32>
    %c0_99 = arith.constant 0 : index
    %c2_100 = arith.constant 2 : index
    %111 = vector.load %arg15[%c0_99, %c2_100] : memref<48x122xbf16, #tpu.memory_space<vmem>>, vector<32x100xbf16>
    %c0_101 = arith.constant 0 : index
    %c64_102 = arith.constant 64 : index
    %112 = vector.load %arg6[%c0_101, %c64_102] : memref<8x288xbf16, #tpu.memory_space<vmem>>, vector<8x32xbf16>
    %cst_103 = arith.constant dense<0.000000e+00> : vector<8x100xf32>
    %113 = tpu.matmul %112, %111, %cst_103 {dimension_numbers = #tpu.dot_dimension_numbers<[1], [0], [0], [1], [0, 0, 1, 1], [], []>} : vector<8x32xbf16>, vector<32x100xbf16>, vector<8x100xf32> -> vector<8x100xf32>
    %114 = arith.addf %110, %113 : vector<8x100xf32>
    %c0_104 = arith.constant 0 : index
    %c10_105 = arith.constant 10 : index
    %115 = vector.load %arg15[%c0_104, %c10_105] : memref<48x122xbf16, #tpu.memory_space<vmem>>, vector<32x100xbf16>
    %c0_106 = arith.constant 0 : index
    %c96_107 = arith.constant 96 : index
    %116 = vector.load %arg6[%c0_106, %c96_107] : memref<8x288xbf16, #tpu.memory_space<vmem>>, vector<8x32xbf16>
    %cst_108 = arith.constant dense<0.000000e+00> : vector<8x100xf32>
    %117 = tpu.matmul %116, %115, %cst_108 {dimension_numbers = #tpu.dot_dimension_numbers<[1], [0], [0], [1], [0, 0, 1, 1], [], []>} : vector<8x32xbf16>, vector<32x100xbf16>, vector<8x100xf32> -> vector<8x100xf32>
    %118 = arith.addf %114, %117 : vector<8x100xf32>
    %c0_109 = arith.constant 0 : index
    %c11_110 = arith.constant 11 : index
    %119 = vector.load %arg15[%c0_109, %c11_110] : memref<48x122xbf16, #tpu.memory_space<vmem>>, vector<32x100xbf16>
    %c0_111 = arith.constant 0 : index
    %c128_112 = arith.constant 128 : index
    %120 = vector.load %arg6[%c0_111, %c128_112] : memref<8x288xbf16, #tpu.memory_space<vmem>>, vector<8x32xbf16>
    %cst_113 = arith.constant dense<0.000000e+00> : vector<8x100xf32>
    %121 = tpu.matmul %120, %119, %cst_113 {dimension_numbers = #tpu.dot_dimension_numbers<[1], [0], [0], [1], [0, 0, 1, 1], [], []>} : vector<8x32xbf16>, vector<32x100xbf16>, vector<8x100xf32> -> vector<8x100xf32>
    %122 = arith.addf %118, %121 : vector<8x100xf32>
    %c0_114 = arith.constant 0 : index
    %c12_115 = arith.constant 12 : index
    %123 = vector.load %arg15[%c0_114, %c12_115] : memref<48x122xbf16, #tpu.memory_space<vmem>>, vector<32x100xbf16>
    %c0_116 = arith.constant 0 : index
    %c160 = arith.constant 160 : index
    %124 = vector.load %arg6[%c0_116, %c160] : memref<8x288xbf16, #tpu.memory_space<vmem>>, vector<8x32xbf16>
    %cst_117 = arith.constant dense<0.000000e+00> : vector<8x100xf32>
    %125 = tpu.matmul %124, %123, %cst_117 {dimension_numbers = #tpu.dot_dimension_numbers<[1], [0], [0], [1], [0, 0, 1, 1], [], []>} : vector<8x32xbf16>, vector<32x100xbf16>, vector<8x100xf32> -> vector<8x100xf32>
    %126 = arith.addf %122, %125 : vector<8x100xf32>
    %c0_118 = arith.constant 0 : index
    %c20_119 = arith.constant 20 : index
    %127 = vector.load %arg15[%c0_118, %c20_119] : memref<48x122xbf16, #tpu.memory_space<vmem>>, vector<32x100xbf16>
    %c0_120 = arith.constant 0 : index
    %c192_121 = arith.constant 192 : index
    %128 = vector.load %arg6[%c0_120, %c192_121] : memref<8x288xbf16, #tpu.memory_space<vmem>>, vector<8x32xbf16>
    %cst_122 = arith.constant dense<0.000000e+00> : vector<8x100xf32>
    %129 = tpu.matmul %128, %127, %cst_122 {dimension_numbers = #tpu.dot_dimension_numbers<[1], [0], [0], [1], [0, 0, 1, 1], [], []>} : vector<8x32xbf16>, vector<32x100xbf16>, vector<8x100xf32> -> vector<8x100xf32>
    %130 = arith.addf %126, %129 : vector<8x100xf32>
    %c0_123 = arith.constant 0 : index
    %c21_124 = arith.constant 21 : index
    %131 = vector.load %arg15[%c0_123, %c21_124] : memref<48x122xbf16, #tpu.memory_space<vmem>>, vector<32x100xbf16>
    %c0_125 = arith.constant 0 : index
    %c224 = arith.constant 224 : index
    %132 = vector.load %arg6[%c0_125, %c224] : memref<8x288xbf16, #tpu.memory_space<vmem>>, vector<8x32xbf16>
    %cst_126 = arith.constant dense<0.000000e+00> : vector<8x100xf32>
    %133 = tpu.matmul %132, %131, %cst_126 {dimension_numbers = #tpu.dot_dimension_numbers<[1], [0], [0], [1], [0, 0, 1, 1], [], []>} : vector<8x32xbf16>, vector<32x100xbf16>, vector<8x100xf32> -> vector<8x100xf32>
    %134 = arith.addf %130, %133 : vector<8x100xf32>
    %c0_127 = arith.constant 0 : index
    %c22_128 = arith.constant 22 : index
    %135 = vector.load %arg15[%c0_127, %c22_128] : memref<48x122xbf16, #tpu.memory_space<vmem>>, vector<32x100xbf16>
    %c0_129 = arith.constant 0 : index
    %c256 = arith.constant 256 : index
    %136 = vector.load %arg6[%c0_129, %c256] : memref<8x288xbf16, #tpu.memory_space<vmem>>, vector<8x32xbf16>
    %cst_130 = arith.constant dense<0.000000e+00> : vector<8x100xf32>
    %137 = tpu.matmul %136, %135, %cst_130 {dimension_numbers = #tpu.dot_dimension_numbers<[1], [0], [0], [1], [0, 0, 1, 1], [], []>} : vector<8x32xbf16>, vector<32x100xbf16>, vector<8x100xf32> -> vector<8x100xf32>
    %138 = arith.addf %134, %137 : vector<8x100xf32>
    %c0_131 = arith.constant 0 : index
    %c0_132 = arith.constant 0 : index
    %139 = vector.load %arg11[%c0_131, %c0_132] : memref<8x1xf32, #tpu.memory_space<vmem>>, vector<8x1xf32>
    %140 = vector.broadcast %139 : vector<8x1xf32> to vector<8x100xf32>
    %141 = arith.addf %138, %140 : vector<8x100xf32>
    %cst_133 = arith.constant 0.000000e+00 : f32
    %142 = vector.broadcast %cst_133 : f32 to vector<8x100xf32>
    %143 = arith.cmpf oge, %141, %142 : vector<8x100xf32>
    %cst_134 = arith.constant 2.000000e-01 : f32
    %144 = vector.broadcast %cst_134 : f32 to vector<8x100xf32>
    %145 = arith.mulf %144, %141 : vector<8x100xf32>
    %146 = arith.select %143, %141, %145 : vector<8x100xi1>, vector<8x100xf32>
    %147 = vector.broadcast %1 : vector<1x100xf32> to vector<8x100xf32>
    %148 = arith.mulf %146, %147 : vector<8x100xf32>
    %149 = arith.truncf %148 : vector<8x100xf32> to vector<8x100xbf16>
    %c32_135 = arith.constant 32 : index
    %c11_136 = arith.constant 11 : index
    %150 = vector.load %arg15[%c32_135, %c11_136] : memref<48x122xbf16, #tpu.memory_space<vmem>>, vector<8x100xbf16>
    tpu.vector_store %arg15[%c32_135, %c11_136], %149 {strides = array<i32>} : memref<48x122xbf16, #tpu.memory_space<vmem>>, vector<8x100xbf16>,
    %c0_137 = arith.constant 0 : index
    %c0_138 = arith.constant 0 : index
    %151 = vector.load %arg15[%c0_137, %c0_138] : memref<48x122xbf16, #tpu.memory_space<vmem>>, vector<40x100xbf16>
    %c0_139 = arith.constant 0 : index
    %c0_140 = arith.constant 0 : index
    %152 = vector.load %arg7[%c0_139, %c0_140] : memref<8x360xbf16, #tpu.memory_space<vmem>>, vector<8x40xbf16>
    %cst_141 = arith.constant dense<0.000000e+00> : vector<8x100xf32>
    %153 = tpu.matmul %152, %151, %cst_141 {dimension_numbers = #tpu.dot_dimension_numbers<[1], [0], [0], [1], [0, 0, 1, 1], [], []>} : vector<8x40xbf16>, vector<40x100xbf16>, vector<8x100xf32> -> vector<8x100xf32>
    %c0_142 = arith.constant 0 : index
    %c1_143 = arith.constant 1 : index
    %154 = vector.load %arg15[%c0_142, %c1_143] : memref<48x122xbf16, #tpu.memory_space<vmem>>, vector<40x100xbf16>
    %c0_144 = arith.constant 0 : index
    %c40 = arith.constant 40 : index
    %155 = vector.load %arg7[%c0_144, %c40] : memref<8x360xbf16, #tpu.memory_space<vmem>>, vector<8x40xbf16>
    %cst_145 = arith.constant dense<0.000000e+00> : vector<8x100xf32>
    %156 = tpu.matmul %155, %154, %cst_145 {dimension_numbers = #tpu.dot_dimension_numbers<[1], [0], [0], [1], [0, 0, 1, 1], [], []>} : vector<8x40xbf16>, vector<40x100xbf16>, vector<8x100xf32> -> vector<8x100xf32>
    %157 = arith.addf %153, %156 : vector<8x100xf32>
    %c0_146 = arith.constant 0 : index
    %c2_147 = arith.constant 2 : index
    %158 = vector.load %arg15[%c0_146, %c2_147] : memref<48x122xbf16, #tpu.memory_space<vmem>>, vector<40x100xbf16>
    %c0_148 = arith.constant 0 : index
    %c80_149 = arith.constant 80 : index
    %159 = vector.load %arg7[%c0_148, %c80_149] : memref<8x360xbf16, #tpu.memory_space<vmem>>, vector<8x40xbf16>
    %cst_150 = arith.constant dense<0.000000e+00> : vector<8x100xf32>
    %160 = tpu.matmul %159, %158, %cst_150 {dimension_numbers = #tpu.dot_dimension_numbers<[1], [0], [0], [1], [0, 0, 1, 1], [], []>} : vector<8x40xbf16>, vector<40x100xbf16>, vector<8x100xf32> -> vector<8x100xf32>
    %161 = arith.addf %157, %160 : vector<8x100xf32>
    %c0_151 = arith.constant 0 : index
    %c10_152 = arith.constant 10 : index
    %162 = vector.load %arg15[%c0_151, %c10_152] : memref<48x122xbf16, #tpu.memory_space<vmem>>, vector<40x100xbf16>
    %c0_153 = arith.constant 0 : index
    %c120_154 = arith.constant 120 : index
    %163 = vector.load %arg7[%c0_153, %c120_154] : memref<8x360xbf16, #tpu.memory_space<vmem>>, vector<8x40xbf16>
    %cst_155 = arith.constant dense<0.000000e+00> : vector<8x100xf32>
    %164 = tpu.matmul %163, %162, %cst_155 {dimension_numbers = #tpu.dot_dimension_numbers<[1], [0], [0], [1], [0, 0, 1, 1], [], []>} : vector<8x40xbf16>, vector<40x100xbf16>, vector<8x100xf32> -> vector<8x100xf32>
    %165 = arith.addf %161, %164 : vector<8x100xf32>
    %c0_156 = arith.constant 0 : index
    %c11_157 = arith.constant 11 : index
    %166 = vector.load %arg15[%c0_156, %c11_157] : memref<48x122xbf16, #tpu.memory_space<vmem>>, vector<40x100xbf16>
    %c0_158 = arith.constant 0 : index
    %c160_159 = arith.constant 160 : index
    %167 = vector.load %arg7[%c0_158, %c160_159] : memref<8x360xbf16, #tpu.memory_space<vmem>>, vector<8x40xbf16>
    %cst_160 = arith.constant dense<0.000000e+00> : vector<8x100xf32>
    %168 = tpu.matmul %167, %166, %cst_160 {dimension_numbers = #tpu.dot_dimension_numbers<[1], [0], [0], [1], [0, 0, 1, 1], [], []>} : vector<8x40xbf16>, vector<40x100xbf16>, vector<8x100xf32> -> vector<8x100xf32>
    %169 = arith.addf %165, %168 : vector<8x100xf32>
    %c0_161 = arith.constant 0 : index
    %c12_162 = arith.constant 12 : index
    %170 = vector.load %arg15[%c0_161, %c12_162] : memref<48x122xbf16, #tpu.memory_space<vmem>>, vector<40x100xbf16>
    %c0_163 = arith.constant 0 : index
    %c200 = arith.constant 200 : index
    %171 = vector.load %arg7[%c0_163, %c200] : memref<8x360xbf16, #tpu.memory_space<vmem>>, vector<8x40xbf16>
    %cst_164 = arith.constant dense<0.000000e+00> : vector<8x100xf32>
    %172 = tpu.matmul %171, %170, %cst_164 {dimension_numbers = #tpu.dot_dimension_numbers<[1], [0], [0], [1], [0, 0, 1, 1], [], []>} : vector<8x40xbf16>, vector<40x100xbf16>, vector<8x100xf32> -> vector<8x100xf32>
    %173 = arith.addf %169, %172 : vector<8x100xf32>
    %c0_165 = arith.constant 0 : index
    %c20_166 = arith.constant 20 : index
    %174 = vector.load %arg15[%c0_165, %c20_166] : memref<48x122xbf16, #tpu.memory_space<vmem>>, vector<40x100xbf16>
    %c0_167 = arith.constant 0 : index
    %c240 = arith.constant 240 : index
    %175 = vector.load %arg7[%c0_167, %c240] : memref<8x360xbf16, #tpu.memory_space<vmem>>, vector<8x40xbf16>
    %cst_168 = arith.constant dense<0.000000e+00> : vector<8x100xf32>
    %176 = tpu.matmul %175, %174, %cst_168 {dimension_numbers = #tpu.dot_dimension_numbers<[1], [0], [0], [1], [0, 0, 1, 1], [], []>} : vector<8x40xbf16>, vector<40x100xbf16>, vector<8x100xf32> -> vector<8x100xf32>
    %177 = arith.addf %173, %176 : vector<8x100xf32>
    %c0_169 = arith.constant 0 : index
    %c21_170 = arith.constant 21 : index
    %178 = vector.load %arg15[%c0_169, %c21_170] : memref<48x122xbf16, #tpu.memory_space<vmem>>, vector<40x100xbf16>
    %c0_171 = arith.constant 0 : index
    %c280 = arith.constant 280 : index
    %179 = vector.load %arg7[%c0_171, %c280] : memref<8x360xbf16, #tpu.memory_space<vmem>>, vector<8x40xbf16>
    %cst_172 = arith.constant dense<0.000000e+00> : vector<8x100xf32>
    %180 = tpu.matmul %179, %178, %cst_172 {dimension_numbers = #tpu.dot_dimension_numbers<[1], [0], [0], [1], [0, 0, 1, 1], [], []>} : vector<8x40xbf16>, vector<40x100xbf16>, vector<8x100xf32> -> vector<8x100xf32>
    %181 = arith.addf %177, %180 : vector<8x100xf32>
    %c0_173 = arith.constant 0 : index
    %c22_174 = arith.constant 22 : index
    %182 = vector.load %arg15[%c0_173, %c22_174] : memref<48x122xbf16, #tpu.memory_space<vmem>>, vector<40x100xbf16>
    %c0_175 = arith.constant 0 : index
    %c320 = arith.constant 320 : index
    %183 = vector.load %arg7[%c0_175, %c320] : memref<8x360xbf16, #tpu.memory_space<vmem>>, vector<8x40xbf16>
    %cst_176 = arith.constant dense<0.000000e+00> : vector<8x100xf32>
    %184 = tpu.matmul %183, %182, %cst_176 {dimension_numbers = #tpu.dot_dimension_numbers<[1], [0], [0], [1], [0, 0, 1, 1], [], []>} : vector<8x40xbf16>, vector<40x100xbf16>, vector<8x100xf32> -> vector<8x100xf32>
    %185 = arith.addf %181, %184 : vector<8x100xf32>
    %c0_177 = arith.constant 0 : index
    %c0_178 = arith.constant 0 : index
    %186 = vector.load %arg12[%c0_177, %c0_178] : memref<8x1xf32, #tpu.memory_space<vmem>>, vector<8x1xf32>
    %187 = vector.broadcast %186 : vector<8x1xf32> to vector<8x100xf32>
    %188 = arith.addf %185, %187 : vector<8x100xf32>
    %cst_179 = arith.constant 0.000000e+00 : f32
    %189 = vector.broadcast %cst_179 : f32 to vector<8x100xf32>
    %190 = arith.cmpf oge, %188, %189 : vector<8x100xf32>
    %cst_180 = arith.constant 2.000000e-01 : f32
    %191 = vector.broadcast %cst_180 : f32 to vector<8x100xf32>
    %192 = arith.mulf %191, %188 : vector<8x100xf32>
    %193 = arith.select %190, %188, %192 : vector<8x100xi1>, vector<8x100xf32>
    %194 = vector.broadcast %1 : vector<1x100xf32> to vector<8x100xf32>
    %195 = arith.mulf %193, %194 : vector<8x100xf32>
    %196 = arith.truncf %195 : vector<8x100xf32> to vector<8x100xbf16>
    %c40_181 = arith.constant 40 : index
    %c11_182 = arith.constant 11 : index
    %197 = vector.load %arg15[%c40_181, %c11_182] : memref<48x122xbf16, #tpu.memory_space<vmem>>, vector<8x100xbf16>
    tpu.vector_store %arg15[%c40_181, %c11_182], %196 {strides = array<i32>} : memref<48x122xbf16, #tpu.memory_space<vmem>>, vector<8x100xbf16>,
    %c0_183 = arith.constant 0 : index
    %c0_184 = arith.constant 0 : index
    %198 = vector.load %arg15[%c0_183, %c0_184] : memref<48x122xbf16, #tpu.memory_space<vmem>>, vector<48x100xbf16>
    %c0_185 = arith.constant 0 : index
    %c0_186 = arith.constant 0 : index
    %199 = vector.load %arg8[%c0_185, %c0_186] : memref<16x432xbf16, #tpu.memory_space<vmem>>, vector<16x48xbf16>
    %cst_187 = arith.constant dense<0.000000e+00> : vector<16x100xf32>
    %200 = tpu.matmul %199, %198, %cst_187 {dimension_numbers = #tpu.dot_dimension_numbers<[1], [0], [0], [1], [0, 0, 1, 1], [], []>} : vector<16x48xbf16>, vector<48x100xbf16>, vector<16x100xf32> -> vector<16x100xf32>
    %c0_188 = arith.constant 0 : index
    %c1_189 = arith.constant 1 : index
    %201 = vector.load %arg15[%c0_188, %c1_189] : memref<48x122xbf16, #tpu.memory_space<vmem>>, vector<48x100xbf16>
    %c0_190 = arith.constant 0 : index
    %c48_191 = arith.constant 48 : index
    %202 = vector.load %arg8[%c0_190, %c48_191] : memref<16x432xbf16, #tpu.memory_space<vmem>>, vector<16x48xbf16>
    %cst_192 = arith.constant dense<0.000000e+00> : vector<16x100xf32>
    %203 = tpu.matmul %202, %201, %cst_192 {dimension_numbers = #tpu.dot_dimension_numbers<[1], [0], [0], [1], [0, 0, 1, 1], [], []>} : vector<16x48xbf16>, vector<48x100xbf16>, vector<16x100xf32> -> vector<16x100xf32>
    %204 = arith.addf %200, %203 : vector<16x100xf32>
    %c0_193 = arith.constant 0 : index
    %c2_194 = arith.constant 2 : index
    %205 = vector.load %arg15[%c0_193, %c2_194] : memref<48x122xbf16, #tpu.memory_space<vmem>>, vector<48x100xbf16>
    %c0_195 = arith.constant 0 : index
    %c96_196 = arith.constant 96 : index
    %206 = vector.load %arg8[%c0_195, %c96_196] : memref<16x432xbf16, #tpu.memory_space<vmem>>, vector<16x48xbf16>
    %cst_197 = arith.constant dense<0.000000e+00> : vector<16x100xf32>
    %207 = tpu.matmul %206, %205, %cst_197 {dimension_numbers = #tpu.dot_dimension_numbers<[1], [0], [0], [1], [0, 0, 1, 1], [], []>} : vector<16x48xbf16>, vector<48x100xbf16>, vector<16x100xf32> -> vector<16x100xf32>
    %208 = arith.addf %204, %207 : vector<16x100xf32>
    %c0_198 = arith.constant 0 : index
    %c10_199 = arith.constant 10 : index
    %209 = vector.load %arg15[%c0_198, %c10_199] : memref<48x122xbf16, #tpu.memory_space<vmem>>, vector<48x100xbf16>
    %c0_200 = arith.constant 0 : index
    %c144_201 = arith.constant 144 : index
    %210 = vector.load %arg8[%c0_200, %c144_201] : memref<16x432xbf16, #tpu.memory_space<vmem>>, vector<16x48xbf16>
    %cst_202 = arith.constant dense<0.000000e+00> : vector<16x100xf32>
    %211 = tpu.matmul %210, %209, %cst_202 {dimension_numbers = #tpu.dot_dimension_numbers<[1], [0], [0], [1], [0, 0, 1, 1], [], []>} : vector<16x48xbf16>, vector<48x100xbf16>, vector<16x100xf32> -> vector<16x100xf32>
    %212 = arith.addf %208, %211 : vector<16x100xf32>
    %c0_203 = arith.constant 0 : index
    %c11_204 = arith.constant 11 : index
    %213 = vector.load %arg15[%c0_203, %c11_204] : memref<48x122xbf16, #tpu.memory_space<vmem>>, vector<48x100xbf16>
    %c0_205 = arith.constant 0 : index
    %c192_206 = arith.constant 192 : index
    %214 = vector.load %arg8[%c0_205, %c192_206] : memref<16x432xbf16, #tpu.memory_space<vmem>>, vector<16x48xbf16>
    %cst_207 = arith.constant dense<0.000000e+00> : vector<16x100xf32>
    %215 = tpu.matmul %214, %213, %cst_207 {dimension_numbers = #tpu.dot_dimension_numbers<[1], [0], [0], [1], [0, 0, 1, 1], [], []>} : vector<16x48xbf16>, vector<48x100xbf16>, vector<16x100xf32> -> vector<16x100xf32>
    %216 = arith.addf %212, %215 : vector<16x100xf32>
    %c0_208 = arith.constant 0 : index
    %c12_209 = arith.constant 12 : index
    %217 = vector.load %arg15[%c0_208, %c12_209] : memref<48x122xbf16, #tpu.memory_space<vmem>>, vector<48x100xbf16>
    %c0_210 = arith.constant 0 : index
    %c240_211 = arith.constant 240 : index
    %218 = vector.load %arg8[%c0_210, %c240_211] : memref<16x432xbf16, #tpu.memory_space<vmem>>, vector<16x48xbf16>
    %cst_212 = arith.constant dense<0.000000e+00> : vector<16x100xf32>
    %219 = tpu.matmul %218, %217, %cst_212 {dimension_numbers = #tpu.dot_dimension_numbers<[1], [0], [0], [1], [0, 0, 1, 1], [], []>} : vector<16x48xbf16>, vector<48x100xbf16>, vector<16x100xf32> -> vector<16x100xf32>
    %220 = arith.addf %216, %219 : vector<16x100xf32>
    %c0_213 = arith.constant 0 : index
    %c20_214 = arith.constant 20 : index
    %221 = vector.load %arg15[%c0_213, %c20_214] : memref<48x122xbf16, #tpu.memory_space<vmem>>, vector<48x100xbf16>
    %c0_215 = arith.constant 0 : index
    %c288 = arith.constant 288 : index
    %222 = vector.load %arg8[%c0_215, %c288] : memref<16x432xbf16, #tpu.memory_space<vmem>>, vector<16x48xbf16>
    %cst_216 = arith.constant dense<0.000000e+00> : vector<16x100xf32>
    %223 = tpu.matmul %222, %221, %cst_216 {dimension_numbers = #tpu.dot_dimension_numbers<[1], [0], [0], [1], [0, 0, 1, 1], [], []>} : vector<16x48xbf16>, vector<48x100xbf16>, vector<16x100xf32> -> vector<16x100xf32>
    %224 = arith.addf %220, %223 : vector<16x100xf32>
    %c0_217 = arith.constant 0 : index
    %c21_218 = arith.constant 21 : index
    %225 = vector.load %arg15[%c0_217, %c21_218] : memref<48x122xbf16, #tpu.memory_space<vmem>>, vector<48x100xbf16>
    %c0_219 = arith.constant 0 : index
    %c336 = arith.constant 336 : index
    %226 = vector.load %arg8[%c0_219, %c336] : memref<16x432xbf16, #tpu.memory_space<vmem>>, vector<16x48xbf16>
    %cst_220 = arith.constant dense<0.000000e+00> : vector<16x100xf32>
    %227 = tpu.matmul %226, %225, %cst_220 {dimension_numbers = #tpu.dot_dimension_numbers<[1], [0], [0], [1], [0, 0, 1, 1], [], []>} : vector<16x48xbf16>, vector<48x100xbf16>, vector<16x100xf32> -> vector<16x100xf32>
    %228 = arith.addf %224, %227 : vector<16x100xf32>
    %c0_221 = arith.constant 0 : index
    %c22_222 = arith.constant 22 : index
    %229 = vector.load %arg15[%c0_221, %c22_222] : memref<48x122xbf16, #tpu.memory_space<vmem>>, vector<48x100xbf16>
    %c0_223 = arith.constant 0 : index
    %c384 = arith.constant 384 : index
    %230 = vector.load %arg8[%c0_223, %c384] : memref<16x432xbf16, #tpu.memory_space<vmem>>, vector<16x48xbf16>
    %cst_224 = arith.constant dense<0.000000e+00> : vector<16x100xf32>
    %231 = tpu.matmul %230, %229, %cst_224 {dimension_numbers = #tpu.dot_dimension_numbers<[1], [0], [0], [1], [0, 0, 1, 1], [], []>} : vector<16x48xbf16>, vector<48x100xbf16>, vector<16x100xf32> -> vector<16x100xf32>
    %232 = arith.addf %228, %231 : vector<16x100xf32>
    %c0_225 = arith.constant 0 : index
    %c0_226 = arith.constant 0 : index
    %233 = vector.load %arg13[%c0_225, %c0_226] : memref<16x1xf32, #tpu.memory_space<vmem>>, vector<16x1xf32>
    %234 = vector.broadcast %233 : vector<16x1xf32> to vector<16x100xf32>
    %235 = arith.addf %232, %234 : vector<16x100xf32>
    %cst_227 = arith.constant 4.000000e-02 : f32
    %236 = vector.broadcast %cst_227 : f32 to vector<16x100xf32>
    %237 = arith.mulf %236, %235 : vector<16x100xf32>
    %238 = arith.extf %8 : vector<16x100xbf16> to vector<16x100xf32>
    %cst_228 = arith.constant 2.000000e-01 : f32
    %239 = vector.broadcast %cst_228 : f32 to vector<16x100xf32>
    %240 = arith.mulf %239, %238 : vector<16x100xf32>
    %241 = arith.addf %237, %240 : vector<16x100xf32>
    %c0_229 = arith.constant 0 : index
    %c0_230 = arith.constant 0 : index
    %c0_231 = arith.constant 0 : index
    %242 = vector.load %arg3[%c0_229, %c0_230, %c0_231] : memref<1x16x100xbf16, #tpu.memory_space<vmem>>, vector<1x16x100xbf16>
    %243 = vector.shape_cast %242 : vector<1x16x100xbf16> to vector<16x100xbf16>
    %244 = arith.extf %243 : vector<16x100xbf16> to vector<16x100xf32>
    %245 = arith.addf %241, %244 : vector<16x100xf32>
    %246 = arith.truncf %245 : vector<16x100xf32> to vector<16x100xbf16>
    %c0_232 = arith.constant 0 : index
    %c0_233 = arith.constant 0 : index
    %c0_234 = arith.constant 0 : index
    %247 = vector.load %arg14[%c0_232, %c0_233, %c0_234] : memref<1x16x100xbf16, #tpu.memory_space<vmem>>, vector<1x16x100xbf16>
    %248 = vector.shape_cast %247 : vector<1x16x100xbf16> to vector<16x100xbf16>
    %249 = vector.shape_cast %246 : vector<16x100xbf16> to vector<1x16x100xbf16>
    tpu.vector_store %arg14[%c0_232, %c0_233, %c0_234], %249 {strides = array<i32>} : memref<1x16x100xbf16, #tpu.memory_space<vmem>>, vector<1x16x100xbf16>,
    return
  }
  func.func @transform_0(%arg0: i32) -> (i32, i32) {
    %c0_i32 = arith.constant 0 : i32
    %c0_i32_0 = arith.constant 0 : i32
    %c0_i32_1 = arith.constant 0 : i32
    return %c0_i32, %c0_i32_0 : i32, i32
  }
  func.func @transform_1(%arg0: i32) -> (i32, i32, i32) {
    %c0_i32 = arith.constant 0 : i32
    %c0_i32_0 = arith.constant 0 : i32
    %c0_i32_1 = arith.constant 0 : i32
    return %arg0, %c0_i32, %c0_i32_0 : i32, i32, i32
  }
  func.func @transform_2(%arg0: i32) -> (i32, i32, i32) {
    %c0_i32 = arith.constant 0 : i32
    %c0_i32_0 = arith.constant 0 : i32
    %c0_i32_1 = arith.constant 0 : i32
    return %arg0, %c0_i32, %c0_i32_0 : i32, i32, i32
  }
  func.func @transform_3(%arg0: i32) -> (i32, i32) {
    %c0_i32 = arith.constant 0 : i32
    %c0_i32_0 = arith.constant 0 : i32
    %c0_i32_1 = arith.constant 0 : i32
    return %c0_i32, %c0_i32_0 : i32, i32
  }
  func.func @transform_4(%arg0: i32) -> (i32, i32) {
    %c0_i32 = arith.constant 0 : i32
    %c0_i32_0 = arith.constant 0 : i32
    %c0_i32_1 = arith.constant 0 : i32
    return %c0_i32, %c0_i32_0 : i32, i32
  }
  func.func @transform_5(%arg0: i32) -> (i32, i32) {
    %c0_i32 = arith.constant 0 : i32
    %c0_i32_0 = arith.constant 0 : i32
    %c0_i32_1 = arith.constant 0 : i32
    return %c0_i32, %c0_i32_0 : i32, i32
  }
  func.func @transform_6(%arg0: i32) -> (i32, i32) {
    %c0_i32 = arith.constant 0 : i32
    %c0_i32_0 = arith.constant 0 : i32
    %c0_i32_1 = arith.constant 0 : i32
    return %c0_i32, %c0_i32_0 : i32, i32
  }
  func.func @transform_7(%arg0: i32) -> (i32, i32) {
    %c0_i32 = arith.constant 0 : i32
    %c0_i32_0 = arith.constant 0 : i32
    %c0_i32_1 = arith.constant 0 : i32
    return %c0_i32, %c0_i32_0 : i32, i32
  }
  func.func @transform_8(%arg0: i32) -> (i32, i32) {
    %c0_i32 = arith.constant 0 : i32
    %c0_i32_0 = arith.constant 0 : i32
    %c0_i32_1 = arith.constant 0 : i32
    return %c0_i32, %c0_i32_0 : i32, i32
  }
  func.func @transform_9(%arg0: i32) -> (i32, i32) {
    %c0_i32 = arith.constant 0 : i32
    %c0_i32_0 = arith.constant 0 : i32
    %c0_i32_1 = arith.constant 0 : i32
    return %c0_i32, %c0_i32_0 : i32, i32
  }
  func.func @transform_10(%arg0: i32) -> (i32, i32) {
    %c0_i32 = arith.constant 0 : i32
    %c0_i32_0 = arith.constant 0 : i32
    %c0_i32_1 = arith.constant 0 : i32
    return %c0_i32, %c0_i32_0 : i32, i32
  }
  func.func @transform_11(%arg0: i32) -> (i32, i32) {
    %c0_i32 = arith.constant 0 : i32
    %c0_i32_0 = arith.constant 0 : i32
    %c0_i32_1 = arith.constant 0 : i32
    return %c0_i32, %c0_i32_0 : i32, i32
  }
  func.func @transform_12(%arg0: i32) -> (i32, i32) {
    %c0_i32 = arith.constant 0 : i32
    %c0_i32_0 = arith.constant 0 : i32
    %c0_i32_1 = arith.constant 0 : i32
    return %c0_i32, %c0_i32_0 : i32, i32
  }
  func.func @transform_13(%arg0: i32) -> (i32, i32, i32) {
    %c0_i32 = arith.constant 0 : i32
    %c0_i32_0 = arith.constant 0 : i32
    %c0_i32_1 = arith.constant 0 : i32
    return %arg0, %c0_i32, %c0_i32_0 : i32, i32, i32
  }
}

module attributes {stable_mosaic.version = 11 : i64} {
  func.func @_conv_chain_kernel(%arg0: i32, %arg1: memref<1x324xbf16, #tpu.memory_space<vmem>>, %arg2: memref<1x16x324xbf16, #tpu.memory_space<vmem>>, %arg3: memref<16x144xbf16, #tpu.memory_space<vmem>>, %arg4: memref<16x144xbf16, #tpu.memory_space<vmem>>, %arg5: memref<16x144xbf16, #tpu.memory_space<vmem>>, %arg6: memref<16x144xbf16, #tpu.memory_space<vmem>>, %arg7: memref<3x144xbf16, #tpu.memory_space<vmem>>, %arg8: memref<16x1xf32, #tpu.memory_space<vmem>>, %arg9: memref<16x1xf32, #tpu.memory_space<vmem>>, %arg10: memref<16x1xf32, #tpu.memory_space<vmem>>, %arg11: memref<16x1xf32, #tpu.memory_space<vmem>>, %arg12: memref<3x1xf32, #tpu.memory_space<vmem>>, %arg13: memref<1x3x324xbf16, #tpu.memory_space<vmem>>, %arg14: memref<16x362xbf16, #tpu.memory_space<vmem>>) attributes {dimension_semantics = [#tpu.dimension_semantics<parallel>], iteration_bounds = array<i64: 2>, scalar_prefetch = 0 : i64, scratch_operands = 1 : i64, tpu.core_type = #tpu.core_type<tc>, window_params = [{pipeline_mode = #tpu.pipeline_mode<synchronous>, transform_indices = @transform_0, window_bounds = array<i64: 1, 324>}, {transform_indices = @transform_1, window_bounds = array<i64: 1, 16, 324>}, {pipeline_mode = #tpu.pipeline_mode<synchronous>, transform_indices = @transform_2, window_bounds = array<i64: 16, 144>}, {pipeline_mode = #tpu.pipeline_mode<synchronous>, transform_indices = @transform_3, window_bounds = array<i64: 16, 144>}, {pipeline_mode = #tpu.pipeline_mode<synchronous>, transform_indices = @transform_4, window_bounds = array<i64: 16, 144>}, {pipeline_mode = #tpu.pipeline_mode<synchronous>, transform_indices = @transform_5, window_bounds = array<i64: 16, 144>}, {pipeline_mode = #tpu.pipeline_mode<synchronous>, transform_indices = @transform_6, window_bounds = array<i64: 3, 144>}, {pipeline_mode = #tpu.pipeline_mode<synchronous>, transform_indices = @transform_7, window_bounds = array<i64: 16, 1>}, {pipeline_mode = #tpu.pipeline_mode<synchronous>, transform_indices = @transform_8, window_bounds = array<i64: 16, 1>}, {pipeline_mode = #tpu.pipeline_mode<synchronous>, transform_indices = @transform_9, window_bounds = array<i64: 16, 1>}, {pipeline_mode = #tpu.pipeline_mode<synchronous>, transform_indices = @transform_10, window_bounds = array<i64: 16, 1>}, {pipeline_mode = #tpu.pipeline_mode<synchronous>, transform_indices = @transform_11, window_bounds = array<i64: 3, 1>}, {transform_indices = @transform_12, window_bounds = array<i64: 1, 3, 324>}]} {
    %c0 = arith.constant 0 : index
    %c0_0 = arith.constant 0 : index
    %0 = vector.load %arg1[%c0, %c0_0] : memref<1x324xbf16, #tpu.memory_space<vmem>>, vector<1x324xbf16>
    %1 = arith.extf %0 : vector<1x324xbf16> to vector<1x324xf32>
    %cst = arith.constant 0.000000e+00 : bf16
    %2 = vector.broadcast %cst : bf16 to vector<16x19xbf16>
    %c0_1 = arith.constant 0 : index
    %c0_2 = arith.constant 0 : index
    %3 = vector.load %arg14[%c0_1, %c0_2] : memref<16x362xbf16, #tpu.memory_space<vmem>>, vector<16x19xbf16>
    tpu.vector_store %arg14[%c0_1, %c0_2], %2 {strides = array<i32>} : memref<16x362xbf16, #tpu.memory_space<vmem>>, vector<16x19xbf16>,
    %c0_3 = arith.constant 0 : index
    %c343 = arith.constant 343 : index
    %4 = vector.load %arg14[%c0_3, %c343] : memref<16x362xbf16, #tpu.memory_space<vmem>>, vector<16x19xbf16>
    tpu.vector_store %arg14[%c0_3, %c343], %2 {strides = array<i32>} : memref<16x362xbf16, #tpu.memory_space<vmem>>, vector<16x19xbf16>,
    %c0_4 = arith.constant 0 : index
    %c0_5 = arith.constant 0 : index
    %c0_6 = arith.constant 0 : index
    %5 = vector.load %arg2[%c0_4, %c0_5, %c0_6] : memref<1x16x324xbf16, #tpu.memory_space<vmem>>, vector<1x16x324xbf16>
    %6 = vector.shape_cast %5 : vector<1x16x324xbf16> to vector<16x324xbf16>
    %7 = vector.broadcast %0 : vector<1x324xbf16> to vector<16x324xbf16>
    %8 = arith.mulf %6, %7 : vector<16x324xbf16>
    %c0_7 = arith.constant 0 : index
    %c19 = arith.constant 19 : index
    %9 = vector.load %arg14[%c0_7, %c19] : memref<16x362xbf16, #tpu.memory_space<vmem>>, vector<16x324xbf16>
    tpu.vector_store %arg14[%c0_7, %c19], %8 {strides = array<i32>} : memref<16x362xbf16, #tpu.memory_space<vmem>>, vector<16x324xbf16>,
    %c0_8 = arith.constant 0 : index
    %c0_9 = arith.constant 0 : index
    %10 = vector.load %arg14[%c0_8, %c0_9] : memref<16x362xbf16, #tpu.memory_space<vmem>>, vector<16x324xbf16>
    %c0_10 = arith.constant 0 : index
    %c0_11 = arith.constant 0 : index
    %11 = vector.load %arg3[%c0_10, %c0_11] : memref<16x144xbf16, #tpu.memory_space<vmem>>, vector<16x16xbf16>
    %cst_12 = arith.constant dense<0.000000e+00> : vector<16x324xf32>
    %12 = tpu.matmul %11, %10, %cst_12 {dimension_numbers = #tpu.dot_dimension_numbers<[1], [0], [0], [1], [0, 0, 1, 1], [], []>} : vector<16x16xbf16>, vector<16x324xbf16>, vector<16x324xf32> -> vector<16x324xf32>
    %c0_13 = arith.constant 0 : index
    %c1 = arith.constant 1 : index
    %13 = vector.load %arg14[%c0_13, %c1] : memref<16x362xbf16, #tpu.memory_space<vmem>>, vector<16x324xbf16>
    %c0_14 = arith.constant 0 : index
    %c16 = arith.constant 16 : index
    %14 = vector.load %arg3[%c0_14, %c16] : memref<16x144xbf16, #tpu.memory_space<vmem>>, vector<16x16xbf16>
    %cst_15 = arith.constant dense<0.000000e+00> : vector<16x324xf32>
    %15 = tpu.matmul %14, %13, %cst_15 {dimension_numbers = #tpu.dot_dimension_numbers<[1], [0], [0], [1], [0, 0, 1, 1], [], []>} : vector<16x16xbf16>, vector<16x324xbf16>, vector<16x324xf32> -> vector<16x324xf32>
    %16 = arith.addf %12, %15 : vector<16x324xf32>
    %c0_16 = arith.constant 0 : index
    %c2 = arith.constant 2 : index
    %17 = vector.load %arg14[%c0_16, %c2] : memref<16x362xbf16, #tpu.memory_space<vmem>>, vector<16x324xbf16>
    %c0_17 = arith.constant 0 : index
    %c32 = arith.constant 32 : index
    %18 = vector.load %arg3[%c0_17, %c32] : memref<16x144xbf16, #tpu.memory_space<vmem>>, vector<16x16xbf16>
    %cst_18 = arith.constant dense<0.000000e+00> : vector<16x324xf32>
    %19 = tpu.matmul %18, %17, %cst_18 {dimension_numbers = #tpu.dot_dimension_numbers<[1], [0], [0], [1], [0, 0, 1, 1], [], []>} : vector<16x16xbf16>, vector<16x324xbf16>, vector<16x324xf32> -> vector<16x324xf32>
    %20 = arith.addf %16, %19 : vector<16x324xf32>
    %c0_19 = arith.constant 0 : index
    %c18 = arith.constant 18 : index
    %21 = vector.load %arg14[%c0_19, %c18] : memref<16x362xbf16, #tpu.memory_space<vmem>>, vector<16x324xbf16>
    %c0_20 = arith.constant 0 : index
    %c48 = arith.constant 48 : index
    %22 = vector.load %arg3[%c0_20, %c48] : memref<16x144xbf16, #tpu.memory_space<vmem>>, vector<16x16xbf16>
    %cst_21 = arith.constant dense<0.000000e+00> : vector<16x324xf32>
    %23 = tpu.matmul %22, %21, %cst_21 {dimension_numbers = #tpu.dot_dimension_numbers<[1], [0], [0], [1], [0, 0, 1, 1], [], []>} : vector<16x16xbf16>, vector<16x324xbf16>, vector<16x324xf32> -> vector<16x324xf32>
    %24 = arith.addf %20, %23 : vector<16x324xf32>
    %c0_22 = arith.constant 0 : index
    %c19_23 = arith.constant 19 : index
    %25 = vector.load %arg14[%c0_22, %c19_23] : memref<16x362xbf16, #tpu.memory_space<vmem>>, vector<16x324xbf16>
    %c0_24 = arith.constant 0 : index
    %c64 = arith.constant 64 : index
    %26 = vector.load %arg3[%c0_24, %c64] : memref<16x144xbf16, #tpu.memory_space<vmem>>, vector<16x16xbf16>
    %cst_25 = arith.constant dense<0.000000e+00> : vector<16x324xf32>
    %27 = tpu.matmul %26, %25, %cst_25 {dimension_numbers = #tpu.dot_dimension_numbers<[1], [0], [0], [1], [0, 0, 1, 1], [], []>} : vector<16x16xbf16>, vector<16x324xbf16>, vector<16x324xf32> -> vector<16x324xf32>
    %28 = arith.addf %24, %27 : vector<16x324xf32>
    %c0_26 = arith.constant 0 : index
    %c20 = arith.constant 20 : index
    %29 = vector.load %arg14[%c0_26, %c20] : memref<16x362xbf16, #tpu.memory_space<vmem>>, vector<16x324xbf16>
    %c0_27 = arith.constant 0 : index
    %c80 = arith.constant 80 : index
    %30 = vector.load %arg3[%c0_27, %c80] : memref<16x144xbf16, #tpu.memory_space<vmem>>, vector<16x16xbf16>
    %cst_28 = arith.constant dense<0.000000e+00> : vector<16x324xf32>
    %31 = tpu.matmul %30, %29, %cst_28 {dimension_numbers = #tpu.dot_dimension_numbers<[1], [0], [0], [1], [0, 0, 1, 1], [], []>} : vector<16x16xbf16>, vector<16x324xbf16>, vector<16x324xf32> -> vector<16x324xf32>
    %32 = arith.addf %28, %31 : vector<16x324xf32>
    %c0_29 = arith.constant 0 : index
    %c36 = arith.constant 36 : index
    %33 = vector.load %arg14[%c0_29, %c36] : memref<16x362xbf16, #tpu.memory_space<vmem>>, vector<16x324xbf16>
    %c0_30 = arith.constant 0 : index
    %c96 = arith.constant 96 : index
    %34 = vector.load %arg3[%c0_30, %c96] : memref<16x144xbf16, #tpu.memory_space<vmem>>, vector<16x16xbf16>
    %cst_31 = arith.constant dense<0.000000e+00> : vector<16x324xf32>
    %35 = tpu.matmul %34, %33, %cst_31 {dimension_numbers = #tpu.dot_dimension_numbers<[1], [0], [0], [1], [0, 0, 1, 1], [], []>} : vector<16x16xbf16>, vector<16x324xbf16>, vector<16x324xf32> -> vector<16x324xf32>
    %36 = arith.addf %32, %35 : vector<16x324xf32>
    %c0_32 = arith.constant 0 : index
    %c37 = arith.constant 37 : index
    %37 = vector.load %arg14[%c0_32, %c37] : memref<16x362xbf16, #tpu.memory_space<vmem>>, vector<16x324xbf16>
    %c0_33 = arith.constant 0 : index
    %c112 = arith.constant 112 : index
    %38 = vector.load %arg3[%c0_33, %c112] : memref<16x144xbf16, #tpu.memory_space<vmem>>, vector<16x16xbf16>
    %cst_34 = arith.constant dense<0.000000e+00> : vector<16x324xf32>
    %39 = tpu.matmul %38, %37, %cst_34 {dimension_numbers = #tpu.dot_dimension_numbers<[1], [0], [0], [1], [0, 0, 1, 1], [], []>} : vector<16x16xbf16>, vector<16x324xbf16>, vector<16x324xf32> -> vector<16x324xf32>
    %40 = arith.addf %36, %39 : vector<16x324xf32>
    %c0_35 = arith.constant 0 : index
    %c38 = arith.constant 38 : index
    %41 = vector.load %arg14[%c0_35, %c38] : memref<16x362xbf16, #tpu.memory_space<vmem>>, vector<16x324xbf16>
    %c0_36 = arith.constant 0 : index
    %c128 = arith.constant 128 : index
    %42 = vector.load %arg3[%c0_36, %c128] : memref<16x144xbf16, #tpu.memory_space<vmem>>, vector<16x16xbf16>
    %cst_37 = arith.constant dense<0.000000e+00> : vector<16x324xf32>
    %43 = tpu.matmul %42, %41, %cst_37 {dimension_numbers = #tpu.dot_dimension_numbers<[1], [0], [0], [1], [0, 0, 1, 1], [], []>} : vector<16x16xbf16>, vector<16x324xbf16>, vector<16x324xf32> -> vector<16x324xf32>
    %44 = arith.addf %40, %43 : vector<16x324xf32>
    %c0_38 = arith.constant 0 : index
    %c0_39 = arith.constant 0 : index
    %45 = vector.load %arg8[%c0_38, %c0_39] : memref<16x1xf32, #tpu.memory_space<vmem>>, vector<16x1xf32>
    %46 = vector.broadcast %45 : vector<16x1xf32> to vector<16x324xf32>
    %47 = arith.addf %44, %46 : vector<16x324xf32>
    %cst_40 = arith.constant 0.000000e+00 : f32
    %48 = vector.broadcast %cst_40 : f32 to vector<16x324xf32>
    %49 = arith.cmpf oge, %47, %48 : vector<16x324xf32>
    %cst_41 = arith.constant 2.000000e-01 : f32
    %50 = vector.broadcast %cst_41 : f32 to vector<16x324xf32>
    %51 = arith.mulf %50, %47 : vector<16x324xf32>
    %52 = arith.select %49, %47, %51 : vector<16x324xi1>, vector<16x324xf32>
    %53 = vector.broadcast %1 : vector<1x324xf32> to vector<16x324xf32>
    %54 = arith.mulf %52, %53 : vector<16x324xf32>
    %55 = arith.truncf %54 : vector<16x324xf32> to vector<16x324xbf16>
    %c0_42 = arith.constant 0 : index
    %c19_43 = arith.constant 19 : index
    %56 = vector.load %arg14[%c0_42, %c19_43] : memref<16x362xbf16, #tpu.memory_space<vmem>>, vector<16x324xbf16>
    tpu.vector_store %arg14[%c0_42, %c19_43], %55 {strides = array<i32>} : memref<16x362xbf16, #tpu.memory_space<vmem>>, vector<16x324xbf16>,
    %c0_44 = arith.constant 0 : index
    %c0_45 = arith.constant 0 : index
    %57 = vector.load %arg14[%c0_44, %c0_45] : memref<16x362xbf16, #tpu.memory_space<vmem>>, vector<16x324xbf16>
    %c0_46 = arith.constant 0 : index
    %c0_47 = arith.constant 0 : index
    %58 = vector.load %arg4[%c0_46, %c0_47] : memref<16x144xbf16, #tpu.memory_space<vmem>>, vector<16x16xbf16>
    %cst_48 = arith.constant dense<0.000000e+00> : vector<16x324xf32>
    %59 = tpu.matmul %58, %57, %cst_48 {dimension_numbers = #tpu.dot_dimension_numbers<[1], [0], [0], [1], [0, 0, 1, 1], [], []>} : vector<16x16xbf16>, vector<16x324xbf16>, vector<16x324xf32> -> vector<16x324xf32>
    %c0_49 = arith.constant 0 : index
    %c1_50 = arith.constant 1 : index
    %60 = vector.load %arg14[%c0_49, %c1_50] : memref<16x362xbf16, #tpu.memory_space<vmem>>, vector<16x324xbf16>
    %c0_51 = arith.constant 0 : index
    %c16_52 = arith.constant 16 : index
    %61 = vector.load %arg4[%c0_51, %c16_52] : memref<16x144xbf16, #tpu.memory_space<vmem>>, vector<16x16xbf16>
    %cst_53 = arith.constant dense<0.000000e+00> : vector<16x324xf32>
    %62 = tpu.matmul %61, %60, %cst_53 {dimension_numbers = #tpu.dot_dimension_numbers<[1], [0], [0], [1], [0, 0, 1, 1], [], []>} : vector<16x16xbf16>, vector<16x324xbf16>, vector<16x324xf32> -> vector<16x324xf32>
    %63 = arith.addf %59, %62 : vector<16x324xf32>
    %c0_54 = arith.constant 0 : index
    %c2_55 = arith.constant 2 : index
    %64 = vector.load %arg14[%c0_54, %c2_55] : memref<16x362xbf16, #tpu.memory_space<vmem>>, vector<16x324xbf16>
    %c0_56 = arith.constant 0 : index
    %c32_57 = arith.constant 32 : index
    %65 = vector.load %arg4[%c0_56, %c32_57] : memref<16x144xbf16, #tpu.memory_space<vmem>>, vector<16x16xbf16>
    %cst_58 = arith.constant dense<0.000000e+00> : vector<16x324xf32>
    %66 = tpu.matmul %65, %64, %cst_58 {dimension_numbers = #tpu.dot_dimension_numbers<[1], [0], [0], [1], [0, 0, 1, 1], [], []>} : vector<16x16xbf16>, vector<16x324xbf16>, vector<16x324xf32> -> vector<16x324xf32>
    %67 = arith.addf %63, %66 : vector<16x324xf32>
    %c0_59 = arith.constant 0 : index
    %c18_60 = arith.constant 18 : index
    %68 = vector.load %arg14[%c0_59, %c18_60] : memref<16x362xbf16, #tpu.memory_space<vmem>>, vector<16x324xbf16>
    %c0_61 = arith.constant 0 : index
    %c48_62 = arith.constant 48 : index
    %69 = vector.load %arg4[%c0_61, %c48_62] : memref<16x144xbf16, #tpu.memory_space<vmem>>, vector<16x16xbf16>
    %cst_63 = arith.constant dense<0.000000e+00> : vector<16x324xf32>
    %70 = tpu.matmul %69, %68, %cst_63 {dimension_numbers = #tpu.dot_dimension_numbers<[1], [0], [0], [1], [0, 0, 1, 1], [], []>} : vector<16x16xbf16>, vector<16x324xbf16>, vector<16x324xf32> -> vector<16x324xf32>
    %71 = arith.addf %67, %70 : vector<16x324xf32>
    %c0_64 = arith.constant 0 : index
    %c19_65 = arith.constant 19 : index
    %72 = vector.load %arg14[%c0_64, %c19_65] : memref<16x362xbf16, #tpu.memory_space<vmem>>, vector<16x324xbf16>
    %c0_66 = arith.constant 0 : index
    %c64_67 = arith.constant 64 : index
    %73 = vector.load %arg4[%c0_66, %c64_67] : memref<16x144xbf16, #tpu.memory_space<vmem>>, vector<16x16xbf16>
    %cst_68 = arith.constant dense<0.000000e+00> : vector<16x324xf32>
    %74 = tpu.matmul %73, %72, %cst_68 {dimension_numbers = #tpu.dot_dimension_numbers<[1], [0], [0], [1], [0, 0, 1, 1], [], []>} : vector<16x16xbf16>, vector<16x324xbf16>, vector<16x324xf32> -> vector<16x324xf32>
    %75 = arith.addf %71, %74 : vector<16x324xf32>
    %c0_69 = arith.constant 0 : index
    %c20_70 = arith.constant 20 : index
    %76 = vector.load %arg14[%c0_69, %c20_70] : memref<16x362xbf16, #tpu.memory_space<vmem>>, vector<16x324xbf16>
    %c0_71 = arith.constant 0 : index
    %c80_72 = arith.constant 80 : index
    %77 = vector.load %arg4[%c0_71, %c80_72] : memref<16x144xbf16, #tpu.memory_space<vmem>>, vector<16x16xbf16>
    %cst_73 = arith.constant dense<0.000000e+00> : vector<16x324xf32>
    %78 = tpu.matmul %77, %76, %cst_73 {dimension_numbers = #tpu.dot_dimension_numbers<[1], [0], [0], [1], [0, 0, 1, 1], [], []>} : vector<16x16xbf16>, vector<16x324xbf16>, vector<16x324xf32> -> vector<16x324xf32>
    %79 = arith.addf %75, %78 : vector<16x324xf32>
    %c0_74 = arith.constant 0 : index
    %c36_75 = arith.constant 36 : index
    %80 = vector.load %arg14[%c0_74, %c36_75] : memref<16x362xbf16, #tpu.memory_space<vmem>>, vector<16x324xbf16>
    %c0_76 = arith.constant 0 : index
    %c96_77 = arith.constant 96 : index
    %81 = vector.load %arg4[%c0_76, %c96_77] : memref<16x144xbf16, #tpu.memory_space<vmem>>, vector<16x16xbf16>
    %cst_78 = arith.constant dense<0.000000e+00> : vector<16x324xf32>
    %82 = tpu.matmul %81, %80, %cst_78 {dimension_numbers = #tpu.dot_dimension_numbers<[1], [0], [0], [1], [0, 0, 1, 1], [], []>} : vector<16x16xbf16>, vector<16x324xbf16>, vector<16x324xf32> -> vector<16x324xf32>
    %83 = arith.addf %79, %82 : vector<16x324xf32>
    %c0_79 = arith.constant 0 : index
    %c37_80 = arith.constant 37 : index
    %84 = vector.load %arg14[%c0_79, %c37_80] : memref<16x362xbf16, #tpu.memory_space<vmem>>, vector<16x324xbf16>
    %c0_81 = arith.constant 0 : index
    %c112_82 = arith.constant 112 : index
    %85 = vector.load %arg4[%c0_81, %c112_82] : memref<16x144xbf16, #tpu.memory_space<vmem>>, vector<16x16xbf16>
    %cst_83 = arith.constant dense<0.000000e+00> : vector<16x324xf32>
    %86 = tpu.matmul %85, %84, %cst_83 {dimension_numbers = #tpu.dot_dimension_numbers<[1], [0], [0], [1], [0, 0, 1, 1], [], []>} : vector<16x16xbf16>, vector<16x324xbf16>, vector<16x324xf32> -> vector<16x324xf32>
    %87 = arith.addf %83, %86 : vector<16x324xf32>
    %c0_84 = arith.constant 0 : index
    %c38_85 = arith.constant 38 : index
    %88 = vector.load %arg14[%c0_84, %c38_85] : memref<16x362xbf16, #tpu.memory_space<vmem>>, vector<16x324xbf16>
    %c0_86 = arith.constant 0 : index
    %c128_87 = arith.constant 128 : index
    %89 = vector.load %arg4[%c0_86, %c128_87] : memref<16x144xbf16, #tpu.memory_space<vmem>>, vector<16x16xbf16>
    %cst_88 = arith.constant dense<0.000000e+00> : vector<16x324xf32>
    %90 = tpu.matmul %89, %88, %cst_88 {dimension_numbers = #tpu.dot_dimension_numbers<[1], [0], [0], [1], [0, 0, 1, 1], [], []>} : vector<16x16xbf16>, vector<16x324xbf16>, vector<16x324xf32> -> vector<16x324xf32>
    %91 = arith.addf %87, %90 : vector<16x324xf32>
    %c0_89 = arith.constant 0 : index
    %c0_90 = arith.constant 0 : index
    %92 = vector.load %arg9[%c0_89, %c0_90] : memref<16x1xf32, #tpu.memory_space<vmem>>, vector<16x1xf32>
    %93 = vector.broadcast %92 : vector<16x1xf32> to vector<16x324xf32>
    %94 = arith.addf %91, %93 : vector<16x324xf32>
    %cst_91 = arith.constant 0.000000e+00 : f32
    %95 = vector.broadcast %cst_91 : f32 to vector<16x324xf32>
    %96 = arith.cmpf oge, %94, %95 : vector<16x324xf32>
    %cst_92 = arith.constant 2.000000e-01 : f32
    %97 = vector.broadcast %cst_92 : f32 to vector<16x324xf32>
    %98 = arith.mulf %97, %94 : vector<16x324xf32>
    %99 = arith.select %96, %94, %98 : vector<16x324xi1>, vector<16x324xf32>
    %100 = vector.broadcast %1 : vector<1x324xf32> to vector<16x324xf32>
    %101 = arith.mulf %99, %100 : vector<16x324xf32>
    %102 = arith.truncf %101 : vector<16x324xf32> to vector<16x324xbf16>
    %c0_93 = arith.constant 0 : index
    %c19_94 = arith.constant 19 : index
    %103 = vector.load %arg14[%c0_93, %c19_94] : memref<16x362xbf16, #tpu.memory_space<vmem>>, vector<16x324xbf16>
    tpu.vector_store %arg14[%c0_93, %c19_94], %102 {strides = array<i32>} : memref<16x362xbf16, #tpu.memory_space<vmem>>, vector<16x324xbf16>,
    %c0_95 = arith.constant 0 : index
    %c0_96 = arith.constant 0 : index
    %104 = vector.load %arg14[%c0_95, %c0_96] : memref<16x362xbf16, #tpu.memory_space<vmem>>, vector<16x324xbf16>
    %c0_97 = arith.constant 0 : index
    %c0_98 = arith.constant 0 : index
    %105 = vector.load %arg5[%c0_97, %c0_98] : memref<16x144xbf16, #tpu.memory_space<vmem>>, vector<16x16xbf16>
    %cst_99 = arith.constant dense<0.000000e+00> : vector<16x324xf32>
    %106 = tpu.matmul %105, %104, %cst_99 {dimension_numbers = #tpu.dot_dimension_numbers<[1], [0], [0], [1], [0, 0, 1, 1], [], []>} : vector<16x16xbf16>, vector<16x324xbf16>, vector<16x324xf32> -> vector<16x324xf32>
    %c0_100 = arith.constant 0 : index
    %c1_101 = arith.constant 1 : index
    %107 = vector.load %arg14[%c0_100, %c1_101] : memref<16x362xbf16, #tpu.memory_space<vmem>>, vector<16x324xbf16>
    %c0_102 = arith.constant 0 : index
    %c16_103 = arith.constant 16 : index
    %108 = vector.load %arg5[%c0_102, %c16_103] : memref<16x144xbf16, #tpu.memory_space<vmem>>, vector<16x16xbf16>
    %cst_104 = arith.constant dense<0.000000e+00> : vector<16x324xf32>
    %109 = tpu.matmul %108, %107, %cst_104 {dimension_numbers = #tpu.dot_dimension_numbers<[1], [0], [0], [1], [0, 0, 1, 1], [], []>} : vector<16x16xbf16>, vector<16x324xbf16>, vector<16x324xf32> -> vector<16x324xf32>
    %110 = arith.addf %106, %109 : vector<16x324xf32>
    %c0_105 = arith.constant 0 : index
    %c2_106 = arith.constant 2 : index
    %111 = vector.load %arg14[%c0_105, %c2_106] : memref<16x362xbf16, #tpu.memory_space<vmem>>, vector<16x324xbf16>
    %c0_107 = arith.constant 0 : index
    %c32_108 = arith.constant 32 : index
    %112 = vector.load %arg5[%c0_107, %c32_108] : memref<16x144xbf16, #tpu.memory_space<vmem>>, vector<16x16xbf16>
    %cst_109 = arith.constant dense<0.000000e+00> : vector<16x324xf32>
    %113 = tpu.matmul %112, %111, %cst_109 {dimension_numbers = #tpu.dot_dimension_numbers<[1], [0], [0], [1], [0, 0, 1, 1], [], []>} : vector<16x16xbf16>, vector<16x324xbf16>, vector<16x324xf32> -> vector<16x324xf32>
    %114 = arith.addf %110, %113 : vector<16x324xf32>
    %c0_110 = arith.constant 0 : index
    %c18_111 = arith.constant 18 : index
    %115 = vector.load %arg14[%c0_110, %c18_111] : memref<16x362xbf16, #tpu.memory_space<vmem>>, vector<16x324xbf16>
    %c0_112 = arith.constant 0 : index
    %c48_113 = arith.constant 48 : index
    %116 = vector.load %arg5[%c0_112, %c48_113] : memref<16x144xbf16, #tpu.memory_space<vmem>>, vector<16x16xbf16>
    %cst_114 = arith.constant dense<0.000000e+00> : vector<16x324xf32>
    %117 = tpu.matmul %116, %115, %cst_114 {dimension_numbers = #tpu.dot_dimension_numbers<[1], [0], [0], [1], [0, 0, 1, 1], [], []>} : vector<16x16xbf16>, vector<16x324xbf16>, vector<16x324xf32> -> vector<16x324xf32>
    %118 = arith.addf %114, %117 : vector<16x324xf32>
    %c0_115 = arith.constant 0 : index
    %c19_116 = arith.constant 19 : index
    %119 = vector.load %arg14[%c0_115, %c19_116] : memref<16x362xbf16, #tpu.memory_space<vmem>>, vector<16x324xbf16>
    %c0_117 = arith.constant 0 : index
    %c64_118 = arith.constant 64 : index
    %120 = vector.load %arg5[%c0_117, %c64_118] : memref<16x144xbf16, #tpu.memory_space<vmem>>, vector<16x16xbf16>
    %cst_119 = arith.constant dense<0.000000e+00> : vector<16x324xf32>
    %121 = tpu.matmul %120, %119, %cst_119 {dimension_numbers = #tpu.dot_dimension_numbers<[1], [0], [0], [1], [0, 0, 1, 1], [], []>} : vector<16x16xbf16>, vector<16x324xbf16>, vector<16x324xf32> -> vector<16x324xf32>
    %122 = arith.addf %118, %121 : vector<16x324xf32>
    %c0_120 = arith.constant 0 : index
    %c20_121 = arith.constant 20 : index
    %123 = vector.load %arg14[%c0_120, %c20_121] : memref<16x362xbf16, #tpu.memory_space<vmem>>, vector<16x324xbf16>
    %c0_122 = arith.constant 0 : index
    %c80_123 = arith.constant 80 : index
    %124 = vector.load %arg5[%c0_122, %c80_123] : memref<16x144xbf16, #tpu.memory_space<vmem>>, vector<16x16xbf16>
    %cst_124 = arith.constant dense<0.000000e+00> : vector<16x324xf32>
    %125 = tpu.matmul %124, %123, %cst_124 {dimension_numbers = #tpu.dot_dimension_numbers<[1], [0], [0], [1], [0, 0, 1, 1], [], []>} : vector<16x16xbf16>, vector<16x324xbf16>, vector<16x324xf32> -> vector<16x324xf32>
    %126 = arith.addf %122, %125 : vector<16x324xf32>
    %c0_125 = arith.constant 0 : index
    %c36_126 = arith.constant 36 : index
    %127 = vector.load %arg14[%c0_125, %c36_126] : memref<16x362xbf16, #tpu.memory_space<vmem>>, vector<16x324xbf16>
    %c0_127 = arith.constant 0 : index
    %c96_128 = arith.constant 96 : index
    %128 = vector.load %arg5[%c0_127, %c96_128] : memref<16x144xbf16, #tpu.memory_space<vmem>>, vector<16x16xbf16>
    %cst_129 = arith.constant dense<0.000000e+00> : vector<16x324xf32>
    %129 = tpu.matmul %128, %127, %cst_129 {dimension_numbers = #tpu.dot_dimension_numbers<[1], [0], [0], [1], [0, 0, 1, 1], [], []>} : vector<16x16xbf16>, vector<16x324xbf16>, vector<16x324xf32> -> vector<16x324xf32>
    %130 = arith.addf %126, %129 : vector<16x324xf32>
    %c0_130 = arith.constant 0 : index
    %c37_131 = arith.constant 37 : index
    %131 = vector.load %arg14[%c0_130, %c37_131] : memref<16x362xbf16, #tpu.memory_space<vmem>>, vector<16x324xbf16>
    %c0_132 = arith.constant 0 : index
    %c112_133 = arith.constant 112 : index
    %132 = vector.load %arg5[%c0_132, %c112_133] : memref<16x144xbf16, #tpu.memory_space<vmem>>, vector<16x16xbf16>
    %cst_134 = arith.constant dense<0.000000e+00> : vector<16x324xf32>
    %133 = tpu.matmul %132, %131, %cst_134 {dimension_numbers = #tpu.dot_dimension_numbers<[1], [0], [0], [1], [0, 0, 1, 1], [], []>} : vector<16x16xbf16>, vector<16x324xbf16>, vector<16x324xf32> -> vector<16x324xf32>
    %134 = arith.addf %130, %133 : vector<16x324xf32>
    %c0_135 = arith.constant 0 : index
    %c38_136 = arith.constant 38 : index
    %135 = vector.load %arg14[%c0_135, %c38_136] : memref<16x362xbf16, #tpu.memory_space<vmem>>, vector<16x324xbf16>
    %c0_137 = arith.constant 0 : index
    %c128_138 = arith.constant 128 : index
    %136 = vector.load %arg5[%c0_137, %c128_138] : memref<16x144xbf16, #tpu.memory_space<vmem>>, vector<16x16xbf16>
    %cst_139 = arith.constant dense<0.000000e+00> : vector<16x324xf32>
    %137 = tpu.matmul %136, %135, %cst_139 {dimension_numbers = #tpu.dot_dimension_numbers<[1], [0], [0], [1], [0, 0, 1, 1], [], []>} : vector<16x16xbf16>, vector<16x324xbf16>, vector<16x324xf32> -> vector<16x324xf32>
    %138 = arith.addf %134, %137 : vector<16x324xf32>
    %c0_140 = arith.constant 0 : index
    %c0_141 = arith.constant 0 : index
    %139 = vector.load %arg10[%c0_140, %c0_141] : memref<16x1xf32, #tpu.memory_space<vmem>>, vector<16x1xf32>
    %140 = vector.broadcast %139 : vector<16x1xf32> to vector<16x324xf32>
    %141 = arith.addf %138, %140 : vector<16x324xf32>
    %cst_142 = arith.constant 0.000000e+00 : f32
    %142 = vector.broadcast %cst_142 : f32 to vector<16x324xf32>
    %143 = arith.cmpf oge, %141, %142 : vector<16x324xf32>
    %cst_143 = arith.constant 2.000000e-01 : f32
    %144 = vector.broadcast %cst_143 : f32 to vector<16x324xf32>
    %145 = arith.mulf %144, %141 : vector<16x324xf32>
    %146 = arith.select %143, %141, %145 : vector<16x324xi1>, vector<16x324xf32>
    %147 = vector.broadcast %1 : vector<1x324xf32> to vector<16x324xf32>
    %148 = arith.mulf %146, %147 : vector<16x324xf32>
    %149 = arith.truncf %148 : vector<16x324xf32> to vector<16x324xbf16>
    %c0_144 = arith.constant 0 : index
    %c19_145 = arith.constant 19 : index
    %150 = vector.load %arg14[%c0_144, %c19_145] : memref<16x362xbf16, #tpu.memory_space<vmem>>, vector<16x324xbf16>
    tpu.vector_store %arg14[%c0_144, %c19_145], %149 {strides = array<i32>} : memref<16x362xbf16, #tpu.memory_space<vmem>>, vector<16x324xbf16>,
    %c0_146 = arith.constant 0 : index
    %c0_147 = arith.constant 0 : index
    %151 = vector.load %arg14[%c0_146, %c0_147] : memref<16x362xbf16, #tpu.memory_space<vmem>>, vector<16x324xbf16>
    %c0_148 = arith.constant 0 : index
    %c0_149 = arith.constant 0 : index
    %152 = vector.load %arg6[%c0_148, %c0_149] : memref<16x144xbf16, #tpu.memory_space<vmem>>, vector<16x16xbf16>
    %cst_150 = arith.constant dense<0.000000e+00> : vector<16x324xf32>
    %153 = tpu.matmul %152, %151, %cst_150 {dimension_numbers = #tpu.dot_dimension_numbers<[1], [0], [0], [1], [0, 0, 1, 1], [], []>} : vector<16x16xbf16>, vector<16x324xbf16>, vector<16x324xf32> -> vector<16x324xf32>
    %c0_151 = arith.constant 0 : index
    %c1_152 = arith.constant 1 : index
    %154 = vector.load %arg14[%c0_151, %c1_152] : memref<16x362xbf16, #tpu.memory_space<vmem>>, vector<16x324xbf16>
    %c0_153 = arith.constant 0 : index
    %c16_154 = arith.constant 16 : index
    %155 = vector.load %arg6[%c0_153, %c16_154] : memref<16x144xbf16, #tpu.memory_space<vmem>>, vector<16x16xbf16>
    %cst_155 = arith.constant dense<0.000000e+00> : vector<16x324xf32>
    %156 = tpu.matmul %155, %154, %cst_155 {dimension_numbers = #tpu.dot_dimension_numbers<[1], [0], [0], [1], [0, 0, 1, 1], [], []>} : vector<16x16xbf16>, vector<16x324xbf16>, vector<16x324xf32> -> vector<16x324xf32>
    %157 = arith.addf %153, %156 : vector<16x324xf32>
    %c0_156 = arith.constant 0 : index
    %c2_157 = arith.constant 2 : index
    %158 = vector.load %arg14[%c0_156, %c2_157] : memref<16x362xbf16, #tpu.memory_space<vmem>>, vector<16x324xbf16>
    %c0_158 = arith.constant 0 : index
    %c32_159 = arith.constant 32 : index
    %159 = vector.load %arg6[%c0_158, %c32_159] : memref<16x144xbf16, #tpu.memory_space<vmem>>, vector<16x16xbf16>
    %cst_160 = arith.constant dense<0.000000e+00> : vector<16x324xf32>
    %160 = tpu.matmul %159, %158, %cst_160 {dimension_numbers = #tpu.dot_dimension_numbers<[1], [0], [0], [1], [0, 0, 1, 1], [], []>} : vector<16x16xbf16>, vector<16x324xbf16>, vector<16x324xf32> -> vector<16x324xf32>
    %161 = arith.addf %157, %160 : vector<16x324xf32>
    %c0_161 = arith.constant 0 : index
    %c18_162 = arith.constant 18 : index
    %162 = vector.load %arg14[%c0_161, %c18_162] : memref<16x362xbf16, #tpu.memory_space<vmem>>, vector<16x324xbf16>
    %c0_163 = arith.constant 0 : index
    %c48_164 = arith.constant 48 : index
    %163 = vector.load %arg6[%c0_163, %c48_164] : memref<16x144xbf16, #tpu.memory_space<vmem>>, vector<16x16xbf16>
    %cst_165 = arith.constant dense<0.000000e+00> : vector<16x324xf32>
    %164 = tpu.matmul %163, %162, %cst_165 {dimension_numbers = #tpu.dot_dimension_numbers<[1], [0], [0], [1], [0, 0, 1, 1], [], []>} : vector<16x16xbf16>, vector<16x324xbf16>, vector<16x324xf32> -> vector<16x324xf32>
    %165 = arith.addf %161, %164 : vector<16x324xf32>
    %c0_166 = arith.constant 0 : index
    %c19_167 = arith.constant 19 : index
    %166 = vector.load %arg14[%c0_166, %c19_167] : memref<16x362xbf16, #tpu.memory_space<vmem>>, vector<16x324xbf16>
    %c0_168 = arith.constant 0 : index
    %c64_169 = arith.constant 64 : index
    %167 = vector.load %arg6[%c0_168, %c64_169] : memref<16x144xbf16, #tpu.memory_space<vmem>>, vector<16x16xbf16>
    %cst_170 = arith.constant dense<0.000000e+00> : vector<16x324xf32>
    %168 = tpu.matmul %167, %166, %cst_170 {dimension_numbers = #tpu.dot_dimension_numbers<[1], [0], [0], [1], [0, 0, 1, 1], [], []>} : vector<16x16xbf16>, vector<16x324xbf16>, vector<16x324xf32> -> vector<16x324xf32>
    %169 = arith.addf %165, %168 : vector<16x324xf32>
    %c0_171 = arith.constant 0 : index
    %c20_172 = arith.constant 20 : index
    %170 = vector.load %arg14[%c0_171, %c20_172] : memref<16x362xbf16, #tpu.memory_space<vmem>>, vector<16x324xbf16>
    %c0_173 = arith.constant 0 : index
    %c80_174 = arith.constant 80 : index
    %171 = vector.load %arg6[%c0_173, %c80_174] : memref<16x144xbf16, #tpu.memory_space<vmem>>, vector<16x16xbf16>
    %cst_175 = arith.constant dense<0.000000e+00> : vector<16x324xf32>
    %172 = tpu.matmul %171, %170, %cst_175 {dimension_numbers = #tpu.dot_dimension_numbers<[1], [0], [0], [1], [0, 0, 1, 1], [], []>} : vector<16x16xbf16>, vector<16x324xbf16>, vector<16x324xf32> -> vector<16x324xf32>
    %173 = arith.addf %169, %172 : vector<16x324xf32>
    %c0_176 = arith.constant 0 : index
    %c36_177 = arith.constant 36 : index
    %174 = vector.load %arg14[%c0_176, %c36_177] : memref<16x362xbf16, #tpu.memory_space<vmem>>, vector<16x324xbf16>
    %c0_178 = arith.constant 0 : index
    %c96_179 = arith.constant 96 : index
    %175 = vector.load %arg6[%c0_178, %c96_179] : memref<16x144xbf16, #tpu.memory_space<vmem>>, vector<16x16xbf16>
    %cst_180 = arith.constant dense<0.000000e+00> : vector<16x324xf32>
    %176 = tpu.matmul %175, %174, %cst_180 {dimension_numbers = #tpu.dot_dimension_numbers<[1], [0], [0], [1], [0, 0, 1, 1], [], []>} : vector<16x16xbf16>, vector<16x324xbf16>, vector<16x324xf32> -> vector<16x324xf32>
    %177 = arith.addf %173, %176 : vector<16x324xf32>
    %c0_181 = arith.constant 0 : index
    %c37_182 = arith.constant 37 : index
    %178 = vector.load %arg14[%c0_181, %c37_182] : memref<16x362xbf16, #tpu.memory_space<vmem>>, vector<16x324xbf16>
    %c0_183 = arith.constant 0 : index
    %c112_184 = arith.constant 112 : index
    %179 = vector.load %arg6[%c0_183, %c112_184] : memref<16x144xbf16, #tpu.memory_space<vmem>>, vector<16x16xbf16>
    %cst_185 = arith.constant dense<0.000000e+00> : vector<16x324xf32>
    %180 = tpu.matmul %179, %178, %cst_185 {dimension_numbers = #tpu.dot_dimension_numbers<[1], [0], [0], [1], [0, 0, 1, 1], [], []>} : vector<16x16xbf16>, vector<16x324xbf16>, vector<16x324xf32> -> vector<16x324xf32>
    %181 = arith.addf %177, %180 : vector<16x324xf32>
    %c0_186 = arith.constant 0 : index
    %c38_187 = arith.constant 38 : index
    %182 = vector.load %arg14[%c0_186, %c38_187] : memref<16x362xbf16, #tpu.memory_space<vmem>>, vector<16x324xbf16>
    %c0_188 = arith.constant 0 : index
    %c128_189 = arith.constant 128 : index
    %183 = vector.load %arg6[%c0_188, %c128_189] : memref<16x144xbf16, #tpu.memory_space<vmem>>, vector<16x16xbf16>
    %cst_190 = arith.constant dense<0.000000e+00> : vector<16x324xf32>
    %184 = tpu.matmul %183, %182, %cst_190 {dimension_numbers = #tpu.dot_dimension_numbers<[1], [0], [0], [1], [0, 0, 1, 1], [], []>} : vector<16x16xbf16>, vector<16x324xbf16>, vector<16x324xf32> -> vector<16x324xf32>
    %185 = arith.addf %181, %184 : vector<16x324xf32>
    %c0_191 = arith.constant 0 : index
    %c0_192 = arith.constant 0 : index
    %186 = vector.load %arg11[%c0_191, %c0_192] : memref<16x1xf32, #tpu.memory_space<vmem>>, vector<16x1xf32>
    %187 = vector.broadcast %186 : vector<16x1xf32> to vector<16x324xf32>
    %188 = arith.addf %185, %187 : vector<16x324xf32>
    %cst_193 = arith.constant 0.000000e+00 : f32
    %189 = vector.broadcast %cst_193 : f32 to vector<16x324xf32>
    %190 = arith.cmpf oge, %188, %189 : vector<16x324xf32>
    %cst_194 = arith.constant 2.000000e-01 : f32
    %191 = vector.broadcast %cst_194 : f32 to vector<16x324xf32>
    %192 = arith.mulf %191, %188 : vector<16x324xf32>
    %193 = arith.select %190, %188, %192 : vector<16x324xi1>, vector<16x324xf32>
    %194 = vector.broadcast %1 : vector<1x324xf32> to vector<16x324xf32>
    %195 = arith.mulf %193, %194 : vector<16x324xf32>
    %196 = arith.truncf %195 : vector<16x324xf32> to vector<16x324xbf16>
    %c0_195 = arith.constant 0 : index
    %c19_196 = arith.constant 19 : index
    %197 = vector.load %arg14[%c0_195, %c19_196] : memref<16x362xbf16, #tpu.memory_space<vmem>>, vector<16x324xbf16>
    tpu.vector_store %arg14[%c0_195, %c19_196], %196 {strides = array<i32>} : memref<16x362xbf16, #tpu.memory_space<vmem>>, vector<16x324xbf16>,
    %c0_197 = arith.constant 0 : index
    %c0_198 = arith.constant 0 : index
    %198 = vector.load %arg14[%c0_197, %c0_198] : memref<16x362xbf16, #tpu.memory_space<vmem>>, vector<16x324xbf16>
    %c0_199 = arith.constant 0 : index
    %c0_200 = arith.constant 0 : index
    %199 = vector.load %arg7[%c0_199, %c0_200] : memref<3x144xbf16, #tpu.memory_space<vmem>>, vector<3x16xbf16>
    %cst_201 = arith.constant dense<0.000000e+00> : vector<3x324xf32>
    %200 = tpu.matmul %199, %198, %cst_201 {dimension_numbers = #tpu.dot_dimension_numbers<[1], [0], [0], [1], [0, 0, 1, 1], [], []>} : vector<3x16xbf16>, vector<16x324xbf16>, vector<3x324xf32> -> vector<3x324xf32>
    %c0_202 = arith.constant 0 : index
    %c1_203 = arith.constant 1 : index
    %201 = vector.load %arg14[%c0_202, %c1_203] : memref<16x362xbf16, #tpu.memory_space<vmem>>, vector<16x324xbf16>
    %c0_204 = arith.constant 0 : index
    %c16_205 = arith.constant 16 : index
    %202 = vector.load %arg7[%c0_204, %c16_205] : memref<3x144xbf16, #tpu.memory_space<vmem>>, vector<3x16xbf16>
    %cst_206 = arith.constant dense<0.000000e+00> : vector<3x324xf32>
    %203 = tpu.matmul %202, %201, %cst_206 {dimension_numbers = #tpu.dot_dimension_numbers<[1], [0], [0], [1], [0, 0, 1, 1], [], []>} : vector<3x16xbf16>, vector<16x324xbf16>, vector<3x324xf32> -> vector<3x324xf32>
    %204 = arith.addf %200, %203 : vector<3x324xf32>
    %c0_207 = arith.constant 0 : index
    %c2_208 = arith.constant 2 : index
    %205 = vector.load %arg14[%c0_207, %c2_208] : memref<16x362xbf16, #tpu.memory_space<vmem>>, vector<16x324xbf16>
    %c0_209 = arith.constant 0 : index
    %c32_210 = arith.constant 32 : index
    %206 = vector.load %arg7[%c0_209, %c32_210] : memref<3x144xbf16, #tpu.memory_space<vmem>>, vector<3x16xbf16>
    %cst_211 = arith.constant dense<0.000000e+00> : vector<3x324xf32>
    %207 = tpu.matmul %206, %205, %cst_211 {dimension_numbers = #tpu.dot_dimension_numbers<[1], [0], [0], [1], [0, 0, 1, 1], [], []>} : vector<3x16xbf16>, vector<16x324xbf16>, vector<3x324xf32> -> vector<3x324xf32>
    %208 = arith.addf %204, %207 : vector<3x324xf32>
    %c0_212 = arith.constant 0 : index
    %c18_213 = arith.constant 18 : index
    %209 = vector.load %arg14[%c0_212, %c18_213] : memref<16x362xbf16, #tpu.memory_space<vmem>>, vector<16x324xbf16>
    %c0_214 = arith.constant 0 : index
    %c48_215 = arith.constant 48 : index
    %210 = vector.load %arg7[%c0_214, %c48_215] : memref<3x144xbf16, #tpu.memory_space<vmem>>, vector<3x16xbf16>
    %cst_216 = arith.constant dense<0.000000e+00> : vector<3x324xf32>
    %211 = tpu.matmul %210, %209, %cst_216 {dimension_numbers = #tpu.dot_dimension_numbers<[1], [0], [0], [1], [0, 0, 1, 1], [], []>} : vector<3x16xbf16>, vector<16x324xbf16>, vector<3x324xf32> -> vector<3x324xf32>
    %212 = arith.addf %208, %211 : vector<3x324xf32>
    %c0_217 = arith.constant 0 : index
    %c19_218 = arith.constant 19 : index
    %213 = vector.load %arg14[%c0_217, %c19_218] : memref<16x362xbf16, #tpu.memory_space<vmem>>, vector<16x324xbf16>
    %c0_219 = arith.constant 0 : index
    %c64_220 = arith.constant 64 : index
    %214 = vector.load %arg7[%c0_219, %c64_220] : memref<3x144xbf16, #tpu.memory_space<vmem>>, vector<3x16xbf16>
    %cst_221 = arith.constant dense<0.000000e+00> : vector<3x324xf32>
    %215 = tpu.matmul %214, %213, %cst_221 {dimension_numbers = #tpu.dot_dimension_numbers<[1], [0], [0], [1], [0, 0, 1, 1], [], []>} : vector<3x16xbf16>, vector<16x324xbf16>, vector<3x324xf32> -> vector<3x324xf32>
    %216 = arith.addf %212, %215 : vector<3x324xf32>
    %c0_222 = arith.constant 0 : index
    %c20_223 = arith.constant 20 : index
    %217 = vector.load %arg14[%c0_222, %c20_223] : memref<16x362xbf16, #tpu.memory_space<vmem>>, vector<16x324xbf16>
    %c0_224 = arith.constant 0 : index
    %c80_225 = arith.constant 80 : index
    %218 = vector.load %arg7[%c0_224, %c80_225] : memref<3x144xbf16, #tpu.memory_space<vmem>>, vector<3x16xbf16>
    %cst_226 = arith.constant dense<0.000000e+00> : vector<3x324xf32>
    %219 = tpu.matmul %218, %217, %cst_226 {dimension_numbers = #tpu.dot_dimension_numbers<[1], [0], [0], [1], [0, 0, 1, 1], [], []>} : vector<3x16xbf16>, vector<16x324xbf16>, vector<3x324xf32> -> vector<3x324xf32>
    %220 = arith.addf %216, %219 : vector<3x324xf32>
    %c0_227 = arith.constant 0 : index
    %c36_228 = arith.constant 36 : index
    %221 = vector.load %arg14[%c0_227, %c36_228] : memref<16x362xbf16, #tpu.memory_space<vmem>>, vector<16x324xbf16>
    %c0_229 = arith.constant 0 : index
    %c96_230 = arith.constant 96 : index
    %222 = vector.load %arg7[%c0_229, %c96_230] : memref<3x144xbf16, #tpu.memory_space<vmem>>, vector<3x16xbf16>
    %cst_231 = arith.constant dense<0.000000e+00> : vector<3x324xf32>
    %223 = tpu.matmul %222, %221, %cst_231 {dimension_numbers = #tpu.dot_dimension_numbers<[1], [0], [0], [1], [0, 0, 1, 1], [], []>} : vector<3x16xbf16>, vector<16x324xbf16>, vector<3x324xf32> -> vector<3x324xf32>
    %224 = arith.addf %220, %223 : vector<3x324xf32>
    %c0_232 = arith.constant 0 : index
    %c37_233 = arith.constant 37 : index
    %225 = vector.load %arg14[%c0_232, %c37_233] : memref<16x362xbf16, #tpu.memory_space<vmem>>, vector<16x324xbf16>
    %c0_234 = arith.constant 0 : index
    %c112_235 = arith.constant 112 : index
    %226 = vector.load %arg7[%c0_234, %c112_235] : memref<3x144xbf16, #tpu.memory_space<vmem>>, vector<3x16xbf16>
    %cst_236 = arith.constant dense<0.000000e+00> : vector<3x324xf32>
    %227 = tpu.matmul %226, %225, %cst_236 {dimension_numbers = #tpu.dot_dimension_numbers<[1], [0], [0], [1], [0, 0, 1, 1], [], []>} : vector<3x16xbf16>, vector<16x324xbf16>, vector<3x324xf32> -> vector<3x324xf32>
    %228 = arith.addf %224, %227 : vector<3x324xf32>
    %c0_237 = arith.constant 0 : index
    %c38_238 = arith.constant 38 : index
    %229 = vector.load %arg14[%c0_237, %c38_238] : memref<16x362xbf16, #tpu.memory_space<vmem>>, vector<16x324xbf16>
    %c0_239 = arith.constant 0 : index
    %c128_240 = arith.constant 128 : index
    %230 = vector.load %arg7[%c0_239, %c128_240] : memref<3x144xbf16, #tpu.memory_space<vmem>>, vector<3x16xbf16>
    %cst_241 = arith.constant dense<0.000000e+00> : vector<3x324xf32>
    %231 = tpu.matmul %230, %229, %cst_241 {dimension_numbers = #tpu.dot_dimension_numbers<[1], [0], [0], [1], [0, 0, 1, 1], [], []>} : vector<3x16xbf16>, vector<16x324xbf16>, vector<3x324xf32> -> vector<3x324xf32>
    %232 = arith.addf %228, %231 : vector<3x324xf32>
    %c0_242 = arith.constant 0 : index
    %c0_243 = arith.constant 0 : index
    %233 = vector.load %arg12[%c0_242, %c0_243] : memref<3x1xf32, #tpu.memory_space<vmem>>, vector<3x1xf32>
    %234 = vector.broadcast %233 : vector<3x1xf32> to vector<3x324xf32>
    %235 = arith.addf %232, %234 : vector<3x324xf32>
    %236 = arith.truncf %235 : vector<3x324xf32> to vector<3x324xbf16>
    %c0_244 = arith.constant 0 : index
    %c0_245 = arith.constant 0 : index
    %c0_246 = arith.constant 0 : index
    %237 = vector.load %arg13[%c0_244, %c0_245, %c0_246] : memref<1x3x324xbf16, #tpu.memory_space<vmem>>, vector<1x3x324xbf16>
    %238 = vector.shape_cast %237 : vector<1x3x324xbf16> to vector<3x324xbf16>
    %239 = vector.shape_cast %236 : vector<3x324xbf16> to vector<1x3x324xbf16>
    tpu.vector_store %arg13[%c0_244, %c0_245, %c0_246], %239 {strides = array<i32>} : memref<1x3x324xbf16, #tpu.memory_space<vmem>>, vector<1x3x324xbf16>,
    return
  }
  func.func @transform_0(%arg0: i32) -> (i32, i32) {
    %c0_i32 = arith.constant 0 : i32
    %c0_i32_0 = arith.constant 0 : i32
    %c0_i32_1 = arith.constant 0 : i32
    return %c0_i32, %c0_i32_0 : i32, i32
  }
  func.func @transform_1(%arg0: i32) -> (i32, i32, i32) {
    %c0_i32 = arith.constant 0 : i32
    %c0_i32_0 = arith.constant 0 : i32
    %c0_i32_1 = arith.constant 0 : i32
    return %arg0, %c0_i32, %c0_i32_0 : i32, i32, i32
  }
  func.func @transform_2(%arg0: i32) -> (i32, i32) {
    %c0_i32 = arith.constant 0 : i32
    %c0_i32_0 = arith.constant 0 : i32
    %c0_i32_1 = arith.constant 0 : i32
    return %c0_i32, %c0_i32_0 : i32, i32
  }
  func.func @transform_3(%arg0: i32) -> (i32, i32) {
    %c0_i32 = arith.constant 0 : i32
    %c0_i32_0 = arith.constant 0 : i32
    %c0_i32_1 = arith.constant 0 : i32
    return %c0_i32, %c0_i32_0 : i32, i32
  }
  func.func @transform_4(%arg0: i32) -> (i32, i32) {
    %c0_i32 = arith.constant 0 : i32
    %c0_i32_0 = arith.constant 0 : i32
    %c0_i32_1 = arith.constant 0 : i32
    return %c0_i32, %c0_i32_0 : i32, i32
  }
  func.func @transform_5(%arg0: i32) -> (i32, i32) {
    %c0_i32 = arith.constant 0 : i32
    %c0_i32_0 = arith.constant 0 : i32
    %c0_i32_1 = arith.constant 0 : i32
    return %c0_i32, %c0_i32_0 : i32, i32
  }
  func.func @transform_6(%arg0: i32) -> (i32, i32) {
    %c0_i32 = arith.constant 0 : i32
    %c0_i32_0 = arith.constant 0 : i32
    %c0_i32_1 = arith.constant 0 : i32
    return %c0_i32, %c0_i32_0 : i32, i32
  }
  func.func @transform_7(%arg0: i32) -> (i32, i32) {
    %c0_i32 = arith.constant 0 : i32
    %c0_i32_0 = arith.constant 0 : i32
    %c0_i32_1 = arith.constant 0 : i32
    return %c0_i32, %c0_i32_0 : i32, i32
  }
  func.func @transform_8(%arg0: i32) -> (i32, i32) {
    %c0_i32 = arith.constant 0 : i32
    %c0_i32_0 = arith.constant 0 : i32
    %c0_i32_1 = arith.constant 0 : i32
    return %c0_i32, %c0_i32_0 : i32, i32
  }
  func.func @transform_9(%arg0: i32) -> (i32, i32) {
    %c0_i32 = arith.constant 0 : i32
    %c0_i32_0 = arith.constant 0 : i32
    %c0_i32_1 = arith.constant 0 : i32
    return %c0_i32, %c0_i32_0 : i32, i32
  }
  func.func @transform_10(%arg0: i32) -> (i32, i32) {
    %c0_i32 = arith.constant 0 : i32
    %c0_i32_0 = arith.constant 0 : i32
    %c0_i32_1 = arith.constant 0 : i32
    return %c0_i32, %c0_i32_0 : i32, i32
  }
  func.func @transform_11(%arg0: i32) -> (i32, i32) {
    %c0_i32 = arith.constant 0 : i32
    %c0_i32_0 = arith.constant 0 : i32
    %c0_i32_1 = arith.constant 0 : i32
    return %c0_i32, %c0_i32_0 : i32, i32
  }
  func.func @transform_12(%arg0: i32) -> (i32, i32, i32) {
    %c0_i32 = arith.constant 0 : i32
    %c0_i32_0 = arith.constant 0 : i32
    %c0_i32_1 = arith.constant 0 : i32
    return %arg0, %c0_i32, %c0_i32_0 : i32, i32, i32
  }
}

</mosaic_0001>

<bundles_post_ra>
// kernel: rrdb_model_forward.7
= control target key start
LH: loop header
LB: loop body
LE: loop exit
PB: predicated region body
PF: predicated region fallthrough
CT: control target
= control target key end

     0   :  { %s1110_s15 = smov 0   ;;  %s1214_s0 = inlined_call_operand.vmem [shape: bf16[1,100], index: 0, kind: input, shape index: {}]   ;;  %s1215_s1 = inlined_call_operand.vmem [shape: bf16[2,3,100], index: 1, kind: input, shape index: {}]   ;;  %s1216_s2 = inlined_call_operand.vmem [shape: bf16[16,27], index: 2, kind: input, shape index: {}]   ;;  %s1217_s3 = inlined_call_operand.vmem [shape: f32[16,1], index: 3, kind: input, shape index: {}]   ;;  %s1218_s4 = inlined_call_operand.vmem [shape: bf16[2,16,100], index: 4, kind: output, shape index: {}]  }
   0x1 LB: > { %s908_s16 = sadd.s32 4294967295, %s1063_s15   ;;  %p912_p0 = scmp.ge.s32.totalorder %s1063_s15, 1  ;;  %s1063_s15 = sphi %s1110_s15, %s14_s15  }
   0x2   : > { %p161_p1 = scmp.lt.s32.totalorder %s1063_s15, 3 }
   0x4   : > { %p162_p2 = pnand %p912_p0, %p161_p1 }
   0x5   : > { %p186_p3 = scmp.lt.s32.totalorder (!%p162_p2), %s908_s16, 1  ;;  %v196_v0 = vld [vmem:[%s1214_s0] sm:$0x1] (!%p162_p2)  ;;  %v212_v1 = vlaneseq (!%p162_p2)  ;;  %vm197_vm0 = vcmask (!%p162_p2), 82944   ;;  %vm198_vm1 = vsmask.f32 (!%p162_p2), 1280 }
   0x6   : > { %165 = sbr.rel (%p162_p2) target bundleno = 519 (0x207), region = 36  ;;  %v200_v2 = vld [vmem:[#allocation2] sm:$0x3] (!%p162_p2)  ;;  %v210_v4 = vpack.i.b16 (!%p162_p2), %v196_v0, %v196_v0  ;;  %vm199_vm2 = vmand (!%p162_p2), %vm197_vm0, %vm198_vm1  ;;  %s1065_s22 = smov (!%p162_p2), 125   ;;  %vm203_vm3 = vcmask (!%p162_p2), 993144   ;;  %v1066_v10 = vmov (!%p162_p2), 0.0  }
   0x7   : > { %v1049_v3 = vld [vmem:[%s1216_s2] sm:$0xff] (!%p162_p2)   ;;  %v213_v5 = vshrl.u32 (!%p162_p2), %v212_v1, 7  ;;  %v201_v6 = vsel (!%p162_p2), %vm199_vm2, 0, %v200_v2  ;;  %971 = vmatprep.subr.bf16.mxu1 (!%p162_p2), %v1066_v10  ;;  %965 = vmatprep.subr.bf16.mxu0 (!%p162_p2), %v1066_v10  ;;  %vm204_vm4 = vmand (!%p162_p2), %vm203_vm3, %vm198_vm1  ;;  %s1067_s26 = smov (!%p162_p2), 11   ;;  %vm221_vm5 = vcmask (!%p162_p2), 902232   ;;  %vm250_vm7 = vcmask (!%p162_p2), 1040384  }
   0x8   : > { %202 = vst [vmem:[#allocation2] sm:$0x3] (!%p162_p2), %v201_v6  ;;  %234 = vrot.lane.b32.xlu1 (!%p162_p2), %v1049_v3, %s1065_s22  ;;  %vm222_vm6 = vmand (!%p162_p2), %vm221_vm5, %vm198_vm1  ;;  %v1068_v15 = vmov (!%p162_p2), 1983009808   ;;  %vm1069_vm8 = vmmov (!%p162_p2), 0   ;;  %vm251_vm9 = vcmask (!%p162_p2), 1041408  }
   0x9   : > { %v214_v7 = vsub.s32 (!%p162_p2), 0, %v213_v5  ;;  %v238_v16 = vunpack.c.l.s4 (!%p162_p2), %v1068_v15  ;;  %973 = vmatprep.mubr.msk.bf16.mxu1 (!%p162_p2), %vm1069_vm8, %v1066_v10  ;;  %967 = vmatprep.mubr.msk.bf16.mxu0 (!%p162_p2), %vm1069_vm8, %v1066_v10  ;;  %v1070_v20 = vmov (!%p162_p2), 65535   ;;  %s1071_s27 = smov (!%p162_p2), 126   ;;  %s1072_s28 = smov (!%p162_p2), 127   ;;  %v1050_v28 = vld [vmem:[%s1216_s2] sm:$0xff] (!%p162_p2)   ;;  %vm246_vm10 = vcmask (!%p162_p2), 23552  }
   0xa   : > { %v252_v21 = vsel (!%p162_p2), %vm250_vm7, 4294967295, %v1070_v20  ;;  %s1073_s5 = smov (!%p162_p2), 118   ;;  %v1051_v29 = vld [vmem:[%s1216_s2] sm:$0xff] (!%p162_p2)   ;;  %s1074_s8 = smov (!%p162_p2), 122   ;;  %v1083_v36 = vmov (!%p162_p2), 0   ;;  %v829_v37 = vld [vmem:[%s1217_s3 + $0x8] sm:$0xff] (!%p162_p2) }
   0xb   : > { %v215_v9 = vrot.slane (!%p162_p2), %v210_v4, %v214_v7  ;;  %v239_v19 = vunpack.c.0.s8 (!%p162_p2), %v238_v16  ;;  %v1139_v23 = vsel (!%p162_p2), %vm251_vm9, %v252_v21, 0  ;;  %s1075_s9 = smov (!%p162_p2), 119   ;;  %s1076_s10 = smov (!%p162_p2), 117   ;;  %v1052_v30 = vld [vmem:[%s1216_s2] sm:$0xff] (!%p162_p2)   ;;  %1047 = vset.pattern.permute.xlu1 (!%p162_p2), %v1083_v36  ;;  %1048 = vset.pattern.permute.xlu0 (!%p162_p2), %v1083_v36  ;;  %vm850_vm11 = vcmask (!%p162_p2), 814080  }
   0xc   : > { %s1077_s13 = smov (!%p162_p2), 116   ;;  %v1053_v31 = vld [vmem:[%s1216_s2] sm:$0xff] (!%p162_p2)   ;;  %s1078_s18 = smov (!%p162_p2), 113  }
   0xd   : > { %s1220_s16 = smov (!%p186_p3, %s908_s16), 1  ;;  %v242_v22 = vsub.s32 %v239_v19, %v213_v5  ;;  %s1079_s19 = smov 108   ;;  %v1054_v32 = vld [vmem:[%s1216_s2] sm:$0xff]  }
   0xe   : > { %s913_s21 = sshll.u32 %s1220_s16, 1  ;;  %s1080_s22 = smov 107   ;;  %v1055_v33 = vld [vmem:[%s1216_s2] sm:$0xff]  }
   0xf   : > { %s189_s25 = scalar_lea.vmem %s1215_s1, %s913_s21  ;;  %v205_v12 = vld [vmem:[#allocation2] sm:$0x3] }
  0x10   : > { %v208_v8 = vld [vmem:[%s189_s25] sm:$0x3]  ;;  %v206_v13 = vsel %vm204_vm4, 0, %v205_v12  ;;  %s1081_s25 = smov 110  }
  0x11   : > { %v216_v11 = vmul.bf16 %v215_v9, %v208_v8  ;;  %207 = vst [vmem:[#allocation2] sm:$0x3] %v206_v13  ;;  %v1056_v34 = vld [vmem:[%s1216_s2] sm:$0xff]  }
  0x12   : > { %v828_v35 = vld [vmem:[%s1217_s3] sm:$0xff] }
  0x13   : > { %218 = vrot.lane.b32.xlu0 %v216_v11, %s1067_s26  ;;  %s1082_s26 = smov 106  }
  0x18   : > { %v223_v14 = vld [vmem:[#allocation2] sm:$0x3] }
  0x7a   : > { %v235_v38 = vpop.permute.xlu1 %234 }
  0x85   : > { %v219_v17 = vpop.permute.xlu0 %218 }
  0x86   : > { %v224_v18 = vsel %vm222_vm6, %v219_v17, %v223_v14 }
  0x87   : > { %225 = vst [vmem:[#allocation2] sm:$0x3] %v224_v18 }
  0x8e   : > { %v920_v24 = vld.sshfl [vmem:[#allocation2] sm:$0x3 pattern:$0x76325410] }
  0x8f   : > { %v226_v25 = vld [vmem:[#allocation2] sm:$0x3]  ;;  %363 = vrot.lane.b32.xlu1 %v920_v24, %s1071_s27 }
  0x90   : > { %v243_v26 = vrot.slane %v226_v25, %v242_v22  ;;  %v302_v27 = vand.u32 %v1139_v23, %v226_v25 }
  0x92   : > { %972 = vmatpush3.bf16.msra.mxu1 %v302_v27  ;;  %244 = vrot.lane.b32.xlu0 %v243_v26, %s1072_s28 }
  0x93   : > { %983 = vmatprep.subr.bf16.mxu1 %v1066_v10  ;;  %432 = vrot.lane.b32.xlu1 %v920_v24, %s1073_s5  ;;  %s1084_s5 = smov 104  }
  0x95   : > { %974 = vmatmul.mubr.msk.bf16.vlgmr.msra.gmra.mrb[0].mxu1 %vm246_vm10, %v1049_v3 }
  0x96   : > { %353 = vrot.lane.b32.xlu0 %v1050_v28, %s1074_s8  ;;  %985 = vmatprep.mubr.msk.bf16.mxu1 %vm1069_vm8, %v1066_v10  ;;  %s944_s8 = sshll.u32 %s1220_s16, 3 }
  0x97   : > { %422 = vrot.lane.b32.xlu1 %v1051_v29, %s1075_s9  ;;  %s194_s11 = scalar_lea.vmem %s1218_s4, %s944_s8 }
  0x9a   : > { %501 = vrot.lane.b32.xlu0 %v920_v24, %s1076_s10 }
  0x9b   : > { %570 = vrot.lane.b32.xlu1 %v920_v24, %s1077_s13 }
  0x9e   : > { %491 = vrot.lane.b32.xlu0 %v1052_v30, %s1077_s13 }
  0x9f   : > { %560 = vrot.lane.b32.xlu1 %v1053_v31, %s1078_s18 }
  0xa2   : > { %639 = vrot.lane.b32.xlu0 %v920_v24, %s1079_s19 }
  0xa3   : > { %708 = vrot.lane.b32.xlu1 %v920_v24, %s1080_s22 }
  0xa6   : > { %629 = vrot.lane.b32.xlu0 %v1054_v32, %s1081_s25 }
  0xa7   : > { %698 = vrot.lane.b32.xlu1 %v1055_v33, %s1080_s22 }
  0xaa   : > { %777 = vrot.lane.b32.xlu0 %v920_v24, %s1082_s26 }
  0xab   : > { %832 = vperm.xlu1 %1047, %v828_v35  }
  0xae   : > { %767 = vrot.lane.b32.xlu0 %v1056_v34, %s1084_s5 }
  0xb2   : > { %837 = vperm.xlu0 %1048, %v829_v37  }
 0x101   : > { %v364_v39 = vpop.permute.xlu1 %363 }
 0x102   : > { %v369_v45 = vand.u32 %v364_v39, %v1139_v23 }
 0x104   : > { %v245_v40 = vpop.permute.xlu0 %244 }
 0x105   : > { %v255_v41 = vand.u32 %v1139_v23, %v245_v40  ;;  %v433_v42 = vpop.permute.xlu1 %432 }
 0x106   : > { %v438_v43 = vand.u32 %v433_v42, %v1139_v23 }
 0x107   : > { %966 = vmatpush3.bf16.msra.mxu0 %v255_v41 }
 0x108   : > { %v354_v44 = vpop.permute.xlu0 %353  ;;  %977 = vmatprep.subr.bf16.mxu0 %v1066_v10  ;;  %984 = vmatpush3.bf16.msra.mxu1 %v438_v43 }
 0x109   : > { %v423_v46 = vpop.permute.xlu1 %422  ;;  %995 = vmatprep.subr.bf16.mxu1 %v1066_v10 }
 0x10a   : > { %968 = vmatmul.mubr.msk.bf16.vlgmr.msra.gmra.mrb[0].mxu0 %vm246_vm10, %v235_v38 }
 0x10b   : > { %978 = vmatpush3.bf16.msra.mxu0 %v369_v45  ;;  %979 = vmatprep.mubr.msk.bf16.mxu0 %vm1069_vm8, %v1066_v10 }
 0x10c   : > { %v502_v47 = vpop.permute.xlu0 %501  ;;  %986 = vmatmul.mubr.msk.bf16.vlgmr.msra.gmra.mrb[4].mxu1 %vm246_vm10, %v423_v46  ;;  %989 = vmatprep.subr.bf16.mxu0 %v1066_v10 }
 0x10d   : > { %997 = vmatprep.mubr.msk.bf16.mxu1 %vm1069_vm8, %v1066_v10  ;;  %v571_v48 = vpop.permute.xlu1 %570  ;;  %v507_v51 = vand.u32 %v502_v47, %v1139_v23 }
 0x10e   : > { %v576_v49 = vand.u32 %v571_v48, %v1139_v23 }
 0x110   : > { %v492_v50 = vpop.permute.xlu0 %491  ;;  %996 = vmatpush3.bf16.msra.mxu1 %v576_v49 }
 0x111   : > { %v561_v52 = vpop.permute.xlu1 %560  ;;  %1007 = vmatprep.subr.bf16.mxu1 %v1066_v10 }
 0x112   : > { %980 = vmatmul.mubr.msk.bf16.vlgmr.msra.gmra.mrb[4].mxu0 %vm246_vm10, %v354_v44 }
 0x113   : > { %990 = vmatpush3.bf16.msra.mxu0 %v507_v51  ;;  %991 = vmatprep.mubr.msk.bf16.mxu0 %vm1069_vm8, %v1066_v10 }
 0x114   : > { %v640_v53 = vpop.permute.xlu0 %639  ;;  %998 = vmatmul.mubr.msk.bf16.vlgmr.msra.gmra.mrb[8].mxu1 %vm246_vm10, %v561_v52  ;;  %1001 = vmatprep.subr.bf16.mxu0 %v1066_v10 }
 0x115   : > { %1009 = vmatprep.mubr.msk.bf16.mxu1 %vm1069_vm8, %v1066_v10  ;;  %v709_v54 = vpop.permute.xlu1 %708  ;;  %v645_v57 = vand.u32 %v640_v53, %v1139_v23 }
 0x116   : > { %v714_v55 = vand.u32 %v709_v54, %v1139_v23 }
 0x118   : > { %v630_v56 = vpop.permute.xlu0 %629  ;;  %1008 = vmatpush3.bf16.msra.mxu1 %v714_v55 }
 0x119   : > { %v699_v58 = vpop.permute.xlu1 %698 }
 0x11a   : > { %992 = vmatmul.mubr.msk.bf16.vlgmr.msra.gmra.mrb[8].mxu0 %vm246_vm10, %v492_v50 }
 0x11b   : > { %1002 = vmatpush3.bf16.msra.mxu0 %v645_v57  ;;  %1003 = vmatprep.mubr.msk.bf16.mxu0 %vm1069_vm8, %v1066_v10 }
 0x11c   : > { %1013 = vmatprep.subr.bf16.mxu0 %v1066_v10  ;;  %1010 = vmatmul.mubr.msk.bf16.vlgmr.msra.gmra.mrb[12].mxu1 %vm246_vm10, %v699_v58  ;;  %v778_v59 = vpop.permute.xlu0 %777 }
 0x11d   : > { %v783_v60 = vand.u32 %v778_v59, %v1139_v23 }
 0x120   : > { %v768_v61 = vpop.permute.xlu0 %767 }
 0x122   : > { %1004 = vmatmul.mubr.msk.bf16.vlgmr.msra.gmra.mrb[12].mxu0 %vm246_vm10, %v630_v56 }
 0x123   : > { %1014 = vmatpush3.bf16.msra.mxu0 %v783_v60  ;;  %1015 = vmatprep.mubr.msk.bf16.mxu0 %vm1069_vm8, %v1066_v10 }
 0x12a   : > { %1016 = vmatmul.mubr.msk.bf16.vlgmr.msra.gmra.mrb[16].mxu0 %vm246_vm10, %v768_v61  ;;  %v833_v45 = vpop.permute.xlu1 %832 }
 0x131   : > { %v838_v49 = vpop.permute.xlu0 %837 }
 0x168   : > { %v338_v62 = vpop.f32.mrb[0].mxu1 }
 0x169   : > { %v975_v63 = vpop.f32.mrb[1].mxu1 }
 0x16a   : > { %v341_v0 = vpop.f32.mrb[2].mxu1 }
 0x16b   : > { %v976_v1 = vpop.f32.mrb[3].mxu1 }
 0x1dd   : > { %v291_v2 = vpop.f32.mrb[0].mxu0 }
 0x1de   : > { %v339_v3 = vadd.f32 %v338_v62, %v291_v2  ;;  %v969_v4 = vpop.f32.mrb[1].mxu0 }
 0x1df   : > { %v294_v5 = vpop.f32.mrb[2].mxu0  ;;  %v474_v6 = vpop.f32.mrb[4].mxu1 }
 0x1e0   : > { %v342_v7 = vadd.f32 %v341_v0, %v294_v5  ;;  %v970_v8 = vpop.f32.mrb[3].mxu0  ;;  %v987_v9 = vpop.f32.mrb[5].mxu1 }
 0x1e1   : > { %v477_v11 = vpop.f32.mrb[6].mxu1 }
 0x1e2   : > { %v988_v12 = vpop.f32.mrb[7].mxu1 }
 0x1e5   : > { %v405_v13 = vpop.f32.mrb[4].mxu0 }
 0x1e6   : > { %v412_v14 = vadd.f32 %v405_v13, %v339_v3  ;;  %v981_v10 = vpop.f32.mrb[5].mxu0 }
 0x1e7   : > { %v408_v15 = vpop.f32.mrb[6].mxu0  ;;  %v612_v16 = vpop.f32.mrb[8].mxu1 }
 0x1e8   : > { %v413_v17 = vadd.f32 %v408_v15, %v342_v7  ;;  %v982_v18 = vpop.f32.mrb[7].mxu0  ;;  %v999_v19 = vpop.f32.mrb[9].mxu1  ;;  %v481_v20 = vadd.f32 %v474_v6, %v412_v14 }
 0x1e9   : > { %v615_v21 = vpop.f32.mrb[10].mxu1 }
 0x1ea   : > { %v1000_v22 = vpop.f32.mrb[11].mxu1  ;;  %v482_v23 = vadd.f32 %v477_v11, %v413_v17 }
 0x1ed   : > { %v543_v24 = vpop.f32.mrb[8].mxu0 }
 0x1ee   : > { %v550_v25 = vadd.f32 %v543_v24, %v481_v20  ;;  %v993_v26 = vpop.f32.mrb[9].mxu0 }
 0x1ef   : > { %v546_v27 = vpop.f32.mrb[10].mxu0  ;;  %v750_v28 = vpop.f32.mrb[12].mxu1 }
 0x1f0   : > { %v551_v29 = vadd.f32 %v546_v27, %v482_v23  ;;  %v994_v30 = vpop.f32.mrb[11].mxu0  ;;  %v619_v31 = vadd.f32 %v612_v16, %v550_v25  ;;  %v1011_v32 = vpop.f32.mrb[13].mxu1 }
 0x1f1   : > { %v753_v33 = vpop.f32.mrb[14].mxu1 }
 0x1f2   : > { %v620_v34 = vadd.f32 %v615_v21, %v551_v29  ;;  %v1012_v35 = vpop.f32.mrb[15].mxu1 }
 0x1f5   : > { %v681_v36 = vpop.f32.mrb[12].mxu0 }
 0x1f6   : > { %v688_v37 = vadd.f32 %v681_v36, %v619_v31  ;;  %v1005_v38 = vpop.f32.mrb[13].mxu0 }
 0x1f7   : > { %v684_v39 = vpop.f32.mrb[14].mxu0 }
 0x1f8   : > { %v689_v40 = vadd.f32 %v684_v39, %v620_v34  ;;  %v757_v41 = vadd.f32 %v750_v28, %v688_v37  ;;  %v1006_v42 = vpop.f32.mrb[15].mxu0 }
 0x1fa   : > { %v758_v43 = vadd.f32 %v753_v33, %v689_v40 }
 0x1fd   : > { %v819_v44 = vpop.f32.mrb[16].mxu0 }
 0x1fe   : > { %v826_v46 = vadd.f32 %v819_v44, %v757_v41  ;;  %v1017_v47 = vpop.f32.mrb[17].mxu0 }
 0x1ff   : > { %v822_v48 = vpop.f32.mrb[18].mxu0 }
 0x200   : > { %v840_v50 = vadd.f32 %v833_v45, %v826_v46  ;;  %v827_v51 = vadd.f32 %v822_v48, %v758_v43  ;;  %v1018_v52 = vpop.f32.mrb[19].mxu0 }
 0x202   : > { %v945_v53 = vpack.c.bf16 %v840_v50, %v840_v50  ;;  %v841_v54 = vadd.f32 %v838_v49, %v827_v51 }
 0x204   : > { %851 = vst.msk [vmem:[%s194_s11] sm:$0xf] %vm850_vm11, %v945_v53  ;;  %v946_v55 = vpack.c.bf16 %v841_v54, %v841_v54 }
 0x206   : > { %852 = vst.msk [vmem:[%s194_s11 + $0x4] sm:$0xf] %vm850_vm11, %v946_v55 }
 0x207 PF: > { %s14_s15 = sadd.s32 1, %s1063_s15  }
 0x208   : > { %p11_p4 = scmp.ge.s32.totalorder %s14_s15, 4  }
 0x20a   :  { %13 = sbr.rel (!%p11_p4) target bundleno = 1 (0x1), region = 66 }

// kernel: rrdb_model_forward.12
= control target key start
LH: loop header
LB: loop body
LE: loop exit
PB: predicated region body
PF: predicated region fallthrough
CT: control target
= control target key end

     0   :  { %s1036_s18 = smov 0   ;;  %s1112_s0 = inlined_call_operand.vmem [shape: bf16[1,100], index: 0, kind: input, shape index: {}]   ;;  %s1113_s1 = inlined_call_operand.vmem [shape: bf16[2,16,100], index: 1, kind: input, shape index: {}]   ;;  %s1114_s2 = inlined_call_operand.vmem [shape: bf16[2,16,100], index: 2, kind: input, shape index: {}, may-alias: {2,5}]   ;;  %s1115_s3 = inlined_call_operand.vmem [shape: bf16[16,144], index: 3, kind: input, shape index: {}]   ;;  %s1116_s4 = inlined_call_operand.vmem [shape: f32[16,1], index: 4, kind: input, shape index: {}]   ;;  %s1117_s5 = inlined_call_operand.vmem [shape: bf16[2,16,100], index: 5, kind: output, shape index: {}, may-alias: {2,5}]  }
   0x1 LB: > { %s839_s19 = sadd.s32 4294967295, %s985_s18   ;;  %p843_p0 = scmp.ge.s32.totalorder %s985_s18, 1  ;;  %s985_s18 = sphi %s1036_s18, %s15_s18  }
   0x2   : > { %p197_p1 = scmp.lt.s32.totalorder %s985_s18, 3 }
   0x4   : > { %p198_p2 = pnand %p843_p0, %p197_p1 }
   0x5   : > { %p230_p3 = scmp.lt.s32.totalorder (!%p198_p2), %s839_s19, 1  ;;  %v246_v0 = vld [vmem:[%s1112_s0] sm:$0x1] (!%p198_p2)  ;;  %v256_v1 = vlaneseq (!%p198_p2)  ;;  %vm247_vm0 = vcmask (!%p198_p2), 89088   ;;  %v987_v2 = vmov (!%p198_p2), 0   ;;  %vm249_vm1 = vcmask (!%p198_p2), 999288  }
   0x6   : > { %201 = sbr.rel (%p198_p2) target bundleno = 517 (0x205), region = 40  ;;  %248 = vst.msk [vmem:[#allocation2] sm:$0xff] (!%p198_p2), %vm247_vm0, %v987_v2  ;;  %975 = vset.pattern.permute.xlu0 (!%p198_p2), %v987_v2  ;;  %976 = vset.pattern.permute.xlu1 (!%p198_p2), %v987_v2  ;;  %v254_v3 = vpack.i.b16 (!%p198_p2), %v246_v0, %v246_v0  ;;  %v977_v5 = vld [vmem:[%s1115_s3] ss:$8 sps:$4 sm:$0xff] (!%p198_p2)   ;;  %v988_v6 = vmov (!%p198_p2), 0.0   ;;  %s989_s25 = smov (!%p198_p2), 112  }
   0x7   : > { %v257_v4 = vshrl.u32 (!%p198_p2), %v256_v1, 7  ;;  %250 = vst.msk [vmem:[#allocation2] sm:$0xff] (!%p198_p2), %vm249_vm1, %v987_v2  ;;  %900 = vmatprep.subr.bf16.mxu1 (!%p198_p2), %v988_v6  ;;  %894 = vmatprep.subr.bf16.mxu0 (!%p198_p2), %v988_v6  ;;  %s990_s29 = smov (!%p198_p2), 11   ;;  %vm991_vm2 = vmmov (!%p198_p2), 0   ;;  %vm274_vm3 = vcmask (!%p198_p2), 908376   ;;  %s992_s30 = smov (!%p198_p2), 126  }
   0x8   : > { %284 = vrot.lane.b32.xlu1 (!%p198_p2), %v977_v5, %s989_s25  ;;  %896 = vmatprep.mubr.msk.bf16.mxu0 (!%p198_p2), %vm991_vm2, %v988_v6  ;;  %s993_s6 = smov (!%p198_p2), 127   ;;  %vm290_vm4 = vcmask (!%p198_p2), 130048   ;;  %s994_s7 = smov (!%p198_p2), 118   ;;  %v741_v17 = vld [vmem:[%s1116_s4] sm:$0xff] (!%p198_p2)  ;;  %v742_v18 = vld [vmem:[%s1116_s4 + $0x8] sm:$0xff] (!%p198_p2)  ;;  %vm769_vm5 = vcmask (!%p198_p2), 814080  }
   0x9   : > { %v258_v7 = vsub.s32 (!%p198_p2), 0, %v257_v4  ;;  %902 = vmatprep.mubr.msk.bf16.mxu1 (!%p198_p2), %vm991_vm2, %v988_v6  ;;  %s995_s8 = smov (!%p198_p2), 96   ;;  %s996_s9 = smov (!%p198_p2), 80   ;;  %v978_v34 = vld [vmem:[%s1115_s3 + $0x4] ss:$8 sps:$4 sm:$0xff] (!%p198_p2)  }
   0xa   : > { %s997_s10 = smov (!%p198_p2), 117   ;;  %s998_s11 = smov (!%p198_p2), 116  }
   0xb   : > { %v259_v8 = vrot.slane (!%p198_p2), %v254_v3, %v258_v7  ;;  %s999_s12 = smov (!%p198_p2), 64   ;;  %s1000_s13 = smov (!%p198_p2), 48  }
   0xc   : > { %s1001_s14 = smov (!%p198_p2), 108   ;;  %s1002_s15 = smov (!%p198_p2), 107  }
   0xd   : > { %s1119_s19 = smov (!%p230_p3, %s839_s19), 1  ;;  %v850_v11 = vcombine.low %v259_v8, %v259_v8  ;;  %s1003_s16 = smov 32  }
   0xe   : > { %s1052_s24 = sshll.u32 %s1119_s19, 3  ;;  %s1004_s17 = smov 106  }
   0xf   : > { %s234_s28 = scalar_lea.vmem %s1113_s1, %s1052_s24  ;;  %s1005_s19 = smov 16  }
  0x10   : > { %v251_v9 = vld [vmem:[%s234_s28] sm:$0xf]  ;;  %v252_v10 = vld [vmem:[%s234_s28 + $0x4] sm:$0xf] }
  0x11   : > { %v264_v12 = vmul.bf16 %v850_v11, %v251_v9  ;;  %v265_v13 = vmul.bf16 %v850_v11, %v252_v10 }
  0x13   : > { %v851_v14 = vcombine.low %v264_v12, %v265_v13 }
  0x15   : > { %271 = vrot.lane.b32.xlu0 %v851_v14, %s990_s29  ;;  %s239_s29 = scalar_lea.vmem %s1114_s2, %s1052_s24 }
  0x7a   : > { %v285_v19 = vpop.permute.xlu1 %284 }
  0x87   : > { %v272_v15 = vpop.permute.xlu0 %271 }
  0x88   : > { %275 = vst.msk [vmem:[#allocation2] sm:$0xff] %vm274_vm3, %v272_v15 }
  0x8f   : > { %v276_v16 = vld [vmem:[#allocation2] sm:$0xff] }
  0x90   : > { %381 = vrot.lane.b32.xlu1 %v276_v16, %s992_s30  ;;  %287 = vrot.lane.b32.xlu0 %v276_v16, %s993_s6 }
  0x91   : > { %901 = vmatpush3.bf16.msra.mxu1 %v276_v16 }
  0x92   : > { %912 = vmatprep.subr.bf16.mxu1 %v988_v6 }
  0x94   : > { %432 = vrot.lane.b32.xlu1 %v276_v16, %s994_s7  ;;  %379 = vrot.lane.b32.xlu0 %v977_v5, %s995_s8  ;;  %s244_s7 = scalar_lea.vmem %s1117_s5, %s1052_s24 }
  0x95   : > { %903 = vmatmul.mubr.msk.bf16.vlgmr.msra.gmra.mrb[0].mxu1 %vm290_vm4, %v977_v5 }
  0x96   : > { %914 = vmatprep.mubr.msk.bf16.mxu1 %vm991_vm2, %v988_v6 }
  0x98   : > { %430 = vrot.lane.b32.xlu1 %v977_v5, %s996_s9  ;;  %483 = vrot.lane.b32.xlu0 %v276_v16, %s997_s10 }
  0x9c   : > { %534 = vrot.lane.b32.xlu1 %v276_v16, %s998_s11  ;;  %481 = vrot.lane.b32.xlu0 %v977_v5, %s999_s12 }
  0xa0   : > { %532 = vrot.lane.b32.xlu1 %v977_v5, %s1000_s13  ;;  %585 = vrot.lane.b32.xlu0 %v276_v16, %s1001_s14 }
  0xa4   : > { %636 = vrot.lane.b32.xlu1 %v276_v16, %s1002_s15  ;;  %583 = vrot.lane.b32.xlu0 %v977_v5, %s1003_s16 }
  0xa8   : > { %692 = vrot.lane.b32.xlu0 %v276_v16, %s1004_s17  ;;  %634 = vrot.lane.b32.xlu1 %v977_v5, %s1005_s19 }
  0xac   : > { %745 = vperm.xlu0 %975, %v741_v17   ;;  %750 = vperm.xlu1 %976, %v742_v18   ;;  %v873_v17 = vld [vmem:[%s239_s29] sm:$0xff]  }
 0x102   : > { %v382_v20 = vpop.permute.xlu1 %381  ;;  %v288_v21 = vpop.permute.xlu0 %287 }
 0x103   : > { %895 = vmatpush3.bf16.msra.mxu0 %v288_v21 }
 0x104   : > { %906 = vmatprep.subr.bf16.mxu0 %v988_v6 }
 0x106   : > { %v433_v22 = vpop.permute.xlu1 %432  ;;  %897 = vmatmul.mubr.msk.bf16.vlgmr.msra.gmra.mrb[0].mxu0 %vm290_vm4, %v285_v19  ;;  %v380_v23 = vpop.permute.xlu0 %379 }
 0x107   : > { %907 = vmatpush3.bf16.msra.mxu0 %v382_v20  ;;  %913 = vmatpush3.bf16.msra.mxu1 %v433_v22  ;;  %v874_v22 = vunpack.c.l.bf16 %v873_v17 }
 0x108   : > { %908 = vmatprep.mubr.msk.bf16.mxu0 %vm991_vm2, %v988_v6  ;;  %918 = vmatprep.subr.bf16.mxu0 %v988_v6 }
 0x109   : > { %924 = vmatprep.subr.bf16.mxu1 %v988_v6 }
 0x10a   : > { %v431_v24 = vpop.permute.xlu1 %430  ;;  %v484_v25 = vpop.permute.xlu0 %483 }
 0x10b   : > { %915 = vmatmul.mubr.msk.bf16.vlgmr.msra.gmra.mrb[4].mxu1 %vm290_vm4, %v431_v24 }
 0x10c   : > { %926 = vmatprep.mubr.msk.bf16.mxu1 %vm991_vm2, %v988_v6 }
 0x10e   : > { %v535_v26 = vpop.permute.xlu1 %534  ;;  %909 = vmatmul.mubr.msk.bf16.vlgmr.msra.gmra.mrb[4].mxu0 %vm290_vm4, %v380_v23  ;;  %v482_v27 = vpop.permute.xlu0 %481 }
 0x10f   : > { %919 = vmatpush3.bf16.msra.mxu0 %v484_v25  ;;  %925 = vmatpush3.bf16.msra.mxu1 %v535_v26 }
 0x110   : > { %920 = vmatprep.mubr.msk.bf16.mxu0 %vm991_vm2, %v988_v6  ;;  %930 = vmatprep.subr.bf16.mxu0 %v988_v6 }
 0x111   : > { %936 = vmatprep.subr.bf16.mxu1 %v988_v6 }
 0x112   : > { %v533_v28 = vpop.permute.xlu1 %532  ;;  %v586_v29 = vpop.permute.xlu0 %585 }
 0x113   : > { %927 = vmatmul.mubr.msk.bf16.vlgmr.msra.gmra.mrb[8].mxu1 %vm290_vm4, %v533_v28  ;;  %v875_v28 = vunpack.c.h.bf16 %v873_v17 }
 0x114   : > { %938 = vmatprep.mubr.msk.bf16.mxu1 %vm991_vm2, %v988_v6 }
 0x116   : > { %v637_v30 = vpop.permute.xlu1 %636  ;;  %921 = vmatmul.mubr.msk.bf16.vlgmr.msra.gmra.mrb[8].mxu0 %vm290_vm4, %v482_v27  ;;  %v584_v31 = vpop.permute.xlu0 %583 }
 0x117   : > { %931 = vmatpush3.bf16.msra.mxu0 %v586_v29  ;;  %937 = vmatpush3.bf16.msra.mxu1 %v637_v30 }
 0x118   : > { %932 = vmatprep.mubr.msk.bf16.mxu0 %vm991_vm2, %v988_v6  ;;  %942 = vmatprep.subr.bf16.mxu0 %v988_v6 }
 0x11a   : > { %v635_v32 = vpop.permute.xlu1 %634  ;;  %v693_v33 = vpop.permute.xlu0 %692 }
 0x11b   : > { %939 = vmatmul.mubr.msk.bf16.vlgmr.msra.gmra.mrb[12].mxu1 %vm290_vm4, %v635_v32 }
 0x11e   : > { %933 = vmatmul.mubr.msk.bf16.vlgmr.msra.gmra.mrb[12].mxu0 %vm290_vm4, %v584_v31 }
 0x11f   : > { %943 = vmatpush3.bf16.msra.mxu0 %v693_v33  ;;  %944 = vmatprep.mubr.msk.bf16.mxu0 %vm991_vm2, %v988_v6 }
 0x126   : > { %945 = vmatmul.mubr.msk.bf16.vlgmr.msra.gmra.mrb[16].mxu0 %vm290_vm4, %v978_v34 }
 0x12b   : > { %v746_v19 = vpop.permute.xlu0 %745  ;;  %v751_v24 = vpop.permute.xlu1 %750 }
 0x168   : > { %v372_v35 = vpop.f32.mrb[0].mxu1 }
 0x169   : > { %v904_v36 = vpop.f32.mrb[1].mxu1 }
 0x16a   : > { %v375_v37 = vpop.f32.mrb[2].mxu1 }
 0x16b   : > { %v905_v38 = vpop.f32.mrb[3].mxu1 }
 0x1d9   : > { %v328_v39 = vpop.f32.mrb[0].mxu0 }
 0x1da   : > { %v373_v40 = vadd.f32 %v372_v35, %v328_v39  ;;  %v898_v41 = vpop.f32.mrb[1].mxu0 }
 0x1db   : > { %v331_v42 = vpop.f32.mrb[2].mxu0 }
 0x1dc   : > { %v376_v43 = vadd.f32 %v375_v37, %v331_v42  ;;  %v899_v44 = vpop.f32.mrb[3].mxu0 }
 0x1de   : > { %v472_v45 = vpop.f32.mrb[4].mxu1 }
 0x1df   : > { %v916_v46 = vpop.f32.mrb[5].mxu1 }
 0x1e0   : > { %v475_v47 = vpop.f32.mrb[6].mxu1 }
 0x1e1   : > { %v421_v48 = vpop.f32.mrb[4].mxu0  ;;  %v917_v49 = vpop.f32.mrb[7].mxu1 }
 0x1e2   : > { %v428_v50 = vadd.f32 %v421_v48, %v373_v40  ;;  %v910_v51 = vpop.f32.mrb[5].mxu0 }
 0x1e3   : > { %v424_v52 = vpop.f32.mrb[6].mxu0 }
 0x1e4   : > { %v479_v53 = vadd.f32 %v472_v45, %v428_v50  ;;  %v429_v54 = vadd.f32 %v424_v52, %v376_v43  ;;  %v911_v55 = vpop.f32.mrb[7].mxu0 }
 0x1e6   : > { %v480_v56 = vadd.f32 %v475_v47, %v429_v54  ;;  %v574_v57 = vpop.f32.mrb[8].mxu1 }
 0x1e7   : > { %v928_v58 = vpop.f32.mrb[9].mxu1 }
 0x1e8   : > { %v577_v59 = vpop.f32.mrb[10].mxu1 }
 0x1e9   : > { %v523_v60 = vpop.f32.mrb[8].mxu0  ;;  %v929_v61 = vpop.f32.mrb[11].mxu1 }
 0x1ea   : > { %v530_v62 = vadd.f32 %v523_v60, %v479_v53  ;;  %v922_v63 = vpop.f32.mrb[9].mxu0 }
 0x1eb   : > { %v526_v0 = vpop.f32.mrb[10].mxu0 }
 0x1ec   : > { %v581_v1 = vadd.f32 %v574_v57, %v530_v62  ;;  %v531_v2 = vadd.f32 %v526_v0, %v480_v56  ;;  %v923_v3 = vpop.f32.mrb[11].mxu0 }
 0x1ee   : > { %v582_v4 = vadd.f32 %v577_v59, %v531_v2  ;;  %v676_v5 = vpop.f32.mrb[12].mxu1 }
 0x1ef   : > { %v940_v6 = vpop.f32.mrb[13].mxu1 }
 0x1f0   : > { %v679_v7 = vpop.f32.mrb[14].mxu1 }
 0x1f1   : > { %v625_v8 = vpop.f32.mrb[12].mxu0  ;;  %v941_v9 = vpop.f32.mrb[15].mxu1 }
 0x1f2   : > { %v632_v10 = vadd.f32 %v625_v8, %v581_v1  ;;  %v934_v11 = vpop.f32.mrb[13].mxu0 }
 0x1f3   : > { %v628_v12 = vpop.f32.mrb[14].mxu0 }
 0x1f4   : > { %v633_v13 = vadd.f32 %v628_v12, %v582_v4  ;;  %v683_v14 = vadd.f32 %v676_v5, %v632_v10  ;;  %v935_v15 = vpop.f32.mrb[15].mxu0 }
 0x1f6   : > { %v684_v16 = vadd.f32 %v679_v7, %v633_v13 }
 0x1f9   : > { %v732_v18 = vpop.f32.mrb[16].mxu0 }
 0x1fa   : > { %v739_v20 = vadd.f32 %v732_v18, %v683_v14  ;;  %v946_v21 = vpop.f32.mrb[17].mxu0 }
 0x1fb   : > { %v735_v23 = vpop.f32.mrb[18].mxu0 }
 0x1fc   : > { %v740_v25 = vadd.f32 %v735_v23, %v684_v16  ;;  %v753_v26 = vadd.f32 %v746_v19, %v739_v20  ;;  %v947_v27 = vpop.f32.mrb[19].mxu0 }
 0x1fe   : > { %v759_v29 = vadd.f32 %v874_v22, %v753_v26  ;;  %v754_v30 = vadd.f32 %v751_v24, %v740_v25 }
 0x200   : > { %v870_v31 = vpack.c.bf16 %v759_v29, %v759_v29  ;;  %v760_v32 = vadd.f32 %v875_v28, %v754_v30 }
 0x202   : > { %770 = vst.msk [vmem:[%s244_s7] sm:$0xf] %vm769_vm5, %v870_v31  ;;  %v871_v33 = vpack.c.bf16 %v760_v32, %v760_v32 }
 0x204   : > { %771 = vst.msk [vmem:[%s244_s7 + $0x4] sm:$0xf] %vm769_vm5, %v871_v33 }
 0x205 PF: > { %s15_s18 = sadd.s32 1, %s985_s18  }
 0x206   : > { %p12_p4 = scmp.ge.s32.totalorder %s15_s18, 4  }
 0x208   :  { %14 = sbr.rel (!%p12_p4) target bundleno = 1 (0x1), region = 73 }

// kernel: rrdb_model_forward.8
= control target key start
LH: loop header
LB: loop body
LE: loop exit
PB: predicated region body
PF: predicated region fallthrough
CT: control target
= control target key end

     0   :  { %s3878_s21 = smov 0   ;;  %s4482_s0 = inlined_call_operand.vmem [shape: bf16[1,100], index: 0, kind: input, shape index: {}]   ;;  %s4483_s1 = inlined_call_operand.vmem [shape: bf16[2,16,100], index: 1, kind: input, shape index: {}]   ;;  %s4484_s2 = inlined_call_operand.vmem [shape: bf16[8,144], index: 2, kind: input, shape index: {}]   ;;  %s4485_s3 = inlined_call_operand.vmem [shape: bf16[8,216], index: 3, kind: input, shape index: {}]   ;;  %s4486_s4 = inlined_call_operand.vmem [shape: bf16[8,288], index: 4, kind: input, shape index: {}]   ;;  %s4487_s5 = inlined_call_operand.vmem [shape: bf16[8,360], index: 5, kind: input, shape index: {}]   ;;  %s4488_s6 = inlined_call_operand.vmem [shape: bf16[16,432], index: 6, kind: input, shape index: {}]   ;;  %s4489_s7 = inlined_call_operand.vmem [shape: f32[8,1], index: 7, kind: input, shape index: {}]   ;;  %s4490_s8 = inlined_call_operand.vmem [shape: f32[8,1], index: 8, kind: input, shape index: {}]   ;;  %s4491_s9 = inlined_call_operand.vmem [shape: f32[8,1], index: 9, kind: input, shape index: {}]   ;;  %s4492_s10 = inlined_call_operand.vmem [shape: f32[8,1], index: 10, kind: input, shape index: {}]   ;;  %s4493_s11 = inlined_call_operand.vmem [shape: f32[16,1], index: 11, kind: input, shape index: {}]   ;;  %s4494_s12 = inlined_call_operand.vmem [shape: bf16[2,16,100], index: 12, kind: output, shape index: {}]  }
   0x1 LB: > { %s3118_s22 = sadd.s32 4294967295, %s3788_s21   ;;  %p3122_p0 = scmp.ge.s32.totalorder %s3788_s21, 1  ;;  %s3788_s21 = sphi %s3878_s21, %s22_s21  }
   0x2   : > { %p362_p1 = scmp.lt.s32.totalorder %s3788_s21, 3 }
   0x4   : > { %p363_p2 = pnand %p3122_p0, %p362_p1 }
   0x5   : > { %p404_p3 = scmp.lt.s32.totalorder (!%p363_p2), %s3118_s22, 1  ;;  %v415_v0 = vld [vmem:[%s4482_s0] sm:$0x1] (!%p363_p2)  ;;  %v430_v1 = vlaneseq (!%p363_p2)  ;;  %vm417_vm0 = vcmask (!%p363_p2), 89088   ;;  %v3790_v3 = vmov (!%p363_p2), 0   ;;  %vm421_vm1 = vcmask (!%p363_p2), 999288  }
   0x6   : > { %366 = sbr.rel (%p363_p2) target bundleno = 2551 (0x9f7), region = 68  ;;  %v416_v2 = vunpack.c.l.bf16 (!%p363_p2), %v415_v0  ;;  %418 = vst.msk [vmem:[#allocation2] sm:$0xff] (!%p363_p2), %vm417_vm0, %v3790_v3  ;;  %419 = vst.msk [vmem:[#allocation2 + $0x8] sm:$0xff] (!%p363_p2), %vm417_vm0, %v3790_v3  ;;  %v451_v4 = vld [vmem:[%s4484_s2] sm:$0xf] (!%p363_p2)  ;;  %3757 = vset.pattern.permute.xlu0 (!%p363_p2), %v3790_v3  ;;  %3758 = vset.pattern.permute.xlu1 (!%p363_p2), %v3790_v3  ;;  %v428_v5 = vpack.i.b16 (!%p363_p2), %v415_v0, %v415_v0  ;;  %v3791_v8 = vmov (!%p363_p2), 0.0  }
   0x7   : > { %420 = vst.msk [vmem:[#allocation2 + $0x10] sm:$0xff] (!%p363_p2), %vm417_vm0, %v3790_v3  ;;  %v431_v6 = vshrl.u32 (!%p363_p2), %v430_v1, 7  ;;  %v3129_v7 = vcombine.low (!%p363_p2), %v451_v4, %v451_v4  ;;  %3354 = vmatprep.subr.bf16.mxu1 (!%p363_p2), %v3791_v8  ;;  %3348 = vmatprep.subr.bf16.mxu0 (!%p363_p2), %v3791_v8  ;;  %s4511_s28 = smov (!%p363_p2), 112   ;;  %s4514_s14 = smov (!%p363_p2), 11   ;;  %vm3794_vm2 = vmmov (!%p363_p2), 0   ;;  %vm448_vm3 = vcmask (!%p363_p2), 908376  }
   0x8   : > { %422 = vst.msk [vmem:[#allocation2] sm:$0xff] (!%p363_p2), %vm421_vm1, %v3790_v3  ;;  %423 = vst.msk [vmem:[#allocation2 + $0x8] sm:$0xff] (!%p363_p2), %vm421_vm1, %v3790_v3  ;;  %3350 = vmatprep.mubr.msk.bf16.mxu0 (!%p363_p2), %vm3794_vm2, %v3791_v8  ;;  %3356 = vmatprep.mubr.msk.bf16.mxu1 (!%p363_p2), %vm3794_vm2, %v3791_v8  ;;  %s3795_s15 = smov (!%p363_p2), 126   ;;  %s3796_s16 = smov (!%p363_p2), 127   ;;  %vm461_vm4 = vcmask (!%p363_p2), 130048   ;;  %v890_v20 = vld [vmem:[%s4489_s7] sm:$0xff] (!%p363_p2) }
   0x9   : > { %424 = vst.msk [vmem:[#allocation2 + $0x10] sm:$0xff] (!%p363_p2), %vm421_vm1, %v3790_v3  ;;  %v432_v9 = vsub.s32 (!%p363_p2), 0, %v431_v6  ;;  %455 = vrot.lane.b32.xlu1 (!%p363_p2), %v3129_v7, %s4511_s28  ;;  %s3797_s17 = smov (!%p363_p2), 118   ;;  %s4496_s18 = smov (!%p363_p2), 96   ;;  %v842_v36 = vld [vmem:[%s4484_s2 + $0x4] sm:$0xf] (!%p363_p2) }
   0xa   : > { %s4504_s19 = smov (!%p363_p2), 80   ;;  %s4509_s20 = smov (!%p363_p2), 117   ;;  %vm910_vm6 = vcmask (!%p363_p2), 904280   ;;  %vm931_vm7 = vcmask (!%p363_p2), 1043456   ;;  %vm927_vm8 = vcmask (!%p363_p2), 195584   ;;  %vm1193_vm9 = vcmask (!%p363_p2), 64512  }
   0xb   : > { %v433_v10 = vrot.slane (!%p363_p2), %v428_v5, %v432_v9  ;;  %v3903_v11 = vrot.slane (!%p363_p2), %v416_v2, %v432_v9  ;;  %s4507_s23 = smov (!%p363_p2), 116   ;;  %s4502_s24 = smov (!%p363_p2), 64   ;;  %vm1430_vm11 = vcmask (!%p363_p2), 908380   ;;  %vm1448_vm12 = vcmask (!%p363_p2), 261120  }
   0xc   : > { %s4498_s25 = smov (!%p363_p2), 48   ;;  %s4515_s26 = smov (!%p363_p2), 108   ;;  %vm1937_vm14 = vcmask (!%p363_p2), 326656   ;;  %vm2498_vm0 = vcmask (!%p363_p2), 392192   ;;  %vm3060_vm1 = vcmask (!%p363_p2), 814080  }
   0xd   : > { %s4538_s22 = smov (!%p404_p3, %s3118_s22), 1  ;;  %v3127_v14 = vcombine.low %v433_v10, %v433_v10  ;;  %s4519_s29 = smov 107  }
   0xe   : > { %s4495_s27 = sshll.u32 %s4538_s22, 3  ;;  %s4512_s30 = smov 32  }
   0xf   : > { %s408_s13 = scalar_lea.vmem %s4483_s1, %s4495_s27  ;;  %s4500_s27 = smov 16  }
  0x10   : > { %v425_v12 = vld [vmem:[%s408_s13] sm:$0xf]  ;;  %v426_v13 = vld [vmem:[%s408_s13 + $0x4] sm:$0xf]  ;;  %s4517_s13 = smov 106  }
  0x11   : > { %v3905_v15 = vmul.bf16 %v3127_v14, %v425_v12  ;;  %v3907_v16 = vmul.bf16 %v3127_v14, %v426_v13 }
  0x13   : > { %v3128_v17 = vcombine.low %v3905_v15, %v3907_v16 }
  0x15   : > { %445 = vrot.lane.b32.xlu0 %v3128_v17, %s4514_s14 }
  0x7b   : > { %v456_v21 = vpop.permute.xlu1 %455 }
  0x87   : > { %v446_v18 = vpop.permute.xlu0 %445 }
  0x88   : > { %449 = vst.msk [vmem:[#allocation2] sm:$0xff] %vm448_vm3, %v446_v18 }
  0x8f   : > { %v3916_v19 = vld [vmem:[#allocation2] sm:$0xff] }
  0x90   : > { %550 = vrot.lane.b32.xlu1 %v3916_v19, %s3795_s15  ;;  %458 = vrot.lane.b32.xlu0 %v3916_v19, %s3796_s16 }
  0x91   : > { %3355 = vmatpush3.bf16.msra.mxu1 %v3916_v19 }
  0x92   : > { %3366 = vmatprep.subr.bf16.mxu1 %v3791_v8 }
  0x94   : > { %599 = vrot.lane.b32.xlu1 %v3916_v19, %s3797_s17  ;;  %548 = vrot.lane.b32.xlu0 %v3129_v7, %s4496_s18  ;;  %s3811_s18 = smov 8  }
  0x95   : > { %3357 = vmatmul.mubr.msk.bf16.vlgmr.msra.gmra.mrb[0].mxu1 %vm461_vm4, %v451_v4 }
  0x96   : > { %3368 = vmatprep.mubr.msk.bf16.mxu1 %vm3794_vm2, %v3791_v8 }
  0x98   : > { %597 = vrot.lane.b32.xlu1 %v3129_v7, %s4504_s19  ;;  %648 = vrot.lane.b32.xlu0 %v3916_v19, %s4509_s20 }
  0x9c   : > { %697 = vrot.lane.b32.xlu1 %v3916_v19, %s4507_s23  ;;  %646 = vrot.lane.b32.xlu0 %v3129_v7, %s4502_s24  ;;  %s4506_s24 = smov 56  }
  0xa0   : > { %695 = vrot.lane.b32.xlu1 %v3129_v7, %s4498_s25  ;;  %746 = vrot.lane.b32.xlu0 %v3916_v19, %s4515_s26  ;;  %s4523_s25 = smov 117  }
  0xa4   : > { %795 = vrot.lane.b32.xlu1 %v3916_v19, %s4519_s29  ;;  %744 = vrot.lane.b32.xlu0 %v3129_v7, %s4512_s30 }
  0xa8   : > { %843 = vrot.lane.b32.xlu0 %v3916_v19, %s4517_s13  ;;  %793 = vrot.lane.b32.xlu1 %v3129_v7, %s4500_s27  ;;  %s4505_s27 = smov 104  }
  0xac   : > { %893 = vperm.xlu0 %3757, %v890_v20  }
  0xb0   : > { %1023 = vrot.lane.b32.xlu0 %v3916_v19, %s3795_s15 }
  0xb4   : > { %1077 = vrot.lane.b32.xlu0 %v3916_v19, %s3797_s17 }
 0x102   : > { %v551_v22 = vpop.permute.xlu1 %550  ;;  %v459_v23 = vpop.permute.xlu0 %458 }
 0x103   : > { %3349 = vmatpush3.bf16.msra.mxu0 %v459_v23 }
 0x104   : > { %3360 = vmatprep.subr.bf16.mxu0 %v3791_v8 }
 0x106   : > { %v600_v24 = vpop.permute.xlu1 %599  ;;  %3351 = vmatmul.mubr.msk.bf16.vlgmr.msra.gmra.mrb[0].mxu0 %vm461_vm4, %v456_v21  ;;  %v549_v25 = vpop.permute.xlu0 %548 }
 0x107   : > { %3361 = vmatpush3.bf16.msra.mxu0 %v551_v22  ;;  %3367 = vmatpush3.bf16.msra.mxu1 %v600_v24 }
 0x108   : > { %3362 = vmatprep.mubr.msk.bf16.mxu0 %vm3794_vm2, %v3791_v8  ;;  %3372 = vmatprep.subr.bf16.mxu0 %v3791_v8 }
 0x109   : > { %3378 = vmatprep.subr.bf16.mxu1 %v3791_v8 }
 0x10a   : > { %v598_v26 = vpop.permute.xlu1 %597  ;;  %v649_v27 = vpop.permute.xlu0 %648 }
 0x10b   : > { %3369 = vmatmul.mubr.msk.bf16.vlgmr.msra.gmra.mrb[4].mxu1 %vm461_vm4, %v598_v26 }
 0x10c   : > { %3380 = vmatprep.mubr.msk.bf16.mxu1 %vm3794_vm2, %v3791_v8 }
 0x10e   : > { %v698_v28 = vpop.permute.xlu1 %697  ;;  %3363 = vmatmul.mubr.msk.bf16.vlgmr.msra.gmra.mrb[4].mxu0 %vm461_vm4, %v549_v25  ;;  %v647_v29 = vpop.permute.xlu0 %646 }
 0x10f   : > { %3373 = vmatpush3.bf16.msra.mxu0 %v649_v27  ;;  %3379 = vmatpush3.bf16.msra.mxu1 %v698_v28  ;;  %v914_v28 = vld [vmem:[%s4485_s3] sm:$0xf] }
 0x110   : > { %3374 = vmatprep.mubr.msk.bf16.mxu0 %vm3794_vm2, %v3791_v8  ;;  %3384 = vmatprep.subr.bf16.mxu0 %v3791_v8 }
 0x111   : > { %3390 = vmatprep.subr.bf16.mxu1 %v3791_v8 }
 0x112   : > { %v696_v30 = vpop.permute.xlu1 %695  ;;  %v747_v31 = vpop.permute.xlu0 %746 }
 0x113   : > { %3381 = vmatmul.mubr.msk.bf16.vlgmr.msra.gmra.mrb[8].mxu1 %vm461_vm4, %v696_v30 }
 0x114   : > { %3392 = vmatprep.mubr.msk.bf16.mxu1 %vm3794_vm2, %v3791_v8 }
 0x116   : > { %v796_v32 = vpop.permute.xlu1 %795  ;;  %3375 = vmatmul.mubr.msk.bf16.vlgmr.msra.gmra.mrb[8].mxu0 %vm461_vm4, %v647_v29  ;;  %v745_v33 = vpop.permute.xlu0 %744  ;;  %v3139_v29 = vcombine.low %v914_v28, %v914_v28 }
 0x117   : > { %3385 = vmatpush3.bf16.msra.mxu0 %v747_v31  ;;  %3391 = vmatpush3.bf16.msra.mxu1 %v796_v32 }
 0x118   : > { %3386 = vmatprep.mubr.msk.bf16.mxu0 %vm3794_vm2, %v3791_v8  ;;  %3396 = vmatprep.subr.bf16.mxu0 %v3791_v8 }
 0x119   : > { %3402 = vmatprep.subr.bf16.mxu1 %v3791_v8 }
 0x11a   : > { %v794_v34 = vpop.permute.xlu1 %793  ;;  %v844_v35 = vpop.permute.xlu0 %843 }
 0x11b   : > { %3393 = vmatmul.mubr.msk.bf16.vlgmr.msra.gmra.mrb[12].mxu1 %vm461_vm4, %v794_v34 }
 0x11c   : > { %3406 = vmatprep.mubr.msk.bf16.mxu1 %vm3794_vm2, %v3791_v8 }
 0x11e   : > { %3387 = vmatmul.mubr.msk.bf16.vlgmr.msra.gmra.mrb[12].mxu0 %vm461_vm4, %v745_v33 }
 0x11f   : > { %3397 = vmatpush3.bf16.msra.mxu0 %v844_v35  ;;  %3398 = vmatprep.mubr.msk.bf16.mxu0 %vm3794_vm2, %v3791_v8  ;;  %v1183_v35 = vld [vmem:[%s4485_s3] sm:$0xff] }
 0x120   : > { %3410 = vmatprep.subr.bf16.mxu0 %v3791_v8 }
 0x126   : > { %3399 = vmatmul.mubr.msk.bf16.vlgmr.msra.gmra.mrb[16].mxu0 %vm461_vm4, %v842_v36  ;;  %v3145_v36 = vcombine.low %v1183_v35, %v1183_v35 }
 0x127   : > { %3411 = vmatpush3.bf16.msra.mxu0 %v3916_v19  ;;  %3414 = vmatprep.mubr.msk.bf16.mxu0 %vm3794_vm2, %v3791_v8 }
 0x128   : > { %3412 = vmatprep.subr.bf16.mxu0 %v3791_v8 }
 0x12b   : > { %v894_v20 = vpop.permute.xlu0 %893 }
 0x12f   : > { %v1024_v32 = vpop.permute.xlu0 %1023 }
 0x168   : > { %v542_v37 = vpop.f32.mrb[0].mxu1 }
 0x169   : > { %v3358_v38 = vpop.f32.mrb[1].mxu1 }
 0x16a   : > { %v545_v39 = vpop.f32.mrb[2].mxu1  ;;  %v3146_v38 = vcombine.high %v1183_v35, %v1183_v35 }
 0x16b   : > { %v3359_v40 = vpop.f32.mrb[3].mxu1  ;;  %v3763_v39 = vld [vmem:[%s4485_s3 + $0x4] ss:$0 sps:$4 sm:$0xff]  }
 0x16c   : > { %v1413_v40 = vld [vmem:[%s4490_s8] sm:$0xff] }
 0x1d9   : > { %v499_v41 = vpop.f32.mrb[0].mxu0 }
 0x1da   : > { %v543_v42 = vadd.f32 %v542_v37, %v499_v41  ;;  %v3352_v43 = vpop.f32.mrb[1].mxu0  ;;  %v1078_v37 = vpop.permute.xlu0 %1077 }
 0x1db   : > { %v502_v44 = vpop.f32.mrb[2].mxu0 }
 0x1dc   : > { %v3353_v45 = vpop.f32.mrb[3].mxu0 }
 0x1de   : > { %v639_v46 = vpop.f32.mrb[4].mxu1 }
 0x1df   : > { %v3370_v47 = vpop.f32.mrb[5].mxu1 }
 0x1e0   : > { %v642_v48 = vpop.f32.mrb[6].mxu1 }
 0x1e1   : > { %v590_v49 = vpop.f32.mrb[4].mxu0  ;;  %v3371_v50 = vpop.f32.mrb[7].mxu1 }
 0x1e2   : > { %v596_v51 = vadd.f32 %v590_v49, %v543_v42  ;;  %v3364_v52 = vpop.f32.mrb[5].mxu0 }
 0x1e3   : > { %v593_v53 = vpop.f32.mrb[6].mxu0 }
 0x1e4   : > { %v645_v54 = vadd.f32 %v639_v46, %v596_v51  ;;  %v3365_v55 = vpop.f32.mrb[7].mxu0 }
 0x1e6   : > { %v737_v56 = vpop.f32.mrb[8].mxu1 }
 0x1e7   : > { %v3382_v57 = vpop.f32.mrb[9].mxu1 }
 0x1e8   : > { %v740_v58 = vpop.f32.mrb[10].mxu1 }
 0x1e9   : > { %v688_v59 = vpop.f32.mrb[8].mxu0  ;;  %v3383_v60 = vpop.f32.mrb[11].mxu1 }
 0x1ea   : > { %v694_v61 = vadd.f32 %v688_v59, %v645_v54  ;;  %v3376_v62 = vpop.f32.mrb[9].mxu0 }
 0x1eb   : > { %v691_v63 = vpop.f32.mrb[10].mxu0 }
 0x1ec   : > { %v743_v0 = vadd.f32 %v737_v56, %v694_v61  ;;  %v3377_v1 = vpop.f32.mrb[11].mxu0 }
 0x1ee   : > { %v835_v2 = vpop.f32.mrb[12].mxu1 }
 0x1ef   : > { %v3394_v3 = vpop.f32.mrb[13].mxu1 }
 0x1f0   : > { %v838_v4 = vpop.f32.mrb[14].mxu1 }
 0x1f1   : > { %v786_v5 = vpop.f32.mrb[12].mxu0  ;;  %v3395_v6 = vpop.f32.mrb[15].mxu1 }
 0x1f2   : > { %v792_v7 = vadd.f32 %v786_v5, %v743_v0  ;;  %v3388_v9 = vpop.f32.mrb[13].mxu0 }
 0x1f3   : > { %v789_v10 = vpop.f32.mrb[14].mxu0 }
 0x1f4   : > { %v841_v12 = vadd.f32 %v835_v2, %v792_v7  ;;  %v3389_v13 = vpop.f32.mrb[15].mxu0 }
 0x1f9   : > { %v883_v14 = vpop.f32.mrb[16].mxu0 }
 0x1fa   : > { %v889_v17 = vadd.f32 %v883_v14, %v841_v12  ;;  %v3400_v18 = vpop.f32.mrb[17].mxu0 }
 0x1fb   : > { %v886_v21 = vpop.f32.mrb[18].mxu0  ;;  %v4095_v18 = vld [vmem:[%s4486_s4] sm:$0xf] }
 0x1fc   : > { %v896_v22 = vadd.f32 %v894_v20, %v889_v17  ;;  %v3401_v23 = vpop.f32.mrb[19].mxu0  ;;  %v3152_v20 = vcombine.low %v4095_v18, %v4095_v18 }
 0x1fe   : > { %vm897_vm5 = vcmp.ge.f32.partialorder %v896_v22, 0.0  ;;  %v898_v24 = vmul.f32 0.2, %v896_v22 }
 0x200   : > { %v899_v25 = vsel %vm897_vm5, %v896_v22, %v898_v24 }
 0x201   : > { %v904_v26 = vmul.f32 %v3903_v11, %v899_v25 }
 0x203   : > { %v905_v27 = vpack.c.bf16 %v904_v26, %v904_v26 }
 0x205   : > { %907 = vrot.lane.b32.xlu1 %v905_v27, %s4514_s14 }
 0x209   : > { %922 = vrot.lane.b32.xlu1 %v3916_v19, %s3796_s16 }
 0x20d   : > { %918 = vrot.lane.b32.xlu1 %v3139_v29, %s4505_s27  ;;  %s4521_s27 = smov 64  }
 0x211   : > { %1021 = vrot.lane.b32.xlu1 %v3139_v29, %s4504_s19  ;;  %s4524_s19 = smov 116  }
 0x215   : > { %1075 = vrot.lane.b32.xlu1 %v3139_v29, %s4506_s24  ;;  %s3812_s24 = smov 88  }
 0x219   : > { %1129 = vrot.lane.b32.xlu1 %v3139_v29, %s4512_s30 }
 0x277   : > { %v908_v30 = vpop.permute.xlu1 %907 }
 0x278   : > { %911 = vst.msk [vmem:[#allocation2 + $0x8] sm:$0xf] %vm910_vm6, %v908_v30 }
 0x27b   : > { %v923_v31 = vpop.permute.xlu1 %922 }
 0x27c   : > { %3403 = vmatpush3.bf16.msra.mxu1 %v923_v31 }
 0x27d   : > { %3404 = vmatprep.subr.bf16.mxu1 %v3791_v8 }
 0x27f   : > { %v913_v33 = vld [vmem:[#allocation2 + $0x8] sm:$0xf]  ;;  %v919_v41 = vpop.permute.xlu1 %918 }
 0x280   : > { %1025 = vrot.lane.b32.xlu1 %v913_v33, %s3795_s15  ;;  %924 = vrot.lane.b32.xlu0 %v913_v33, %s3796_s16  ;;  %v979_v34 = vsel %vm931_vm7, %v913_v33, 0 }
 0x281   : > { %3413 = vmatpush3.bf16.msra.mxu0 %v979_v34 }
 0x282   : > { %3426 = vmatprep.subr.bf16.mxu0 %v3791_v8 }
 0x283   : > { %v1022_v42 = vpop.permute.xlu1 %1021 }
 0x284   : > { %1079 = vrot.lane.b32.xlu1 %v913_v33, %s3797_s17  ;;  %1131 = vrot.lane.b32.xlu0 %v3916_v19, %s4509_s20 }
 0x285   : > { %3415 = vmatmul.mubr.msk.bf16.vlgmr.msra.gmra.mrb[20].mxu0 %vm927_vm8, %v914_v28 }
 0x286   : > { %3427 = vmatpush3.bf16.msra.mxu0 %v1078_v37  ;;  %3430 = vmatprep.mubr.msk.bf16.mxu0 %vm3794_vm2, %v3791_v8 }
 0x287   : > { %3428 = vmatprep.subr.bf16.mxu0 %v3791_v8  ;;  %v1076_v43 = vpop.permute.xlu1 %1075 }
 0x288   : > { %1189 = vrot.lane.b32.xlu1 %v3145_v36, %s3811_s18  ;;  %1195 = vrot.lane.b32.xlu0 %v3916_v19, %s4507_s23 }
 0x28b   : > { %v1130_v44 = vpop.permute.xlu1 %1129 }
 0x28c   : > { %1197 = vrot.lane.b32.xlu1 %v913_v33, %s4507_s23  ;;  %1253 = vrot.lane.b32.xlu0 %v3916_v19, %s4515_s26  ;;  %s4522_s23 = smov 96  }
 0x290   : > { %1307 = vrot.lane.b32.xlu1 %v3916_v19, %s4519_s29  ;;  %1133 = vrot.lane.b32.xlu0 %v913_v33, %s4509_s20  ;;  %s4531_s20 = smov 80  }
 0x294   : > { %1361 = vrot.lane.b32.xlu1 %v3916_v19, %s4517_s13  ;;  %1191 = vrot.lane.b32.xlu0 %v3146_v38, %s3811_s18 }
 0x298   : > { %1363 = vrot.lane.b32.xlu1 %v913_v33, %s4517_s13  ;;  %1255 = vrot.lane.b32.xlu0 %v913_v33, %s4515_s26 }
 0x29c   : > { %1251 = vrot.lane.b32.xlu0 %v3763_v39, %s4511_s28  ;;  %1359 = vrot.lane.b32.xlu1 %v3763_v39, %s4521_s27  ;;  %s4528_s28 = smov 104  }
 0x2a0   : > { %1309 = vrot.lane.b32.xlu0 %v913_v33, %s4519_s29 }
 0x2a4   : > { %1305 = vrot.lane.b32.xlu0 %v3763_v39, %s3812_s24 }
 0x2a8   : > { %1416 = vperm.xlu0 %3757, %v1413_v40  }
 0x2ac   : > { %1442 = vrot.lane.b32.xlu0 %v3916_v19, %s3796_s16 }
 0x2b0   : > { %1438 = vrot.lane.b32.xlu0 %v3152_v20, %s4522_s23 }
 0x2b4   : > { %1535 = vrot.lane.b32.xlu0 %v3152_v20, %s4521_s27 }
 0x2b8   : > { %1587 = vrot.lane.b32.xlu0 %v3152_v20, %s4512_s30 }
 0x2f2   : > { %v925_v45 = vpop.permute.xlu0 %924  ;;  %v1026_v46 = vpop.permute.xlu1 %1025 }
 0x2f3   : > { %v933_v47 = vsel %vm931_vm7, %v925_v45, 0  ;;  %v1032_v53 = vsel %vm931_vm7, %v1026_v46, 0 }
 0x2f4   : > { %3405 = vmatpush3.bf16.msra.mxu1 %v933_v47 }
 0x2f5   : > { %3418 = vmatprep.subr.bf16.mxu1 %v3791_v8 }
 0x2f6   : > { %v1132_v48 = vpop.permute.xlu0 %1131  ;;  %v1080_v49 = vpop.permute.xlu1 %1079 }
 0x2f7   : > { %v1086_v50 = vsel %vm931_vm7, %v1080_v49, 0  ;;  %3407 = vmatmul.mubr.msk.bf16.vlgmr.msra.gmra.mrb[16].mxu1 %vm927_vm8, %v919_v41 }
 0x2f8   : > { %3419 = vmatpush3.bf16.msra.mxu1 %v1024_v32  ;;  %3429 = vmatpush3.bf16.msra.mxu0 %v1086_v50 }
 0x2f9   : > { %3420 = vmatprep.subr.bf16.mxu1 %v3791_v8  ;;  %3442 = vmatprep.subr.bf16.mxu0 %v3791_v8 }
 0x2fa   : > { %v1196_v51 = vpop.permute.xlu0 %1195  ;;  %v1190_v52 = vpop.permute.xlu1 %1189  ;;  %3422 = vmatprep.mubr.msk.bf16.mxu1 %vm3794_vm2, %v3791_v8 }
 0x2fb   : > { %3431 = vmatmul.mubr.msk.bf16.vlgmr.msra.gmra.mrb[24].mxu0 %vm927_vm8, %v1076_v43 }
 0x2fc   : > { %3421 = vmatpush3.bf16.msra.mxu1 %v1032_v53  ;;  %3443 = vmatpush3.bf16.msra.mxu0 %v1196_v51 }
 0x2fd   : > { %3434 = vmatprep.subr.bf16.mxu1 %v3791_v8  ;;  %3444 = vmatprep.subr.bf16.mxu0 %v3791_v8 }
 0x2fe   : > { %v1254_v54 = vpop.permute.xlu0 %1253  ;;  %v1198_v55 = vpop.permute.xlu1 %1197  ;;  %3446 = vmatprep.mubr.msk.bf16.mxu0 %vm3794_vm2, %v3791_v8 }
 0x2ff   : > { %v1204_v56 = vsel %vm931_vm7, %v1198_v55, 0  ;;  %3423 = vmatmul.mubr.msk.bf16.vlgmr.msra.gmra.mrb[20].mxu1 %vm927_vm8, %v1022_v42 }
 0x300   : > { %3435 = vmatpush3.bf16.msra.mxu1 %v1132_v48  ;;  %3445 = vmatpush3.bf16.msra.mxu0 %v1204_v56 }
 0x301   : > { %3436 = vmatprep.subr.bf16.mxu1 %v3791_v8  ;;  %3438 = vmatprep.mubr.msk.bf16.mxu1 %vm3794_vm2, %v3791_v8 }
 0x302   : > { %v1134_v57 = vpop.permute.xlu0 %1133  ;;  %3458 = vmatprep.subr.bf16.mxu0 %v3791_v8  ;;  %v1308_v59 = vpop.permute.xlu1 %1307 }
 0x303   : > { %v1140_v58 = vsel %vm931_vm7, %v1134_v57, 0 }
 0x304   : > { %3437 = vmatpush3.bf16.msra.mxu1 %v1140_v58 }
 0x305   : > { %3450 = vmatprep.subr.bf16.mxu1 %v3791_v8 }
 0x306   : > { %v1192_v60 = vpop.permute.xlu0 %1191  ;;  %v1362_v62 = vpop.permute.xlu1 %1361 }
 0x307   : > { %v1194_v61 = vsel %vm1193_vm9, %v1190_v52, %v1192_v60  ;;  %3439 = vmatmul.mubr.msk.bf16.vlgmr.msra.gmra.mrb[24].mxu1 %vm927_vm8, %v1130_v44 }
 0x308   : > { %3447 = vmatmul.mubr.msk.bf16.vlgmr.msra.gmra.mrb[28].mxu0 %vm927_vm8, %v1194_v61  ;;  %3451 = vmatpush3.bf16.msra.mxu1 %v1254_v54 }
 0x309   : > { %3459 = vmatpush3.bf16.msra.mxu0 %v1308_v59  ;;  %3452 = vmatprep.subr.bf16.mxu1 %v3791_v8 }
 0x30a   : > { %v1256_v63 = vpop.permute.xlu0 %1255  ;;  %3454 = vmatprep.mubr.msk.bf16.mxu1 %vm3794_vm2, %v3791_v8  ;;  %3460 = vmatprep.subr.bf16.mxu0 %v3791_v8  ;;  %v1364_v2 = vpop.permute.xlu1 %1363 }
 0x30b   : > { %v1262_v0 = vsel %vm931_vm7, %v1256_v63, 0  ;;  %3462 = vmatprep.mubr.msk.bf16.mxu0 %vm3794_vm2, %v3791_v8  ;;  %v1370_v4 = vsel %vm931_vm7, %v1364_v2, 0 }
 0x30c   : > { %3453 = vmatpush3.bf16.msra.mxu1 %v1262_v0 }
 0x30d   : > { %3466 = vmatprep.subr.bf16.mxu1 %v3791_v8 }
 0x30e   : > { %v1252_v1 = vpop.permute.xlu0 %1251  ;;  %v1360_v6 = vpop.permute.xlu1 %1359 }
 0x30f   : > { %3455 = vmatmul.mubr.msk.bf16.vlgmr.msra.gmra.mrb[28].mxu1 %vm927_vm8, %v1252_v1 }
 0x310   : > { %3467 = vmatpush3.bf16.msra.mxu1 %v1362_v62  ;;  %3470 = vmatprep.mubr.msk.bf16.mxu1 %vm3794_vm2, %v3791_v8 }
 0x311   : > { %3468 = vmatprep.subr.bf16.mxu1 %v3791_v8 }
 0x312   : > { %v1310_v3 = vpop.permute.xlu0 %1309 }
 0x313   : > { %v1316_v5 = vsel %vm931_vm7, %v1310_v3, 0 }
 0x314   : > { %3461 = vmatpush3.bf16.msra.mxu0 %v1316_v5  ;;  %3469 = vmatpush3.bf16.msra.mxu1 %v1370_v4  ;;  %v1639_v5 = vld [vmem:[%s4486_s4 + $0x4] sm:$0xf] }
 0x315   : > { %3482 = vmatprep.subr.bf16.mxu1 %v3791_v8  ;;  %3474 = vmatprep.subr.bf16.mxu0 %v3791_v8 }
 0x316   : > { %v1306_v7 = vpop.permute.xlu0 %1305 }
 0x317   : > { %3463 = vmatmul.mubr.msk.bf16.vlgmr.msra.gmra.mrb[32].mxu0 %vm927_vm8, %v1306_v7  ;;  %3471 = vmatmul.mubr.msk.bf16.vlgmr.msra.gmra.mrb[32].mxu1 %vm927_vm8, %v1360_v6  ;;  %v3158_v6 = vcombine.low %v1639_v5, %v1639_v5  ;;  %v1900_v7 = vld [vmem:[%s4491_s9] sm:$0xff] }
 0x318   : > { %3483 = vmatpush3.bf16.msra.mxu1 %v3916_v19  ;;  %3478 = vmatprep.mubr.msk.bf16.mxu0 %vm3794_vm2, %v3791_v8 }
 0x319   : > { %3484 = vmatprep.subr.bf16.mxu1 %v3791_v8  ;;  %3486 = vmatprep.mubr.msk.bf16.mxu1 %vm3794_vm2, %v3791_v8 }
 0x327   : > { %v1417_v9 = vpop.permute.xlu0 %1416 }
 0x32b   : > { %v1443_v10 = vpop.permute.xlu0 %1442 }
 0x32c   : > { %3475 = vmatpush3.bf16.msra.mxu0 %v1443_v10 }
 0x32d   : > { %3476 = vmatprep.subr.bf16.mxu0 %v3791_v8 }
 0x358   : > { %v1015_v12 = vpop.f32.mrb[20].mxu0 }
 0x359   : > { %v3416_v13 = vpop.f32.mrb[21].mxu0 }
 0x35a   : > { %v1018_v14 = vpop.f32.mrb[22].mxu0 }
 0x35b   : > { %v3417_v17 = vpop.f32.mrb[23].mxu0 }
 0x3ca   : > { %v969_v21 = vpop.f32.mrb[16].mxu1 }
 0x3cb   : > { %v1016_v22 = vadd.f32 %v1015_v12, %v969_v21  ;;  %v3408_v23 = vpop.f32.mrb[17].mxu1 }
 0x3cc   : > { %v972_v24 = vpop.f32.mrb[18].mxu1 }
 0x3cd   : > { %v3409_v25 = vpop.f32.mrb[19].mxu1 }
 0x3ce   : > { %v1122_v26 = vpop.f32.mrb[24].mxu0 }
 0x3cf   : > { %v3432_v27 = vpop.f32.mrb[25].mxu0 }
 0x3d0   : > { %v1125_v28 = vpop.f32.mrb[26].mxu0 }
 0x3d1   : > { %v3433_v29 = vpop.f32.mrb[27].mxu0 }
 0x3d2   : > { %v1068_v30 = vpop.f32.mrb[20].mxu1 }
 0x3d3   : > { %v1074_v31 = vadd.f32 %v1068_v30, %v1016_v22  ;;  %v3424_v32 = vpop.f32.mrb[21].mxu1 }
 0x3d4   : > { %v1071_v33 = vpop.f32.mrb[22].mxu1 }
 0x3d5   : > { %v3425_v34 = vpop.f32.mrb[23].mxu1  ;;  %v1128_v35 = vadd.f32 %v1122_v26, %v1074_v31  ;;  %v1849_v33 = vld [vmem:[%s4486_s4 + $0x8] sm:$0xf] }
 0x3da   : > { %v1176_v36 = vpop.f32.mrb[24].mxu1 }
 0x3db   : > { %v1182_v37 = vadd.f32 %v1176_v36, %v1128_v35  ;;  %v3440_v38 = vpop.f32.mrb[25].mxu1  ;;  %v1240_v39 = vpop.f32.mrb[28].mxu0 }
 0x3dc   : > { %v1179_v40 = vpop.f32.mrb[26].mxu1  ;;  %v3448_v41 = vpop.f32.mrb[29].mxu0 }
 0x3dd   : > { %v1246_v42 = vadd.f32 %v1240_v39, %v1182_v37  ;;  %v3441_v43 = vpop.f32.mrb[27].mxu1  ;;  %v1243_v44 = vpop.f32.mrb[30].mxu0  ;;  %v4206_v41 = vld [vmem:[%s4487_s5] sm:$0xf] }
 0x3de   : > { %v3449_v45 = vpop.f32.mrb[31].mxu0 }
 0x3e2   : > { %v1298_v46 = vpop.f32.mrb[28].mxu1 }
 0x3e3   : > { %v1304_v47 = vadd.f32 %v1298_v46, %v1246_v42  ;;  %v3456_v48 = vpop.f32.mrb[29].mxu1  ;;  %v3163_v42 = vcombine.low %v4206_v41, %v4206_v41 }
 0x3e4   : > { %v1301_v49 = vpop.f32.mrb[30].mxu1 }
 0x3e5   : > { %v3457_v50 = vpop.f32.mrb[31].mxu1 }
 0x3ea   : > { %v1352_v51 = vpop.f32.mrb[32].mxu0  ;;  %v1406_v52 = vpop.f32.mrb[32].mxu1 }
 0x3eb   : > { %v1358_v53 = vadd.f32 %v1352_v51, %v1304_v47  ;;  %v3464_v54 = vpop.f32.mrb[33].mxu0  ;;  %v3472_v55 = vpop.f32.mrb[33].mxu1 }
 0x3ec   : > { %v1355_v56 = vpop.f32.mrb[34].mxu0  ;;  %v1409_v57 = vpop.f32.mrb[34].mxu1 }
 0x3ed   : > { %v1412_v58 = vadd.f32 %v1406_v52, %v1358_v53  ;;  %v3465_v59 = vpop.f32.mrb[35].mxu0  ;;  %v3473_v60 = vpop.f32.mrb[35].mxu1 }
 0x3ef   : > { %v1419_v61 = vadd.f32 %v1417_v9, %v1412_v58  ;;  %v1439_v9 = vpop.permute.xlu0 %1438 }
 0x3f1   : > { %vm1420_vm10 = vcmp.ge.f32.partialorder %v1419_v61, 0.0  ;;  %v1421_v62 = vmul.f32 0.2, %v1419_v61 }
 0x3f3   : > { %v1422_v63 = vsel %vm1420_vm10, %v1419_v61, %v1421_v62  ;;  %v1536_v10 = vpop.permute.xlu0 %1535 }
 0x3f4   : > { %v1423_v0 = vmul.f32 %v1422_v63, %v3903_v11 }
 0x3f6   : > { %v1424_v1 = vpack.c.bf16 %v1423_v0, %v1423_v0 }
 0x3f7   : > { %v1588_v12 = vpop.permute.xlu0 %1587 }
 0x3f8   : > { %v1426_v2 = vrot.slane %v1424_v1, 4 }
 0x3fa   : > { %1427 = vrot.lane.b32.xlu1 %v1426_v2, %s4514_s14 }
 0x3fe   : > { %1537 = vrot.lane.b32.xlu1 %v3916_v19, %s3795_s15 }
 0x46c   : > { %v1428_v3 = vpop.permute.xlu1 %1427 }
 0x46d   : > { %1431 = vst.msk [vmem:[#allocation2 + $0x8] sm:$0xf0] %vm1430_vm11, %v1428_v3 }
 0x470   : > { %v1538_v13 = vpop.permute.xlu1 %1537 }
 0x474   : > { %v4107_v4 = vld [vmem:[#allocation2 + $0x8] sm:$0xff] }
 0x475   : > { %1539 = vrot.lane.b32.xlu0 %v4107_v4, %s3795_s15  ;;  %1444 = vrot.lane.b32.xlu1 %v4107_v4, %s3796_s16 }
 0x476   : > { %3485 = vmatpush3.bf16.msra.mxu1 %v4107_v4 }
 0x477   : > { %3498 = vmatprep.subr.bf16.mxu1 %v3791_v8 }
 0x479   : > { %1591 = vrot.lane.b32.xlu0 %v4107_v4, %s3797_s17  ;;  %1589 = vrot.lane.b32.xlu1 %v3916_v19, %s3797_s17 }
 0x47a   : > { %3487 = vmatmul.mubr.msk.bf16.vlgmr.msra.gmra.mrb[36].mxu1 %vm1448_vm12, %v4095_v18 }
 0x47b   : > { %3502 = vmatprep.mubr.msk.bf16.mxu1 %vm3794_vm2, %v3791_v8 }
 0x47d   : > { %1747 = vrot.lane.b32.xlu0 %v3916_v19, %s4515_s26  ;;  %1640 = vrot.lane.b32.xlu1 %v3916_v19, %s4523_s25 }
 0x481   : > { %1799 = vrot.lane.b32.xlu0 %v3916_v19, %s4519_s29  ;;  %1695 = vrot.lane.b32.xlu1 %v3916_v19, %s4524_s19 }
 0x485   : > { %1749 = vrot.lane.b32.xlu0 %v4107_v4, %s4515_s26  ;;  %1642 = vrot.lane.b32.xlu1 %v4107_v4, %s4523_s25 }
 0x489   : > { %1850 = vrot.lane.b32.xlu0 %v3916_v19, %s4517_s13  ;;  %1693 = vrot.lane.b32.xlu1 %v3158_v6, %s4522_s23 }
 0x48d   : > { %1852 = vrot.lane.b32.xlu0 %v4107_v4, %s4517_s13  ;;  %1697 = vrot.lane.b32.xlu1 %v4107_v4, %s4524_s19 }
 0x491   : > { %1903 = vperm.xlu0 %3757, %v1900_v7   ;;  %1745 = vrot.lane.b32.xlu1 %v3158_v6, %s4521_s27 }
 0x495   : > { %1929 = vrot.lane.b32.xlu0 %v3916_v19, %s3796_s16  ;;  %1801 = vrot.lane.b32.xlu1 %v4107_v4, %s4519_s29 }
 0x499   : > { %2032 = vrot.lane.b32.xlu0 %v3916_v19, %s3795_s15  ;;  %1797 = vrot.lane.b32.xlu1 %v3158_v6, %s4512_s30  ;;  %s4525_s30 = smov 48  }
 0x49d   : > { %2030 = vrot.lane.b32.xlu0 %v3163_v42, %s4525_s30 }
 0x4e7   : > { %v1540_v14 = vpop.permute.xlu0 %1539  ;;  %v1445_v17 = vpop.permute.xlu1 %1444 }
 0x4e8   : > { %3477 = vmatpush3.bf16.msra.mxu0 %v1445_v17 }
 0x4e9   : > { %3490 = vmatprep.subr.bf16.mxu0 %v3791_v8 }
 0x4eb   : > { %v1592_v18 = vpop.permute.xlu0 %1591  ;;  %3479 = vmatmul.mubr.msk.bf16.vlgmr.msra.gmra.mrb[36].mxu0 %vm1448_vm12, %v1439_v9  ;;  %v1590_v20 = vpop.permute.xlu1 %1589 }
 0x4ec   : > { %3491 = vmatpush3.bf16.msra.mxu0 %v1538_v13  ;;  %3499 = vmatpush3.bf16.msra.mxu1 %v1590_v20 }
 0x4ed   : > { %3492 = vmatprep.subr.bf16.mxu0 %v3791_v8  ;;  %3500 = vmatprep.subr.bf16.mxu1 %v3791_v8 }
 0x4ee   : > { %3494 = vmatprep.mubr.msk.bf16.mxu0 %vm3794_vm2, %v3791_v8 }
 0x4ef   : > { %v1641_v21 = vpop.permute.xlu1 %1640  ;;  %v1748_v22 = vpop.permute.xlu0 %1747 }
 0x4f0   : > { %3493 = vmatpush3.bf16.msra.mxu0 %v1540_v14  ;;  %3501 = vmatpush3.bf16.msra.mxu1 %v1592_v18 }
 0x4f1   : > { %3506 = vmatprep.subr.bf16.mxu0 %v3791_v8  ;;  %3514 = vmatprep.subr.bf16.mxu1 %v3791_v8 }
 0x4f3   : > { %3495 = vmatmul.mubr.msk.bf16.vlgmr.msra.gmra.mrb[40].mxu0 %vm1448_vm12, %v1536_v10  ;;  %3503 = vmatmul.mubr.msk.bf16.vlgmr.msra.gmra.mrb[40].mxu1 %vm1448_vm12, %v1588_v12  ;;  %v1696_v23 = vpop.permute.xlu1 %1695  ;;  %v1800_v24 = vpop.permute.xlu0 %1799 }
 0x4f4   : > { %3507 = vmatpush3.bf16.msra.mxu0 %v1641_v21  ;;  %3515 = vmatpush3.bf16.msra.mxu1 %v1696_v23 }
 0x4f5   : > { %3508 = vmatprep.subr.bf16.mxu0 %v3791_v8  ;;  %3510 = vmatprep.mubr.msk.bf16.mxu0 %vm3794_vm2, %v3791_v8 }
 0x4f6   : > { %3516 = vmatprep.subr.bf16.mxu1 %v3791_v8  ;;  %3518 = vmatprep.mubr.msk.bf16.mxu1 %vm3794_vm2, %v3791_v8 }
 0x4f7   : > { %v1643_v25 = vpop.permute.xlu1 %1642  ;;  %v1750_v27 = vpop.permute.xlu0 %1749 }
 0x4f8   : > { %3509 = vmatpush3.bf16.msra.mxu0 %v1643_v25 }
 0x4f9   : > { %3522 = vmatprep.subr.bf16.mxu0 %v3791_v8 }
 0x4fb   : > { %3511 = vmatmul.mubr.msk.bf16.vlgmr.msra.gmra.mrb[44].mxu0 %vm1448_vm12, %v1639_v5  ;;  %v1694_v26 = vpop.permute.xlu1 %1693  ;;  %v1851_v29 = vpop.permute.xlu0 %1850 }
 0x4fc   : > { %3523 = vmatpush3.bf16.msra.mxu0 %v1748_v22  ;;  %3526 = vmatprep.mubr.msk.bf16.mxu0 %vm3794_vm2, %v3791_v8 }
 0x4fd   : > { %3524 = vmatprep.subr.bf16.mxu0 %v3791_v8 }
 0x4ff   : > { %v1698_v28 = vpop.permute.xlu1 %1697  ;;  %v1853_v32 = vpop.permute.xlu0 %1852 }
 0x500   : > { %3517 = vmatpush3.bf16.msra.mxu1 %v1698_v28  ;;  %3525 = vmatpush3.bf16.msra.mxu0 %v1750_v27 }
 0x501   : > { %3530 = vmatprep.subr.bf16.mxu1 %v3791_v8  ;;  %3538 = vmatprep.subr.bf16.mxu0 %v3791_v8 }
 0x503   : > { %3519 = vmatmul.mubr.msk.bf16.vlgmr.msra.gmra.mrb[44].mxu1 %vm1448_vm12, %v1694_v26  ;;  %v1746_v30 = vpop.permute.xlu1 %1745 }
 0x504   : > { %3527 = vmatmul.mubr.msk.bf16.vlgmr.msra.gmra.mrb[48].mxu0 %vm1448_vm12, %v1746_v30  ;;  %3531 = vmatpush3.bf16.msra.mxu1 %v1800_v24  ;;  %v2087_v30 = vld [vmem:[%s4487_s5] sm:$0xff] }
 0x505   : > { %3539 = vmatpush3.bf16.msra.mxu0 %v1851_v29  ;;  %3532 = vmatprep.subr.bf16.mxu1 %v3791_v8 }
 0x506   : > { %3540 = vmatprep.subr.bf16.mxu0 %v3791_v8  ;;  %3534 = vmatprep.mubr.msk.bf16.mxu1 %vm3794_vm2, %v3791_v8 }
 0x507   : > { %v1802_v31 = vpop.permute.xlu1 %1801  ;;  %3542 = vmatprep.mubr.msk.bf16.mxu0 %vm3794_vm2, %v3791_v8 }
 0x508   : > { %3533 = vmatpush3.bf16.msra.mxu1 %v1802_v31  ;;  %v3168_v31 = vcombine.high %v2087_v30, %v2087_v30 }
 0x509   : > { %3541 = vmatpush3.bf16.msra.mxu0 %v1853_v32  ;;  %3546 = vmatprep.subr.bf16.mxu1 %v3791_v8  ;;  %v3768_v32 = vld [vmem:[%s4487_s5 + $0x4] ss:$0 sps:$4 sm:$0xff]  }
 0x50a   : > { %3556 = vmatprep.subr.bf16.mxu0 %v3791_v8 }
 0x50b   : > { %v1798_v34 = vpop.permute.xlu1 %1797 }
 0x50c   : > { %3535 = vmatmul.mubr.msk.bf16.vlgmr.msra.gmra.mrb[48].mxu1 %vm1448_vm12, %v1798_v34  ;;  %3543 = vmatmul.mubr.msk.bf16.vlgmr.msra.gmra.mrb[52].mxu0 %vm1448_vm12, %v1849_v33 }
 0x50d   : > { %3557 = vmatpush3.bf16.msra.mxu0 %v3916_v19  ;;  %3562 = vmatprep.mubr.msk.bf16.mxu0 %vm3794_vm2, %v3791_v8 }
 0x50e   : > { %3558 = vmatprep.subr.bf16.mxu0 %v3791_v8  ;;  %3552 = vmatprep.mubr.msk.bf16.mxu1 %vm3794_vm2, %v3791_v8 }
 0x510   : > { %v1904_v35 = vpop.permute.xlu0 %1903 }
 0x511   : > { %3559 = vmatpush3.bf16.msra.mxu0 %v4107_v4 }
 0x512   : > { %3560 = vmatprep.subr.bf16.mxu0 %v3791_v8 }
 0x514   : > { %v1930_v36 = vpop.permute.xlu0 %1929 }
 0x515   : > { %3547 = vmatpush3.bf16.msra.mxu1 %v1930_v36 }
 0x516   : > { %3548 = vmatprep.subr.bf16.mxu1 %v3791_v8 }
 0x54d   : > { %v1529_v37 = vpop.f32.mrb[36].mxu1 }
 0x54e   : > { %v3488_v38 = vpop.f32.mrb[37].mxu1 }
 0x54f   : > { %v1532_v39 = vpop.f32.mrb[38].mxu1  ;;  %v3167_v38 = vcombine.low %v2087_v30, %v2087_v30 }
 0x550   : > { %v3489_v40 = vpop.f32.mrb[39].mxu1  ;;  %v2271_v39 = vld [vmem:[%s4487_s5 + $0x4] sm:$0xff] }
 0x5be   : > { %v1486_v43 = vpop.f32.mrb[36].mxu0 }
 0x5bf   : > { %v1530_v44 = vadd.f32 %v1529_v37, %v1486_v43  ;;  %v3480_v45 = vpop.f32.mrb[37].mxu0  ;;  %v3771_v43 = vld [vmem:[%s4487_s5 + $0x8] ss:$0 sps:$4 sm:$0xff]  }
 0x5c0   : > { %v1489_v46 = vpop.f32.mrb[38].mxu0  ;;  %v2456_v45 = vld [vmem:[%s4492_s10] sm:$0xff] }
 0x5c1   : > { %v3481_v47 = vpop.f32.mrb[39].mxu0  ;;  %v4278_v46 = vld [vmem:[#allocation2] sm:$0xff] }
 0x5c6   : > { %v1580_v48 = vpop.f32.mrb[40].mxu0  ;;  %v1632_v49 = vpop.f32.mrb[40].mxu1 }
 0x5c7   : > { %v1586_v50 = vadd.f32 %v1580_v48, %v1530_v44  ;;  %v3496_v51 = vpop.f32.mrb[41].mxu0  ;;  %v3504_v52 = vpop.f32.mrb[41].mxu1  ;;  %v3174_v44 = vcombine.high %v2271_v39, %v2271_v39 }
 0x5c8   : > { %v1583_v53 = vpop.f32.mrb[42].mxu0  ;;  %v1635_v54 = vpop.f32.mrb[42].mxu1 }
 0x5c9   : > { %v1638_v55 = vadd.f32 %v1632_v49, %v1586_v50  ;;  %v3497_v56 = vpop.f32.mrb[43].mxu0  ;;  %v3505_v57 = vpop.f32.mrb[43].mxu1 }
 0x5ca   : > { %v2033_v49 = vpop.permute.xlu0 %2032 }
 0x5ce   : > { %v1683_v58 = vpop.f32.mrb[44].mxu0  ;;  %v2031_v50 = vpop.permute.xlu0 %2030 }
 0x5cf   : > { %v1689_v59 = vadd.f32 %v1683_v58, %v1638_v55  ;;  %v3512_v60 = vpop.f32.mrb[45].mxu0 }
 0x5d0   : > { %v1686_v61 = vpop.f32.mrb[46].mxu0 }
 0x5d1   : > { %v3513_v62 = vpop.f32.mrb[47].mxu0 }
 0x5d6   : > { %v1738_v63 = vpop.f32.mrb[44].mxu1 }
 0x5d7   : > { %v1744_v0 = vadd.f32 %v1738_v63, %v1689_v59  ;;  %v3520_v1 = vpop.f32.mrb[45].mxu1  ;;  %v1790_v2 = vpop.f32.mrb[48].mxu0 }
 0x5d8   : > { %v1741_v3 = vpop.f32.mrb[46].mxu1  ;;  %v3528_v5 = vpop.f32.mrb[49].mxu0 }
 0x5d9   : > { %v1796_v6 = vadd.f32 %v1790_v2, %v1744_v0  ;;  %v3521_v7 = vpop.f32.mrb[47].mxu1  ;;  %v1793_v9 = vpop.f32.mrb[50].mxu0 }
 0x5da   : > { %v3529_v10 = vpop.f32.mrb[51].mxu0 }
 0x5df   : > { %v1842_v12 = vpop.f32.mrb[48].mxu1  ;;  %v1893_v13 = vpop.f32.mrb[52].mxu0 }
 0x5e0   : > { %v1848_v14 = vadd.f32 %v1842_v12, %v1796_v6  ;;  %v3536_v17 = vpop.f32.mrb[49].mxu1  ;;  %v3544_v18 = vpop.f32.mrb[53].mxu0 }
 0x5e1   : > { %v1845_v20 = vpop.f32.mrb[50].mxu1  ;;  %v1896_v21 = vpop.f32.mrb[54].mxu0 }
 0x5e2   : > { %v1899_v22 = vadd.f32 %v1893_v13, %v1848_v14  ;;  %v3537_v23 = vpop.f32.mrb[51].mxu1  ;;  %v3545_v24 = vpop.f32.mrb[55].mxu0 }
 0x5e4   : > { %v1906_v25 = vadd.f32 %v1904_v35, %v1899_v22 }
 0x5e6   : > { %vm1907_vm13 = vcmp.ge.f32.partialorder %v1906_v25, 0.0  ;;  %v1908_v26 = vmul.f32 0.2, %v1906_v25 }
 0x5e8   : > { %v1909_v27 = vsel %vm1907_vm13, %v1906_v25, %v1908_v26 }
 0x5e9   : > { %v1910_v28 = vmul.f32 %v1909_v27, %v3903_v11 }
 0x5eb   : > { %v1911_v29 = vpack.c.bf16 %v1910_v28, %v1910_v28 }
 0x5ed   : > { %1913 = vrot.lane.b32.xlu1 %v1911_v29, %s4514_s14  ;;  %s4526_s14 = smov 56  }
 0x5f1   : > { %1931 = vrot.lane.b32.xlu1 %v4107_v4, %s3796_s16 }
 0x5f5   : > { %1924 = vrot.lane.b32.xlu1 %v3163_v42, %s3812_s24  ;;  %v3173_v42 = vcombine.low %v2271_v39, %v2271_v39  ;;  %s4527_s24 = smov 16  }
 0x5f9   : > { %2034 = vrot.lane.b32.xlu1 %v4107_v4, %s3795_s15 }
 0x5fd   : > { %2098 = vrot.lane.b32.xlu1 %v3916_v19, %s3797_s17 }
 0x601   : > { %2159 = vrot.lane.b32.xlu1 %v3916_v19, %s4523_s25 }
 0x605   : > { %2161 = vrot.lane.b32.xlu1 %v4107_v4, %s4523_s25 }
 0x609   : > { %2095 = vrot.lane.b32.xlu1 %v3168_v31, %s3811_s18 }
 0x60d   : > { %2157 = vrot.lane.b32.xlu1 %v3768_v32, %s4522_s23 }
 0x611   : > { %2218 = vrot.lane.b32.xlu1 %v4107_v4, %s4524_s19 }
 0x65f   : > { %v1914_v19 = vpop.permute.xlu1 %1913 }
 0x660   : > { %1916 = vst.msk [vmem:[#allocation2 + $0x10] sm:$0xf] %vm910_vm6, %v1914_v19 }
 0x663   : > { %v1932_v33 = vpop.permute.xlu1 %1931 }
 0x664   : > { %3549 = vmatpush3.bf16.msra.mxu1 %v1932_v33 }
 0x665   : > { %3550 = vmatprep.subr.bf16.mxu1 %v3791_v8 }
 0x667   : > { %v1925_v34 = vpop.permute.xlu1 %1924  ;;  %v1919_v35 = vld [vmem:[#allocation2 + $0x10] sm:$0xf] }
 0x668   : > { %2163 = vrot.lane.b32.xlu1 %v1919_v35, %s4523_s25  ;;  %1933 = vrot.lane.b32.xlu0 %v1919_v35, %s3796_s16  ;;  %v1988_v36 = vsel %vm931_vm7, %v1919_v35, 0 }
 0x669   : > { %3561 = vmatpush3.bf16.msra.mxu0 %v1988_v36 }
 0x66a   : > { %3576 = vmatprep.subr.bf16.mxu0 %v3791_v8 }
 0x66b   : > { %v2035_v37 = vpop.permute.xlu1 %2034 }
 0x66c   : > { %2214 = vrot.lane.b32.xlu1 %v3768_v32, %s4526_s14  ;;  %2100 = vrot.lane.b32.xlu0 %v4107_v4, %s3797_s17 }
 0x66d   : > { %3563 = vmatmul.mubr.msk.bf16.vlgmr.msra.gmra.mrb[56].mxu0 %vm1937_vm14, %v4206_v41  ;;  %v3781_v41 = vld [vmem:[#allocation2] sm:$0xff] }
 0x66e   : > { %3582 = vmatprep.mubr.msk.bf16.mxu0 %vm3794_vm2, %v3791_v8 }
 0x66f   : > { %v2099_v40 = vpop.permute.xlu1 %2098 }
 0x670   : > { %2220 = vrot.lane.b32.xlu1 %v1919_v35, %s4524_s19  ;;  %2093 = vrot.lane.b32.xlu0 %v3167_v38, %s3811_s18 }
 0x671   : > { %3577 = vmatpush3.bf16.msra.mxu0 %v2099_v40 }
 0x672   : > { %3578 = vmatprep.subr.bf16.mxu0 %v3791_v8 }
 0x673   : > { %v2160_v47 = vpop.permute.xlu1 %2159 }
 0x674   : > { %2277 = vrot.lane.b32.xlu1 %v3173_v42, %s4527_s24  ;;  %2036 = vrot.lane.b32.xlu0 %v1919_v35, %s3795_s15 }
 0x677   : > { %v2162_v48 = vpop.permute.xlu1 %2161 }
 0x678   : > { %2401 = vrot.lane.b32.xlu1 %v3781_v41, %s4517_s13  ;;  %2216 = vrot.lane.b32.xlu0 %v3781_v41, %s4524_s19 }
 0x67b   : > { %v2096_v51 = vpop.permute.xlu1 %2095 }
 0x67c   : > { %2403 = vrot.lane.b32.xlu1 %v4107_v4, %s4517_s13  ;;  %2283 = vrot.lane.b32.xlu0 %v3781_v41, %s4515_s26 }
 0x67f   : > { %v2158_v53 = vpop.permute.xlu1 %2157 }
 0x680   : > { %2405 = vrot.lane.b32.xlu1 %v1919_v35, %s4517_s13  ;;  %2102 = vrot.lane.b32.xlu0 %v1919_v35, %s3797_s17  ;;  %s4530_s13 = smov 11  }
 0x683   : > { %v2219_v56 = vpop.permute.xlu1 %2218 }
 0x684   : > { %2285 = vrot.lane.b32.xlu0 %v4107_v4, %s4515_s26  ;;  %2399 = vrot.lane.b32.xlu1 %v3771_v43, %s4521_s27 }
 0x688   : > { %2344 = vrot.lane.b32.xlu0 %v3781_v41, %s4519_s29 }
 0x68c   : > { %2287 = vrot.lane.b32.xlu0 %v1919_v35, %s4515_s26  ;;  %s4529_s26 = smov 32  }
 0x690   : > { %2279 = vrot.lane.b32.xlu0 %v3174_v44, %s4527_s24 }
 0x694   : > { %2346 = vrot.lane.b32.xlu0 %v4107_v4, %s4519_s29 }
 0x698   : > { %2348 = vrot.lane.b32.xlu0 %v1919_v35, %s4519_s29  ;;  %s4535_s29 = smov 108  }
 0x69c   : > { %2342 = vrot.lane.b32.xlu0 %v3771_v43, %s4528_s28  ;;  %s4532_s28 = smov 112  }
 0x6a0   : > { %2459 = vperm.xlu0 %3757, %v2456_v45  }
 0x6a4   : > { %2489 = vrot.lane.b32.xlu0 %v4278_v46, %s3796_s16 }
 0x6a8   : > { %2603 = vrot.lane.b32.xlu0 %v4278_v46, %s3795_s15 }
 0x6da   : > { %v1934_v52 = vpop.permute.xlu0 %1933  ;;  %v2164_v58 = vpop.permute.xlu1 %2163 }
 0x6db   : > { %v1942_v54 = vsel %vm931_vm7, %v1934_v52, 0  ;;  %v2171_v2 = vsel %vm931_vm7, %v2164_v58, 0 }
 0x6dc   : > { %3551 = vmatpush3.bf16.msra.mxu1 %v1942_v54 }
 0x6dd   : > { %3566 = vmatprep.subr.bf16.mxu1 %v3791_v8 }
 0x6de   : > { %v2101_v55 = vpop.permute.xlu0 %2100  ;;  %v2215_v62 = vpop.permute.xlu1 %2214 }
 0x6df   : > { %3553 = vmatmul.mubr.msk.bf16.vlgmr.msra.gmra.mrb[52].mxu1 %vm1937_vm14, %v1925_v34  ;;  %3579 = vmatpush3.bf16.msra.mxu0 %v2101_v55 }
 0x6e0   : > { %3567 = vmatpush3.bf16.msra.mxu1 %v2033_v49  ;;  %3572 = vmatprep.mubr.msk.bf16.mxu1 %vm3794_vm2, %v3791_v8 }
 0x6e1   : > { %3568 = vmatprep.subr.bf16.mxu1 %v3791_v8  ;;  %3580 = vmatprep.subr.bf16.mxu0 %v3791_v8 }
 0x6e2   : > { %v2094_v57 = vpop.permute.xlu0 %2093  ;;  %v2221_v0 = vpop.permute.xlu1 %2220 }
 0x6e3   : > { %v2097_v5 = vsel %vm1193_vm9, %v2094_v57, %v2096_v51  ;;  %v2228_v13 = vsel %vm931_vm7, %v2221_v0, 0 }
 0x6e4   : > { %3569 = vmatpush3.bf16.msra.mxu1 %v2035_v37 }
 0x6e5   : > { %3570 = vmatprep.subr.bf16.mxu1 %v3791_v8 }
 0x6e6   : > { %v2037_v59 = vpop.permute.xlu0 %2036  ;;  %v2278_v7 = vpop.permute.xlu1 %2277 }
 0x6e7   : > { %v2044_v60 = vsel %vm931_vm7, %v2037_v59, 0 }
 0x6e8   : > { %3571 = vmatpush3.bf16.msra.mxu1 %v2044_v60 }
 0x6e9   : > { %3586 = vmatprep.subr.bf16.mxu1 %v3791_v8 }
 0x6ea   : > { %v2217_v61 = vpop.permute.xlu0 %2216  ;;  %v2402_v10 = vpop.permute.xlu1 %2401 }
 0x6eb   : > { %3573 = vmatmul.mubr.msk.bf16.vlgmr.msra.gmra.mrb[56].mxu1 %vm1937_vm14, %v2031_v50 }
 0x6ec   : > { %3587 = vmatpush3.bf16.msra.mxu1 %v2160_v47  ;;  %3592 = vmatprep.mubr.msk.bf16.mxu1 %vm3794_vm2, %v3791_v8 }
 0x6ed   : > { %3588 = vmatprep.subr.bf16.mxu1 %v3791_v8 }
 0x6ee   : > { %v2284_v63 = vpop.permute.xlu0 %2283  ;;  %v2404_v18 = vpop.permute.xlu1 %2403 }
 0x6f0   : > { %3589 = vmatpush3.bf16.msra.mxu1 %v2162_v48 }
 0x6f1   : > { %3590 = vmatprep.subr.bf16.mxu1 %v3791_v8 }
 0x6f2   : > { %v2103_v1 = vpop.permute.xlu0 %2102  ;;  %v2406_v22 = vpop.permute.xlu1 %2405 }
 0x6f3   : > { %v2110_v3 = vsel %vm931_vm7, %v2103_v1, 0  ;;  %v2413_v25 = vsel %vm931_vm7, %v2406_v22, 0 }
 0x6f4   : > { %3581 = vmatpush3.bf16.msra.mxu0 %v2110_v3  ;;  %3591 = vmatpush3.bf16.msra.mxu1 %v2171_v2 }
 0x6f5   : > { %3596 = vmatprep.subr.bf16.mxu0 %v3791_v8  ;;  %3606 = vmatprep.subr.bf16.mxu1 %v3791_v8 }
 0x6f6   : > { %v2286_v6 = vpop.permute.xlu0 %2285  ;;  %v2400_v26 = vpop.permute.xlu1 %2399 }
 0x6f7   : > { %3583 = vmatmul.mubr.msk.bf16.vlgmr.msra.gmra.mrb[60].mxu0 %vm1937_vm14, %v2097_v5  ;;  %3593 = vmatmul.mubr.msk.bf16.vlgmr.msra.gmra.mrb[60].mxu1 %vm1937_vm14, %v2158_v53 }
 0x6f8   : > { %3597 = vmatpush3.bf16.msra.mxu0 %v2217_v61  ;;  %3607 = vmatpush3.bf16.msra.mxu1 %v2284_v63 }
 0x6f9   : > { %3598 = vmatprep.subr.bf16.mxu0 %v3791_v8  ;;  %3608 = vmatprep.subr.bf16.mxu1 %v3791_v8 }
 0x6fa   : > { %v2345_v9 = vpop.permute.xlu0 %2344  ;;  %3602 = vmatprep.mubr.msk.bf16.mxu0 %vm3794_vm2, %v3791_v8  ;;  %3612 = vmatprep.mubr.msk.bf16.mxu1 %vm3794_vm2, %v3791_v8 }
 0x6fc   : > { %3599 = vmatpush3.bf16.msra.mxu0 %v2219_v56  ;;  %3609 = vmatpush3.bf16.msra.mxu1 %v2286_v6 }
 0x6fd   : > { %3600 = vmatprep.subr.bf16.mxu0 %v3791_v8  ;;  %3610 = vmatprep.subr.bf16.mxu1 %v3791_v8 }
 0x6fe   : > { %v2288_v12 = vpop.permute.xlu0 %2287 }
 0x6ff   : > { %v2295_v14 = vsel %vm931_vm7, %v2288_v12, 0  ;;  %v2587_v12 = vld [vmem:[%s4488_s6] sm:$0xff] }
 0x700   : > { %3601 = vmatpush3.bf16.msra.mxu0 %v2228_v13  ;;  %3611 = vmatpush3.bf16.msra.mxu1 %v2295_v14  ;;  %v2588_v13 = vld [vmem:[%s4488_s6 + $0x10] sm:$0xff] }
 0x701   : > { %3616 = vmatprep.subr.bf16.mxu0 %v3791_v8  ;;  %3626 = vmatprep.subr.bf16.mxu1 %v3791_v8 }
 0x702   : > { %v2280_v17 = vpop.permute.xlu0 %2279 }
 0x703   : > { %v2282_v20 = vsel %vm461_vm4, %v2278_v7, %v2280_v17  ;;  %3603 = vmatmul.mubr.msk.bf16.vlgmr.msra.gmra.mrb[64].mxu0 %vm1937_vm14, %v2215_v62 }
 0x704   : > { %3613 = vmatmul.mubr.msk.bf16.vlgmr.msra.gmra.mrb[64].mxu1 %vm1937_vm14, %v2282_v20  ;;  %3617 = vmatpush3.bf16.msra.mxu0 %v2345_v9 }
 0x705   : > { %3627 = vmatpush3.bf16.msra.mxu1 %v2402_v10  ;;  %3618 = vmatprep.subr.bf16.mxu0 %v3791_v8 }
 0x706   : > { %v2347_v21 = vpop.permute.xlu0 %2346  ;;  %3628 = vmatprep.subr.bf16.mxu1 %v3791_v8  ;;  %3622 = vmatprep.mubr.msk.bf16.mxu0 %vm3794_vm2, %v3791_v8 }
 0x707   : > { %3632 = vmatprep.mubr.msk.bf16.mxu1 %vm3794_vm2, %v3791_v8 }
 0x708   : > { %3619 = vmatpush3.bf16.msra.mxu0 %v2347_v21 }
 0x709   : > { %3629 = vmatpush3.bf16.msra.mxu1 %v2404_v18  ;;  %3620 = vmatprep.subr.bf16.mxu0 %v3791_v8  ;;  %v3182_v18 = vcombine.low %v2587_v12, %v2588_v13 }
 0x70a   : > { %v2349_v23 = vpop.permute.xlu0 %2348  ;;  %3630 = vmatprep.subr.bf16.mxu1 %v3791_v8 }
 0x70b   : > { %v2356_v24 = vsel %vm931_vm7, %v2349_v23, 0  ;;  %2597 = vrot.lane.b32.xlu0 %v3182_v18, %s4529_s26 }
 0x70c   : > { %3621 = vmatpush3.bf16.msra.mxu0 %v2356_v24 }
 0x70d   : > { %3631 = vmatpush3.bf16.msra.mxu1 %v2413_v25  ;;  %3636 = vmatprep.subr.bf16.mxu0 %v3791_v8  ;;  %v3772_v25 = vld [vmem:[%s4488_s6] ss:$16 sps:$4 sm:$0xff]  }
 0x70e   : > { %v2343_v27 = vpop.permute.xlu0 %2342  ;;  %3646 = vmatprep.subr.bf16.mxu1 %v3791_v8 }
 0x70f   : > { %3623 = vmatmul.mubr.msk.bf16.vlgmr.msra.gmra.mrb[68].mxu0 %vm1937_vm14, %v2343_v27 }
 0x710   : > { %3633 = vmatmul.mubr.msk.bf16.vlgmr.msra.gmra.mrb[68].mxu1 %vm1937_vm14, %v2400_v26  ;;  %3642 = vmatprep.mubr.msk.bf16.mxu0 %vm3794_vm2, %v3791_v8  ;;  %v3775_v26 = vld [vmem:[%s4488_s6 + $0x4] ss:$16 sps:$4 sm:$0xff]  }
 0x711   : > { %3647 = vmatpush3.bf16.msra.mxu1 %v4278_v46  ;;  %3652 = vmatprep.mubr.msk.bf16.mxu1 %vm3794_vm2, %v3791_v8 }
 0x712   : > { %3648 = vmatprep.subr.bf16.mxu1 %v3791_v8 }
 0x715   : > { %3649 = vmatpush3.bf16.msra.mxu1 %v4107_v4 }
 0x716   : > { %3650 = vmatprep.subr.bf16.mxu1 %v3791_v8 }
 0x71f   : > { %v2460_v28 = vpop.permute.xlu0 %2459 }
 0x723   : > { %v2490_v29 = vpop.permute.xlu0 %2489 }
 0x724   : > { %3637 = vmatpush3.bf16.msra.mxu0 %v2490_v29 }
 0x725   : > { %3638 = vmatprep.subr.bf16.mxu0 %v3791_v8 }
 0x740   : > { %v2024_v30 = vpop.f32.mrb[56].mxu0 }
 0x741   : > { %v3564_v31 = vpop.f32.mrb[57].mxu0 }
 0x742   : > { %v2027_v32 = vpop.f32.mrb[58].mxu0 }
 0x743   : > { %v3565_v19 = vpop.f32.mrb[59].mxu0  ;;  %v3776_v32 = vld [vmem:[%s4488_s6 + $0x4] ss:$16 sps:$4 sm:$0xff]  }
 0x7b2   : > { %v1978_v33 = vpop.f32.mrb[52].mxu1 }
 0x7b3   : > { %v2025_v34 = vadd.f32 %v2024_v30, %v1978_v33  ;;  %v3554_v35 = vpop.f32.mrb[53].mxu1 }
 0x7b4   : > { %v1981_v36 = vpop.f32.mrb[54].mxu1  ;;  %v3778_v35 = vld [vmem:[%s4488_s6 + $0x8] ss:$16 sps:$4 sm:$0xff]  }
 0x7b5   : > { %v3555_v37 = vpop.f32.mrb[55].mxu1  ;;  %v3033_v36 = vld [vmem:[%s4493_s11 + $0x8] sm:$0xff] }
 0x7b6   : > { %v3032_v37 = vld [vmem:[%s4493_s11] sm:$0xff] }
 0x7be   : > { %v2080_v38 = vpop.f32.mrb[56].mxu1 }
 0x7bf   : > { %v2086_v39 = vadd.f32 %v2080_v38, %v2025_v34  ;;  %v3574_v40 = vpop.f32.mrb[57].mxu1 }
 0x7c0   : > { %v2083_v42 = vpop.f32.mrb[58].mxu1 }
 0x7c1   : > { %v3575_v41 = vpop.f32.mrb[59].mxu1 }
 0x7ca   : > { %v2146_v43 = vpop.f32.mrb[60].mxu0  ;;  %v2207_v44 = vpop.f32.mrb[60].mxu1 }
 0x7cb   : > { %v2152_v45 = vadd.f32 %v2146_v43, %v2086_v39  ;;  %v3584_v47 = vpop.f32.mrb[61].mxu0  ;;  %v3594_v48 = vpop.f32.mrb[61].mxu1 }
 0x7cc   : > { %v2149_v49 = vpop.f32.mrb[62].mxu0  ;;  %v2210_v50 = vpop.f32.mrb[62].mxu1 }
 0x7cd   : > { %v2213_v51 = vadd.f32 %v2207_v44, %v2152_v45  ;;  %v3585_v52 = vpop.f32.mrb[63].mxu0  ;;  %v3595_v53 = vpop.f32.mrb[63].mxu1 }
 0x7ce   : > { %v2604_v39 = vpop.permute.xlu0 %2603 }
 0x7d2   : > { %v2598_v40 = vpop.permute.xlu0 %2597 }
 0x7d6   : > { %v2264_v54 = vpop.f32.mrb[64].mxu0 }
 0x7d7   : > { %v2270_v55 = vadd.f32 %v2264_v54, %v2213_v51  ;;  %v3604_v56 = vpop.f32.mrb[65].mxu0  ;;  %v2331_v57 = vpop.f32.mrb[64].mxu1 }
 0x7d8   : > { %v2267_v58 = vpop.f32.mrb[66].mxu0  ;;  %v3614_v59 = vpop.f32.mrb[65].mxu1 }
 0x7d9   : > { %v2337_v60 = vadd.f32 %v2331_v57, %v2270_v55  ;;  %v3605_v61 = vpop.f32.mrb[67].mxu0  ;;  %v2334_v62 = vpop.f32.mrb[66].mxu1 }
 0x7da   : > { %v3615_v63 = vpop.f32.mrb[67].mxu1 }
 0x7e2   : > { %v2392_v0 = vpop.f32.mrb[68].mxu0 }
 0x7e3   : > { %v2398_v1 = vadd.f32 %v2392_v0, %v2337_v60  ;;  %v2449_v2 = vpop.f32.mrb[68].mxu1  ;;  %v3624_v3 = vpop.f32.mrb[69].mxu0 }
 0x7e4   : > { %v3634_v5 = vpop.f32.mrb[69].mxu1  ;;  %v2395_v6 = vpop.f32.mrb[70].mxu0 }
 0x7e5   : > { %v2455_v7 = vadd.f32 %v2449_v2, %v2398_v1  ;;  %v2452_v9 = vpop.f32.mrb[70].mxu1  ;;  %v3625_v10 = vpop.f32.mrb[71].mxu0  ;;  %v3780_v1 = vld [vmem:[%s4488_s6 + $0xc] ss:$16 sps:$4 sm:$0xff]  }
 0x7e6   : > { %v3635_v14 = vpop.f32.mrb[71].mxu1 }
 0x7e7   : > { %v2462_v17 = vadd.f32 %v2460_v28, %v2455_v7 }
 0x7e9   : > { %vm2463_vm15 = vcmp.ge.f32.partialorder %v2462_v17, 0.0  ;;  %v2464_v20 = vmul.f32 0.2, %v2462_v17 }
 0x7eb   : > { %v2465_v21 = vsel %vm2463_vm15, %v2462_v17, %v2464_v20 }
 0x7ec   : > { %v2466_v22 = vmul.f32 %v2465_v21, %v3903_v11  ;;  %v3773_v11 = vld [vmem:[%s4488_s6 + $0x4] ss:$16 sps:$4 sm:$0xff]  }
 0x7ee   : > { %v2467_v23 = vpack.c.bf16 %v2466_v22, %v2466_v22 }
 0x7f0   : > { %v2469_v24 = vrot.slane %v2467_v23, 4 }
 0x7f2   : > { %2470 = vrot.lane.b32.xlu1 %v2469_v24, %s4530_s13 }
 0x7f6   : > { %2491 = vrot.lane.b32.xlu1 %v4107_v4, %s3796_s16 }
 0x7fa   : > { %2484 = vrot.lane.b32.xlu1 %v3772_v25, %s4531_s20 }
 0x7fe   : > { %2605 = vrot.lane.b32.xlu1 %v4107_v4, %s3795_s15 }
 0x802   : > { %2667 = vrot.lane.b32.xlu1 %v4278_v46, %s3797_s17 }
 0x806   : > { %2599 = vrot.lane.b32.xlu1 %v3773_v11, %s4529_s26 }
 0x80a   : > { %2669 = vrot.lane.b32.xlu1 %v4107_v4, %s3797_s17 }
 0x80e   : > { %2665 = vrot.lane.b32.xlu1 %v3775_v26, %s4532_s28  ;;  %s4536_s28 = sshll.u32 %s4538_s22, 3 }
 0x812   : > { %2722 = vrot.lane.b32.xlu1 %v3775_v26, %s4521_s27 }
 0x864   : > { %v2471_v27 = vpop.permute.xlu1 %2470 }
 0x865   : > { %2473 = vst.msk [vmem:[#allocation2 + $0x10] sm:$0xf0] %vm1430_vm11, %v2471_v27 }
 0x868   : > { %v2492_v28 = vpop.permute.xlu1 %2491 }
 0x869   : > { %3639 = vmatpush3.bf16.msra.mxu0 %v2492_v28 }
 0x86a   : > { %3640 = vmatprep.subr.bf16.mxu0 %v3791_v8 }
 0x86c   : > { %v2485_v29 = vpop.permute.xlu1 %2484  ;;  %v2476_v30 = vld [vmem:[#allocation2 + $0x10] sm:$0xff] }
 0x86d   : > { %2671 = vrot.lane.b32.xlu1 %v2476_v30, %s3797_s17  ;;  %2493 = vrot.lane.b32.xlu0 %v2476_v30, %s3796_s16  ;;  %s4533_s16 = smov 107   ;;  %s4534_s17 = smov 106  }
 0x86e   : > { %3651 = vmatpush3.bf16.msra.mxu1 %v2476_v30 }
 0x86f   : > { %3666 = vmatprep.subr.bf16.mxu1 %v3791_v8 }
 0x870   : > { %v2606_v31 = vpop.permute.xlu1 %2605 }
 0x871   : > { %2796 = vrot.lane.b32.xlu1 %v4107_v4, %s4524_s19  ;;  %2724 = vrot.lane.b32.xlu0 %v4278_v46, %s4523_s25 }
 0x872   : > { %3653 = vmatmul.mubr.msk.bf16.vlgmr.msra.gmra.mrb[72].mxu1 %vm2498_vm0, %v3772_v25 }
 0x873   : > { %3672 = vmatprep.mubr.msk.bf16.mxu1 %vm3794_vm2, %v3791_v8 }
 0x874   : > { %v2668_v19 = vpop.permute.xlu1 %2667 }
 0x875   : > { %2789 = vrot.lane.b32.xlu1 %v3776_v32, %s4527_s24  ;;  %2726 = vrot.lane.b32.xlu0 %v4107_v4, %s4523_s25 }
 0x876   : > { %3667 = vmatpush3.bf16.msra.mxu1 %v2668_v19 }
 0x877   : > { %3668 = vmatprep.subr.bf16.mxu1 %v3791_v8 }
 0x878   : > { %v2600_v33 = vpop.permute.xlu1 %2599 }
 0x879   : > { %2798 = vrot.lane.b32.xlu1 %v2476_v30, %s4524_s19  ;;  %2607 = vrot.lane.b32.xlu0 %v2476_v30, %s3795_s15  ;;  %v2602_v48 = vsel %vm1448_vm12, %v2598_v40, %v2600_v33 }
 0x87c   : > { %v2670_v34 = vpop.permute.xlu1 %2669 }
 0x87d   : > { %2915 = vrot.lane.b32.xlu1 %v4278_v46, %s4533_s16  ;;  %2794 = vrot.lane.b32.xlu0 %v4278_v46, %s4524_s19 }
 0x87e   : > { %3669 = vmatpush3.bf16.msra.mxu1 %v2670_v34 }
 0x87f   : > { %3670 = vmatprep.subr.bf16.mxu1 %v3791_v8 }
 0x880   : > { %v2666_v38 = vpop.permute.xlu1 %2665 }
 0x881   : > { %2977 = vrot.lane.b32.xlu1 %v4278_v46, %s4534_s17  ;;  %2858 = vrot.lane.b32.xlu0 %v4278_v46, %s4535_s29  ;;  %v3779_v46 = vld [vmem:[%s4488_s6 + $0x8] ss:$16 sps:$4 sm:$0xff]  }
 0x884   : > { %v2723_v42 = vpop.permute.xlu1 %2722 }
 0x885   : > { %2979 = vrot.lane.b32.xlu1 %v4107_v4, %s4534_s17  ;;  %2728 = vrot.lane.b32.xlu0 %v2476_v30, %s4523_s25 }
 0x889   : > { %2981 = vrot.lane.b32.xlu1 %v2476_v30, %s4534_s17  ;;  %2860 = vrot.lane.b32.xlu0 %v4107_v4, %s4535_s29 }
 0x88d   : > { %2791 = vrot.lane.b32.xlu0 %v3778_v35, %s4527_s24  ;;  %3036 = vperm.xlu1 %3758, %v3032_v37  }
 0x891   : > { %2862 = vrot.lane.b32.xlu0 %v2476_v30, %s4535_s29 }
 0x895   : > { %2856 = vrot.lane.b32.xlu0 %v3779_v46, %s4522_s23 }
 0x899   : > { %2917 = vrot.lane.b32.xlu0 %v4107_v4, %s4533_s16 }
 0x89d   : > { %2919 = vrot.lane.b32.xlu0 %v2476_v30, %s4533_s16  ;;  %s413_s16 = scalar_lea.vmem %s4494_s12, %s4536_s28 }
 0x8a1   : > { %2913 = vrot.lane.b32.xlu0 %v3779_v46, %s4525_s30 }
 0x8a5   : > { %3041 = vperm.xlu0 %3757, %v3033_v36  }
 0x8df   : > { %v2494_v41 = vpop.permute.xlu0 %2493  ;;  %v2672_v4 = vpop.permute.xlu1 %2671 }
 0x8e0   : > { %3641 = vmatpush3.bf16.msra.mxu0 %v2494_v41  ;;  %3671 = vmatpush3.bf16.msra.mxu1 %v2672_v4 }
 0x8e1   : > { %3656 = vmatprep.subr.bf16.mxu0 %v3791_v8  ;;  %3686 = vmatprep.subr.bf16.mxu1 %v3791_v8 }
 0x8e3   : > { %v2725_v43 = vpop.permute.xlu0 %2724  ;;  %3643 = vmatmul.mubr.msk.bf16.vlgmr.msra.gmra.mrb[72].mxu0 %vm2498_vm0, %v2485_v29  ;;  %3673 = vmatmul.mubr.msk.bf16.vlgmr.msra.gmra.mrb[76].mxu1 %vm2498_vm0, %v2666_v38  ;;  %v2797_v45 = vpop.permute.xlu1 %2796 }
 0x8e4   : > { %3657 = vmatpush3.bf16.msra.mxu0 %v2604_v39  ;;  %3662 = vmatprep.mubr.msk.bf16.mxu0 %vm3794_vm2, %v3791_v8 }
 0x8e5   : > { %3658 = vmatprep.subr.bf16.mxu0 %v3791_v8  ;;  %3692 = vmatprep.mubr.msk.bf16.mxu1 %vm3794_vm2, %v3791_v8 }
 0x8e7   : > { %v2727_v44 = vpop.permute.xlu0 %2726  ;;  %v2790_v50 = vpop.permute.xlu1 %2789 }
 0x8e8   : > { %3659 = vmatpush3.bf16.msra.mxu0 %v2606_v31 }
 0x8e9   : > { %3660 = vmatprep.subr.bf16.mxu0 %v3791_v8 }
 0x8eb   : > { %v2608_v47 = vpop.permute.xlu0 %2607  ;;  %v2799_v52 = vpop.permute.xlu1 %2798 }
 0x8ec   : > { %3661 = vmatpush3.bf16.msra.mxu0 %v2608_v47 }
 0x8ed   : > { %3676 = vmatprep.subr.bf16.mxu0 %v3791_v8 }
 0x8ef   : > { %v2795_v49 = vpop.permute.xlu0 %2794  ;;  %3663 = vmatmul.mubr.msk.bf16.vlgmr.msra.gmra.mrb[76].mxu0 %vm2498_vm0, %v2602_v48  ;;  %v2916_v55 = vpop.permute.xlu1 %2915 }
 0x8f0   : > { %3677 = vmatpush3.bf16.msra.mxu0 %v2725_v43  ;;  %3687 = vmatpush3.bf16.msra.mxu1 %v2795_v49 }
 0x8f1   : > { %3678 = vmatprep.subr.bf16.mxu0 %v3791_v8  ;;  %3688 = vmatprep.subr.bf16.mxu1 %v3791_v8 }
 0x8f2   : > { %3682 = vmatprep.mubr.msk.bf16.mxu0 %vm3794_vm2, %v3791_v8 }
 0x8f3   : > { %v2859_v51 = vpop.permute.xlu0 %2858  ;;  %v2978_v59 = vpop.permute.xlu1 %2977 }
 0x8f4   : > { %3679 = vmatpush3.bf16.msra.mxu0 %v2727_v44  ;;  %3689 = vmatpush3.bf16.msra.mxu1 %v2797_v45 }
 0x8f5   : > { %3680 = vmatprep.subr.bf16.mxu0 %v3791_v8  ;;  %3690 = vmatprep.subr.bf16.mxu1 %v3791_v8 }
 0x8f7   : > { %v2729_v53 = vpop.permute.xlu0 %2728  ;;  %v2980_v61 = vpop.permute.xlu1 %2979 }
 0x8f8   : > { %3681 = vmatpush3.bf16.msra.mxu0 %v2729_v53  ;;  %3691 = vmatpush3.bf16.msra.mxu1 %v2799_v52 }
 0x8f9   : > { %3696 = vmatprep.subr.bf16.mxu0 %v3791_v8  ;;  %3706 = vmatprep.subr.bf16.mxu1 %v3791_v8 }
 0x8fb   : > { %v2861_v54 = vpop.permute.xlu0 %2860  ;;  %3683 = vmatmul.mubr.msk.bf16.vlgmr.msra.gmra.mrb[80].mxu0 %vm2498_vm0, %v2723_v42  ;;  %v2982_v0 = vpop.permute.xlu1 %2981 }
 0x8fc   : > { %3697 = vmatpush3.bf16.msra.mxu0 %v2859_v51  ;;  %3702 = vmatprep.mubr.msk.bf16.mxu0 %vm3794_vm2, %v3791_v8 }
 0x8fd   : > { %3698 = vmatprep.subr.bf16.mxu0 %v3791_v8 }
 0x8ff   : > { %v2792_v56 = vpop.permute.xlu0 %2791 }
 0x900   : > { %v2793_v57 = vsel %vm461_vm4, %v2790_v50, %v2792_v56  ;;  %3699 = vmatpush3.bf16.msra.mxu0 %v2861_v54 }
 0x901   : > { %3693 = vmatmul.mubr.msk.bf16.vlgmr.msra.gmra.mrb[80].mxu1 %vm2498_vm0, %v2793_v57  ;;  %3700 = vmatprep.subr.bf16.mxu0 %v3791_v8 }
 0x902   : > { %3707 = vmatpush3.bf16.msra.mxu1 %v2916_v55  ;;  %3712 = vmatprep.mubr.msk.bf16.mxu1 %vm3794_vm2, %v3791_v8 }
 0x903   : > { %v2863_v58 = vpop.permute.xlu0 %2862  ;;  %3708 = vmatprep.subr.bf16.mxu1 %v3791_v8 }
 0x904   : > { %3701 = vmatpush3.bf16.msra.mxu0 %v2863_v58  ;;  %v3048_v58 = vunpack.c.l.bf16 %v3905_v15 }
 0x905   : > { %3716 = vmatprep.subr.bf16.mxu0 %v3791_v8 }
 0x907   : > { %v2857_v60 = vpop.permute.xlu0 %2856 }
 0x908   : > { %3703 = vmatmul.mubr.msk.bf16.vlgmr.msra.gmra.mrb[84].mxu0 %vm2498_vm0, %v2857_v60 }
 0x909   : > { %3717 = vmatpush3.bf16.msra.mxu0 %v2978_v59  ;;  %3722 = vmatprep.mubr.msk.bf16.mxu0 %vm3794_vm2, %v3791_v8 }
 0x90a   : > { %3718 = vmatprep.subr.bf16.mxu0 %v3791_v8 }
 0x90b   : > { %v2918_v62 = vpop.permute.xlu0 %2917 }
 0x90c   : > { %3709 = vmatpush3.bf16.msra.mxu1 %v2918_v62  ;;  %v3037_v44 = vpop.permute.xlu1 %3036 }
 0x90d   : > { %3719 = vmatpush3.bf16.msra.mxu0 %v2980_v61  ;;  %3710 = vmatprep.subr.bf16.mxu1 %v3791_v8  ;;  %v3049_v61 = vunpack.c.l.bf16 %v3907_v16 }
 0x90e   : > { %3720 = vmatprep.subr.bf16.mxu0 %v3791_v8 }
 0x90f   : > { %v2920_v63 = vpop.permute.xlu0 %2919 }
 0x910   : > { %3711 = vmatpush3.bf16.msra.mxu1 %v2920_v63 }
 0x911   : > { %3721 = vmatpush3.bf16.msra.mxu0 %v2982_v0 }
 0x913   : > { %v2914_v2 = vpop.permute.xlu0 %2913 }
 0x914   : > { %3713 = vmatmul.mubr.msk.bf16.vlgmr.msra.gmra.mrb[84].mxu1 %vm2498_vm0, %v2914_v2  ;;  %3723 = vmatmul.mubr.msk.bf16.vlgmr.msra.gmra.mrb[88].mxu0 %vm2498_vm0, %v3780_v1 }
 0x924   : > { %v3042_v60 = vpop.permute.xlu0 %3041 }
 0x945   : > { %v2580_v3 = vpop.f32.mrb[72].mxu1 }
 0x946   : > { %v3654_v5 = vpop.f32.mrb[73].mxu1 }
 0x947   : > { %v2583_v6 = vpop.f32.mrb[74].mxu1 }
 0x948   : > { %v3655_v7 = vpop.f32.mrb[75].mxu1 }
 0x9b6   : > { %v2536_v9 = vpop.f32.mrb[72].mxu0  ;;  %v2713_v10 = vpop.f32.mrb[76].mxu1 }
 0x9b7   : > { %v2581_v8 = vadd.f32 %v2580_v3, %v2536_v9  ;;  %v3644_v12 = vpop.f32.mrb[73].mxu0  ;;  %v3674_v13 = vpop.f32.mrb[77].mxu1 }
 0x9b8   : > { %v2539_v14 = vpop.f32.mrb[74].mxu0  ;;  %v2716_v17 = vpop.f32.mrb[78].mxu1 }
 0x9b9   : > { %v2584_v18 = vadd.f32 %v2583_v6, %v2539_v14  ;;  %v3645_v20 = vpop.f32.mrb[75].mxu0  ;;  %v3675_v21 = vpop.f32.mrb[79].mxu1 }
 0x9c2   : > { %v2649_v22 = vpop.f32.mrb[76].mxu0 }
 0x9c3   : > { %v2656_v23 = vadd.f32 %v2649_v22, %v2581_v8  ;;  %v3664_v24 = vpop.f32.mrb[77].mxu0 }
 0x9c4   : > { %v2652_v25 = vpop.f32.mrb[78].mxu0 }
 0x9c5   : > { %v2657_v11 = vadd.f32 %v2652_v25, %v2584_v18  ;;  %v3665_v26 = vpop.f32.mrb[79].mxu0  ;;  %v2720_v27 = vadd.f32 %v2713_v10, %v2656_v23 }
 0x9c7   : > { %v2721_v28 = vadd.f32 %v2716_v17, %v2657_v11 }
 0x9ce   : > { %v2770_v29 = vpop.f32.mrb[80].mxu0 }
 0x9cf   : > { %v2777_v30 = vadd.f32 %v2770_v29, %v2720_v27  ;;  %v3684_v31 = vpop.f32.mrb[81].mxu0 }
 0x9d0   : > { %v2773_v32 = vpop.f32.mrb[82].mxu0 }
 0x9d1   : > { %v2778_v19 = vadd.f32 %v2773_v32, %v2721_v28  ;;  %v3685_v33 = vpop.f32.mrb[83].mxu0 }
 0x9d4   : > { %v2840_v34 = vpop.f32.mrb[80].mxu1 }
 0x9d5   : > { %v2847_v35 = vadd.f32 %v2840_v34, %v2777_v30  ;;  %v3694_v46 = vpop.f32.mrb[81].mxu1 }
 0x9d6   : > { %v2843_v36 = vpop.f32.mrb[82].mxu1 }
 0x9d7   : > { %v2848_v37 = vadd.f32 %v2843_v36, %v2778_v19  ;;  %v3695_v38 = vpop.f32.mrb[83].mxu1 }
 0x9db   : > { %v2904_v39 = vpop.f32.mrb[84].mxu0 }
 0x9dc   : > { %v2911_v40 = vadd.f32 %v2904_v39, %v2847_v35  ;;  %v3704_v42 = vpop.f32.mrb[85].mxu0 }
 0x9dd   : > { %v2907_v41 = vpop.f32.mrb[86].mxu0 }
 0x9de   : > { %v2912_v4 = vadd.f32 %v2907_v41, %v2848_v37  ;;  %v3705_v43 = vpop.f32.mrb[87].mxu0 }
 0x9e7   : > { %v2961_v45 = vpop.f32.mrb[84].mxu1  ;;  %v3023_v47 = vpop.f32.mrb[88].mxu0 }
 0x9e8   : > { %v2968_v48 = vadd.f32 %v2961_v45, %v2911_v40  ;;  %v3714_v49 = vpop.f32.mrb[85].mxu1  ;;  %v3724_v50 = vpop.f32.mrb[89].mxu0 }
 0x9e9   : > { %v2964_v51 = vpop.f32.mrb[86].mxu1  ;;  %v3026_v52 = vpop.f32.mrb[90].mxu0 }
 0x9ea   : > { %v3030_v53 = vadd.f32 %v3023_v47, %v2968_v48  ;;  %v2969_v54 = vadd.f32 %v2964_v51, %v2912_v4  ;;  %v3715_v55 = vpop.f32.mrb[87].mxu1  ;;  %v3725_v56 = vpop.f32.mrb[91].mxu0 }
 0x9ec   : > { %v3031_v57 = vadd.f32 %v3026_v52, %v2969_v54  ;;  %v3044_v59 = vadd.f32 %v3037_v44, %v3030_v53 }
 0x9ee   : > { %v3045_v62 = vadd.f32 %v3042_v60, %v3031_v57  ;;  %v3046_v63 = vmul.f32 0.2, %v3044_v59 }
 0x9f0   : > { %v3047_v0 = vmul.f32 0.2, %v3045_v62  ;;  %v3050_v1 = vadd.f32 %v3048_v58, %v3046_v63 }
 0x9f2   : > { %v3051_v2 = vadd.f32 %v3049_v61, %v3047_v0  ;;  %v3202_v3 = vpack.c.bf16 %v3050_v1, %v3050_v1 }
 0x9f4   : > { %v3203_v5 = vpack.c.bf16 %v3051_v2, %v3051_v2  ;;  %3061 = vst.msk [vmem:[%s413_s16] sm:$0xf] %vm3060_vm1, %v3202_v3 }
 0x9f6   : > { %3062 = vst.msk [vmem:[%s413_s16 + $0x4] sm:$0xf] %vm3060_vm1, %v3203_v5 }
 0x9f7 PF: > { %s22_s21 = sadd.s32 1, %s3788_s21  }
 0x9f8   : > { %p19_p4 = scmp.ge.s32.totalorder %s22_s21, 4  }
 0x9fa   :  { %21 = sbr.rel (!%p19_p4) target bundleno = 1 (0x1), region = 98 }

// kernel: rrdb_model_forward.9
= control target key start
LH: loop header
LB: loop body
LE: loop exit
PB: predicated region body
PF: predicated region fallthrough
CT: control target
= control target key end

     0   :  { %s3957_s25 = smov 0   ;;  %s4562_s0 = inlined_call_operand.vmem [shape: bf16[1,100], index: 0, kind: input, shape index: {}]   ;;  %s4563_s1 = inlined_call_operand.vmem [shape: bf16[2,16,100], index: 1, kind: input, shape index: {}]   ;;  %s4564_s2 = inlined_call_operand.vmem [shape: bf16[2,16,100], index: 2, kind: input, shape index: {}]   ;;  %s4565_s3 = inlined_call_operand.vmem [shape: bf16[8,144], index: 3, kind: input, shape index: {}]   ;;  %s4566_s4 = inlined_call_operand.vmem [shape: bf16[8,216], index: 4, kind: input, shape index: {}]   ;;  %s4567_s5 = inlined_call_operand.vmem [shape: bf16[8,288], index: 5, kind: input, shape index: {}]   ;;  %s4568_s6 = inlined_call_operand.vmem [shape: bf16[8,360], index: 6, kind: input, shape index: {}]   ;;  %s4569_s7 = inlined_call_operand.vmem [shape: bf16[16,432], index: 7, kind: input, shape index: {}]   ;;  %s4570_s8 = inlined_call_operand.vmem [shape: f32[8,1], index: 8, kind: input, shape index: {}]   ;;  %s4571_s9 = inlined_call_operand.vmem [shape: f32[8,1], index: 9, kind: input, shape index: {}]   ;;  %s4572_s10 = inlined_call_operand.vmem [shape: f32[8,1], index: 10, kind: input, shape index: {}]   ;;  %s4573_s11 = inlined_call_operand.vmem [shape: f32[8,1], index: 11, kind: input, shape index: {}]   ;;  %s4574_s12 = inlined_call_operand.vmem [shape: f32[16,1], index: 12, kind: input, shape index: {}]   ;;  %s4575_s13 = inlined_call_operand.vmem [shape: bf16[2,16,100], index: 13, kind: output, shape index: {}]  }
   0x1   :  { %4611 = sst [smem:[#allocation3_spill]] %s4562_s0 }
   0x2   :  { %4612 = sst [smem:[#allocation4_spill]] %s4563_s1 }
   0x3   :  { %4613 = sst [smem:[#allocation5_spill]] %s4565_s3 }
   0x4   :  { %4614 = sst [smem:[#allocation6_spill]] %s4566_s4 }
   0x5 LB: > { %s3185_s26 = sadd.s32 4294967295, %s3862_s25   ;;  %p3189_p0 = scmp.ge.s32.totalorder %s3862_s25, 1  ;;  %s3862_s25 = sphi %s3957_s25, %s23_s25  }
   0x6   : > { %p397_p1 = scmp.lt.s32.totalorder %s3862_s25, 3 }
   0x8   : > { %p398_p2 = pnand %p3189_p0, %p397_p1 }
   0x9   : > { %p446_p3 = scmp.lt.s32.totalorder (!%p398_p2), %s3185_s26, 1  ;;  %s4615_s0 = sld [smem:[#allocation3_spill]] (!%p398_p2)  ;;  %v477_v1 = vlaneseq (!%p398_p2)  ;;  %vm464_vm0 = vcmask (!%p398_p2), 89088   ;;  %v3864_v3 = vmov (!%p398_p2), 0   ;;  %vm468_vm1 = vcmask (!%p398_p2), 999288   ;;  %v937_v20 = vld [vmem:[%s4570_s8] sm:$0xff] (!%p398_p2) }
   0xa   : > { %401 = sbr.rel (%p398_p2) target bundleno = 2558 (0x9fe), region = 72  ;;  %465 = vst.msk [vmem:[#allocation2] sm:$0xff] (!%p398_p2), %vm464_vm0, %v3864_v3  ;;  %466 = vst.msk [vmem:[#allocation2 + $0x8] sm:$0xff] (!%p398_p2), %vm464_vm0, %v3864_v3  ;;  %s4616_s3 = sld [smem:[#allocation5_spill]] (!%p398_p2)  ;;  %3831 = vset.pattern.permute.xlu0 (!%p398_p2), %v3864_v3  ;;  %3832 = vset.pattern.permute.xlu1 (!%p398_p2), %v3864_v3  ;;  %v3865_v8 = vmov (!%p398_p2), 0.0   ;;  %vm3868_vm2 = vmmov (!%p398_p2), 0  }
   0xb   : > { %467 = vst.msk [vmem:[#allocation2 + $0x10] sm:$0xff] (!%p398_p2), %vm464_vm0, %v3864_v3  ;;  %v478_v6 = vshrl.u32 (!%p398_p2), %v477_v1, 7  ;;  %3428 = vmatprep.subr.bf16.mxu1 (!%p398_p2), %v3865_v8  ;;  %3422 = vmatprep.subr.bf16.mxu0 (!%p398_p2), %v3865_v8  ;;  %s4584_s15 = smov (!%p398_p2), 112   ;;  %s4617_s1 = sld [smem:[#allocation4_spill]] (!%p398_p2)  ;;  %vm495_vm3 = vcmask (!%p398_p2), 908376   ;;  %vm508_vm4 = vcmask (!%p398_p2), 130048  }
   0xc   : > { %469 = vst.msk [vmem:[#allocation2] sm:$0xff] (!%p398_p2), %vm468_vm1, %v3864_v3  ;;  %470 = vst.msk [vmem:[#allocation2 + $0x8] sm:$0xff] (!%p398_p2), %vm468_vm1, %v3864_v3  ;;  %s4602_s19 = smov (!%p398_p2), 11   ;;  %3424 = vmatprep.mubr.msk.bf16.mxu0 (!%p398_p2), %vm3868_vm2, %v3865_v8  ;;  %3430 = vmatprep.mubr.msk.bf16.mxu1 (!%p398_p2), %vm3868_vm2, %v3865_v8  ;;  %s4607_s20 = smov (!%p398_p2), 126   ;;  %vm957_vm6 = vcmask (!%p398_p2), 904280   ;;  %vm978_vm7 = vcmask (!%p398_p2), 1043456  }
   0xd   : > { %471 = vst.msk [vmem:[#allocation2 + $0x10] sm:$0xff] (!%p398_p2), %vm468_vm1, %v3864_v3  ;;  %v479_v9 = vsub.s32 (!%p398_p2), 0, %v478_v6  ;;  %s4609_s21 = smov (!%p398_p2), 127   ;;  %s4593_s22 = smov (!%p398_p2), 118   ;;  %vm974_vm8 = vcmask (!%p398_p2), 195584   ;;  %vm1240_vm9 = vcmask (!%p398_p2), 64512  }
   0xe   : > { %s4576_s23 = smov (!%p398_p2), 96   ;;  %s4586_s24 = smov (!%p398_p2), 80   ;;  %vm1477_vm11 = vcmask (!%p398_p2), 908380   ;;  %vm1495_vm12 = vcmask (!%p398_p2), 261120   ;;  %vm1984_vm14 = vcmask (!%p398_p2), 326656   ;;  %vm2545_vm0 = vcmask (!%p398_p2), 392192  }
   0xf   : > { %v462_v0 = vld [vmem:[%s4615_s0] sm:$0x1] (!%p398_p2)  ;;  %s4589_s27 = smov (!%p398_p2), 116   ;;  %s4578_s28 = smov (!%p398_p2), 64   ;;  %vm3115_vm1 = vcmask (!%p398_p2), 814080  }
  0x10   : > { %v463_v2 = vunpack.c.l.bf16 (!%p398_p2), %v462_v0  ;;  %v498_v4 = vld [vmem:[%s4616_s3] sm:$0xf] (!%p398_p2)  ;;  %v475_v5 = vpack.i.b16 (!%p398_p2), %v462_v0, %v462_v0  ;;  %s4580_s29 = smov (!%p398_p2), 48   ;;  %s4603_s30 = smov (!%p398_p2), 108   ;;  %v889_v36 = vld [vmem:[%s4616_s3 + $0x4] sm:$0xf] (!%p398_p2) }
  0x11   : > { %s4640_s26 = smov (!%p446_p3, %s3185_s26), 1  ;;  %v3198_v7 = vcombine.low %v498_v4, %v498_v4  ;;  %s4600_s16 = smov 107  }
  0x12   : > { %s3973_s14 = sshll.u32 %s4640_s26, 3  ;;  %v480_v10 = vrot.slane %v475_v5, %v479_v9  ;;  %v3980_v11 = vrot.slane %v463_v2, %v479_v9  ;;  %s4591_s26 = smov 117  }
  0x13   : > { %502 = vrot.lane.b32.xlu1 %v3198_v7, %s4584_s15  ;;  %s450_s18 = scalar_lea.vmem %s4617_s1, %s3973_s14  ;;  %s4598_s17 = smov 32  }
  0x14   : > { %v472_v12 = vld [vmem:[%s450_s18] sm:$0xf]  ;;  %v473_v13 = vld [vmem:[%s450_s18 + $0x4] sm:$0xf]  ;;  %v3196_v14 = vcombine.low %v480_v10, %v480_v10  ;;  %s4605_s18 = smov 106   ;;  %s4618_s4 = sld [smem:[#allocation6_spill]] }
  0x15   : > { %s4588_s15 = smov 56   ;;  %s4634_s0 = smov 11  }
  0x16   : > { %v3982_v15 = vmul.bf16 %v3196_v14, %v472_v12  ;;  %v3984_v16 = vmul.bf16 %v3196_v14, %v473_v13  ;;  %s4637_s1 = smov 126  }
  0x18   : > { %v3197_v17 = vcombine.low %v3982_v15, %v3984_v16 }
  0x1a   : > { %492 = vrot.lane.b32.xlu0 %v3197_v17, %s4602_s19 }
  0x85   : > { %v503_v21 = vpop.permute.xlu1 %502 }
  0x8c   : > { %v493_v18 = vpop.permute.xlu0 %492 }
  0x8d   : > { %496 = vst.msk [vmem:[#allocation2] sm:$0xff] %vm495_vm3, %v493_v18 }
  0x94   : > { %v3993_v19 = vld [vmem:[#allocation2] sm:$0xff] }
  0x95   : > { %597 = vrot.lane.b32.xlu1 %v3993_v19, %s4607_s20  ;;  %505 = vrot.lane.b32.xlu0 %v3993_v19, %s4609_s21 }
  0x96   : > { %3429 = vmatpush3.bf16.msra.mxu1 %v3993_v19 }
  0x97   : > { %3440 = vmatprep.subr.bf16.mxu1 %v3865_v8 }
  0x99   : > { %646 = vrot.lane.b32.xlu1 %v3993_v19, %s4593_s22  ;;  %595 = vrot.lane.b32.xlu0 %v3198_v7, %s4576_s23  ;;  %s4582_s23 = smov 16  }
  0x9a   : > { %3431 = vmatmul.mubr.msk.bf16.vlgmr.msra.gmra.mrb[0].mxu1 %vm508_vm4, %v498_v4 }
  0x9b   : > { %3442 = vmatprep.mubr.msk.bf16.mxu1 %vm3868_vm2, %v3865_v8 }
  0x9d   : > { %644 = vrot.lane.b32.xlu1 %v3198_v7, %s4586_s24  ;;  %695 = vrot.lane.b32.xlu0 %v3993_v19, %s4591_s26 }
  0xa1   : > { %744 = vrot.lane.b32.xlu1 %v3993_v19, %s4589_s27  ;;  %693 = vrot.lane.b32.xlu0 %v3198_v7, %s4578_s28  ;;  %s4595_s28 = smov 8  }
  0xa5   : > { %742 = vrot.lane.b32.xlu1 %v3198_v7, %s4580_s29  ;;  %793 = vrot.lane.b32.xlu0 %v3993_v19, %s4603_s30  ;;  %s4622_s29 = smov 118  }
  0xa9   : > { %842 = vrot.lane.b32.xlu1 %v3993_v19, %s4600_s16  ;;  %791 = vrot.lane.b32.xlu0 %v3198_v7, %s4598_s17 }
  0xad   : > { %890 = vrot.lane.b32.xlu0 %v3993_v19, %s4605_s18  ;;  %840 = vrot.lane.b32.xlu1 %v3198_v7, %s4582_s23  ;;  %s4587_s23 = smov 104  }
  0xb1   : > { %940 = vperm.xlu0 %3831, %v937_v20  }
  0xb5   : > { %1070 = vrot.lane.b32.xlu0 %v3993_v19, %s4607_s20 }
  0xb9   : > { %1124 = vrot.lane.b32.xlu0 %v3993_v19, %s4593_s22 }
 0x107   : > { %v598_v22 = vpop.permute.xlu1 %597  ;;  %v506_v23 = vpop.permute.xlu0 %505 }
 0x108   : > { %3423 = vmatpush3.bf16.msra.mxu0 %v506_v23 }
 0x109   : > { %3434 = vmatprep.subr.bf16.mxu0 %v3865_v8 }
 0x10b   : > { %v647_v24 = vpop.permute.xlu1 %646  ;;  %3425 = vmatmul.mubr.msk.bf16.vlgmr.msra.gmra.mrb[0].mxu0 %vm508_vm4, %v503_v21  ;;  %v596_v25 = vpop.permute.xlu0 %595 }
 0x10c   : > { %3435 = vmatpush3.bf16.msra.mxu0 %v598_v22  ;;  %3441 = vmatpush3.bf16.msra.mxu1 %v647_v24 }
 0x10d   : > { %3436 = vmatprep.mubr.msk.bf16.mxu0 %vm3868_vm2, %v3865_v8  ;;  %3446 = vmatprep.subr.bf16.mxu0 %v3865_v8 }
 0x10e   : > { %3452 = vmatprep.subr.bf16.mxu1 %v3865_v8 }
 0x10f   : > { %v645_v26 = vpop.permute.xlu1 %644  ;;  %v696_v27 = vpop.permute.xlu0 %695 }
 0x110   : > { %3443 = vmatmul.mubr.msk.bf16.vlgmr.msra.gmra.mrb[4].mxu1 %vm508_vm4, %v645_v26 }
 0x111   : > { %3454 = vmatprep.mubr.msk.bf16.mxu1 %vm3868_vm2, %v3865_v8 }
 0x113   : > { %v745_v28 = vpop.permute.xlu1 %744  ;;  %3437 = vmatmul.mubr.msk.bf16.vlgmr.msra.gmra.mrb[4].mxu0 %vm508_vm4, %v596_v25  ;;  %v694_v29 = vpop.permute.xlu0 %693 }
 0x114   : > { %3447 = vmatpush3.bf16.msra.mxu0 %v696_v27  ;;  %3453 = vmatpush3.bf16.msra.mxu1 %v745_v28  ;;  %v961_v28 = vld [vmem:[%s4618_s4] sm:$0xf] }
 0x115   : > { %3448 = vmatprep.mubr.msk.bf16.mxu0 %vm3868_vm2, %v3865_v8  ;;  %3458 = vmatprep.subr.bf16.mxu0 %v3865_v8 }
 0x116   : > { %3464 = vmatprep.subr.bf16.mxu1 %v3865_v8 }
 0x117   : > { %v743_v30 = vpop.permute.xlu1 %742  ;;  %v794_v31 = vpop.permute.xlu0 %793 }
 0x118   : > { %3455 = vmatmul.mubr.msk.bf16.vlgmr.msra.gmra.mrb[8].mxu1 %vm508_vm4, %v743_v30 }
 0x119   : > { %3466 = vmatprep.mubr.msk.bf16.mxu1 %vm3868_vm2, %v3865_v8 }
 0x11b   : > { %v843_v32 = vpop.permute.xlu1 %842  ;;  %3449 = vmatmul.mubr.msk.bf16.vlgmr.msra.gmra.mrb[8].mxu0 %vm508_vm4, %v694_v29  ;;  %v792_v33 = vpop.permute.xlu0 %791  ;;  %v3208_v29 = vcombine.low %v961_v28, %v961_v28 }
 0x11c   : > { %3459 = vmatpush3.bf16.msra.mxu0 %v794_v31  ;;  %3465 = vmatpush3.bf16.msra.mxu1 %v843_v32 }
 0x11d   : > { %3460 = vmatprep.mubr.msk.bf16.mxu0 %vm3868_vm2, %v3865_v8  ;;  %3470 = vmatprep.subr.bf16.mxu0 %v3865_v8 }
 0x11e   : > { %3476 = vmatprep.subr.bf16.mxu1 %v3865_v8 }
 0x11f   : > { %v841_v34 = vpop.permute.xlu1 %840  ;;  %v891_v35 = vpop.permute.xlu0 %890 }
 0x120   : > { %3467 = vmatmul.mubr.msk.bf16.vlgmr.msra.gmra.mrb[12].mxu1 %vm508_vm4, %v841_v34 }
 0x121   : > { %3480 = vmatprep.mubr.msk.bf16.mxu1 %vm3868_vm2, %v3865_v8 }
 0x123   : > { %3461 = vmatmul.mubr.msk.bf16.vlgmr.msra.gmra.mrb[12].mxu0 %vm508_vm4, %v792_v33 }
 0x124   : > { %3471 = vmatpush3.bf16.msra.mxu0 %v891_v35  ;;  %3472 = vmatprep.mubr.msk.bf16.mxu0 %vm3868_vm2, %v3865_v8  ;;  %v1230_v35 = vld [vmem:[%s4618_s4] sm:$0xff] }
 0x125   : > { %3484 = vmatprep.subr.bf16.mxu0 %v3865_v8 }
 0x12b   : > { %3473 = vmatmul.mubr.msk.bf16.vlgmr.msra.gmra.mrb[16].mxu0 %vm508_vm4, %v889_v36  ;;  %v3214_v36 = vcombine.low %v1230_v35, %v1230_v35 }
 0x12c   : > { %3485 = vmatpush3.bf16.msra.mxu0 %v3993_v19  ;;  %3488 = vmatprep.mubr.msk.bf16.mxu0 %vm3868_vm2, %v3865_v8 }
 0x12d   : > { %3486 = vmatprep.subr.bf16.mxu0 %v3865_v8 }
 0x130   : > { %v941_v20 = vpop.permute.xlu0 %940 }
 0x134   : > { %v1071_v32 = vpop.permute.xlu0 %1070 }
 0x16d   : > { %v589_v37 = vpop.f32.mrb[0].mxu1 }
 0x16e   : > { %v3432_v38 = vpop.f32.mrb[1].mxu1 }
 0x16f   : > { %v592_v39 = vpop.f32.mrb[2].mxu1  ;;  %v3215_v38 = vcombine.high %v1230_v35, %v1230_v35 }
 0x170   : > { %v3433_v40 = vpop.f32.mrb[3].mxu1  ;;  %v3837_v39 = vld [vmem:[%s4618_s4 + $0x4] ss:$0 sps:$4 sm:$0xff]  }
 0x171   : > { %v1460_v40 = vld [vmem:[%s4571_s9] sm:$0xff] }
 0x1de   : > { %v546_v41 = vpop.f32.mrb[0].mxu0 }
 0x1df   : > { %v590_v42 = vadd.f32 %v589_v37, %v546_v41  ;;  %v3426_v43 = vpop.f32.mrb[1].mxu0  ;;  %v1125_v37 = vpop.permute.xlu0 %1124 }
 0x1e0   : > { %v549_v44 = vpop.f32.mrb[2].mxu0 }
 0x1e1   : > { %v3427_v45 = vpop.f32.mrb[3].mxu0 }
 0x1e3   : > { %v686_v46 = vpop.f32.mrb[4].mxu1 }
 0x1e4   : > { %v3444_v47 = vpop.f32.mrb[5].mxu1 }
 0x1e5   : > { %v689_v48 = vpop.f32.mrb[6].mxu1 }
 0x1e6   : > { %v637_v49 = vpop.f32.mrb[4].mxu0  ;;  %v3445_v50 = vpop.f32.mrb[7].mxu1 }
 0x1e7   : > { %v643_v51 = vadd.f32 %v637_v49, %v590_v42  ;;  %v3438_v52 = vpop.f32.mrb[5].mxu0 }
 0x1e8   : > { %v640_v53 = vpop.f32.mrb[6].mxu0 }
 0x1e9   : > { %v692_v54 = vadd.f32 %v686_v46, %v643_v51  ;;  %v3439_v55 = vpop.f32.mrb[7].mxu0 }
 0x1eb   : > { %v784_v56 = vpop.f32.mrb[8].mxu1 }
 0x1ec   : > { %v3456_v57 = vpop.f32.mrb[9].mxu1 }
 0x1ed   : > { %v787_v58 = vpop.f32.mrb[10].mxu1 }
 0x1ee   : > { %v735_v59 = vpop.f32.mrb[8].mxu0  ;;  %v3457_v60 = vpop.f32.mrb[11].mxu1 }
 0x1ef   : > { %v741_v61 = vadd.f32 %v735_v59, %v692_v54  ;;  %v3450_v62 = vpop.f32.mrb[9].mxu0 }
 0x1f0   : > { %v738_v63 = vpop.f32.mrb[10].mxu0 }
 0x1f1   : > { %v790_v0 = vadd.f32 %v784_v56, %v741_v61  ;;  %v3451_v1 = vpop.f32.mrb[11].mxu0 }
 0x1f3   : > { %v882_v2 = vpop.f32.mrb[12].mxu1 }
 0x1f4   : > { %v3468_v3 = vpop.f32.mrb[13].mxu1 }
 0x1f5   : > { %v885_v4 = vpop.f32.mrb[14].mxu1 }
 0x1f6   : > { %v833_v5 = vpop.f32.mrb[12].mxu0  ;;  %v3469_v6 = vpop.f32.mrb[15].mxu1 }
 0x1f7   : > { %v839_v7 = vadd.f32 %v833_v5, %v790_v0  ;;  %v3462_v9 = vpop.f32.mrb[13].mxu0 }
 0x1f8   : > { %v836_v10 = vpop.f32.mrb[14].mxu0 }
 0x1f9   : > { %v888_v12 = vadd.f32 %v882_v2, %v839_v7  ;;  %v3463_v13 = vpop.f32.mrb[15].mxu0 }
 0x1fe   : > { %v930_v14 = vpop.f32.mrb[16].mxu0 }
 0x1ff   : > { %v936_v17 = vadd.f32 %v930_v14, %v888_v12  ;;  %v3474_v18 = vpop.f32.mrb[17].mxu0 }
 0x200   : > { %v933_v21 = vpop.f32.mrb[18].mxu0  ;;  %v4172_v18 = vld [vmem:[%s4567_s5] sm:$0xf] }
 0x201   : > { %v943_v22 = vadd.f32 %v941_v20, %v936_v17  ;;  %v3475_v23 = vpop.f32.mrb[19].mxu0  ;;  %v3221_v20 = vcombine.low %v4172_v18, %v4172_v18 }
 0x203   : > { %vm944_vm5 = vcmp.ge.f32.partialorder %v943_v22, 0.0  ;;  %v945_v24 = vmul.f32 0.2, %v943_v22 }
 0x205   : > { %v946_v25 = vsel %vm944_vm5, %v943_v22, %v945_v24 }
 0x206   : > { %v951_v26 = vmul.f32 %v3980_v11, %v946_v25 }
 0x208   : > { %v952_v27 = vpack.c.bf16 %v951_v26, %v951_v26 }
 0x20a   : > { %954 = vrot.lane.b32.xlu1 %v952_v27, %s4602_s19 }
 0x20e   : > { %969 = vrot.lane.b32.xlu1 %v3993_v19, %s4609_s21 }
 0x212   : > { %965 = vrot.lane.b32.xlu1 %v3208_v29, %s4587_s23  ;;  %s4619_s23 = smov 112  }
 0x216   : > { %1068 = vrot.lane.b32.xlu1 %v3208_v29, %s4586_s24  ;;  %s4624_s24 = smov 116  }
 0x21a   : > { %1122 = vrot.lane.b32.xlu1 %v3208_v29, %s4588_s15  ;;  %s4620_s15 = smov 64  }
 0x21e   : > { %1176 = vrot.lane.b32.xlu1 %v3208_v29, %s4598_s17 }
 0x27c   : > { %v955_v30 = vpop.permute.xlu1 %954 }
 0x27d   : > { %958 = vst.msk [vmem:[#allocation2 + $0x8] sm:$0xf] %vm957_vm6, %v955_v30 }
 0x280   : > { %v970_v31 = vpop.permute.xlu1 %969 }
 0x281   : > { %3477 = vmatpush3.bf16.msra.mxu1 %v970_v31 }
 0x282   : > { %3478 = vmatprep.subr.bf16.mxu1 %v3865_v8 }
 0x284   : > { %v960_v33 = vld [vmem:[#allocation2 + $0x8] sm:$0xf]  ;;  %v966_v41 = vpop.permute.xlu1 %965 }
 0x285   : > { %1072 = vrot.lane.b32.xlu1 %v960_v33, %s4607_s20  ;;  %971 = vrot.lane.b32.xlu0 %v960_v33, %s4609_s21  ;;  %v1026_v34 = vsel %vm978_vm7, %v960_v33, 0 }
 0x286   : > { %3487 = vmatpush3.bf16.msra.mxu0 %v1026_v34 }
 0x287   : > { %3500 = vmatprep.subr.bf16.mxu0 %v3865_v8 }
 0x288   : > { %v1069_v42 = vpop.permute.xlu1 %1068 }
 0x289   : > { %1126 = vrot.lane.b32.xlu1 %v960_v33, %s4593_s22  ;;  %1178 = vrot.lane.b32.xlu0 %v3993_v19, %s4591_s26  ;;  %s4623_s22 = smov 117  }
 0x28a   : > { %3489 = vmatmul.mubr.msk.bf16.vlgmr.msra.gmra.mrb[20].mxu0 %vm974_vm8, %v961_v28 }
 0x28b   : > { %3501 = vmatpush3.bf16.msra.mxu0 %v1125_v37  ;;  %3504 = vmatprep.mubr.msk.bf16.mxu0 %vm3868_vm2, %v3865_v8 }
 0x28c   : > { %3502 = vmatprep.subr.bf16.mxu0 %v3865_v8  ;;  %v1123_v43 = vpop.permute.xlu1 %1122 }
 0x28d   : > { %1236 = vrot.lane.b32.xlu1 %v3214_v36, %s4595_s28  ;;  %1242 = vrot.lane.b32.xlu0 %v3993_v19, %s4589_s27 }
 0x290   : > { %v1177_v44 = vpop.permute.xlu1 %1176 }
 0x291   : > { %1244 = vrot.lane.b32.xlu1 %v960_v33, %s4589_s27  ;;  %1300 = vrot.lane.b32.xlu0 %v3993_v19, %s4603_s30  ;;  %s4597_s27 = smov 88  }
 0x295   : > { %1354 = vrot.lane.b32.xlu1 %v3993_v19, %s4600_s16  ;;  %1180 = vrot.lane.b32.xlu0 %v960_v33, %s4591_s26  ;;  %s4621_s26 = smov 96  }
 0x299   : > { %1408 = vrot.lane.b32.xlu1 %v3993_v19, %s4605_s18  ;;  %1238 = vrot.lane.b32.xlu0 %v3215_v38, %s4595_s28  ;;  %s4631_s28 = smov 107  }
 0x29d   : > { %1410 = vrot.lane.b32.xlu1 %v960_v33, %s4605_s18  ;;  %1302 = vrot.lane.b32.xlu0 %v960_v33, %s4603_s30 }
 0x2a1   : > { %1298 = vrot.lane.b32.xlu0 %v3837_v39, %s4619_s23  ;;  %1406 = vrot.lane.b32.xlu1 %v3837_v39, %s4620_s15 }
 0x2a5   : > { %1356 = vrot.lane.b32.xlu0 %v960_v33, %s4600_s16 }
 0x2a9   : > { %1352 = vrot.lane.b32.xlu0 %v3837_v39, %s4597_s27  ;;  %s4626_s27 = smov 88  }
 0x2ad   : > { %1463 = vperm.xlu0 %3831, %v1460_v40  }
 0x2b1   : > { %1489 = vrot.lane.b32.xlu0 %v3993_v19, %s4609_s21 }
 0x2b5   : > { %1485 = vrot.lane.b32.xlu0 %v3221_v20, %s4621_s26 }
 0x2b9   : > { %1582 = vrot.lane.b32.xlu0 %v3221_v20, %s4620_s15 }
 0x2bd   : > { %1634 = vrot.lane.b32.xlu0 %v3221_v20, %s4598_s17 }
 0x2f7   : > { %v972_v45 = vpop.permute.xlu0 %971  ;;  %v1073_v46 = vpop.permute.xlu1 %1072 }
 0x2f8   : > { %v980_v47 = vsel %vm978_vm7, %v972_v45, 0  ;;  %v1079_v53 = vsel %vm978_vm7, %v1073_v46, 0 }
 0x2f9   : > { %3479 = vmatpush3.bf16.msra.mxu1 %v980_v47 }
 0x2fa   : > { %3492 = vmatprep.subr.bf16.mxu1 %v3865_v8 }
 0x2fb   : > { %v1179_v48 = vpop.permute.xlu0 %1178  ;;  %v1127_v49 = vpop.permute.xlu1 %1126 }
 0x2fc   : > { %v1133_v50 = vsel %vm978_vm7, %v1127_v49, 0  ;;  %3481 = vmatmul.mubr.msk.bf16.vlgmr.msra.gmra.mrb[16].mxu1 %vm974_vm8, %v966_v41 }
 0x2fd   : > { %3493 = vmatpush3.bf16.msra.mxu1 %v1071_v32  ;;  %3503 = vmatpush3.bf16.msra.mxu0 %v1133_v50 }
 0x2fe   : > { %3494 = vmatprep.subr.bf16.mxu1 %v3865_v8  ;;  %3516 = vmatprep.subr.bf16.mxu0 %v3865_v8 }
 0x2ff   : > { %v1243_v51 = vpop.permute.xlu0 %1242  ;;  %v1237_v52 = vpop.permute.xlu1 %1236  ;;  %3496 = vmatprep.mubr.msk.bf16.mxu1 %vm3868_vm2, %v3865_v8 }
 0x300   : > { %3505 = vmatmul.mubr.msk.bf16.vlgmr.msra.gmra.mrb[24].mxu0 %vm974_vm8, %v1123_v43 }
 0x301   : > { %3495 = vmatpush3.bf16.msra.mxu1 %v1079_v53  ;;  %3517 = vmatpush3.bf16.msra.mxu0 %v1243_v51 }
 0x302   : > { %3508 = vmatprep.subr.bf16.mxu1 %v3865_v8  ;;  %3518 = vmatprep.subr.bf16.mxu0 %v3865_v8 }
 0x303   : > { %v1301_v54 = vpop.permute.xlu0 %1300  ;;  %v1245_v55 = vpop.permute.xlu1 %1244  ;;  %3520 = vmatprep.mubr.msk.bf16.mxu0 %vm3868_vm2, %v3865_v8 }
 0x304   : > { %v1251_v56 = vsel %vm978_vm7, %v1245_v55, 0  ;;  %3497 = vmatmul.mubr.msk.bf16.vlgmr.msra.gmra.mrb[20].mxu1 %vm974_vm8, %v1069_v42 }
 0x305   : > { %3509 = vmatpush3.bf16.msra.mxu1 %v1179_v48  ;;  %3519 = vmatpush3.bf16.msra.mxu0 %v1251_v56 }
 0x306   : > { %3510 = vmatprep.subr.bf16.mxu1 %v3865_v8  ;;  %3512 = vmatprep.mubr.msk.bf16.mxu1 %vm3868_vm2, %v3865_v8 }
 0x307   : > { %v1181_v57 = vpop.permute.xlu0 %1180  ;;  %3532 = vmatprep.subr.bf16.mxu0 %v3865_v8  ;;  %v1355_v59 = vpop.permute.xlu1 %1354 }
 0x308   : > { %v1187_v58 = vsel %vm978_vm7, %v1181_v57, 0 }
 0x309   : > { %3511 = vmatpush3.bf16.msra.mxu1 %v1187_v58 }
 0x30a   : > { %3524 = vmatprep.subr.bf16.mxu1 %v3865_v8 }
 0x30b   : > { %v1239_v60 = vpop.permute.xlu0 %1238  ;;  %v1409_v62 = vpop.permute.xlu1 %1408 }
 0x30c   : > { %v1241_v61 = vsel %vm1240_vm9, %v1237_v52, %v1239_v60  ;;  %3513 = vmatmul.mubr.msk.bf16.vlgmr.msra.gmra.mrb[24].mxu1 %vm974_vm8, %v1177_v44 }
 0x30d   : > { %3521 = vmatmul.mubr.msk.bf16.vlgmr.msra.gmra.mrb[28].mxu0 %vm974_vm8, %v1241_v61  ;;  %3525 = vmatpush3.bf16.msra.mxu1 %v1301_v54 }
 0x30e   : > { %3533 = vmatpush3.bf16.msra.mxu0 %v1355_v59  ;;  %3526 = vmatprep.subr.bf16.mxu1 %v3865_v8 }
 0x30f   : > { %v1303_v63 = vpop.permute.xlu0 %1302  ;;  %3528 = vmatprep.mubr.msk.bf16.mxu1 %vm3868_vm2, %v3865_v8  ;;  %3534 = vmatprep.subr.bf16.mxu0 %v3865_v8  ;;  %v1411_v2 = vpop.permute.xlu1 %1410 }
 0x310   : > { %v1309_v0 = vsel %vm978_vm7, %v1303_v63, 0  ;;  %3536 = vmatprep.mubr.msk.bf16.mxu0 %vm3868_vm2, %v3865_v8  ;;  %v1417_v4 = vsel %vm978_vm7, %v1411_v2, 0 }
 0x311   : > { %3527 = vmatpush3.bf16.msra.mxu1 %v1309_v0 }
 0x312   : > { %3540 = vmatprep.subr.bf16.mxu1 %v3865_v8 }
 0x313   : > { %v1299_v1 = vpop.permute.xlu0 %1298  ;;  %v1407_v6 = vpop.permute.xlu1 %1406 }
 0x314   : > { %3529 = vmatmul.mubr.msk.bf16.vlgmr.msra.gmra.mrb[28].mxu1 %vm974_vm8, %v1299_v1 }
 0x315   : > { %3541 = vmatpush3.bf16.msra.mxu1 %v1409_v62  ;;  %3544 = vmatprep.mubr.msk.bf16.mxu1 %vm3868_vm2, %v3865_v8 }
 0x316   : > { %3542 = vmatprep.subr.bf16.mxu1 %v3865_v8 }
 0x317   : > { %v1357_v3 = vpop.permute.xlu0 %1356 }
 0x318   : > { %v1363_v5 = vsel %vm978_vm7, %v1357_v3, 0 }
 0x319   : > { %3535 = vmatpush3.bf16.msra.mxu0 %v1363_v5  ;;  %3543 = vmatpush3.bf16.msra.mxu1 %v1417_v4  ;;  %v1686_v5 = vld [vmem:[%s4567_s5 + $0x4] sm:$0xf] }
 0x31a   : > { %3556 = vmatprep.subr.bf16.mxu1 %v3865_v8  ;;  %3548 = vmatprep.subr.bf16.mxu0 %v3865_v8 }
 0x31b   : > { %v1353_v7 = vpop.permute.xlu0 %1352 }
 0x31c   : > { %3537 = vmatmul.mubr.msk.bf16.vlgmr.msra.gmra.mrb[32].mxu0 %vm974_vm8, %v1353_v7  ;;  %3545 = vmatmul.mubr.msk.bf16.vlgmr.msra.gmra.mrb[32].mxu1 %vm974_vm8, %v1407_v6  ;;  %v3227_v6 = vcombine.low %v1686_v5, %v1686_v5  ;;  %v1947_v7 = vld [vmem:[%s4572_s10] sm:$0xff] }
 0x31d   : > { %3557 = vmatpush3.bf16.msra.mxu1 %v3993_v19  ;;  %3552 = vmatprep.mubr.msk.bf16.mxu0 %vm3868_vm2, %v3865_v8 }
 0x31e   : > { %3558 = vmatprep.subr.bf16.mxu1 %v3865_v8  ;;  %3560 = vmatprep.mubr.msk.bf16.mxu1 %vm3868_vm2, %v3865_v8 }
 0x32c   : > { %v1464_v9 = vpop.permute.xlu0 %1463 }
 0x330   : > { %v1490_v10 = vpop.permute.xlu0 %1489 }
 0x331   : > { %3549 = vmatpush3.bf16.msra.mxu0 %v1490_v10 }
 0x332   : > { %3550 = vmatprep.subr.bf16.mxu0 %v3865_v8 }
 0x35d   : > { %v1062_v12 = vpop.f32.mrb[20].mxu0 }
 0x35e   : > { %v3490_v13 = vpop.f32.mrb[21].mxu0 }
 0x35f   : > { %v1065_v14 = vpop.f32.mrb[22].mxu0 }
 0x360   : > { %v3491_v17 = vpop.f32.mrb[23].mxu0 }
 0x3cf   : > { %v1016_v21 = vpop.f32.mrb[16].mxu1 }
 0x3d0   : > { %v1063_v22 = vadd.f32 %v1062_v12, %v1016_v21  ;;  %v3482_v23 = vpop.f32.mrb[17].mxu1 }
 0x3d1   : > { %v1019_v24 = vpop.f32.mrb[18].mxu1 }
 0x3d2   : > { %v3483_v25 = vpop.f32.mrb[19].mxu1 }
 0x3d3   : > { %v1169_v26 = vpop.f32.mrb[24].mxu0 }
 0x3d4   : > { %v3506_v27 = vpop.f32.mrb[25].mxu0 }
 0x3d5   : > { %v1172_v28 = vpop.f32.mrb[26].mxu0 }
 0x3d6   : > { %v3507_v29 = vpop.f32.mrb[27].mxu0 }
 0x3d7   : > { %v1115_v30 = vpop.f32.mrb[20].mxu1 }
 0x3d8   : > { %v1121_v31 = vadd.f32 %v1115_v30, %v1063_v22  ;;  %v3498_v32 = vpop.f32.mrb[21].mxu1 }
 0x3d9   : > { %v1118_v33 = vpop.f32.mrb[22].mxu1 }
 0x3da   : > { %v3499_v34 = vpop.f32.mrb[23].mxu1  ;;  %v1175_v35 = vadd.f32 %v1169_v26, %v1121_v31  ;;  %v1896_v33 = vld [vmem:[%s4567_s5 + $0x8] sm:$0xf] }
 0x3df   : > { %v1223_v36 = vpop.f32.mrb[24].mxu1 }
 0x3e0   : > { %v1229_v37 = vadd.f32 %v1223_v36, %v1175_v35  ;;  %v3514_v38 = vpop.f32.mrb[25].mxu1  ;;  %v1287_v39 = vpop.f32.mrb[28].mxu0 }
 0x3e1   : > { %v1226_v40 = vpop.f32.mrb[26].mxu1  ;;  %v3522_v41 = vpop.f32.mrb[29].mxu0 }
 0x3e2   : > { %v1293_v42 = vadd.f32 %v1287_v39, %v1229_v37  ;;  %v3515_v43 = vpop.f32.mrb[27].mxu1  ;;  %v1290_v44 = vpop.f32.mrb[30].mxu0  ;;  %v4283_v41 = vld [vmem:[%s4568_s6] sm:$0xf] }
 0x3e3   : > { %v3523_v45 = vpop.f32.mrb[31].mxu0 }
 0x3e7   : > { %v1345_v46 = vpop.f32.mrb[28].mxu1 }
 0x3e8   : > { %v1351_v47 = vadd.f32 %v1345_v46, %v1293_v42  ;;  %v3530_v48 = vpop.f32.mrb[29].mxu1  ;;  %v3232_v42 = vcombine.low %v4283_v41, %v4283_v41 }
 0x3e9   : > { %v1348_v49 = vpop.f32.mrb[30].mxu1 }
 0x3ea   : > { %v3531_v50 = vpop.f32.mrb[31].mxu1 }
 0x3ef   : > { %v1399_v51 = vpop.f32.mrb[32].mxu0  ;;  %v1453_v52 = vpop.f32.mrb[32].mxu1 }
 0x3f0   : > { %v1405_v53 = vadd.f32 %v1399_v51, %v1351_v47  ;;  %v3538_v54 = vpop.f32.mrb[33].mxu0  ;;  %v3546_v55 = vpop.f32.mrb[33].mxu1 }
 0x3f1   : > { %v1402_v56 = vpop.f32.mrb[34].mxu0  ;;  %v1456_v57 = vpop.f32.mrb[34].mxu1 }
 0x3f2   : > { %v1459_v58 = vadd.f32 %v1453_v52, %v1405_v53  ;;  %v3539_v59 = vpop.f32.mrb[35].mxu0  ;;  %v3547_v60 = vpop.f32.mrb[35].mxu1 }
 0x3f4   : > { %v1466_v61 = vadd.f32 %v1464_v9, %v1459_v58  ;;  %v1486_v9 = vpop.permute.xlu0 %1485 }
 0x3f6   : > { %vm1467_vm10 = vcmp.ge.f32.partialorder %v1466_v61, 0.0  ;;  %v1468_v62 = vmul.f32 0.2, %v1466_v61 }
 0x3f8   : > { %v1469_v63 = vsel %vm1467_vm10, %v1466_v61, %v1468_v62  ;;  %v1583_v10 = vpop.permute.xlu0 %1582 }
 0x3f9   : > { %v1470_v0 = vmul.f32 %v1469_v63, %v3980_v11 }
 0x3fb   : > { %v1471_v1 = vpack.c.bf16 %v1470_v0, %v1470_v0 }
 0x3fc   : > { %v1635_v12 = vpop.permute.xlu0 %1634 }
 0x3fd   : > { %v1473_v2 = vrot.slane %v1471_v1, 4 }
 0x3ff   : > { %1474 = vrot.lane.b32.xlu1 %v1473_v2, %s4602_s19 }
 0x403   : > { %1584 = vrot.lane.b32.xlu1 %v3993_v19, %s4607_s20 }
 0x471   : > { %v1475_v3 = vpop.permute.xlu1 %1474 }
 0x472   : > { %1478 = vst.msk [vmem:[#allocation2 + $0x8] sm:$0xf0] %vm1477_vm11, %v1475_v3 }
 0x475   : > { %v1585_v13 = vpop.permute.xlu1 %1584 }
 0x479   : > { %v4184_v4 = vld [vmem:[#allocation2 + $0x8] sm:$0xff] }
 0x47a   : > { %1586 = vrot.lane.b32.xlu0 %v4184_v4, %s4607_s20  ;;  %1491 = vrot.lane.b32.xlu1 %v4184_v4, %s4609_s21 }
 0x47b   : > { %3559 = vmatpush3.bf16.msra.mxu1 %v4184_v4 }
 0x47c   : > { %3572 = vmatprep.subr.bf16.mxu1 %v3865_v8 }
 0x47e   : > { %1638 = vrot.lane.b32.xlu0 %v4184_v4, %s4622_s29  ;;  %1636 = vrot.lane.b32.xlu1 %v3993_v19, %s4622_s29 }
 0x47f   : > { %3561 = vmatmul.mubr.msk.bf16.vlgmr.msra.gmra.mrb[36].mxu1 %vm1495_vm12, %v4172_v18 }
 0x480   : > { %3576 = vmatprep.mubr.msk.bf16.mxu1 %vm3868_vm2, %v3865_v8 }
 0x482   : > { %1794 = vrot.lane.b32.xlu0 %v3993_v19, %s4603_s30  ;;  %1687 = vrot.lane.b32.xlu1 %v3993_v19, %s4623_s22 }
 0x486   : > { %1846 = vrot.lane.b32.xlu0 %v3993_v19, %s4600_s16  ;;  %1742 = vrot.lane.b32.xlu1 %v3993_v19, %s4624_s24 }
 0x48a   : > { %1796 = vrot.lane.b32.xlu0 %v4184_v4, %s4603_s30  ;;  %1689 = vrot.lane.b32.xlu1 %v4184_v4, %s4623_s22  ;;  %s4628_s30 = smov 56  }
 0x48e   : > { %1897 = vrot.lane.b32.xlu0 %v3993_v19, %s4605_s18  ;;  %1740 = vrot.lane.b32.xlu1 %v3227_v6, %s4621_s26 }
 0x492   : > { %1899 = vrot.lane.b32.xlu0 %v4184_v4, %s4605_s18  ;;  %1744 = vrot.lane.b32.xlu1 %v4184_v4, %s4624_s24 }
 0x496   : > { %1950 = vperm.xlu0 %3831, %v1947_v7   ;;  %1792 = vrot.lane.b32.xlu1 %v3227_v6, %s4620_s15 }
 0x49a   : > { %1976 = vrot.lane.b32.xlu0 %v3993_v19, %s4609_s21  ;;  %1848 = vrot.lane.b32.xlu1 %v4184_v4, %s4600_s16  ;;  %s4636_s16 = smov 80  }
 0x49e   : > { %2079 = vrot.lane.b32.xlu0 %v3993_v19, %s4607_s20  ;;  %1844 = vrot.lane.b32.xlu1 %v3227_v6, %s4598_s17  ;;  %s4625_s17 = smov 48  }
 0x4a2   : > { %2077 = vrot.lane.b32.xlu0 %v3232_v42, %s4625_s17 }
 0x4ec   : > { %v1587_v14 = vpop.permute.xlu0 %1586  ;;  %v1492_v17 = vpop.permute.xlu1 %1491 }
 0x4ed   : > { %3551 = vmatpush3.bf16.msra.mxu0 %v1492_v17 }
 0x4ee   : > { %3564 = vmatprep.subr.bf16.mxu0 %v3865_v8 }
 0x4f0   : > { %v1639_v18 = vpop.permute.xlu0 %1638  ;;  %3553 = vmatmul.mubr.msk.bf16.vlgmr.msra.gmra.mrb[36].mxu0 %vm1495_vm12, %v1486_v9  ;;  %v1637_v20 = vpop.permute.xlu1 %1636 }
 0x4f1   : > { %3565 = vmatpush3.bf16.msra.mxu0 %v1585_v13  ;;  %3573 = vmatpush3.bf16.msra.mxu1 %v1637_v20 }
 0x4f2   : > { %3566 = vmatprep.subr.bf16.mxu0 %v3865_v8  ;;  %3574 = vmatprep.subr.bf16.mxu1 %v3865_v8 }
 0x4f3   : > { %3568 = vmatprep.mubr.msk.bf16.mxu0 %vm3868_vm2, %v3865_v8 }
 0x4f4   : > { %v1688_v21 = vpop.permute.xlu1 %1687  ;;  %v1795_v22 = vpop.permute.xlu0 %1794 }
 0x4f5   : > { %3567 = vmatpush3.bf16.msra.mxu0 %v1587_v14  ;;  %3575 = vmatpush3.bf16.msra.mxu1 %v1639_v18 }
 0x4f6   : > { %3580 = vmatprep.subr.bf16.mxu0 %v3865_v8  ;;  %3588 = vmatprep.subr.bf16.mxu1 %v3865_v8 }
 0x4f8   : > { %3569 = vmatmul.mubr.msk.bf16.vlgmr.msra.gmra.mrb[40].mxu0 %vm1495_vm12, %v1583_v10  ;;  %3577 = vmatmul.mubr.msk.bf16.vlgmr.msra.gmra.mrb[40].mxu1 %vm1495_vm12, %v1635_v12  ;;  %v1743_v23 = vpop.permute.xlu1 %1742  ;;  %v1847_v24 = vpop.permute.xlu0 %1846 }
 0x4f9   : > { %3581 = vmatpush3.bf16.msra.mxu0 %v1688_v21  ;;  %3589 = vmatpush3.bf16.msra.mxu1 %v1743_v23 }
 0x4fa   : > { %3582 = vmatprep.subr.bf16.mxu0 %v3865_v8  ;;  %3584 = vmatprep.mubr.msk.bf16.mxu0 %vm3868_vm2, %v3865_v8 }
 0x4fb   : > { %3590 = vmatprep.subr.bf16.mxu1 %v3865_v8  ;;  %3592 = vmatprep.mubr.msk.bf16.mxu1 %vm3868_vm2, %v3865_v8 }
 0x4fc   : > { %v1690_v25 = vpop.permute.xlu1 %1689  ;;  %v1797_v27 = vpop.permute.xlu0 %1796 }
 0x4fd   : > { %3583 = vmatpush3.bf16.msra.mxu0 %v1690_v25 }
 0x4fe   : > { %3596 = vmatprep.subr.bf16.mxu0 %v3865_v8 }
 0x500   : > { %3585 = vmatmul.mubr.msk.bf16.vlgmr.msra.gmra.mrb[44].mxu0 %vm1495_vm12, %v1686_v5  ;;  %v1741_v26 = vpop.permute.xlu1 %1740  ;;  %v1898_v29 = vpop.permute.xlu0 %1897 }
 0x501   : > { %3597 = vmatpush3.bf16.msra.mxu0 %v1795_v22  ;;  %3600 = vmatprep.mubr.msk.bf16.mxu0 %vm3868_vm2, %v3865_v8 }
 0x502   : > { %3598 = vmatprep.subr.bf16.mxu0 %v3865_v8 }
 0x504   : > { %v1745_v28 = vpop.permute.xlu1 %1744  ;;  %v1900_v32 = vpop.permute.xlu0 %1899 }
 0x505   : > { %3591 = vmatpush3.bf16.msra.mxu1 %v1745_v28  ;;  %3599 = vmatpush3.bf16.msra.mxu0 %v1797_v27 }
 0x506   : > { %3604 = vmatprep.subr.bf16.mxu1 %v3865_v8  ;;  %3612 = vmatprep.subr.bf16.mxu0 %v3865_v8 }
 0x508   : > { %3593 = vmatmul.mubr.msk.bf16.vlgmr.msra.gmra.mrb[44].mxu1 %vm1495_vm12, %v1741_v26  ;;  %v1793_v30 = vpop.permute.xlu1 %1792 }
 0x509   : > { %3601 = vmatmul.mubr.msk.bf16.vlgmr.msra.gmra.mrb[48].mxu0 %vm1495_vm12, %v1793_v30  ;;  %3605 = vmatpush3.bf16.msra.mxu1 %v1847_v24  ;;  %v2134_v30 = vld [vmem:[%s4568_s6] sm:$0xff] }
 0x50a   : > { %3613 = vmatpush3.bf16.msra.mxu0 %v1898_v29  ;;  %3606 = vmatprep.subr.bf16.mxu1 %v3865_v8 }
 0x50b   : > { %3614 = vmatprep.subr.bf16.mxu0 %v3865_v8  ;;  %3608 = vmatprep.mubr.msk.bf16.mxu1 %vm3868_vm2, %v3865_v8 }
 0x50c   : > { %v1849_v31 = vpop.permute.xlu1 %1848  ;;  %3616 = vmatprep.mubr.msk.bf16.mxu0 %vm3868_vm2, %v3865_v8 }
 0x50d   : > { %3607 = vmatpush3.bf16.msra.mxu1 %v1849_v31  ;;  %v3237_v31 = vcombine.high %v2134_v30, %v2134_v30 }
 0x50e   : > { %3615 = vmatpush3.bf16.msra.mxu0 %v1900_v32  ;;  %3620 = vmatprep.subr.bf16.mxu1 %v3865_v8  ;;  %v3842_v32 = vld [vmem:[%s4568_s6 + $0x4] ss:$0 sps:$4 sm:$0xff]  }
 0x50f   : > { %3630 = vmatprep.subr.bf16.mxu0 %v3865_v8 }
 0x510   : > { %v1845_v34 = vpop.permute.xlu1 %1844 }
 0x511   : > { %3609 = vmatmul.mubr.msk.bf16.vlgmr.msra.gmra.mrb[48].mxu1 %vm1495_vm12, %v1845_v34  ;;  %3617 = vmatmul.mubr.msk.bf16.vlgmr.msra.gmra.mrb[52].mxu0 %vm1495_vm12, %v1896_v33 }
 0x512   : > { %3631 = vmatpush3.bf16.msra.mxu0 %v3993_v19  ;;  %3636 = vmatprep.mubr.msk.bf16.mxu0 %vm3868_vm2, %v3865_v8 }
 0x513   : > { %3632 = vmatprep.subr.bf16.mxu0 %v3865_v8  ;;  %3626 = vmatprep.mubr.msk.bf16.mxu1 %vm3868_vm2, %v3865_v8 }
 0x515   : > { %v1951_v35 = vpop.permute.xlu0 %1950 }
 0x516   : > { %3633 = vmatpush3.bf16.msra.mxu0 %v4184_v4 }
 0x517   : > { %3634 = vmatprep.subr.bf16.mxu0 %v3865_v8 }
 0x519   : > { %v1977_v36 = vpop.permute.xlu0 %1976 }
 0x51a   : > { %3621 = vmatpush3.bf16.msra.mxu1 %v1977_v36 }
 0x51b   : > { %3622 = vmatprep.subr.bf16.mxu1 %v3865_v8 }
 0x552   : > { %v1576_v37 = vpop.f32.mrb[36].mxu1 }
 0x553   : > { %v3562_v38 = vpop.f32.mrb[37].mxu1 }
 0x554   : > { %v1579_v39 = vpop.f32.mrb[38].mxu1  ;;  %v3236_v38 = vcombine.low %v2134_v30, %v2134_v30 }
 0x555   : > { %v3563_v40 = vpop.f32.mrb[39].mxu1  ;;  %v2318_v39 = vld [vmem:[%s4568_s6 + $0x4] sm:$0xff] }
 0x5c3   : > { %v1533_v43 = vpop.f32.mrb[36].mxu0 }
 0x5c4   : > { %v1577_v44 = vadd.f32 %v1576_v37, %v1533_v43  ;;  %v3554_v45 = vpop.f32.mrb[37].mxu0  ;;  %v3845_v43 = vld [vmem:[%s4568_s6 + $0x8] ss:$0 sps:$4 sm:$0xff]  }
 0x5c5   : > { %v1536_v46 = vpop.f32.mrb[38].mxu0  ;;  %v2503_v45 = vld [vmem:[%s4573_s11] sm:$0xff] }
 0x5c6   : > { %v3555_v47 = vpop.f32.mrb[39].mxu0  ;;  %v4355_v46 = vld [vmem:[#allocation2] sm:$0xff] }
 0x5cb   : > { %v1627_v48 = vpop.f32.mrb[40].mxu0  ;;  %v1679_v49 = vpop.f32.mrb[40].mxu1 }
 0x5cc   : > { %v1633_v50 = vadd.f32 %v1627_v48, %v1577_v44  ;;  %v3570_v51 = vpop.f32.mrb[41].mxu0  ;;  %v3578_v52 = vpop.f32.mrb[41].mxu1  ;;  %v3243_v44 = vcombine.high %v2318_v39, %v2318_v39 }
 0x5cd   : > { %v1630_v53 = vpop.f32.mrb[42].mxu0  ;;  %v1682_v54 = vpop.f32.mrb[42].mxu1 }
 0x5ce   : > { %v1685_v55 = vadd.f32 %v1679_v49, %v1633_v50  ;;  %v3571_v56 = vpop.f32.mrb[43].mxu0  ;;  %v3579_v57 = vpop.f32.mrb[43].mxu1 }
 0x5cf   : > { %v2080_v49 = vpop.permute.xlu0 %2079 }
 0x5d3   : > { %v1730_v58 = vpop.f32.mrb[44].mxu0  ;;  %v2078_v50 = vpop.permute.xlu0 %2077 }
 0x5d4   : > { %v1736_v59 = vadd.f32 %v1730_v58, %v1685_v55  ;;  %v3586_v60 = vpop.f32.mrb[45].mxu0 }
 0x5d5   : > { %v1733_v61 = vpop.f32.mrb[46].mxu0 }
 0x5d6   : > { %v3587_v62 = vpop.f32.mrb[47].mxu0 }
 0x5db   : > { %v1785_v63 = vpop.f32.mrb[44].mxu1 }
 0x5dc   : > { %v1791_v0 = vadd.f32 %v1785_v63, %v1736_v59  ;;  %v3594_v1 = vpop.f32.mrb[45].mxu1  ;;  %v1837_v2 = vpop.f32.mrb[48].mxu0 }
 0x5dd   : > { %v1788_v3 = vpop.f32.mrb[46].mxu1  ;;  %v3602_v5 = vpop.f32.mrb[49].mxu0 }
 0x5de   : > { %v1843_v6 = vadd.f32 %v1837_v2, %v1791_v0  ;;  %v3595_v7 = vpop.f32.mrb[47].mxu1  ;;  %v1840_v9 = vpop.f32.mrb[50].mxu0 }
 0x5df   : > { %v3603_v10 = vpop.f32.mrb[51].mxu0 }
 0x5e4   : > { %v1889_v12 = vpop.f32.mrb[48].mxu1  ;;  %v1940_v13 = vpop.f32.mrb[52].mxu0 }
 0x5e5   : > { %v1895_v14 = vadd.f32 %v1889_v12, %v1843_v6  ;;  %v3610_v17 = vpop.f32.mrb[49].mxu1  ;;  %v3618_v18 = vpop.f32.mrb[53].mxu0 }
 0x5e6   : > { %v1892_v20 = vpop.f32.mrb[50].mxu1  ;;  %v1943_v21 = vpop.f32.mrb[54].mxu0 }
 0x5e7   : > { %v1946_v22 = vadd.f32 %v1940_v13, %v1895_v14  ;;  %v3611_v23 = vpop.f32.mrb[51].mxu1  ;;  %v3619_v24 = vpop.f32.mrb[55].mxu0 }
 0x5e9   : > { %v1953_v25 = vadd.f32 %v1951_v35, %v1946_v22 }
 0x5eb   : > { %vm1954_vm13 = vcmp.ge.f32.partialorder %v1953_v25, 0.0  ;;  %v1955_v26 = vmul.f32 0.2, %v1953_v25 }
 0x5ed   : > { %v1956_v27 = vsel %vm1954_vm13, %v1953_v25, %v1955_v26 }
 0x5ee   : > { %v1957_v28 = vmul.f32 %v1956_v27, %v3980_v11 }
 0x5f0   : > { %v1958_v29 = vpack.c.bf16 %v1957_v28, %v1957_v28 }
 0x5f2   : > { %1960 = vrot.lane.b32.xlu1 %v1958_v29, %s4602_s19  ;;  %s4627_s19 = smov 8  }
 0x5f6   : > { %1978 = vrot.lane.b32.xlu1 %v4184_v4, %s4609_s21 }
 0x5fa   : > { %1971 = vrot.lane.b32.xlu1 %v3232_v42, %s4626_s27  ;;  %v3242_v42 = vcombine.low %v2318_v39, %v2318_v39  ;;  %s4629_s27 = smov 16  }
 0x5fe   : > { %2081 = vrot.lane.b32.xlu1 %v4184_v4, %s4607_s20 }
 0x602   : > { %2145 = vrot.lane.b32.xlu1 %v3993_v19, %s4622_s29 }
 0x606   : > { %2206 = vrot.lane.b32.xlu1 %v3993_v19, %s4623_s22 }
 0x60a   : > { %2208 = vrot.lane.b32.xlu1 %v4184_v4, %s4623_s22 }
 0x60e   : > { %2142 = vrot.lane.b32.xlu1 %v3237_v31, %s4627_s19 }
 0x612   : > { %2204 = vrot.lane.b32.xlu1 %v3842_v32, %s4621_s26 }
 0x616   : > { %2265 = vrot.lane.b32.xlu1 %v4184_v4, %s4624_s24 }
 0x664   : > { %v1961_v19 = vpop.permute.xlu1 %1960 }
 0x665   : > { %1963 = vst.msk [vmem:[#allocation2 + $0x10] sm:$0xf] %vm957_vm6, %v1961_v19 }
 0x668   : > { %v1979_v33 = vpop.permute.xlu1 %1978 }
 0x669   : > { %3623 = vmatpush3.bf16.msra.mxu1 %v1979_v33 }
 0x66a   : > { %3624 = vmatprep.subr.bf16.mxu1 %v3865_v8 }
 0x66c   : > { %v1972_v34 = vpop.permute.xlu1 %1971  ;;  %v1966_v35 = vld [vmem:[#allocation2 + $0x10] sm:$0xf] }
 0x66d   : > { %2210 = vrot.lane.b32.xlu1 %v1966_v35, %s4623_s22  ;;  %1980 = vrot.lane.b32.xlu0 %v1966_v35, %s4609_s21  ;;  %v2035_v36 = vsel %vm978_vm7, %v1966_v35, 0 }
 0x66e   : > { %3635 = vmatpush3.bf16.msra.mxu0 %v2035_v36 }
 0x66f   : > { %3650 = vmatprep.subr.bf16.mxu0 %v3865_v8 }
 0x670   : > { %v2082_v37 = vpop.permute.xlu1 %2081 }
 0x671   : > { %2261 = vrot.lane.b32.xlu1 %v3842_v32, %s4628_s30  ;;  %2147 = vrot.lane.b32.xlu0 %v4184_v4, %s4622_s29  ;;  %s4630_s30 = smov 108  }
 0x672   : > { %3637 = vmatmul.mubr.msk.bf16.vlgmr.msra.gmra.mrb[56].mxu0 %vm1984_vm14, %v4283_v41  ;;  %v3855_v41 = vld [vmem:[#allocation2] sm:$0xff] }
 0x673   : > { %3656 = vmatprep.mubr.msk.bf16.mxu0 %vm3868_vm2, %v3865_v8 }
 0x674   : > { %v2146_v40 = vpop.permute.xlu1 %2145 }
 0x675   : > { %2267 = vrot.lane.b32.xlu1 %v1966_v35, %s4624_s24  ;;  %2140 = vrot.lane.b32.xlu0 %v3236_v38, %s4627_s19  ;;  %s460_s19 = scalar_lea.vmem %s4575_s13, %s3973_s14 }
 0x676   : > { %3651 = vmatpush3.bf16.msra.mxu0 %v2146_v40 }
 0x677   : > { %3652 = vmatprep.subr.bf16.mxu0 %v3865_v8 }
 0x678   : > { %v2207_v47 = vpop.permute.xlu1 %2206 }
 0x679   : > { %2324 = vrot.lane.b32.xlu1 %v3242_v42, %s4629_s27  ;;  %2083 = vrot.lane.b32.xlu0 %v1966_v35, %s4607_s20 }
 0x67c   : > { %v2209_v48 = vpop.permute.xlu1 %2208 }
 0x67d   : > { %2448 = vrot.lane.b32.xlu1 %v3855_v41, %s4605_s18  ;;  %2263 = vrot.lane.b32.xlu0 %v3855_v41, %s4624_s24 }
 0x680   : > { %v2143_v51 = vpop.permute.xlu1 %2142 }
 0x681   : > { %2450 = vrot.lane.b32.xlu1 %v4184_v4, %s4605_s18  ;;  %2330 = vrot.lane.b32.xlu0 %v3855_v41, %s4630_s30 }
 0x684   : > { %v2205_v53 = vpop.permute.xlu1 %2204 }
 0x685   : > { %2452 = vrot.lane.b32.xlu1 %v1966_v35, %s4605_s18  ;;  %2149 = vrot.lane.b32.xlu0 %v1966_v35, %s4622_s29  ;;  %s4632_s18 = smov 104  }
 0x688   : > { %v2266_v56 = vpop.permute.xlu1 %2265 }
 0x689   : > { %2332 = vrot.lane.b32.xlu0 %v4184_v4, %s4630_s30  ;;  %2446 = vrot.lane.b32.xlu1 %v3845_v43, %s4620_s15 }
 0x68d   : > { %2391 = vrot.lane.b32.xlu0 %v3855_v41, %s4631_s28 }
 0x691   : > { %2334 = vrot.lane.b32.xlu0 %v1966_v35, %s4630_s30 }
 0x695   : > { %2326 = vrot.lane.b32.xlu0 %v3243_v44, %s4629_s27 }
 0x699   : > { %2393 = vrot.lane.b32.xlu0 %v4184_v4, %s4631_s28 }
 0x69d   : > { %2395 = vrot.lane.b32.xlu0 %v1966_v35, %s4631_s28 }
 0x6a1   : > { %2389 = vrot.lane.b32.xlu0 %v3845_v43, %s4632_s18  ;;  %s4635_s18 = smov 127  }
 0x6a5   : > { %2506 = vperm.xlu0 %3831, %v2503_v45  }
 0x6a9   : > { %2536 = vrot.lane.b32.xlu0 %v4355_v46, %s4609_s21  ;;  %s4633_s21 = smov 32  }
 0x6ad   : > { %2650 = vrot.lane.b32.xlu0 %v4355_v46, %s4607_s20  ;;  %s455_s20 = scalar_lea.vmem %s4564_s2, %s3973_s14 }
 0x6df   : > { %v1981_v52 = vpop.permute.xlu0 %1980  ;;  %v2211_v58 = vpop.permute.xlu1 %2210 }
 0x6e0   : > { %v1989_v54 = vsel %vm978_vm7, %v1981_v52, 0  ;;  %v2218_v2 = vsel %vm978_vm7, %v2211_v58, 0 }
 0x6e1   : > { %3625 = vmatpush3.bf16.msra.mxu1 %v1989_v54 }
 0x6e2   : > { %3640 = vmatprep.subr.bf16.mxu1 %v3865_v8 }
 0x6e3   : > { %v2148_v55 = vpop.permute.xlu0 %2147  ;;  %v2262_v62 = vpop.permute.xlu1 %2261 }
 0x6e4   : > { %3627 = vmatmul.mubr.msk.bf16.vlgmr.msra.gmra.mrb[52].mxu1 %vm1984_vm14, %v1972_v34  ;;  %3653 = vmatpush3.bf16.msra.mxu0 %v2148_v55 }
 0x6e5   : > { %3641 = vmatpush3.bf16.msra.mxu1 %v2080_v49  ;;  %3646 = vmatprep.mubr.msk.bf16.mxu1 %vm3868_vm2, %v3865_v8 }
 0x6e6   : > { %3642 = vmatprep.subr.bf16.mxu1 %v3865_v8  ;;  %3654 = vmatprep.subr.bf16.mxu0 %v3865_v8 }
 0x6e7   : > { %v2141_v57 = vpop.permute.xlu0 %2140  ;;  %v2268_v0 = vpop.permute.xlu1 %2267 }
 0x6e8   : > { %v2144_v5 = vsel %vm1240_vm9, %v2141_v57, %v2143_v51  ;;  %v2275_v13 = vsel %vm978_vm7, %v2268_v0, 0 }
 0x6e9   : > { %3643 = vmatpush3.bf16.msra.mxu1 %v2082_v37 }
 0x6ea   : > { %3644 = vmatprep.subr.bf16.mxu1 %v3865_v8 }
 0x6eb   : > { %v2084_v59 = vpop.permute.xlu0 %2083  ;;  %v2325_v7 = vpop.permute.xlu1 %2324 }
 0x6ec   : > { %v2091_v60 = vsel %vm978_vm7, %v2084_v59, 0 }
 0x6ed   : > { %3645 = vmatpush3.bf16.msra.mxu1 %v2091_v60 }
 0x6ee   : > { %3660 = vmatprep.subr.bf16.mxu1 %v3865_v8 }
 0x6ef   : > { %v2264_v61 = vpop.permute.xlu0 %2263  ;;  %v2449_v10 = vpop.permute.xlu1 %2448 }
 0x6f0   : > { %3647 = vmatmul.mubr.msk.bf16.vlgmr.msra.gmra.mrb[56].mxu1 %vm1984_vm14, %v2078_v50 }
 0x6f1   : > { %3661 = vmatpush3.bf16.msra.mxu1 %v2207_v47  ;;  %3666 = vmatprep.mubr.msk.bf16.mxu1 %vm3868_vm2, %v3865_v8 }
 0x6f2   : > { %3662 = vmatprep.subr.bf16.mxu1 %v3865_v8 }
 0x6f3   : > { %v2331_v63 = vpop.permute.xlu0 %2330  ;;  %v2451_v18 = vpop.permute.xlu1 %2450 }
 0x6f5   : > { %3663 = vmatpush3.bf16.msra.mxu1 %v2209_v48 }
 0x6f6   : > { %3664 = vmatprep.subr.bf16.mxu1 %v3865_v8 }
 0x6f7   : > { %v2150_v1 = vpop.permute.xlu0 %2149  ;;  %v2453_v22 = vpop.permute.xlu1 %2452 }
 0x6f8   : > { %v2157_v3 = vsel %vm978_vm7, %v2150_v1, 0  ;;  %v2460_v25 = vsel %vm978_vm7, %v2453_v22, 0 }
 0x6f9   : > { %3655 = vmatpush3.bf16.msra.mxu0 %v2157_v3  ;;  %3665 = vmatpush3.bf16.msra.mxu1 %v2218_v2 }
 0x6fa   : > { %3670 = vmatprep.subr.bf16.mxu0 %v3865_v8  ;;  %3680 = vmatprep.subr.bf16.mxu1 %v3865_v8 }
 0x6fb   : > { %v2333_v6 = vpop.permute.xlu0 %2332  ;;  %v2447_v26 = vpop.permute.xlu1 %2446 }
 0x6fc   : > { %3657 = vmatmul.mubr.msk.bf16.vlgmr.msra.gmra.mrb[60].mxu0 %vm1984_vm14, %v2144_v5  ;;  %3667 = vmatmul.mubr.msk.bf16.vlgmr.msra.gmra.mrb[60].mxu1 %vm1984_vm14, %v2205_v53 }
 0x6fd   : > { %3671 = vmatpush3.bf16.msra.mxu0 %v2264_v61  ;;  %3681 = vmatpush3.bf16.msra.mxu1 %v2331_v63 }
 0x6fe   : > { %3672 = vmatprep.subr.bf16.mxu0 %v3865_v8  ;;  %3682 = vmatprep.subr.bf16.mxu1 %v3865_v8 }
 0x6ff   : > { %v2392_v9 = vpop.permute.xlu0 %2391  ;;  %3676 = vmatprep.mubr.msk.bf16.mxu0 %vm3868_vm2, %v3865_v8  ;;  %3686 = vmatprep.mubr.msk.bf16.mxu1 %vm3868_vm2, %v3865_v8 }
 0x701   : > { %3673 = vmatpush3.bf16.msra.mxu0 %v2266_v56  ;;  %3683 = vmatpush3.bf16.msra.mxu1 %v2333_v6 }
 0x702   : > { %3674 = vmatprep.subr.bf16.mxu0 %v3865_v8  ;;  %3684 = vmatprep.subr.bf16.mxu1 %v3865_v8 }
 0x703   : > { %v2335_v12 = vpop.permute.xlu0 %2334 }
 0x704   : > { %v2342_v14 = vsel %vm978_vm7, %v2335_v12, 0  ;;  %v2634_v12 = vld [vmem:[%s4569_s7] sm:$0xff] }
 0x705   : > { %3675 = vmatpush3.bf16.msra.mxu0 %v2275_v13  ;;  %3685 = vmatpush3.bf16.msra.mxu1 %v2342_v14  ;;  %v2635_v13 = vld [vmem:[%s4569_s7 + $0x10] sm:$0xff] }
 0x706   : > { %3690 = vmatprep.subr.bf16.mxu0 %v3865_v8  ;;  %3700 = vmatprep.subr.bf16.mxu1 %v3865_v8 }
 0x707   : > { %v2327_v17 = vpop.permute.xlu0 %2326 }
 0x708   : > { %v2329_v20 = vsel %vm508_vm4, %v2325_v7, %v2327_v17  ;;  %3677 = vmatmul.mubr.msk.bf16.vlgmr.msra.gmra.mrb[64].mxu0 %vm1984_vm14, %v2262_v62 }
 0x709   : > { %3687 = vmatmul.mubr.msk.bf16.vlgmr.msra.gmra.mrb[64].mxu1 %vm1984_vm14, %v2329_v20  ;;  %3691 = vmatpush3.bf16.msra.mxu0 %v2392_v9 }
 0x70a   : > { %3701 = vmatpush3.bf16.msra.mxu1 %v2449_v10  ;;  %3692 = vmatprep.subr.bf16.mxu0 %v3865_v8 }
 0x70b   : > { %v2394_v21 = vpop.permute.xlu0 %2393  ;;  %3702 = vmatprep.subr.bf16.mxu1 %v3865_v8  ;;  %3696 = vmatprep.mubr.msk.bf16.mxu0 %vm3868_vm2, %v3865_v8 }
 0x70c   : > { %3706 = vmatprep.mubr.msk.bf16.mxu1 %vm3868_vm2, %v3865_v8 }
 0x70d   : > { %3693 = vmatpush3.bf16.msra.mxu0 %v2394_v21 }
 0x70e   : > { %3703 = vmatpush3.bf16.msra.mxu1 %v2451_v18  ;;  %3694 = vmatprep.subr.bf16.mxu0 %v3865_v8  ;;  %v3251_v18 = vcombine.low %v2634_v12, %v2635_v13 }
 0x70f   : > { %v2396_v23 = vpop.permute.xlu0 %2395  ;;  %3704 = vmatprep.subr.bf16.mxu1 %v3865_v8 }
 0x710   : > { %v2403_v24 = vsel %vm978_vm7, %v2396_v23, 0  ;;  %2644 = vrot.lane.b32.xlu0 %v3251_v18, %s4633_s21 }
 0x711   : > { %3695 = vmatpush3.bf16.msra.mxu0 %v2403_v24 }
 0x712   : > { %3705 = vmatpush3.bf16.msra.mxu1 %v2460_v25  ;;  %3710 = vmatprep.subr.bf16.mxu0 %v3865_v8  ;;  %v3846_v25 = vld [vmem:[%s4569_s7] ss:$16 sps:$4 sm:$0xff]  }
 0x713   : > { %v2390_v27 = vpop.permute.xlu0 %2389  ;;  %3720 = vmatprep.subr.bf16.mxu1 %v3865_v8 }
 0x714   : > { %3697 = vmatmul.mubr.msk.bf16.vlgmr.msra.gmra.mrb[68].mxu0 %vm1984_vm14, %v2390_v27 }
 0x715   : > { %3707 = vmatmul.mubr.msk.bf16.vlgmr.msra.gmra.mrb[68].mxu1 %vm1984_vm14, %v2447_v26  ;;  %3716 = vmatprep.mubr.msk.bf16.mxu0 %vm3868_vm2, %v3865_v8  ;;  %v3849_v26 = vld [vmem:[%s4569_s7 + $0x4] ss:$16 sps:$4 sm:$0xff]  }
 0x716   : > { %3721 = vmatpush3.bf16.msra.mxu1 %v4355_v46  ;;  %3726 = vmatprep.mubr.msk.bf16.mxu1 %vm3868_vm2, %v3865_v8 }
 0x717   : > { %3722 = vmatprep.subr.bf16.mxu1 %v3865_v8 }
 0x71a   : > { %3723 = vmatpush3.bf16.msra.mxu1 %v4184_v4 }
 0x71b   : > { %3724 = vmatprep.subr.bf16.mxu1 %v3865_v8 }
 0x724   : > { %v2507_v28 = vpop.permute.xlu0 %2506 }
 0x728   : > { %v2537_v29 = vpop.permute.xlu0 %2536 }
 0x729   : > { %3711 = vmatpush3.bf16.msra.mxu0 %v2537_v29 }
 0x72a   : > { %3712 = vmatprep.subr.bf16.mxu0 %v3865_v8 }
 0x745   : > { %v2071_v30 = vpop.f32.mrb[56].mxu0 }
 0x746   : > { %v3638_v31 = vpop.f32.mrb[57].mxu0 }
 0x747   : > { %v2074_v32 = vpop.f32.mrb[58].mxu0 }
 0x748   : > { %v3639_v19 = vpop.f32.mrb[59].mxu0  ;;  %v3850_v32 = vld [vmem:[%s4569_s7 + $0x4] ss:$16 sps:$4 sm:$0xff]  }
 0x7b7   : > { %v2025_v33 = vpop.f32.mrb[52].mxu1 }
 0x7b8   : > { %v2072_v34 = vadd.f32 %v2071_v30, %v2025_v33  ;;  %v3628_v35 = vpop.f32.mrb[53].mxu1 }
 0x7b9   : > { %v2028_v36 = vpop.f32.mrb[54].mxu1  ;;  %v3852_v35 = vld [vmem:[%s4569_s7 + $0x8] ss:$16 sps:$4 sm:$0xff]  }
 0x7ba   : > { %v3629_v37 = vpop.f32.mrb[55].mxu1  ;;  %v3080_v36 = vld [vmem:[%s4574_s12 + $0x8] sm:$0xff] }
 0x7bb   : > { %v3079_v37 = vld [vmem:[%s4574_s12] sm:$0xff] }
 0x7c3   : > { %v2127_v38 = vpop.f32.mrb[56].mxu1 }
 0x7c4   : > { %v2133_v39 = vadd.f32 %v2127_v38, %v2072_v34  ;;  %v3648_v40 = vpop.f32.mrb[57].mxu1 }
 0x7c5   : > { %v2130_v42 = vpop.f32.mrb[58].mxu1 }
 0x7c6   : > { %v3649_v41 = vpop.f32.mrb[59].mxu1 }
 0x7cf   : > { %v2193_v43 = vpop.f32.mrb[60].mxu0  ;;  %v2254_v44 = vpop.f32.mrb[60].mxu1 }
 0x7d0   : > { %v2199_v45 = vadd.f32 %v2193_v43, %v2133_v39  ;;  %v3658_v47 = vpop.f32.mrb[61].mxu0  ;;  %v3668_v48 = vpop.f32.mrb[61].mxu1 }
 0x7d1   : > { %v2196_v49 = vpop.f32.mrb[62].mxu0  ;;  %v2257_v50 = vpop.f32.mrb[62].mxu1 }
 0x7d2   : > { %v2260_v51 = vadd.f32 %v2254_v44, %v2199_v45  ;;  %v3659_v52 = vpop.f32.mrb[63].mxu0  ;;  %v3669_v53 = vpop.f32.mrb[63].mxu1 }
 0x7d3   : > { %v2651_v39 = vpop.permute.xlu0 %2650 }
 0x7d7   : > { %v2645_v40 = vpop.permute.xlu0 %2644 }
 0x7db   : > { %v2311_v54 = vpop.f32.mrb[64].mxu0 }
 0x7dc   : > { %v2317_v55 = vadd.f32 %v2311_v54, %v2260_v51  ;;  %v3678_v56 = vpop.f32.mrb[65].mxu0  ;;  %v2378_v57 = vpop.f32.mrb[64].mxu1 }
 0x7dd   : > { %v2314_v58 = vpop.f32.mrb[66].mxu0  ;;  %v3688_v59 = vpop.f32.mrb[65].mxu1 }
 0x7de   : > { %v2384_v60 = vadd.f32 %v2378_v57, %v2317_v55  ;;  %v3679_v61 = vpop.f32.mrb[67].mxu0  ;;  %v2381_v62 = vpop.f32.mrb[66].mxu1 }
 0x7df   : > { %v3689_v63 = vpop.f32.mrb[67].mxu1 }
 0x7e7   : > { %v2439_v0 = vpop.f32.mrb[68].mxu0 }
 0x7e8   : > { %v2445_v1 = vadd.f32 %v2439_v0, %v2384_v60  ;;  %v2496_v2 = vpop.f32.mrb[68].mxu1  ;;  %v3698_v3 = vpop.f32.mrb[69].mxu0 }
 0x7e9   : > { %v3708_v5 = vpop.f32.mrb[69].mxu1  ;;  %v2442_v6 = vpop.f32.mrb[70].mxu0 }
 0x7ea   : > { %v2502_v7 = vadd.f32 %v2496_v2, %v2445_v1  ;;  %v2499_v9 = vpop.f32.mrb[70].mxu1  ;;  %v3699_v10 = vpop.f32.mrb[71].mxu0  ;;  %v3854_v1 = vld [vmem:[%s4569_s7 + $0xc] ss:$16 sps:$4 sm:$0xff]  }
 0x7eb   : > { %v3709_v14 = vpop.f32.mrb[71].mxu1 }
 0x7ec   : > { %v2509_v17 = vadd.f32 %v2507_v28, %v2502_v7 }
 0x7ee   : > { %vm2510_vm15 = vcmp.ge.f32.partialorder %v2509_v17, 0.0  ;;  %v2511_v20 = vmul.f32 0.2, %v2509_v17 }
 0x7f0   : > { %v2512_v21 = vsel %vm2510_vm15, %v2509_v17, %v2511_v20 }
 0x7f1   : > { %v2513_v22 = vmul.f32 %v2512_v21, %v3980_v11  ;;  %v3847_v11 = vld [vmem:[%s4569_s7 + $0x4] ss:$16 sps:$4 sm:$0xff]  }
 0x7f3   : > { %v2514_v23 = vpack.c.bf16 %v2513_v22, %v2513_v22 }
 0x7f5   : > { %v2516_v24 = vrot.slane %v2514_v23, 4 }
 0x7f7   : > { %2517 = vrot.lane.b32.xlu1 %v2516_v24, %s4634_s0 }
 0x7fb   : > { %2538 = vrot.lane.b32.xlu1 %v4184_v4, %s4635_s18 }
 0x7ff   : > { %2531 = vrot.lane.b32.xlu1 %v3846_v25, %s4636_s16 }
 0x803   : > { %2652 = vrot.lane.b32.xlu1 %v4184_v4, %s4637_s1 }
 0x807   : > { %2714 = vrot.lane.b32.xlu1 %v4355_v46, %s4622_s29 }
 0x80b   : > { %2646 = vrot.lane.b32.xlu1 %v3847_v11, %s4633_s21 }
 0x80f   : > { %2716 = vrot.lane.b32.xlu1 %v4184_v4, %s4622_s29 }
 0x813   : > { %2712 = vrot.lane.b32.xlu1 %v3849_v26, %s4619_s23 }
 0x817   : > { %2769 = vrot.lane.b32.xlu1 %v3849_v26, %s4620_s15  ;;  %s4638_s15 = smov 106  }
 0x869   : > { %v2518_v27 = vpop.permute.xlu1 %2517 }
 0x86a   : > { %2520 = vst.msk [vmem:[#allocation2 + $0x10] sm:$0xf0] %vm1477_vm11, %v2518_v27 }
 0x86d   : > { %v2539_v28 = vpop.permute.xlu1 %2538 }
 0x86e   : > { %3713 = vmatpush3.bf16.msra.mxu0 %v2539_v28 }
 0x86f   : > { %3714 = vmatprep.subr.bf16.mxu0 %v3865_v8 }
 0x871   : > { %v2532_v29 = vpop.permute.xlu1 %2531  ;;  %v2523_v30 = vld [vmem:[#allocation2 + $0x10] sm:$0xff] }
 0x872   : > { %2718 = vrot.lane.b32.xlu1 %v2523_v30, %s4622_s29  ;;  %2540 = vrot.lane.b32.xlu0 %v2523_v30, %s4635_s18 }
 0x873   : > { %3725 = vmatpush3.bf16.msra.mxu1 %v2523_v30 }
 0x874   : > { %3740 = vmatprep.subr.bf16.mxu1 %v3865_v8 }
 0x875   : > { %v2653_v31 = vpop.permute.xlu1 %2652 }
 0x876   : > { %2843 = vrot.lane.b32.xlu1 %v4184_v4, %s4624_s24  ;;  %2771 = vrot.lane.b32.xlu0 %v4355_v46, %s4623_s22 }
 0x877   : > { %3727 = vmatmul.mubr.msk.bf16.vlgmr.msra.gmra.mrb[72].mxu1 %vm2545_vm0, %v3846_v25 }
 0x878   : > { %3746 = vmatprep.mubr.msk.bf16.mxu1 %vm3868_vm2, %v3865_v8 }
 0x879   : > { %v2715_v19 = vpop.permute.xlu1 %2714 }
 0x87a   : > { %2836 = vrot.lane.b32.xlu1 %v3850_v32, %s4629_s27  ;;  %2773 = vrot.lane.b32.xlu0 %v4184_v4, %s4623_s22 }
 0x87b   : > { %3741 = vmatpush3.bf16.msra.mxu1 %v2715_v19 }
 0x87c   : > { %3742 = vmatprep.subr.bf16.mxu1 %v3865_v8 }
 0x87d   : > { %v2647_v33 = vpop.permute.xlu1 %2646 }
 0x87e   : > { %2845 = vrot.lane.b32.xlu1 %v2523_v30, %s4624_s24  ;;  %2654 = vrot.lane.b32.xlu0 %v2523_v30, %s4637_s1  ;;  %v2649_v48 = vsel %vm1495_vm12, %v2645_v40, %v2647_v33 }
 0x881   : > { %v2717_v34 = vpop.permute.xlu1 %2716 }
 0x882   : > { %2962 = vrot.lane.b32.xlu1 %v4355_v46, %s4631_s28  ;;  %2841 = vrot.lane.b32.xlu0 %v4355_v46, %s4624_s24 }
 0x883   : > { %3743 = vmatpush3.bf16.msra.mxu1 %v2717_v34 }
 0x884   : > { %3744 = vmatprep.subr.bf16.mxu1 %v3865_v8 }
 0x885   : > { %v2713_v38 = vpop.permute.xlu1 %2712 }
 0x886   : > { %3024 = vrot.lane.b32.xlu1 %v4355_v46, %s4638_s15  ;;  %2905 = vrot.lane.b32.xlu0 %v4355_v46, %s4630_s30  ;;  %v3853_v46 = vld [vmem:[%s4569_s7 + $0x8] ss:$16 sps:$4 sm:$0xff]  }
 0x889   : > { %v2770_v42 = vpop.permute.xlu1 %2769 }
 0x88a   : > { %3026 = vrot.lane.b32.xlu1 %v4184_v4, %s4638_s15  ;;  %2775 = vrot.lane.b32.xlu0 %v2523_v30, %s4623_s22 }
 0x88e   : > { %3028 = vrot.lane.b32.xlu1 %v2523_v30, %s4638_s15  ;;  %2907 = vrot.lane.b32.xlu0 %v4184_v4, %s4630_s30 }
 0x892   : > { %2838 = vrot.lane.b32.xlu0 %v3852_v35, %s4629_s27  ;;  %3083 = vperm.xlu1 %3832, %v3079_v37  }
 0x896   : > { %2909 = vrot.lane.b32.xlu0 %v2523_v30, %s4630_s30 }
 0x89a   : > { %2903 = vrot.lane.b32.xlu0 %v3853_v46, %s4621_s26 }
 0x89e   : > { %2964 = vrot.lane.b32.xlu0 %v4184_v4, %s4631_s28 }
 0x8a2   : > { %2966 = vrot.lane.b32.xlu0 %v2523_v30, %s4631_s28 }
 0x8a6   : > { %2960 = vrot.lane.b32.xlu0 %v3853_v46, %s4625_s17 }
 0x8aa   : > { %3088 = vperm.xlu0 %3831, %v3080_v36  }
 0x8e4   : > { %v2541_v41 = vpop.permute.xlu0 %2540  ;;  %v2719_v4 = vpop.permute.xlu1 %2718 }
 0x8e5   : > { %3715 = vmatpush3.bf16.msra.mxu0 %v2541_v41  ;;  %3745 = vmatpush3.bf16.msra.mxu1 %v2719_v4 }
 0x8e6   : > { %3730 = vmatprep.subr.bf16.mxu0 %v3865_v8  ;;  %3760 = vmatprep.subr.bf16.mxu1 %v3865_v8 }
 0x8e8   : > { %v2772_v43 = vpop.permute.xlu0 %2771  ;;  %3717 = vmatmul.mubr.msk.bf16.vlgmr.msra.gmra.mrb[72].mxu0 %vm2545_vm0, %v2532_v29  ;;  %3747 = vmatmul.mubr.msk.bf16.vlgmr.msra.gmra.mrb[76].mxu1 %vm2545_vm0, %v2713_v38  ;;  %v2844_v45 = vpop.permute.xlu1 %2843 }
 0x8e9   : > { %3731 = vmatpush3.bf16.msra.mxu0 %v2651_v39  ;;  %3736 = vmatprep.mubr.msk.bf16.mxu0 %vm3868_vm2, %v3865_v8 }
 0x8ea   : > { %3732 = vmatprep.subr.bf16.mxu0 %v3865_v8  ;;  %3766 = vmatprep.mubr.msk.bf16.mxu1 %vm3868_vm2, %v3865_v8 }
 0x8ec   : > { %v2774_v44 = vpop.permute.xlu0 %2773  ;;  %v2837_v50 = vpop.permute.xlu1 %2836 }
 0x8ed   : > { %3733 = vmatpush3.bf16.msra.mxu0 %v2653_v31 }
 0x8ee   : > { %3734 = vmatprep.subr.bf16.mxu0 %v3865_v8 }
 0x8f0   : > { %v2655_v47 = vpop.permute.xlu0 %2654  ;;  %v2846_v52 = vpop.permute.xlu1 %2845 }
 0x8f1   : > { %3735 = vmatpush3.bf16.msra.mxu0 %v2655_v47 }
 0x8f2   : > { %3750 = vmatprep.subr.bf16.mxu0 %v3865_v8 }
 0x8f4   : > { %v2842_v49 = vpop.permute.xlu0 %2841  ;;  %3737 = vmatmul.mubr.msk.bf16.vlgmr.msra.gmra.mrb[76].mxu0 %vm2545_vm0, %v2649_v48  ;;  %v2963_v55 = vpop.permute.xlu1 %2962 }
 0x8f5   : > { %3751 = vmatpush3.bf16.msra.mxu0 %v2772_v43  ;;  %3761 = vmatpush3.bf16.msra.mxu1 %v2842_v49 }
 0x8f6   : > { %3752 = vmatprep.subr.bf16.mxu0 %v3865_v8  ;;  %3762 = vmatprep.subr.bf16.mxu1 %v3865_v8 }
 0x8f7   : > { %3756 = vmatprep.mubr.msk.bf16.mxu0 %vm3868_vm2, %v3865_v8 }
 0x8f8   : > { %v2906_v51 = vpop.permute.xlu0 %2905  ;;  %v3025_v59 = vpop.permute.xlu1 %3024 }
 0x8f9   : > { %3753 = vmatpush3.bf16.msra.mxu0 %v2774_v44  ;;  %3763 = vmatpush3.bf16.msra.mxu1 %v2844_v45 }
 0x8fa   : > { %3754 = vmatprep.subr.bf16.mxu0 %v3865_v8  ;;  %3764 = vmatprep.subr.bf16.mxu1 %v3865_v8 }
 0x8fc   : > { %v2776_v53 = vpop.permute.xlu0 %2775  ;;  %v3027_v61 = vpop.permute.xlu1 %3026 }
 0x8fd   : > { %3755 = vmatpush3.bf16.msra.mxu0 %v2776_v53  ;;  %3765 = vmatpush3.bf16.msra.mxu1 %v2846_v52 }
 0x8fe   : > { %3770 = vmatprep.subr.bf16.mxu0 %v3865_v8  ;;  %3780 = vmatprep.subr.bf16.mxu1 %v3865_v8 }
 0x900   : > { %v2908_v54 = vpop.permute.xlu0 %2907  ;;  %3757 = vmatmul.mubr.msk.bf16.vlgmr.msra.gmra.mrb[80].mxu0 %vm2545_vm0, %v2770_v42  ;;  %v3029_v0 = vpop.permute.xlu1 %3028 }
 0x901   : > { %3771 = vmatpush3.bf16.msra.mxu0 %v2906_v51  ;;  %3776 = vmatprep.mubr.msk.bf16.mxu0 %vm3868_vm2, %v3865_v8  ;;  %v3095_v51 = vunpack.c.l.bf16 %v3982_v15 }
 0x902   : > { %3772 = vmatprep.subr.bf16.mxu0 %v3865_v8 }
 0x904   : > { %v2839_v56 = vpop.permute.xlu0 %2838 }
 0x905   : > { %v2840_v57 = vsel %vm508_vm4, %v2837_v50, %v2839_v56  ;;  %3773 = vmatpush3.bf16.msra.mxu0 %v2908_v54  ;;  %v3096_v54 = vunpack.c.l.bf16 %v3984_v16 }
 0x906   : > { %3767 = vmatmul.mubr.msk.bf16.vlgmr.msra.gmra.mrb[80].mxu1 %vm2545_vm0, %v2840_v57  ;;  %3774 = vmatprep.subr.bf16.mxu0 %v3865_v8 }
 0x907   : > { %3781 = vmatpush3.bf16.msra.mxu1 %v2963_v55  ;;  %3786 = vmatprep.mubr.msk.bf16.mxu1 %vm3868_vm2, %v3865_v8 }
 0x908   : > { %v2910_v58 = vpop.permute.xlu0 %2909  ;;  %3782 = vmatprep.subr.bf16.mxu1 %v3865_v8 }
 0x909   : > { %3775 = vmatpush3.bf16.msra.mxu0 %v2910_v58 }
 0x90a   : > { %3790 = vmatprep.subr.bf16.mxu0 %v3865_v8 }
 0x90c   : > { %v2904_v60 = vpop.permute.xlu0 %2903 }
 0x90d   : > { %3777 = vmatmul.mubr.msk.bf16.vlgmr.msra.gmra.mrb[84].mxu0 %vm2545_vm0, %v2904_v60 }
 0x90e   : > { %3791 = vmatpush3.bf16.msra.mxu0 %v3025_v59  ;;  %3796 = vmatprep.mubr.msk.bf16.mxu0 %vm3868_vm2, %v3865_v8  ;;  %v3275_v59 = vld [vmem:[%s455_s20] sm:$0xff]  }
 0x90f   : > { %3792 = vmatprep.subr.bf16.mxu0 %v3865_v8  ;;  %v3277_v15 = vunpack.c.h.bf16 %v3275_v59 }
 0x910   : > { %v2965_v62 = vpop.permute.xlu0 %2964 }
 0x911   : > { %3783 = vmatpush3.bf16.msra.mxu1 %v2965_v62  ;;  %v3084_v44 = vpop.permute.xlu1 %3083 }
 0x912   : > { %3793 = vmatpush3.bf16.msra.mxu0 %v3027_v61  ;;  %3784 = vmatprep.subr.bf16.mxu1 %v3865_v8  ;;  %v3097_v61 = vmul.f32 0.2, %v3095_v51 }
 0x913   : > { %3794 = vmatprep.subr.bf16.mxu0 %v3865_v8 }
 0x914   : > { %v2967_v63 = vpop.permute.xlu0 %2966 }
 0x915   : > { %3785 = vmatpush3.bf16.msra.mxu1 %v2967_v63 }
 0x916   : > { %3795 = vmatpush3.bf16.msra.mxu0 %v3029_v0  ;;  %v3098_v0 = vmul.f32 0.2, %v3096_v54 }
 0x918   : > { %v2961_v2 = vpop.permute.xlu0 %2960 }
 0x919   : > { %3787 = vmatmul.mubr.msk.bf16.vlgmr.msra.gmra.mrb[84].mxu1 %vm2545_vm0, %v2961_v2  ;;  %3797 = vmatmul.mubr.msk.bf16.vlgmr.msra.gmra.mrb[88].mxu0 %vm2545_vm0, %v3854_v1  ;;  %v3276_v2 = vunpack.c.l.bf16 %v3275_v59 }
 0x929   : > { %v3089_v63 = vpop.permute.xlu0 %3088 }
 0x94a   : > { %v2627_v3 = vpop.f32.mrb[72].mxu1 }
 0x94b   : > { %v3728_v5 = vpop.f32.mrb[73].mxu1 }
 0x94c   : > { %v2630_v6 = vpop.f32.mrb[74].mxu1 }
 0x94d   : > { %v3729_v7 = vpop.f32.mrb[75].mxu1 }
 0x9bb   : > { %v2583_v9 = vpop.f32.mrb[72].mxu0  ;;  %v2760_v10 = vpop.f32.mrb[76].mxu1 }
 0x9bc   : > { %v2628_v8 = vadd.f32 %v2627_v3, %v2583_v9  ;;  %v3718_v12 = vpop.f32.mrb[73].mxu0  ;;  %v3748_v13 = vpop.f32.mrb[77].mxu1 }
 0x9bd   : > { %v2586_v14 = vpop.f32.mrb[74].mxu0  ;;  %v2763_v17 = vpop.f32.mrb[78].mxu1 }
 0x9be   : > { %v2631_v18 = vadd.f32 %v2630_v6, %v2586_v14  ;;  %v3719_v20 = vpop.f32.mrb[75].mxu0  ;;  %v3749_v21 = vpop.f32.mrb[79].mxu1 }
 0x9c7   : > { %v2696_v22 = vpop.f32.mrb[76].mxu0 }
 0x9c8   : > { %v2703_v23 = vadd.f32 %v2696_v22, %v2628_v8  ;;  %v3738_v24 = vpop.f32.mrb[77].mxu0 }
 0x9c9   : > { %v2699_v25 = vpop.f32.mrb[78].mxu0 }
 0x9ca   : > { %v2704_v11 = vadd.f32 %v2699_v25, %v2631_v18  ;;  %v3739_v26 = vpop.f32.mrb[79].mxu0  ;;  %v2767_v27 = vadd.f32 %v2760_v10, %v2703_v23 }
 0x9cc   : > { %v2768_v28 = vadd.f32 %v2763_v17, %v2704_v11 }
 0x9d3   : > { %v2817_v29 = vpop.f32.mrb[80].mxu0 }
 0x9d4   : > { %v2824_v30 = vadd.f32 %v2817_v29, %v2767_v27  ;;  %v3758_v31 = vpop.f32.mrb[81].mxu0 }
 0x9d5   : > { %v2820_v32 = vpop.f32.mrb[82].mxu0 }
 0x9d6   : > { %v2825_v19 = vadd.f32 %v2820_v32, %v2768_v28  ;;  %v3759_v33 = vpop.f32.mrb[83].mxu0 }
 0x9d9   : > { %v2887_v34 = vpop.f32.mrb[80].mxu1 }
 0x9da   : > { %v2894_v35 = vadd.f32 %v2887_v34, %v2824_v30  ;;  %v3768_v46 = vpop.f32.mrb[81].mxu1 }
 0x9db   : > { %v2890_v36 = vpop.f32.mrb[82].mxu1 }
 0x9dc   : > { %v2895_v37 = vadd.f32 %v2890_v36, %v2825_v19  ;;  %v3769_v38 = vpop.f32.mrb[83].mxu1 }
 0x9e0   : > { %v2951_v39 = vpop.f32.mrb[84].mxu0 }
 0x9e1   : > { %v2958_v40 = vadd.f32 %v2951_v39, %v2894_v35  ;;  %v3778_v42 = vpop.f32.mrb[85].mxu0 }
 0x9e2   : > { %v2954_v41 = vpop.f32.mrb[86].mxu0 }
 0x9e3   : > { %v2959_v4 = vadd.f32 %v2954_v41, %v2895_v37  ;;  %v3779_v43 = vpop.f32.mrb[87].mxu0 }
 0x9ec   : > { %v3008_v45 = vpop.f32.mrb[84].mxu1  ;;  %v3070_v47 = vpop.f32.mrb[88].mxu0 }
 0x9ed   : > { %v3015_v48 = vadd.f32 %v3008_v45, %v2958_v40  ;;  %v3788_v49 = vpop.f32.mrb[85].mxu1  ;;  %v3798_v50 = vpop.f32.mrb[89].mxu0 }
 0x9ee   : > { %v3011_v52 = vpop.f32.mrb[86].mxu1  ;;  %v3073_v53 = vpop.f32.mrb[90].mxu0 }
 0x9ef   : > { %v3077_v55 = vadd.f32 %v3070_v47, %v3015_v48  ;;  %v3016_v56 = vadd.f32 %v3011_v52, %v2959_v4  ;;  %v3789_v57 = vpop.f32.mrb[87].mxu1  ;;  %v3799_v58 = vpop.f32.mrb[91].mxu0 }
 0x9f1   : > { %v3078_v60 = vadd.f32 %v3073_v53, %v3016_v56  ;;  %v3091_v62 = vadd.f32 %v3084_v44, %v3077_v55 }
 0x9f3   : > { %v3092_v1 = vadd.f32 %v3089_v63, %v3078_v60  ;;  %v3093_v3 = vmul.f32 0.04, %v3091_v62 }
 0x9f5   : > { %v3094_v5 = vmul.f32 0.04, %v3092_v1  ;;  %v3099_v6 = vadd.f32 %v3097_v61, %v3093_v3 }
 0x9f7   : > { %v3100_v7 = vadd.f32 %v3098_v0, %v3094_v5  ;;  %v3105_v9 = vadd.f32 %v3276_v2, %v3099_v6 }
 0x9f9   : > { %v3106_v16 = vadd.f32 %v3277_v15, %v3100_v7  ;;  %v3272_v10 = vpack.c.bf16 %v3105_v9, %v3105_v9 }
 0x9fb   : > { %v3273_v8 = vpack.c.bf16 %v3106_v16, %v3106_v16  ;;  %3116 = vst.msk [vmem:[%s460_s19] sm:$0xf] %vm3115_vm1, %v3272_v10 }
 0x9fd   : > { %3117 = vst.msk [vmem:[%s460_s19 + $0x4] sm:$0xf] %vm3115_vm1, %v3273_v8 }
 0x9fe PF: > { %s23_s25 = sadd.s32 1, %s3862_s25  }
 0x9ff   : > { %p20_p4 = scmp.ge.s32.totalorder %s23_s25, 4  }
 0xa01   :  { %22 = sbr.rel (!%p20_p4) target bundleno = 5 (0x5), region = 105 }

// kernel: rrdb_model_forward.13
= control target key start
LH: loop header
LB: loop body
LE: loop exit
PB: predicated region body
PF: predicated region fallthrough
CT: control target
= control target key end

     0   :  { %s6421_s21 = smov 0   ;;  %s7192_s0 = inlined_call_operand.vmem [shape: bf16[1,324], index: 0, kind: input, shape index: {}]   ;;  %s7193_s1 = inlined_call_operand.vmem [shape: bf16[2,16,324], index: 1, kind: input, shape index: {}]   ;;  %s7194_s2 = inlined_call_operand.vmem [shape: bf16[16,144], index: 2, kind: input, shape index: {}]   ;;  %s7195_s3 = inlined_call_operand.vmem [shape: bf16[16,144], index: 3, kind: input, shape index: {}]   ;;  %s7196_s4 = inlined_call_operand.vmem [shape: bf16[16,144], index: 4, kind: input, shape index: {}]   ;;  %s7197_s5 = inlined_call_operand.vmem [shape: bf16[16,144], index: 5, kind: input, shape index: {}]   ;;  %s7198_s6 = inlined_call_operand.vmem [shape: bf16[3,144], index: 6, kind: input, shape index: {}]   ;;  %s7199_s7 = inlined_call_operand.vmem [shape: f32[16,1], index: 7, kind: input, shape index: {}]   ;;  %s7200_s8 = inlined_call_operand.vmem [shape: f32[16,1], index: 8, kind: input, shape index: {}]   ;;  %s7201_s9 = inlined_call_operand.vmem [shape: f32[16,1], index: 9, kind: input, shape index: {}]   ;;  %s7202_s10 = inlined_call_operand.vmem [shape: f32[16,1], index: 10, kind: input, shape index: {}]   ;;  %s7203_s11 = inlined_call_operand.vmem [shape: f32[3,1], index: 11, kind: input, shape index: {}]   ;;  %s7204_s12 = inlined_call_operand.vmem [shape: bf16[2,3,324], index: 12, kind: output, shape index: {}]  }
   0x1   :  { %7236 = sst [smem:[#allocation3_spill]] %s7192_s0 }
   0x2   :  { %7237 = sst [smem:[#allocation4_spill]] %s7193_s1 }
   0x3 LB: > { %s5679_s22 = sadd.s32 4294967295, %s6333_s21   ;;  %p5683_p0 = scmp.ge.s32.totalorder %s6333_s21, 1  ;;  %s6333_s21 = sphi %s6421_s21, %s22_s21  }
   0x4   : > { %p362_p1 = scmp.lt.s32.totalorder %s6333_s21, 3 }
   0x6   : > { %p363_p2 = pnand %p5683_p0, %p362_p1 }
   0x7   : > { %p6429_p3 = scmp.lt.s32.totalorder (!%p363_p2), %s5679_s22, 1  ;;  %s7239_s0 = sld [smem:[#allocation3_spill]] (!%p363_p2)  ;;  %v429_v1 = vlaneseq (!%p363_p2)  ;;  %v6335_v2 = vmov (!%p363_p2), 1966171168   ;;  %vm417_vm0 = vcmask (!%p363_p2), 154624   ;;  %v6336_v6 = vmov (!%p363_p2), 0  }
   0x8   : > { %366 = sbr.rel (%p363_p2) target bundleno = 2835 (0xb13), region = 68  ;;  %v427_v3 = vunpack.c.l.s4 (!%p363_p2), %v6335_v2  ;;  %418 = vst.msk [vmem:[#allocation2] sm:$0xff] (!%p363_p2), %vm417_vm0, %v6336_v6  ;;  %577 = vmatprep.mubr.bf16.mxu0 (!%p363_p2), %v6336_v6  ;;  %6317 = vset.pattern.permute.xlu0 (!%p363_p2), %v6336_v6  ;;  %vm419_vm1 = vcmask (!%p363_p2), 868024   ;;  %s7240_s1 = sld [smem:[#allocation4_spill]] (!%p363_p2)  ;;  %v6338_v42 = vmov (!%p363_p2), 0.0   ;;  %vm509_vm2 = vcmask (!%p363_p2), 1047704  }
   0x9   : > { %v6436_v5 = vshrl.u32 (!%p363_p2), %v429_v1, 7  ;;  %6318 = vset.pattern.permute.xlu1 (!%p363_p2), %v6336_v6  ;;  %420 = vst.msk [vmem:[#allocation2 + $0x10] sm:$0xff] (!%p363_p2), %vm419_vm1, %v6336_v6  ;;  %s7230_s30 = smov (!%p363_p2), 19   ;;  %5888 = vmatprep.subr.bf16.mxu1 (!%p363_p2), %v6338_v42  ;;  %vm512_vm3 = vcmask (!%p363_p2), 711680   ;;  %vm6339_vm4 = vmmov (!%p363_p2), 0   ;;  %s7234_s13 = smov (!%p363_p2), 127  }
   0xa   : > { %v428_v7 = vunpack.c.0.s8 (!%p363_p2), %v427_v3  ;;  %5890 = vmatprep.mubr.msk.bf16.mxu1 (!%p363_p2), %vm6339_vm4, %v6338_v42  ;;  %v6487_v50 = vld [vmem:[%s7194_s2] ss:$8 sps:$4 sm:$0xff] (!%p363_p2)   ;;  %s7228_s16 = smov (!%p363_p2), 126   ;;  %s7226_s17 = smov (!%p363_p2), 112   ;;  %vm535_vm5 = vcmask (!%p363_p2), 1039360   ;;  %vm541_vm6 = vcmask (!%p363_p2), 130048  }
   0xb   : > { %v454_v8 = vsub.s32 (!%p363_p2), 0, %v6436_v5  ;;  %v1513_v9 = vsub.s32 (!%p363_p2), 2, %v6436_v5  ;;  %v1517_v10 = vsub.s32 (!%p363_p2), 4, %v6436_v5  ;;  %s7224_s18 = smov (!%p363_p2), 110   ;;  %s7222_s19 = smov (!%p363_p2), 96   ;;  %v1470_v51 = vld [vmem:[%s7199_s7] sm:$0xff] (!%p363_p2) }
   0xc   : > { %v431_v11 = vsub.s32 (!%p363_p2), %v428_v7, %v6436_v5  ;;  %s7220_s20 = smov (!%p363_p2), 109   ;;  %s7218_s23 = smov (!%p363_p2), 80   ;;  %v1471_v52 = vld [vmem:[%s7199_s7 + $0x8] sm:$0xff] (!%p363_p2)  ;;  %vm724_vm7 = vcmask (!%p363_p2), 1031168   ;;  %vm831_vm8 = vcmask (!%p363_p2), 900096   ;;  %vm938_vm9 = vcmask (!%p363_p2), 891904  }
   0xd   : > { %v415_v0 = vld [vmem:[%s7239_s0] sm:$0x7] (!%p363_p2)  ;;  %s7216_s24 = smov (!%p363_p2), 108   ;;  %s7214_s25 = smov (!%p363_p2), 64   ;;  %vm1045_vm10 = vcmask (!%p363_p2), 883712   ;;  %vm1152_vm11 = vcmask (!%p363_p2), 752640  }
   0xe   : > { %v416_v4 = vunpack.c.l.bf16 (!%p363_p2), %v415_v0  ;;  %v432_v15 = vrot.slane (!%p363_p2), %v415_v0, %v431_v11  ;;  %s7207_s27 = smov (!%p363_p2), 48   ;;  %s7211_s28 = smov (!%p363_p2), 91   ;;  %vm1259_vm12 = vcmask (!%p363_p2), 744448   ;;  %vm7213_vm13 = vcmask (!%p363_p2), 736256  }
   0xf   : > { %s7269_s22 = smov (!%p6429_p3, %s5679_s22), 1  ;;  %s6353_s14 = smov 90  }
  0x10   : > { %v1510_v12 = vrot.slane %v416_v4, %v454_v8  ;;  %v1514_v13 = vrot.slane %v416_v4, %v1513_v9  ;;  %v1518_v14 = vrot.slane %v416_v4, %v1517_v10  ;;  %s6286_s26 = smul.u32 24, %s7269_s22  ;;  %v433_v19 = vcombine.high %v432_v15, %v432_v15  ;;  %s7232_s15 = smov 16  }
  0x11   : > { %v440_v20 = vrot.slane %v432_v15, %v431_v11 }
  0x12   : > { %v6452_v16 = vrot.slane %v1510_v12, %v454_v8  ;;  %v6454_v17 = vrot.slane %v1514_v13, %v454_v8  ;;  %v6456_v18 = vrot.slane %v1518_v14, %v454_v8  ;;  %v447_v21 = vrot.slane %v433_v19, %v431_v11  ;;  %s408_s29 = scalar_lea.vmem %s7240_s1, %s6286_s26  ;;  %s7209_s26 = smov 92  }
  0x13   : > { %v450_v22 = vpack.i.b16 %v440_v20, %v440_v20  ;;  %v448_v23 = vcombine.high %v440_v20, %v440_v20  ;;  %v421_v27 = vld [vmem:[%s408_s29] sm:$0xff]  ;;  %v423_v30 = vld [vmem:[%s408_s29 + $0xc] sm:$0xff]  ;;  %v422_v31 = vld [vmem:[%s408_s29 + $0x8] sm:$0xf] }
  0x14   : > { %v457_v25 = vpack.i.b16 %v447_v21, %v447_v21  ;;  %v424_v32 = vld [vmem:[%s408_s29 + $0x14] sm:$0xf]  ;;  %s7205_s29 = smov 32  }
  0x15   : > { %v455_v24 = vrot.slane %v450_v22, %v454_v8  ;;  %v464_v26 = vpack.i.b16 %v448_v23, %v448_v23 }
  0x16   : > { %v462_v28 = vrot.slane %v457_v25, %v454_v8 }
  0x17   : > { %v469_v29 = vrot.slane %v464_v26, %v454_v8 }
  0x18   : > { %v5686_v33 = vcombine.low %v455_v24, %v462_v28 }
  0x19   : > { %v5687_v34 = vcombine.low %v469_v29, %v469_v29 }
  0x1a   : > { %v480_v35 = vmul.bf16 %v5686_v33, %v421_v27  ;;  %v482_v36 = vmul.bf16 %v5686_v33, %v423_v30 }
  0x1b   : > { %v481_v37 = vmul.bf16 %v5687_v34, %v422_v31  ;;  %v483_v38 = vmul.bf16 %v5687_v34, %v424_v32  ;;  %v6320_v32 = vld [vmem:[%s7194_s2 + $0x4] ss:$8 sps:$4 sm:$0xff]  }
  0x1c   : > { %v5688_v39 = vcombine.low %v480_v35, %v482_v36  ;;  %v5689_v41 = vcombine.high %v480_v35, %v482_v36 }
  0x1d   : > { %v5690_v40 = vcombine.low %v481_v37, %v483_v38 }
  0x1e   : > { %497 = vrot.lane.b32.xlu0 %v5688_v39, %s7230_s30 }
  0x1f   : > { %501 = vrot.lane.b32.xlu1 %v5690_v40, %s7230_s30 }
  0x22   : > { %499 = vrot.lane.b32.xlu0 %v5689_v41, %s7230_s30 }
  0x90   : > { %v498_v43 = vpop.permute.xlu0 %497 }
  0x91   : > { %510 = vst.msk [vmem:[#allocation2] sm:$0xff] %vm509_vm2, %v498_v43  ;;  %v502_v44 = vpop.permute.xlu1 %501 }
  0x94   : > { %v500_v45 = vpop.permute.xlu0 %499 }
  0x95   : > { %v6470_v46 = vsel %vm417_vm0, %v498_v43, %v500_v45  ;;  %v505_v47 = vsel %vm417_vm0, %v500_v45, %v502_v44 }
  0x96   : > { %513 = vst.msk [vmem:[#allocation2 + $0x10] sm:$0xff] %vm512_vm3, %v505_v47  ;;  %531 = vrot.lane.b32.xlu1 %v6470_v46, %s7234_s13 }
  0x98   : > { %v6476_v48 = vld [vmem:[#allocation2] sm:$0xff] }
  0x9a   : > { %529 = vrot.lane.b32.xlu1 %v6476_v48, %s7234_s13 }
  0x9d   : > { %v6480_v49 = vld [vmem:[#allocation2 + $0x10] sm:$0xff] }
  0x9e   : > { %533 = vrot.lane.b32.xlu0 %v6480_v49, %s7234_s13  ;;  %720 = vrot.lane.b32.xlu1 %v6470_v46, %s7228_s16 }
  0xa2   : > { %524 = vrot.lane.b32.xlu0 %v6487_v50, %s7226_s17  ;;  %718 = vrot.lane.b32.xlu1 %v6476_v48, %s7228_s16 }
  0xa6   : > { %722 = vrot.lane.b32.xlu0 %v6480_v49, %s7228_s16  ;;  %827 = vrot.lane.b32.xlu1 %v6470_v46, %s7224_s18 }
  0xaa   : > { %716 = vrot.lane.b32.xlu0 %v6487_v50, %s7222_s19  ;;  %825 = vrot.lane.b32.xlu1 %v6476_v48, %s7224_s18 }
  0xae   : > { %829 = vrot.lane.b32.xlu0 %v6480_v49, %s7224_s18  ;;  %934 = vrot.lane.b32.xlu1 %v6470_v46, %s7220_s20 }
  0xb2   : > { %823 = vrot.lane.b32.xlu0 %v6487_v50, %s7218_s23  ;;  %932 = vrot.lane.b32.xlu1 %v6476_v48, %s7220_s20 }
  0xb6   : > { %936 = vrot.lane.b32.xlu0 %v6480_v49, %s7220_s20  ;;  %1041 = vrot.lane.b32.xlu1 %v6470_v46, %s7216_s24 }
  0xba   : > { %930 = vrot.lane.b32.xlu0 %v6487_v50, %s7214_s25  ;;  %1039 = vrot.lane.b32.xlu1 %v6476_v48, %s7216_s24 }
  0xbe   : > { %1043 = vrot.lane.b32.xlu0 %v6480_v49, %s7216_s24  ;;  %1148 = vrot.lane.b32.xlu1 %v6470_v46, %s7209_s26 }
  0xc2   : > { %1037 = vrot.lane.b32.xlu0 %v6487_v50, %s7207_s27  ;;  %1146 = vrot.lane.b32.xlu1 %v6476_v48, %s7209_s26  ;;  %s7242_s27 = smov 48  }
  0xc6   : > { %1150 = vrot.lane.b32.xlu0 %v6480_v49, %s7209_s26  ;;  %1255 = vrot.lane.b32.xlu1 %v6470_v46, %s7211_s28  ;;  %s7241_s26 = smov 92  }
  0xca   : > { %1144 = vrot.lane.b32.xlu0 %v6487_v50, %s7205_s29  ;;  %1253 = vrot.lane.b32.xlu1 %v6476_v48, %s7211_s28  ;;  %s7244_s29 = smov 32  }
  0xce   : > { %1257 = vrot.lane.b32.xlu0 %v6480_v49, %s7211_s28  ;;  %1367 = vrot.lane.b32.xlu1 %v6470_v46, %s6353_s14  ;;  %s7243_s28 = smov 91  }
  0xd2   : > { %1251 = vrot.lane.b32.xlu0 %v6487_v50, %s7232_s15  ;;  %1365 = vrot.lane.b32.xlu1 %v6476_v48, %s6353_s14 }
  0xd6   : > { %1369 = vrot.lane.b32.xlu0 %v6480_v49, %s6353_s14  ;;  %1479 = vperm.xlu1 %6318, %v1471_v52  }
  0xda   : > { %1474 = vperm.xlu0 %6317, %v1470_v51  }
 0x108   : > { %v532_v53 = vpop.permute.xlu1 %531 }
 0x10c   : > { %v530_v54 = vpop.permute.xlu1 %529 }
 0x10d   : > { %v536_v57 = vsel %vm535_vm5, %v530_v54, %v532_v53 }
 0x110   : > { %v534_v55 = vpop.permute.xlu0 %533  ;;  %v721_v59 = vpop.permute.xlu1 %720 }
 0x111   : > { %5889 = vmatpush3.bf16.msra.mxu1 %v534_v55  ;;  %v537_v56 = vsel %vm535_vm5, %v532_v53, %v534_v55 }
 0x112   : > { %545 = vmatprep.subr.bf16.mxu0 %v537_v56  ;;  %5894 = vmatprep.subr.bf16.mxu1 %v6338_v42 }
 0x113   : > { %546 = vmatpush1.bf16.msra.mxu0 %v536_v57 }
 0x114   : > { %v525_v58 = vpop.permute.xlu0 %524  ;;  %632 = vmatprep.subr.bf16.mxu0 %v6470_v46  ;;  %v719_v62 = vpop.permute.xlu1 %718 }
 0x115   : > { %5891 = vmatmul.mubr.msk.bf16.vlgmr.msra.gmra.mrb[0].mxu1 %vm541_vm6, %v525_v58  ;;  %v725_v3 = vsel %vm724_vm7, %v719_v62, %v721_v59 }
 0x116   : > { %5895 = vmatpush3.bf16.msra.mxu1 %v6480_v49  ;;  %5692 = vmatmul.mubr.msk.bf16.vlgmr.msra.gmra.mrb[0].mxu0 %vm541_vm6, %v525_v58 }
 0x117   : > { %633 = vmatpush1.bf16.msra.mxu0 %v6476_v48  ;;  %5896 = vmatprep.mubr.msk.bf16.mxu1 %vm6339_vm4, %v6338_v42 }
 0x118   : > { %v723_v60 = vpop.permute.xlu0 %722  ;;  %5900 = vmatprep.subr.bf16.mxu1 %v6338_v42  ;;  %664 = vmatprep.mubr.bf16.mxu0 %v6336_v6  ;;  %v828_v1 = vpop.permute.xlu1 %827 }
 0x119   : > { %v726_v61 = vsel %vm724_vm7, %v721_v59, %v723_v60 }
 0x11a   : > { %733 = vmatprep.subr.bf16.mxu0 %v726_v61 }
 0x11c   : > { %v717_v63 = vpop.permute.xlu0 %716  ;;  %v826_v7 = vpop.permute.xlu1 %825 }
 0x11d   : > { %5897 = vmatmul.mubr.msk.bf16.vlgmr.msra.gmra.mrb[4].mxu1 %vm541_vm6, %v6487_v50  ;;  %v832_v10 = vsel %vm831_vm8, %v826_v7, %v828_v1 }
 0x11e   : > { %5901 = vmatpush3.bf16.msra.mxu1 %v723_v60  ;;  %5902 = vmatprep.mubr.msk.bf16.mxu1 %vm6339_vm4, %v6338_v42 }
 0x11f   : > { %5906 = vmatprep.subr.bf16.mxu1 %v6338_v42 }
 0x120   : > { %v830_v0 = vpop.permute.xlu0 %829  ;;  %v935_v11 = vpop.permute.xlu1 %934 }
 0x121   : > { %v833_v2 = vsel %vm831_vm8, %v828_v1, %v830_v0 }
 0x122   : > { %5694 = vmatmul.mubr.msk.bf16.vlgmr.msra.gmra.mrb[0].mxu0 %vm541_vm6, %v6487_v50 }
 0x123   : > { %734 = vmatpush1.bf16.msra.mxu0 %v725_v3  ;;  %765 = vmatprep.mubr.bf16.mxu0 %v6336_v6 }
 0x124   : > { %v824_v4 = vpop.permute.xlu0 %823  ;;  %840 = vmatprep.subr.bf16.mxu0 %v833_v2  ;;  %v933_v14 = vpop.permute.xlu1 %932 }
 0x125   : > { %5903 = vmatmul.mubr.msk.bf16.vlgmr.msra.gmra.mrb[8].mxu1 %vm541_vm6, %v717_v63  ;;  %v939_v20 = vsel %vm938_vm9, %v933_v14, %v935_v11 }
 0x126   : > { %5907 = vmatpush3.bf16.msra.mxu1 %v830_v0  ;;  %5908 = vmatprep.mubr.msk.bf16.mxu1 %vm6339_vm4, %v6338_v42 }
 0x127   : > { %5912 = vmatprep.subr.bf16.mxu1 %v6338_v42 }
 0x128   : > { %v937_v8 = vpop.permute.xlu0 %936  ;;  %v1042_v21 = vpop.permute.xlu1 %1041 }
 0x129   : > { %v940_v12 = vsel %vm938_vm9, %v935_v11, %v937_v8 }
 0x12c   : > { %v931_v9 = vpop.permute.xlu0 %930  ;;  %v1040_v24 = vpop.permute.xlu1 %1039 }
 0x12d   : > { %5909 = vmatmul.mubr.msk.bf16.vlgmr.msra.gmra.mrb[12].mxu1 %vm541_vm6, %v824_v4  ;;  %v1046_v26 = vsel %vm1045_vm10, %v1040_v24, %v1042_v21 }
 0x12e   : > { %5913 = vmatpush3.bf16.msra.mxu1 %v937_v8  ;;  %5696 = vmatmul.mubr.msk.bf16.vlgmr.msra.gmra.mrb[0].mxu0 %vm541_vm6, %v717_v63 }
 0x12f   : > { %841 = vmatpush1.bf16.msra.mxu0 %v832_v10  ;;  %5914 = vmatprep.mubr.msk.bf16.mxu1 %vm6339_vm4, %v6338_v42 }
 0x130   : > { %v1044_v13 = vpop.permute.xlu0 %1043  ;;  %947 = vmatprep.subr.bf16.mxu0 %v940_v12  ;;  %5918 = vmatprep.subr.bf16.mxu1 %v6338_v42  ;;  %v1149_v27 = vpop.permute.xlu1 %1148 }
 0x131   : > { %872 = vmatprep.mubr.bf16.mxu0 %v6336_v6  ;;  %v1047_v22 = vsel %vm1045_vm10, %v1042_v21, %v1044_v13 }
 0x134   : > { %v1038_v15 = vpop.permute.xlu0 %1037  ;;  %v1147_v30 = vpop.permute.xlu1 %1146 }
 0x135   : > { %5915 = vmatmul.mubr.msk.bf16.vlgmr.msra.gmra.mrb[16].mxu1 %vm541_vm6, %v931_v9  ;;  %v1153_v33 = vsel %vm1152_vm11, %v1147_v30, %v1149_v27 }
 0x136   : > { %5919 = vmatpush3.bf16.msra.mxu1 %v1044_v13  ;;  %5920 = vmatprep.mubr.msk.bf16.mxu1 %vm6339_vm4, %v6338_v42 }
 0x137   : > { %5924 = vmatprep.subr.bf16.mxu1 %v6338_v42 }
 0x138   : > { %v1151_v19 = vpop.permute.xlu0 %1150  ;;  %v1256_v34 = vpop.permute.xlu1 %1255 }
 0x139   : > { %v1154_v29 = vsel %vm1152_vm11, %v1149_v27, %v1151_v19 }
 0x13a   : > { %5698 = vmatmul.mubr.msk.bf16.vlgmr.msra.gmra.mrb[0].mxu0 %vm541_vm6, %v824_v4 }
 0x13b   : > { %948 = vmatpush1.bf16.msra.mxu0 %v939_v20  ;;  %979 = vmatprep.mubr.bf16.mxu0 %v6336_v6 }
 0x13c   : > { %v1145_v23 = vpop.permute.xlu0 %1144  ;;  %1054 = vmatprep.subr.bf16.mxu0 %v1047_v22  ;;  %v1254_v36 = vpop.permute.xlu1 %1253 }
 0x13d   : > { %5921 = vmatmul.mubr.msk.bf16.vlgmr.msra.gmra.mrb[20].mxu1 %vm541_vm6, %v1038_v15  ;;  %v1260_v37 = vsel %vm1259_vm12, %v1254_v36, %v1256_v34 }
 0x13e   : > { %5925 = vmatpush3.bf16.msra.mxu1 %v1151_v19  ;;  %5926 = vmatprep.mubr.msk.bf16.mxu1 %vm6339_vm4, %v6338_v42 }
 0x13f   : > { %5930 = vmatprep.subr.bf16.mxu1 %v6338_v42 }
 0x140   : > { %v1258_v25 = vpop.permute.xlu0 %1257  ;;  %v1368_v38 = vpop.permute.xlu1 %1367 }
 0x141   : > { %v1261_v35 = vsel %vm1259_vm12, %v1256_v34, %v1258_v25 }
 0x144   : > { %v1252_v28 = vpop.permute.xlu0 %1251  ;;  %v1366_v40 = vpop.permute.xlu1 %1365 }
 0x145   : > { %5927 = vmatmul.mubr.msk.bf16.vlgmr.msra.gmra.mrb[24].mxu1 %vm541_vm6, %v1145_v23  ;;  %v1372_v41 = vsel %vm7213_vm13, %v1366_v40, %v1368_v38 }
 0x146   : > { %5931 = vmatpush3.bf16.msra.mxu1 %v1258_v25  ;;  %5700 = vmatmul.mubr.msk.bf16.vlgmr.msra.gmra.mrb[0].mxu0 %vm541_vm6, %v931_v9 }
 0x147   : > { %1055 = vmatpush1.bf16.msra.mxu0 %v1046_v26  ;;  %5932 = vmatprep.mubr.msk.bf16.mxu1 %vm6339_vm4, %v6338_v42 }
 0x148   : > { %1161 = vmatprep.subr.bf16.mxu0 %v1154_v29  ;;  %5936 = vmatprep.subr.bf16.mxu1 %v6338_v42  ;;  %v1370_v31 = vpop.permute.xlu0 %1369 }
 0x149   : > { %1086 = vmatprep.mubr.bf16.mxu0 %v6336_v6  ;;  %v1373_v39 = vsel %vm7213_vm13, %v1368_v38, %v1370_v31 }
 0x14d   : > { %5933 = vmatmul.mubr.msk.bf16.vlgmr.msra.gmra.mrb[28].mxu1 %vm541_vm6, %v1252_v28 }
 0x14e   : > { %5937 = vmatpush3.bf16.msra.mxu1 %v1370_v31  ;;  %5938 = vmatprep.mubr.msk.bf16.mxu1 %vm6339_vm4, %v6338_v42 }
 0x14f   : > { %5942 = vmatprep.subr.bf16.mxu1 %v6338_v42 }
 0x152   : > { %5702 = vmatmul.mubr.msk.bf16.vlgmr.msra.gmra.mrb[0].mxu0 %vm541_vm6, %v1038_v15 }
 0x153   : > { %1162 = vmatpush1.bf16.msra.mxu0 %v1153_v33  ;;  %1193 = vmatprep.mubr.bf16.mxu0 %v6336_v6 }
 0x154   : > { %1268 = vmatprep.subr.bf16.mxu0 %v1261_v35 }
 0x155   : > { %5939 = vmatmul.mubr.msk.bf16.vlgmr.msra.gmra.mrb[32].mxu1 %vm541_vm6, %v6320_v32  ;;  %v1480_v35 = vpop.permute.xlu1 %1479 }
 0x156   : > { %5944 = vmatprep.mubr.msk.bf16.mxu1 %vm6339_vm4, %v6338_v42 }
 0x159   : > { %v1475_v31 = vpop.permute.xlu0 %1474 }
 0x15e   : > { %5704 = vmatmul.mubr.msk.bf16.vlgmr.msra.gmra.mrb[0].mxu0 %vm541_vm6, %v1145_v23 }
 0x15f   : > { %1269 = vmatpush1.bf16.msra.mxu0 %v1260_v37  ;;  %1300 = vmatprep.mubr.bf16.mxu0 %v6336_v6 }
 0x160   : > { %1380 = vmatprep.subr.bf16.mxu0 %v1373_v39 }
 0x16a   : > { %5706 = vmatmul.mubr.msk.bf16.vlgmr.msra.gmra.mrb[0].mxu0 %vm541_vm6, %v1252_v28 }
 0x16b   : > { %1381 = vmatpush1.bf16.msra.mxu0 %v1372_v41  ;;  %1412 = vmatprep.mubr.bf16.mxu0 %v6336_v6 }
 0x176   : > { %5709 = vmatmul.mubr.msk.bf16.vlgmr.msra.gmra.mrb[0].mxu0 %vm541_vm6, %v6320_v32 }
 0x177   : > { %1621 = vmatprep.mubr.bf16.mxu0 %v6336_v6 }
 0x1e8   : > { %v622_v43 = vpop.f32.mrb[0].mxu1 }
 0x1e9   : > { %v5892_v44 = vpop.f32.mrb[1].mxu1 }
 0x1ea   : > { %v625_v45 = vpop.f32.mrb[2].mxu1 }
 0x1eb   : > { %v5893_v46 = vpop.f32.mrb[3].mxu1 }
 0x1f0   : > { %v709_v47 = vpop.f32.mrb[4].mxu1 }
 0x1f1   : > { %v710_v48 = vadd.f32 %v709_v47, %v622_v43  ;;  %v5898_v49 = vpop.f32.mrb[5].mxu1 }
 0x1f2   : > { %v712_v50 = vpop.f32.mrb[6].mxu1 }
 0x1f3   : > { %v713_v51 = vadd.f32 %v712_v50, %v625_v45  ;;  %v5899_v52 = vpop.f32.mrb[7].mxu1 }
 0x1f8   : > { %v810_v53 = vpop.f32.mrb[8].mxu1 }
 0x1f9   : > { %v819_v54 = vadd.f32 %v810_v53, %v710_v48  ;;  %v5904_v55 = vpop.f32.mrb[9].mxu1 }
 0x1fa   : > { %v813_v56 = vpop.f32.mrb[10].mxu1 }
 0x1fb   : > { %v822_v57 = vadd.f32 %v813_v56, %v713_v51  ;;  %v5905_v58 = vpop.f32.mrb[11].mxu1 }
 0x200   : > { %v917_v59 = vpop.f32.mrb[12].mxu1 }
 0x201   : > { %v926_v60 = vadd.f32 %v917_v59, %v819_v54  ;;  %v5910_v61 = vpop.f32.mrb[13].mxu1 }
 0x202   : > { %v920_v62 = vpop.f32.mrb[14].mxu1 }
 0x203   : > { %v929_v63 = vadd.f32 %v920_v62, %v822_v57  ;;  %v5911_v0 = vpop.f32.mrb[15].mxu1 }
 0x208   : > { %v1024_v1 = vpop.f32.mrb[16].mxu1 }
 0x209   : > { %v1033_v2 = vadd.f32 %v1024_v1, %v926_v60  ;;  %v5916_v3 = vpop.f32.mrb[17].mxu1 }
 0x20a   : > { %v1027_v4 = vpop.f32.mrb[18].mxu1 }
 0x20b   : > { %v1036_v7 = vadd.f32 %v1027_v4, %v929_v63  ;;  %v5917_v8 = vpop.f32.mrb[19].mxu1 }
 0x210   : > { %v1131_v9 = vpop.f32.mrb[20].mxu1 }
 0x211   : > { %v1140_v10 = vadd.f32 %v1131_v9, %v1033_v2  ;;  %v5922_v11 = vpop.f32.mrb[21].mxu1 }
 0x212   : > { %v1134_v12 = vpop.f32.mrb[22].mxu1 }
 0x213   : > { %v1143_v13 = vadd.f32 %v1134_v12, %v1036_v7  ;;  %v5923_v14 = vpop.f32.mrb[23].mxu1 }
 0x218   : > { %v1238_v15 = vpop.f32.mrb[24].mxu1 }
 0x219   : > { %v1247_v19 = vadd.f32 %v1238_v15, %v1140_v10  ;;  %v5928_v20 = vpop.f32.mrb[25].mxu1  ;;  %v6649_v15 = vld [vmem:[%s7195_s3] ss:$8 sps:$4 sm:$0xff]  }
 0x21a   : > { %v1241_v21 = vpop.f32.mrb[26].mxu1  ;;  %v2507_v20 = vld [vmem:[%s7200_s8] sm:$0xff] }
 0x21b   : > { %v1250_v22 = vadd.f32 %v1241_v21, %v1143_v13  ;;  %v5929_v23 = vpop.f32.mrb[27].mxu1 }
 0x220   : > { %v1345_v24 = vpop.f32.mrb[28].mxu1 }
 0x221   : > { %v1354_v25 = vadd.f32 %v1345_v24, %v1247_v19  ;;  %v5934_v26 = vpop.f32.mrb[29].mxu1  ;;  %v2508_v19 = vld [vmem:[%s7200_s8 + $0x8] sm:$0xff] }
 0x222   : > { %v1348_v27 = vpop.f32.mrb[30].mxu1 }
 0x223   : > { %v1357_v28 = vadd.f32 %v1348_v27, %v1250_v22  ;;  %v5935_v29 = vpop.f32.mrb[31].mxu1 }
 0x228   : > { %v1457_v30 = vpop.f32.mrb[32].mxu1 }
 0x229   : > { %v1466_v32 = vadd.f32 %v1457_v30, %v1354_v25  ;;  %v5940_v33 = vpop.f32.mrb[33].mxu1 }
 0x22a   : > { %v1460_v34 = vpop.f32.mrb[34].mxu1 }
 0x22b   : > { %v1469_v36 = vadd.f32 %v1460_v34, %v1357_v28  ;;  %v1484_v37 = vadd.f32 %v1475_v31, %v1466_v32  ;;  %v5941_v38 = vpop.f32.mrb[35].mxu1 }
 0x22d   : > { %v1496_v39 = vmul.f32 0.2, %v1484_v37  ;;  %v1487_v40 = vadd.f32 %v1480_v35, %v1469_v36  ;;  %vm1490_vm14 = vcmp.ge.f32.partialorder %v1484_v37, 0.0 }
 0x22f   : > { %v1499_v41 = vmul.f32 0.2, %v1487_v40  ;;  %vm1493_vm15 = vcmp.ge.f32.partialorder %v1487_v40, 0.0  ;;  %v1502_v43 = vsel %vm1490_vm14, %v1484_v37, %v1496_v39 }
 0x230   : > { %v1536_v45 = vmul.f32 %v6456_v18, %v1502_v43 }
 0x231   : > { %v1505_v44 = vsel %vm1493_vm15, %v1487_v40, %v1499_v41 }
 0x232   : > { %v1539_v46 = vmul.f32 %v6456_v18, %v1505_v44 }
 0x234   : > { %v1542_v47 = vpack.c.bf16 %v1539_v46, %v1536_v45 }
 0x249   : > { %v1414_v48 = vpop.f32.mrb[0].mxu0 }
 0x24a   : > { %v1482_v49 = vadd.f32 %v1475_v31, %v1414_v48  ;;  %v1416_v50 = vpop.f32.mrb[1].mxu0 }
 0x24b   : > { %v1483_v51 = vadd.f32 %v1475_v31, %v1416_v50  ;;  %v1418_v52 = vpop.f32.mrb[2].mxu0 }
 0x24c   : > { %vm1488_vm1 = vcmp.ge.f32.partialorder %v1482_v49, 0.0  ;;  %v1494_v53 = vmul.f32 0.2, %v1482_v49  ;;  %v1485_v54 = vadd.f32 %v1480_v35, %v1418_v52  ;;  %v1420_v55 = vpop.f32.mrb[3].mxu0 }
 0x24d   : > { %vm1489_vm13 = vcmp.ge.f32.partialorder %v1483_v51, 0.0  ;;  %v1495_v56 = vmul.f32 0.2, %v1483_v51  ;;  %v1486_v57 = vadd.f32 %v1480_v35, %v1420_v55 }
 0x24e   : > { %v1500_v58 = vsel %vm1488_vm1, %v1482_v49, %v1494_v53  ;;  %vm1491_vm14 = vcmp.ge.f32.partialorder %v1485_v54, 0.0  ;;  %v1497_v59 = vmul.f32 0.2, %v1485_v54 }
 0x24f   : > { %v1501_v60 = vsel %vm1489_vm13, %v1483_v51, %v1495_v56  ;;  %vm1492_vm15 = vcmp.ge.f32.partialorder %v1486_v57, 0.0  ;;  %v1498_v61 = vmul.f32 0.2, %v1486_v57  ;;  %v1534_v0 = vmul.f32 %v6452_v16, %v1500_v58 }
 0x250   : > { %v1503_v62 = vsel %vm1491_vm14, %v1485_v54, %v1497_v59  ;;  %v1535_v2 = vmul.f32 %v6454_v17, %v1501_v60  ;;  %v6322_v60 = vld [vmem:[%s7195_s3 + $0x4] ss:$8 sps:$4 sm:$0xff]   ;;  %vm7245_vm13 = vcmask 736256  }
 0x251   : > { %v1504_v63 = vsel %vm1492_vm15, %v1486_v57, %v1498_v61  ;;  %v1537_v1 = vmul.f32 %v6452_v16, %v1503_v62  ;;  %vm7246_vm1 = vmmov %vm7245_vm13 }
 0x252   : > { %v1538_v3 = vmul.f32 %v6454_v17, %v1504_v63 }
 0x253   : > { %v1540_v4 = vpack.c.bf16 %v1537_v1, %v1534_v0 }
 0x254   : > { %v1541_v7 = vpack.c.bf16 %v1538_v3, %v1535_v2 }
 0x255   : > { %1546 = vrot.lane.b32.xlu1 %v1540_v4, %s7230_s30 }
 0x256   : > { %1548 = vrot.lane.b32.xlu0 %v1541_v7, %s7230_s30 }
 0x259   : > { %1550 = vrot.lane.b32.xlu1 %v1542_v47, %s7230_s30 }
 0x2c7   : > { %v1547_v8 = vpop.permute.xlu1 %1546 }
 0x2c8   : > { %1557 = vst.msk [vmem:[#allocation2] sm:$0xff] %vm509_vm2, %v1547_v8  ;;  %v1549_v9 = vpop.permute.xlu0 %1548 }
 0x2c9   : > { %v1552_v10 = vsel %vm417_vm0, %v1547_v8, %v1549_v9 }
 0x2ca   : > { %1577 = vrot.lane.b32.xlu0 %v1552_v10, %s7234_s13 }
 0x2cb   : > { %v1551_v11 = vpop.permute.xlu1 %1550 }
 0x2cc   : > { %v1553_v12 = vsel %vm417_vm0, %v1549_v9, %v1551_v11 }
 0x2cd   : > { %1559 = vst.msk [vmem:[#allocation2 + $0x10] sm:$0xff] %vm512_vm3, %v1553_v12 }
 0x2cf   : > { %v1560_v13 = vld [vmem:[#allocation2] sm:$0xff] }
 0x2d0   : > { %1575 = vrot.lane.b32.xlu0 %v1560_v13, %s7234_s13 }
 0x2d4   : > { %v1562_v14 = vld [vmem:[#allocation2 + $0x10] sm:$0xff]  ;;  %1764 = vrot.lane.b32.xlu0 %v1552_v10, %s7228_s16 }
 0x2d5   : > { %1579 = vrot.lane.b32.xlu1 %v1562_v14, %s7234_s13 }
 0x2d8   : > { %1762 = vrot.lane.b32.xlu0 %v1560_v13, %s7228_s16 }
 0x2d9   : > { %1570 = vrot.lane.b32.xlu1 %v6649_v15, %s7226_s17 }
 0x2dc   : > { %1870 = vrot.lane.b32.xlu0 %v1552_v10, %s7224_s18 }
 0x2dd   : > { %1766 = vrot.lane.b32.xlu1 %v1562_v14, %s7228_s16 }
 0x2e0   : > { %1868 = vrot.lane.b32.xlu0 %v1560_v13, %s7224_s18 }
 0x2e1   : > { %1760 = vrot.lane.b32.xlu1 %v6649_v15, %s7222_s19 }
 0x2e4   : > { %1976 = vrot.lane.b32.xlu0 %v1552_v10, %s7220_s20 }
 0x2e5   : > { %1872 = vrot.lane.b32.xlu1 %v1562_v14, %s7224_s18 }
 0x2e8   : > { %1974 = vrot.lane.b32.xlu0 %v1560_v13, %s7220_s20 }
 0x2e9   : > { %1866 = vrot.lane.b32.xlu1 %v6649_v15, %s7218_s23  ;;  %s7248_s23 = smov 80  }
 0x2ec   : > { %2082 = vrot.lane.b32.xlu0 %v1552_v10, %s7216_s24 }
 0x2ed   : > { %1978 = vrot.lane.b32.xlu1 %v1562_v14, %s7220_s20  ;;  %s7247_s20 = smov 109  }
 0x2f0   : > { %2080 = vrot.lane.b32.xlu0 %v1560_v13, %s7216_s24 }
 0x2f1   : > { %1972 = vrot.lane.b32.xlu1 %v6649_v15, %s7214_s25  ;;  %s7250_s25 = smov 64  }
 0x2f4   : > { %2188 = vrot.lane.b32.xlu0 %v1552_v10, %s7241_s26 }
 0x2f5   : > { %2084 = vrot.lane.b32.xlu1 %v1562_v14, %s7216_s24  ;;  %s7249_s24 = smov 108  }
 0x2f8   : > { %2186 = vrot.lane.b32.xlu0 %v1560_v13, %s7241_s26 }
 0x2f9   : > { %2078 = vrot.lane.b32.xlu1 %v6649_v15, %s7242_s27 }
 0x2fc   : > { %2294 = vrot.lane.b32.xlu0 %v1552_v10, %s7243_s28 }
 0x2fd   : > { %2190 = vrot.lane.b32.xlu1 %v1562_v14, %s7241_s26 }
 0x300   : > { %2292 = vrot.lane.b32.xlu0 %v1560_v13, %s7243_s28 }
 0x301   : > { %2184 = vrot.lane.b32.xlu1 %v6649_v15, %s7244_s29 }
 0x304   : > { %2405 = vrot.lane.b32.xlu0 %v1552_v10, %s6353_s14 }
 0x305   : > { %2296 = vrot.lane.b32.xlu1 %v1562_v14, %s7243_s28 }
 0x308   : > { %2403 = vrot.lane.b32.xlu0 %v1560_v13, %s6353_s14 }
 0x309   : > { %2290 = vrot.lane.b32.xlu1 %v6649_v15, %s7232_s15 }
 0x30c   : > { %2516 = vperm.xlu0 %6317, %v2508_v19  }
 0x30d   : > { %2407 = vrot.lane.b32.xlu1 %v1562_v14, %s6353_s14 }
 0x311   : > { %2511 = vperm.xlu1 %6318, %v2507_v20  }
 0x33c   : > { %v1578_v21 = vpop.permute.xlu0 %1577 }
 0x342   : > { %v1576_v22 = vpop.permute.xlu0 %1575 }
 0x343   : > { %v1581_v25 = vsel %vm535_vm5, %v1576_v22, %v1578_v21 }
 0x346   : > { %v1765_v27 = vpop.permute.xlu0 %1764 }
 0x347   : > { %v1580_v23 = vpop.permute.xlu1 %1579 }
 0x348   : > { %5943 = vmatpush3.bf16.msra.mxu1 %v1580_v23  ;;  %v1582_v24 = vsel %vm535_vm5, %v1578_v21, %v1580_v23 }
 0x349   : > { %1589 = vmatprep.subr.bf16.mxu0 %v1582_v24  ;;  %5948 = vmatprep.subr.bf16.mxu1 %v6338_v42 }
 0x34a   : > { %1590 = vmatpush1.bf16.msra.mxu0 %v1581_v25  ;;  %v1763_v30 = vpop.permute.xlu0 %1762 }
 0x34b   : > { %1676 = vmatprep.subr.bf16.mxu0 %v1552_v10  ;;  %v1571_v26 = vpop.permute.xlu1 %1570  ;;  %v1768_v35 = vsel %vm724_vm7, %v1763_v30, %v1765_v27 }
 0x34c   : > { %5945 = vmatmul.mubr.msk.bf16.vlgmr.msra.gmra.mrb[36].mxu1 %vm541_vm6, %v1571_v26 }
 0x34d   : > { %5949 = vmatpush3.bf16.msra.mxu1 %v1562_v14  ;;  %5712 = vmatmul.mubr.msk.bf16.vlgmr.msra.gmra.mrb[4].mxu0 %vm541_vm6, %v1571_v26 }
 0x34e   : > { %1677 = vmatpush1.bf16.msra.mxu0 %v1560_v13  ;;  %5950 = vmatprep.mubr.msk.bf16.mxu1 %vm6339_vm4, %v6338_v42  ;;  %v1871_v32 = vpop.permute.xlu0 %1870 }
 0x34f   : > { %v1767_v28 = vpop.permute.xlu1 %1766  ;;  %5954 = vmatprep.subr.bf16.mxu1 %v6338_v42  ;;  %1708 = vmatprep.mubr.bf16.mxu0 %v6336_v6 }
 0x350   : > { %v1769_v29 = vsel %vm724_vm7, %v1765_v27, %v1767_v28 }
 0x351   : > { %1776 = vmatprep.subr.bf16.mxu0 %v1769_v29 }
 0x352   : > { %v1869_v37 = vpop.permute.xlu0 %1868 }
 0x353   : > { %v1761_v31 = vpop.permute.xlu1 %1760  ;;  %v1874_v40 = vsel %vm831_vm8, %v1869_v37, %v1871_v32 }
 0x354   : > { %5951 = vmatmul.mubr.msk.bf16.vlgmr.msra.gmra.mrb[40].mxu1 %vm541_vm6, %v6649_v15 }
 0x355   : > { %5955 = vmatpush3.bf16.msra.mxu1 %v1767_v28  ;;  %5956 = vmatprep.mubr.msk.bf16.mxu1 %vm6339_vm4, %v6338_v42 }
 0x356   : > { %5960 = vmatprep.subr.bf16.mxu1 %v6338_v42  ;;  %v1977_v41 = vpop.permute.xlu0 %1976 }
 0x357   : > { %v1873_v33 = vpop.permute.xlu1 %1872 }
 0x358   : > { %v1875_v34 = vsel %vm831_vm8, %v1871_v32, %v1873_v33 }
 0x359   : > { %5714 = vmatmul.mubr.msk.bf16.vlgmr.msra.gmra.mrb[4].mxu0 %vm541_vm6, %v6649_v15 }
 0x35a   : > { %1777 = vmatpush1.bf16.msra.mxu0 %v1768_v35  ;;  %1808 = vmatprep.mubr.bf16.mxu0 %v6336_v6  ;;  %v1975_v45 = vpop.permute.xlu0 %1974 }
 0x35b   : > { %1882 = vmatprep.subr.bf16.mxu0 %v1875_v34  ;;  %v1867_v36 = vpop.permute.xlu1 %1866  ;;  %v1980_v48 = vsel %vm938_vm9, %v1975_v45, %v1977_v41 }
 0x35c   : > { %5957 = vmatmul.mubr.msk.bf16.vlgmr.msra.gmra.mrb[44].mxu1 %vm541_vm6, %v1761_v31 }
 0x35d   : > { %5961 = vmatpush3.bf16.msra.mxu1 %v1873_v33  ;;  %5962 = vmatprep.mubr.msk.bf16.mxu1 %vm6339_vm4, %v6338_v42 }
 0x35e   : > { %5966 = vmatprep.subr.bf16.mxu1 %v6338_v42  ;;  %v2083_v49 = vpop.permute.xlu0 %2082 }
 0x35f   : > { %v1979_v38 = vpop.permute.xlu1 %1978 }
 0x360   : > { %v1981_v43 = vsel %vm938_vm9, %v1977_v41, %v1979_v38 }
 0x362   : > { %v2081_v52 = vpop.permute.xlu0 %2080 }
 0x363   : > { %v1973_v39 = vpop.permute.xlu1 %1972  ;;  %v2086_v54 = vsel %vm1045_vm10, %v2081_v52, %v2083_v49 }
 0x364   : > { %5963 = vmatmul.mubr.msk.bf16.vlgmr.msra.gmra.mrb[48].mxu1 %vm541_vm6, %v1867_v36 }
 0x365   : > { %5967 = vmatpush3.bf16.msra.mxu1 %v1979_v38  ;;  %5716 = vmatmul.mubr.msk.bf16.vlgmr.msra.gmra.mrb[4].mxu0 %vm541_vm6, %v1761_v31 }
 0x366   : > { %1883 = vmatpush1.bf16.msra.mxu0 %v1874_v40  ;;  %5968 = vmatprep.mubr.msk.bf16.mxu1 %vm6339_vm4, %v6338_v42  ;;  %v2189_v55 = vpop.permute.xlu0 %2188 }
 0x367   : > { %1988 = vmatprep.subr.bf16.mxu0 %v1981_v43  ;;  %v2085_v44 = vpop.permute.xlu1 %2084  ;;  %5972 = vmatprep.subr.bf16.mxu1 %v6338_v42 }
 0x368   : > { %1914 = vmatprep.mubr.bf16.mxu0 %v6336_v6  ;;  %v2087_v50 = vsel %vm1045_vm10, %v2083_v49, %v2085_v44 }
 0x36a   : > { %v2187_v58 = vpop.permute.xlu0 %2186 }
 0x36b   : > { %v2079_v46 = vpop.permute.xlu1 %2078  ;;  %v2192_v61 = vsel %vm1152_vm11, %v2187_v58, %v2189_v55 }
 0x36c   : > { %5969 = vmatmul.mubr.msk.bf16.vlgmr.msra.gmra.mrb[52].mxu1 %vm541_vm6, %v1973_v39 }
 0x36d   : > { %5973 = vmatpush3.bf16.msra.mxu1 %v2085_v44  ;;  %5974 = vmatprep.mubr.msk.bf16.mxu1 %vm6339_vm4, %v6338_v42 }
 0x36e   : > { %5978 = vmatprep.subr.bf16.mxu1 %v6338_v42  ;;  %v2295_v62 = vpop.permute.xlu0 %2294 }
 0x36f   : > { %v2191_v47 = vpop.permute.xlu1 %2190 }
 0x370   : > { %v2193_v57 = vsel %vm1152_vm11, %v2189_v55, %v2191_v47 }
 0x371   : > { %5718 = vmatmul.mubr.msk.bf16.vlgmr.msra.gmra.mrb[4].mxu0 %vm541_vm6, %v1867_v36 }
 0x372   : > { %1989 = vmatpush1.bf16.msra.mxu0 %v1980_v48  ;;  %2020 = vmatprep.mubr.bf16.mxu0 %v6336_v6  ;;  %v2293_v0 = vpop.permute.xlu0 %2292 }
 0x373   : > { %2094 = vmatprep.subr.bf16.mxu0 %v2087_v50  ;;  %v2185_v51 = vpop.permute.xlu1 %2184  ;;  %v2298_v1 = vsel %vm1259_vm12, %v2293_v0, %v2295_v62 }
 0x374   : > { %5975 = vmatmul.mubr.msk.bf16.vlgmr.msra.gmra.mrb[56].mxu1 %vm541_vm6, %v2079_v46 }
 0x375   : > { %5979 = vmatpush3.bf16.msra.mxu1 %v2191_v47  ;;  %5980 = vmatprep.mubr.msk.bf16.mxu1 %vm6339_vm4, %v6338_v42 }
 0x376   : > { %5984 = vmatprep.subr.bf16.mxu1 %v6338_v42  ;;  %v2406_v2 = vpop.permute.xlu0 %2405 }
 0x377   : > { %v2297_v53 = vpop.permute.xlu1 %2296 }
 0x378   : > { %v2299_v63 = vsel %vm1259_vm12, %v2295_v62, %v2297_v53 }
 0x37a   : > { %v2404_v4 = vpop.permute.xlu0 %2403 }
 0x37b   : > { %v2291_v56 = vpop.permute.xlu1 %2290  ;;  %v2409_v7 = vsel %vm7246_vm1, %v2404_v4, %v2406_v2 }
 0x37c   : > { %5981 = vmatmul.mubr.msk.bf16.vlgmr.msra.gmra.mrb[60].mxu1 %vm541_vm6, %v2185_v51 }
 0x37d   : > { %5985 = vmatpush3.bf16.msra.mxu1 %v2297_v53  ;;  %5720 = vmatmul.mubr.msk.bf16.vlgmr.msra.gmra.mrb[4].mxu0 %vm541_vm6, %v1973_v39 }
 0x37e   : > { %2095 = vmatpush1.bf16.msra.mxu0 %v2086_v54  ;;  %5986 = vmatprep.mubr.msk.bf16.mxu1 %vm6339_vm4, %v6338_v42 }
 0x37f   : > { %2200 = vmatprep.subr.bf16.mxu0 %v2193_v57  ;;  %5990 = vmatprep.subr.bf16.mxu1 %v6338_v42  ;;  %v2408_v59 = vpop.permute.xlu1 %2407 }
 0x380   : > { %2126 = vmatprep.mubr.bf16.mxu0 %v6336_v6  ;;  %v2410_v3 = vsel %vm7245_vm13, %v2406_v2, %v2408_v59 }
 0x384   : > { %5987 = vmatmul.mubr.msk.bf16.vlgmr.msra.gmra.mrb[64].mxu1 %vm541_vm6, %v2291_v56 }
 0x385   : > { %5991 = vmatpush3.bf16.msra.mxu1 %v2408_v59  ;;  %5992 = vmatprep.mubr.msk.bf16.mxu1 %vm6339_vm4, %v6338_v42 }
 0x386   : > { %5996 = vmatprep.subr.bf16.mxu1 %v6338_v42 }
 0x389   : > { %5722 = vmatmul.mubr.msk.bf16.vlgmr.msra.gmra.mrb[4].mxu0 %vm541_vm6, %v2079_v46 }
 0x38a   : > { %2201 = vmatpush1.bf16.msra.mxu0 %v2192_v61  ;;  %2232 = vmatprep.mubr.bf16.mxu0 %v6336_v6 }
 0x38b   : > { %2306 = vmatprep.subr.bf16.mxu0 %v2299_v63  ;;  %v2517_v2 = vpop.permute.xlu0 %2516 }
 0x38c   : > { %5993 = vmatmul.mubr.msk.bf16.vlgmr.msra.gmra.mrb[68].mxu1 %vm541_vm6, %v6322_v60 }
 0x38d   : > { %5998 = vmatprep.mubr.msk.bf16.mxu1 %vm6339_vm4, %v6338_v42 }
 0x390   : > { %v2512_v61 = vpop.permute.xlu1 %2511 }
 0x395   : > { %5724 = vmatmul.mubr.msk.bf16.vlgmr.msra.gmra.mrb[4].mxu0 %vm541_vm6, %v2185_v51 }
 0x396   : > { %2307 = vmatpush1.bf16.msra.mxu0 %v2298_v1  ;;  %2338 = vmatprep.mubr.bf16.mxu0 %v6336_v6 }
 0x397   : > { %2417 = vmatprep.subr.bf16.mxu0 %v2410_v3 }
 0x3a1   : > { %5726 = vmatmul.mubr.msk.bf16.vlgmr.msra.gmra.mrb[4].mxu0 %vm541_vm6, %v2291_v56 }
 0x3a2   : > { %2418 = vmatpush1.bf16.msra.mxu0 %v2409_v7  ;;  %2449 = vmatprep.mubr.bf16.mxu0 %v6336_v6 }
 0x3ad   : > { %5729 = vmatmul.mubr.msk.bf16.vlgmr.msra.gmra.mrb[4].mxu0 %vm541_vm6, %v6322_v60 }
 0x3ae   : > { %2630 = vmatprep.mubr.bf16.mxu0 %v6336_v6 }
 0x41f   : > { %v1666_v8 = vpop.f32.mrb[36].mxu1 }
 0x420   : > { %v5946_v9 = vpop.f32.mrb[37].mxu1 }
 0x421   : > { %v1669_v10 = vpop.f32.mrb[38].mxu1 }
 0x422   : > { %v5947_v11 = vpop.f32.mrb[39].mxu1 }
 0x427   : > { %v1753_v12 = vpop.f32.mrb[40].mxu1 }
 0x428   : > { %v1754_v13 = vadd.f32 %v1753_v12, %v1666_v8  ;;  %v5952_v14 = vpop.f32.mrb[41].mxu1 }
 0x429   : > { %v1756_v15 = vpop.f32.mrb[42].mxu1 }
 0x42a   : > { %v1757_v19 = vadd.f32 %v1756_v15, %v1669_v10  ;;  %v5953_v20 = vpop.f32.mrb[43].mxu1 }
 0x42f   : > { %v1853_v21 = vpop.f32.mrb[44].mxu1 }
 0x430   : > { %v1862_v22 = vadd.f32 %v1853_v21, %v1754_v13  ;;  %v5958_v23 = vpop.f32.mrb[45].mxu1 }
 0x431   : > { %v1856_v24 = vpop.f32.mrb[46].mxu1 }
 0x432   : > { %v1865_v25 = vadd.f32 %v1856_v24, %v1757_v19  ;;  %v5959_v26 = vpop.f32.mrb[47].mxu1 }
 0x437   : > { %v1959_v27 = vpop.f32.mrb[48].mxu1 }
 0x438   : > { %v1968_v28 = vadd.f32 %v1959_v27, %v1862_v22  ;;  %v5964_v29 = vpop.f32.mrb[49].mxu1 }
 0x439   : > { %v1962_v30 = vpop.f32.mrb[50].mxu1 }
 0x43a   : > { %v1971_v31 = vadd.f32 %v1962_v30, %v1865_v25  ;;  %v5965_v32 = vpop.f32.mrb[51].mxu1 }
 0x43f   : > { %v2065_v33 = vpop.f32.mrb[52].mxu1 }
 0x440   : > { %v2074_v34 = vadd.f32 %v2065_v33, %v1968_v28  ;;  %v5970_v35 = vpop.f32.mrb[53].mxu1 }
 0x441   : > { %v2068_v36 = vpop.f32.mrb[54].mxu1 }
 0x442   : > { %v2077_v37 = vadd.f32 %v2068_v36, %v1971_v31  ;;  %v5971_v38 = vpop.f32.mrb[55].mxu1 }
 0x447   : > { %v2171_v39 = vpop.f32.mrb[56].mxu1 }
 0x448   : > { %v2180_v40 = vadd.f32 %v2171_v39, %v2074_v34  ;;  %v5976_v41 = vpop.f32.mrb[57].mxu1 }
 0x449   : > { %v2174_v43 = vpop.f32.mrb[58].mxu1 }
 0x44a   : > { %v2183_v44 = vadd.f32 %v2174_v43, %v2077_v37  ;;  %v5977_v45 = vpop.f32.mrb[59].mxu1 }
 0x44f   : > { %v2277_v46 = vpop.f32.mrb[60].mxu1 }
 0x450   : > { %v2286_v47 = vadd.f32 %v2277_v46, %v2180_v40  ;;  %v5982_v48 = vpop.f32.mrb[61].mxu1  ;;  %v6786_v46 = vld [vmem:[%s7196_s4] ss:$8 sps:$4 sm:$0xff]  }
 0x451   : > { %v2280_v49 = vpop.f32.mrb[62].mxu1  ;;  %v3516_v48 = vld [vmem:[%s7201_s9] sm:$0xff] }
 0x452   : > { %v2289_v50 = vadd.f32 %v2280_v49, %v2183_v44  ;;  %v5983_v51 = vpop.f32.mrb[63].mxu1 }
 0x457   : > { %v2383_v52 = vpop.f32.mrb[64].mxu1 }
 0x458   : > { %v2392_v53 = vadd.f32 %v2383_v52, %v2286_v47  ;;  %v5988_v54 = vpop.f32.mrb[65].mxu1  ;;  %v3517_v47 = vld [vmem:[%s7201_s9 + $0x8] sm:$0xff] }
 0x459   : > { %v2386_v55 = vpop.f32.mrb[66].mxu1 }
 0x45a   : > { %v2395_v56 = vadd.f32 %v2386_v55, %v2289_v50  ;;  %v5989_v57 = vpop.f32.mrb[67].mxu1 }
 0x45f   : > { %v2494_v58 = vpop.f32.mrb[68].mxu1 }
 0x460   : > { %v2503_v59 = vadd.f32 %v2494_v58, %v2392_v53  ;;  %v5994_v60 = vpop.f32.mrb[69].mxu1 }
 0x461   : > { %v2497_v62 = vpop.f32.mrb[70].mxu1 }
 0x462   : > { %v2521_v63 = vadd.f32 %v2512_v61, %v2503_v59  ;;  %v2506_v0 = vadd.f32 %v2497_v62, %v2395_v56  ;;  %v5995_v1 = vpop.f32.mrb[71].mxu1 }
 0x464   : > { %vm2527_vm14 = vcmp.ge.f32.partialorder %v2521_v63, 0.0  ;;  %v2533_v3 = vmul.f32 0.2, %v2521_v63  ;;  %v2524_v4 = vadd.f32 %v2517_v2, %v2506_v0 }
 0x466   : > { %vm2530_vm15 = vcmp.ge.f32.partialorder %v2524_v4, 0.0  ;;  %v2536_v7 = vmul.f32 0.2, %v2524_v4  ;;  %v2539_v8 = vsel %vm2527_vm14, %v2521_v63, %v2533_v3 }
 0x467   : > { %v2545_v10 = vmul.f32 %v2539_v8, %v6456_v18 }
 0x468   : > { %v2542_v9 = vsel %vm2530_vm15, %v2524_v4, %v2536_v7 }
 0x469   : > { %v2548_v11 = vmul.f32 %v2542_v9, %v6456_v18 }
 0x46b   : > { %v2551_v12 = vpack.c.bf16 %v2548_v11, %v2545_v10 }
 0x480   : > { %v2451_v13 = vpop.f32.mrb[4].mxu0 }
 0x481   : > { %v2519_v14 = vadd.f32 %v2512_v61, %v2451_v13  ;;  %v2453_v15 = vpop.f32.mrb[5].mxu0 }
 0x482   : > { %v2520_v19 = vadd.f32 %v2512_v61, %v2453_v15  ;;  %v2455_v20 = vpop.f32.mrb[6].mxu0 }
 0x483   : > { %vm2525_vm13 = vcmp.ge.f32.partialorder %v2519_v14, 0.0  ;;  %v2531_v21 = vmul.f32 0.2, %v2519_v14  ;;  %v2522_v22 = vadd.f32 %v2517_v2, %v2455_v20  ;;  %v2457_v23 = vpop.f32.mrb[7].mxu0 }
 0x484   : > { %vm2526_vm1 = vcmp.ge.f32.partialorder %v2520_v19, 0.0  ;;  %v2532_v24 = vmul.f32 0.2, %v2520_v19  ;;  %v2523_v25 = vadd.f32 %v2517_v2, %v2457_v23 }
 0x485   : > { %v2537_v26 = vsel %vm2525_vm13, %v2519_v14, %v2531_v21  ;;  %vm2528_vm14 = vcmp.ge.f32.partialorder %v2522_v22, 0.0  ;;  %v2534_v27 = vmul.f32 0.2, %v2522_v22  ;;  %vm7251_vm13 = vcmask 736256  }
 0x486   : > { %v2538_v28 = vsel %vm2526_vm1, %v2520_v19, %v2532_v24  ;;  %vm2529_vm15 = vcmp.ge.f32.partialorder %v2523_v25, 0.0  ;;  %v2535_v29 = vmul.f32 0.2, %v2523_v25  ;;  %v2543_v32 = vmul.f32 %v2537_v26, %v6452_v16  ;;  %vm7252_vm1 = vmmov %vm7251_vm13 }
 0x487   : > { %v2540_v30 = vsel %vm2528_vm14, %v2522_v22, %v2534_v27  ;;  %v2544_v34 = vmul.f32 %v2538_v28, %v6454_v17  ;;  %v6324_v28 = vld [vmem:[%s7196_s4 + $0x4] ss:$8 sps:$4 sm:$0xff]  }
 0x488   : > { %v2541_v31 = vsel %vm2529_vm15, %v2523_v25, %v2535_v29  ;;  %v2546_v33 = vmul.f32 %v2540_v30, %v6452_v16 }
 0x489   : > { %v2547_v35 = vmul.f32 %v2541_v31, %v6454_v17 }
 0x48a   : > { %v2549_v36 = vpack.c.bf16 %v2546_v33, %v2543_v32 }
 0x48b   : > { %v2550_v37 = vpack.c.bf16 %v2547_v35, %v2544_v34 }
 0x48c   : > { %2555 = vrot.lane.b32.xlu1 %v2549_v36, %s7230_s30 }
 0x48d   : > { %2557 = vrot.lane.b32.xlu0 %v2550_v37, %s7230_s30 }
 0x490   : > { %2559 = vrot.lane.b32.xlu1 %v2551_v12, %s7230_s30 }
 0x4fe   : > { %v2556_v38 = vpop.permute.xlu1 %2555 }
 0x4ff   : > { %2566 = vst.msk [vmem:[#allocation2] sm:$0xff] %vm509_vm2, %v2556_v38  ;;  %v2558_v39 = vpop.permute.xlu0 %2557 }
 0x500   : > { %v2561_v40 = vsel %vm417_vm0, %v2556_v38, %v2558_v39 }
 0x501   : > { %2586 = vrot.lane.b32.xlu0 %v2561_v40, %s7234_s13 }
 0x502   : > { %v2560_v41 = vpop.permute.xlu1 %2559 }
 0x503   : > { %v2562_v43 = vsel %vm417_vm0, %v2558_v39, %v2560_v41 }
 0x504   : > { %2568 = vst.msk [vmem:[#allocation2 + $0x10] sm:$0xff] %vm512_vm3, %v2562_v43 }
 0x506   : > { %v2569_v44 = vld [vmem:[#allocation2] sm:$0xff] }
 0x507   : > { %2584 = vrot.lane.b32.xlu0 %v2569_v44, %s7234_s13 }
 0x50b   : > { %v2571_v45 = vld [vmem:[#allocation2 + $0x10] sm:$0xff]  ;;  %2773 = vrot.lane.b32.xlu0 %v2561_v40, %s7228_s16 }
 0x50c   : > { %2588 = vrot.lane.b32.xlu1 %v2571_v45, %s7234_s13 }
 0x50f   : > { %2771 = vrot.lane.b32.xlu0 %v2569_v44, %s7228_s16 }
 0x510   : > { %2579 = vrot.lane.b32.xlu1 %v6786_v46, %s7226_s17  ;;  %s7254_s17 = smov 112  }
 0x513   : > { %2879 = vrot.lane.b32.xlu0 %v2561_v40, %s7224_s18 }
 0x514   : > { %2775 = vrot.lane.b32.xlu1 %v2571_v45, %s7228_s16  ;;  %s7261_s16 = smov 127  }
 0x517   : > { %2877 = vrot.lane.b32.xlu0 %v2569_v44, %s7224_s18 }
 0x518   : > { %2769 = vrot.lane.b32.xlu1 %v6786_v46, %s7222_s19  ;;  %s7257_s19 = smov 16  }
 0x51b   : > { %2985 = vrot.lane.b32.xlu0 %v2561_v40, %s7247_s20 }
 0x51c   : > { %2881 = vrot.lane.b32.xlu1 %v2571_v45, %s7224_s18  ;;  %s7253_s18 = smov 126  }
 0x51f   : > { %2983 = vrot.lane.b32.xlu0 %v2569_v44, %s7247_s20 }
 0x520   : > { %2875 = vrot.lane.b32.xlu1 %v6786_v46, %s7248_s23 }
 0x523   : > { %3091 = vrot.lane.b32.xlu0 %v2561_v40, %s7249_s24 }
 0x524   : > { %2987 = vrot.lane.b32.xlu1 %v2571_v45, %s7247_s20 }
 0x527   : > { %3089 = vrot.lane.b32.xlu0 %v2569_v44, %s7249_s24 }
 0x528   : > { %2981 = vrot.lane.b32.xlu1 %v6786_v46, %s7250_s25 }
 0x52b   : > { %3197 = vrot.lane.b32.xlu0 %v2561_v40, %s7241_s26 }
 0x52c   : > { %3093 = vrot.lane.b32.xlu1 %v2571_v45, %s7249_s24 }
 0x52f   : > { %3195 = vrot.lane.b32.xlu0 %v2569_v44, %s7241_s26 }
 0x530   : > { %3087 = vrot.lane.b32.xlu1 %v6786_v46, %s7242_s27 }
 0x533   : > { %3303 = vrot.lane.b32.xlu0 %v2561_v40, %s7243_s28 }
 0x534   : > { %3199 = vrot.lane.b32.xlu1 %v2571_v45, %s7241_s26 }
 0x537   : > { %3301 = vrot.lane.b32.xlu0 %v2569_v44, %s7243_s28 }
 0x538   : > { %3193 = vrot.lane.b32.xlu1 %v6786_v46, %s7244_s29 }
 0x53b   : > { %3414 = vrot.lane.b32.xlu0 %v2561_v40, %s6353_s14 }
 0x53c   : > { %3305 = vrot.lane.b32.xlu1 %v2571_v45, %s7243_s28 }
 0x53f   : > { %3412 = vrot.lane.b32.xlu0 %v2569_v44, %s6353_s14 }
 0x540   : > { %3299 = vrot.lane.b32.xlu1 %v6786_v46, %s7232_s15  ;;  %s7256_s15 = smov 96  }
 0x543   : > { %3525 = vperm.xlu0 %6317, %v3517_v47  }
 0x544   : > { %3416 = vrot.lane.b32.xlu1 %v2571_v45, %s6353_s14 }
 0x548   : > { %3520 = vperm.xlu1 %6318, %v3516_v48  }
 0x573   : > { %v2587_v49 = vpop.permute.xlu0 %2586 }
 0x579   : > { %v2585_v50 = vpop.permute.xlu0 %2584 }
 0x57a   : > { %v2590_v53 = vsel %vm535_vm5, %v2585_v50, %v2587_v49 }
 0x57d   : > { %v2774_v55 = vpop.permute.xlu0 %2773 }
 0x57e   : > { %v2589_v51 = vpop.permute.xlu1 %2588 }
 0x57f   : > { %5997 = vmatpush3.bf16.msra.mxu1 %v2589_v51  ;;  %v2591_v52 = vsel %vm535_vm5, %v2587_v49, %v2589_v51 }
 0x580   : > { %2598 = vmatprep.subr.bf16.mxu0 %v2591_v52  ;;  %6002 = vmatprep.subr.bf16.mxu1 %v6338_v42 }
 0x581   : > { %2599 = vmatpush1.bf16.msra.mxu0 %v2590_v53  ;;  %v2772_v58 = vpop.permute.xlu0 %2771 }
 0x582   : > { %2685 = vmatprep.subr.bf16.mxu0 %v2561_v40  ;;  %v2580_v54 = vpop.permute.xlu1 %2579  ;;  %v2777_v63 = vsel %vm724_vm7, %v2772_v58, %v2774_v55 }
 0x583   : > { %5999 = vmatmul.mubr.msk.bf16.vlgmr.msra.gmra.mrb[72].mxu1 %vm541_vm6, %v2580_v54 }
 0x584   : > { %6003 = vmatpush3.bf16.msra.mxu1 %v2571_v45  ;;  %5732 = vmatmul.mubr.msk.bf16.vlgmr.msra.gmra.mrb[8].mxu0 %vm541_vm6, %v2580_v54 }
 0x585   : > { %2686 = vmatpush1.bf16.msra.mxu0 %v2569_v44  ;;  %6004 = vmatprep.mubr.msk.bf16.mxu1 %vm6339_vm4, %v6338_v42  ;;  %v2880_v60 = vpop.permute.xlu0 %2879 }
 0x586   : > { %v2776_v56 = vpop.permute.xlu1 %2775  ;;  %6008 = vmatprep.subr.bf16.mxu1 %v6338_v42  ;;  %2717 = vmatprep.mubr.bf16.mxu0 %v6336_v6 }
 0x587   : > { %v2778_v57 = vsel %vm724_vm7, %v2774_v55, %v2776_v56 }
 0x588   : > { %2785 = vmatprep.subr.bf16.mxu0 %v2778_v57 }
 0x589   : > { %v2878_v1 = vpop.permute.xlu0 %2877 }
 0x58a   : > { %v2770_v59 = vpop.permute.xlu1 %2769  ;;  %v2883_v4 = vsel %vm831_vm8, %v2878_v1, %v2880_v60 }
 0x58b   : > { %6005 = vmatmul.mubr.msk.bf16.vlgmr.msra.gmra.mrb[76].mxu1 %vm541_vm6, %v6786_v46 }
 0x58c   : > { %6009 = vmatpush3.bf16.msra.mxu1 %v2776_v56  ;;  %6010 = vmatprep.mubr.msk.bf16.mxu1 %vm6339_vm4, %v6338_v42 }
 0x58d   : > { %6014 = vmatprep.subr.bf16.mxu1 %v6338_v42  ;;  %v2986_v7 = vpop.permute.xlu0 %2985 }
 0x58e   : > { %v2882_v61 = vpop.permute.xlu1 %2881 }
 0x58f   : > { %v2884_v62 = vsel %vm831_vm8, %v2880_v60, %v2882_v61 }
 0x590   : > { %5734 = vmatmul.mubr.msk.bf16.vlgmr.msra.gmra.mrb[8].mxu0 %vm541_vm6, %v6786_v46 }
 0x591   : > { %2786 = vmatpush1.bf16.msra.mxu0 %v2777_v63  ;;  %2817 = vmatprep.mubr.bf16.mxu0 %v6336_v6  ;;  %v2984_v10 = vpop.permute.xlu0 %2983 }
 0x592   : > { %2891 = vmatprep.subr.bf16.mxu0 %v2884_v62  ;;  %v2876_v0 = vpop.permute.xlu1 %2875  ;;  %v2989_v13 = vsel %vm938_vm9, %v2984_v10, %v2986_v7 }
 0x593   : > { %6011 = vmatmul.mubr.msk.bf16.vlgmr.msra.gmra.mrb[80].mxu1 %vm541_vm6, %v2770_v59 }
 0x594   : > { %6015 = vmatpush3.bf16.msra.mxu1 %v2882_v61  ;;  %6016 = vmatprep.mubr.msk.bf16.mxu1 %vm6339_vm4, %v6338_v42 }
 0x595   : > { %6020 = vmatprep.subr.bf16.mxu1 %v6338_v42  ;;  %v3092_v14 = vpop.permute.xlu0 %3091 }
 0x596   : > { %v2988_v2 = vpop.permute.xlu1 %2987 }
 0x597   : > { %v2990_v8 = vsel %vm938_vm9, %v2986_v7, %v2988_v2 }
 0x599   : > { %v3090_v20 = vpop.permute.xlu0 %3089 }
 0x59a   : > { %v2982_v3 = vpop.permute.xlu1 %2981  ;;  %v3095_v22 = vsel %vm1045_vm10, %v3090_v20, %v3092_v14 }
 0x59b   : > { %6017 = vmatmul.mubr.msk.bf16.vlgmr.msra.gmra.mrb[84].mxu1 %vm541_vm6, %v2876_v0 }
 0x59c   : > { %6021 = vmatpush3.bf16.msra.mxu1 %v2988_v2  ;;  %5736 = vmatmul.mubr.msk.bf16.vlgmr.msra.gmra.mrb[8].mxu0 %vm541_vm6, %v2770_v59 }
 0x59d   : > { %2892 = vmatpush1.bf16.msra.mxu0 %v2883_v4  ;;  %6022 = vmatprep.mubr.msk.bf16.mxu1 %vm6339_vm4, %v6338_v42  ;;  %v3198_v23 = vpop.permute.xlu0 %3197 }
 0x59e   : > { %2997 = vmatprep.subr.bf16.mxu0 %v2990_v8  ;;  %v3094_v9 = vpop.permute.xlu1 %3093  ;;  %6026 = vmatprep.subr.bf16.mxu1 %v6338_v42 }
 0x59f   : > { %2923 = vmatprep.mubr.bf16.mxu0 %v6336_v6  ;;  %v3096_v15 = vsel %vm1045_vm10, %v3092_v14, %v3094_v9 }
 0x5a1   : > { %v3196_v26 = vpop.permute.xlu0 %3195 }
 0x5a2   : > { %v3088_v11 = vpop.permute.xlu1 %3087  ;;  %v3201_v29 = vsel %vm1152_vm11, %v3196_v26, %v3198_v23 }
 0x5a3   : > { %6023 = vmatmul.mubr.msk.bf16.vlgmr.msra.gmra.mrb[88].mxu1 %vm541_vm6, %v2982_v3 }
 0x5a4   : > { %6027 = vmatpush3.bf16.msra.mxu1 %v3094_v9  ;;  %6028 = vmatprep.mubr.msk.bf16.mxu1 %vm6339_vm4, %v6338_v42 }
 0x5a5   : > { %6032 = vmatprep.subr.bf16.mxu1 %v6338_v42  ;;  %v3304_v30 = vpop.permute.xlu0 %3303 }
 0x5a6   : > { %v3200_v12 = vpop.permute.xlu1 %3199 }
 0x5a7   : > { %v3202_v25 = vsel %vm1152_vm11, %v3198_v23, %v3200_v12 }
 0x5a8   : > { %5738 = vmatmul.mubr.msk.bf16.vlgmr.msra.gmra.mrb[8].mxu0 %vm541_vm6, %v2876_v0 }
 0x5a9   : > { %2998 = vmatpush1.bf16.msra.mxu0 %v2989_v13  ;;  %3029 = vmatprep.mubr.bf16.mxu0 %v6336_v6  ;;  %v3302_v32 = vpop.permute.xlu0 %3301 }
 0x5aa   : > { %3103 = vmatprep.subr.bf16.mxu0 %v3096_v15  ;;  %v3194_v19 = vpop.permute.xlu1 %3193  ;;  %v3307_v33 = vsel %vm1259_vm12, %v3302_v32, %v3304_v30 }
 0x5ab   : > { %6029 = vmatmul.mubr.msk.bf16.vlgmr.msra.gmra.mrb[92].mxu1 %vm541_vm6, %v3088_v11 }
 0x5ac   : > { %6033 = vmatpush3.bf16.msra.mxu1 %v3200_v12  ;;  %6034 = vmatprep.mubr.msk.bf16.mxu1 %vm6339_vm4, %v6338_v42 }
 0x5ad   : > { %6038 = vmatprep.subr.bf16.mxu1 %v6338_v42  ;;  %v3415_v34 = vpop.permute.xlu0 %3414 }
 0x5ae   : > { %v3306_v21 = vpop.permute.xlu1 %3305 }
 0x5af   : > { %v3308_v31 = vsel %vm1259_vm12, %v3304_v30, %v3306_v21 }
 0x5b1   : > { %v3413_v36 = vpop.permute.xlu0 %3412 }
 0x5b2   : > { %v3300_v24 = vpop.permute.xlu1 %3299  ;;  %v3418_v37 = vsel %vm7252_vm1, %v3413_v36, %v3415_v34 }
 0x5b3   : > { %6035 = vmatmul.mubr.msk.bf16.vlgmr.msra.gmra.mrb[96].mxu1 %vm541_vm6, %v3194_v19 }
 0x5b4   : > { %6039 = vmatpush3.bf16.msra.mxu1 %v3306_v21  ;;  %5740 = vmatmul.mubr.msk.bf16.vlgmr.msra.gmra.mrb[8].mxu0 %vm541_vm6, %v2982_v3 }
 0x5b5   : > { %3104 = vmatpush1.bf16.msra.mxu0 %v3095_v22  ;;  %6040 = vmatprep.mubr.msk.bf16.mxu1 %vm6339_vm4, %v6338_v42 }
 0x5b6   : > { %3209 = vmatprep.subr.bf16.mxu0 %v3202_v25  ;;  %6044 = vmatprep.subr.bf16.mxu1 %v6338_v42  ;;  %v3417_v27 = vpop.permute.xlu1 %3416 }
 0x5b7   : > { %3135 = vmatprep.mubr.bf16.mxu0 %v6336_v6  ;;  %v3419_v35 = vsel %vm7251_vm13, %v3415_v34, %v3417_v27 }
 0x5bb   : > { %6041 = vmatmul.mubr.msk.bf16.vlgmr.msra.gmra.mrb[100].mxu1 %vm541_vm6, %v3300_v24 }
 0x5bc   : > { %6045 = vmatpush3.bf16.msra.mxu1 %v3417_v27  ;;  %6046 = vmatprep.mubr.msk.bf16.mxu1 %vm6339_vm4, %v6338_v42 }
 0x5bd   : > { %6050 = vmatprep.subr.bf16.mxu1 %v6338_v42 }
 0x5c0   : > { %5742 = vmatmul.mubr.msk.bf16.vlgmr.msra.gmra.mrb[8].mxu0 %vm541_vm6, %v3088_v11 }
 0x5c1   : > { %3210 = vmatpush1.bf16.msra.mxu0 %v3201_v29  ;;  %3241 = vmatprep.mubr.bf16.mxu0 %v6336_v6 }
 0x5c2   : > { %3315 = vmatprep.subr.bf16.mxu0 %v3308_v31  ;;  %v3526_v34 = vpop.permute.xlu0 %3525 }
 0x5c3   : > { %6047 = vmatmul.mubr.msk.bf16.vlgmr.msra.gmra.mrb[104].mxu1 %vm541_vm6, %v6324_v28 }
 0x5c4   : > { %6052 = vmatprep.mubr.msk.bf16.mxu1 %vm6339_vm4, %v6338_v42 }
 0x5c7   : > { %v3521_v29 = vpop.permute.xlu1 %3520 }
 0x5cc   : > { %5744 = vmatmul.mubr.msk.bf16.vlgmr.msra.gmra.mrb[8].mxu0 %vm541_vm6, %v3194_v19 }
 0x5cd   : > { %3316 = vmatpush1.bf16.msra.mxu0 %v3307_v33  ;;  %3347 = vmatprep.mubr.bf16.mxu0 %v6336_v6 }
 0x5ce   : > { %3426 = vmatprep.subr.bf16.mxu0 %v3419_v35 }
 0x5d8   : > { %5746 = vmatmul.mubr.msk.bf16.vlgmr.msra.gmra.mrb[8].mxu0 %vm541_vm6, %v3300_v24 }
 0x5d9   : > { %3427 = vmatpush1.bf16.msra.mxu0 %v3418_v37  ;;  %3458 = vmatprep.mubr.bf16.mxu0 %v6336_v6 }
 0x5e4   : > { %5749 = vmatmul.mubr.msk.bf16.vlgmr.msra.gmra.mrb[8].mxu0 %vm541_vm6, %v6324_v28 }
 0x5e5   : > { %3639 = vmatprep.mubr.bf16.mxu0 %v6336_v6 }
 0x656   : > { %v2675_v38 = vpop.f32.mrb[72].mxu1 }
 0x657   : > { %v6000_v39 = vpop.f32.mrb[73].mxu1 }
 0x658   : > { %v2678_v40 = vpop.f32.mrb[74].mxu1 }
 0x659   : > { %v6001_v41 = vpop.f32.mrb[75].mxu1 }
 0x65e   : > { %v2762_v43 = vpop.f32.mrb[76].mxu1 }
 0x65f   : > { %v2763_v44 = vadd.f32 %v2762_v43, %v2675_v38  ;;  %v6006_v45 = vpop.f32.mrb[77].mxu1 }
 0x660   : > { %v2765_v46 = vpop.f32.mrb[78].mxu1 }
 0x661   : > { %v2766_v47 = vadd.f32 %v2765_v46, %v2678_v40  ;;  %v6007_v48 = vpop.f32.mrb[79].mxu1 }
 0x666   : > { %v2862_v49 = vpop.f32.mrb[80].mxu1 }
 0x667   : > { %v2871_v50 = vadd.f32 %v2862_v49, %v2763_v44  ;;  %v6012_v51 = vpop.f32.mrb[81].mxu1 }
 0x668   : > { %v2865_v52 = vpop.f32.mrb[82].mxu1 }
 0x669   : > { %v2874_v53 = vadd.f32 %v2865_v52, %v2766_v47  ;;  %v6013_v54 = vpop.f32.mrb[83].mxu1 }
 0x66e   : > { %v2968_v55 = vpop.f32.mrb[84].mxu1 }
 0x66f   : > { %v2977_v56 = vadd.f32 %v2968_v55, %v2871_v50  ;;  %v6018_v57 = vpop.f32.mrb[85].mxu1 }
 0x670   : > { %v2971_v58 = vpop.f32.mrb[86].mxu1 }
 0x671   : > { %v2980_v59 = vadd.f32 %v2971_v58, %v2874_v53  ;;  %v6019_v60 = vpop.f32.mrb[87].mxu1 }
 0x676   : > { %v3074_v61 = vpop.f32.mrb[88].mxu1 }
 0x677   : > { %v3083_v62 = vadd.f32 %v3074_v61, %v2977_v56  ;;  %v6024_v63 = vpop.f32.mrb[89].mxu1 }
 0x678   : > { %v3077_v0 = vpop.f32.mrb[90].mxu1 }
 0x679   : > { %v3086_v1 = vadd.f32 %v3077_v0, %v2980_v59  ;;  %v6025_v2 = vpop.f32.mrb[91].mxu1 }
 0x67e   : > { %v3180_v3 = vpop.f32.mrb[92].mxu1 }
 0x67f   : > { %v3189_v4 = vadd.f32 %v3180_v3, %v3083_v62  ;;  %v6030_v7 = vpop.f32.mrb[93].mxu1 }
 0x680   : > { %v3183_v8 = vpop.f32.mrb[94].mxu1 }
 0x681   : > { %v3192_v9 = vadd.f32 %v3183_v8, %v3086_v1  ;;  %v6031_v10 = vpop.f32.mrb[95].mxu1 }
 0x686   : > { %v3286_v11 = vpop.f32.mrb[96].mxu1 }
 0x687   : > { %v3295_v12 = vadd.f32 %v3286_v11, %v3189_v4  ;;  %v6036_v13 = vpop.f32.mrb[97].mxu1  ;;  %v6923_v11 = vld [vmem:[%s7197_s5] ss:$8 sps:$4 sm:$0xff]  }
 0x688   : > { %v3289_v14 = vpop.f32.mrb[98].mxu1  ;;  %v4525_v13 = vld [vmem:[%s7202_s10] sm:$0xff] }
 0x689   : > { %v3298_v15 = vadd.f32 %v3289_v14, %v3192_v9  ;;  %v6037_v19 = vpop.f32.mrb[99].mxu1 }
 0x68e   : > { %v3392_v20 = vpop.f32.mrb[100].mxu1 }
 0x68f   : > { %v3401_v21 = vadd.f32 %v3392_v20, %v3295_v12  ;;  %v6042_v22 = vpop.f32.mrb[101].mxu1  ;;  %v4526_v12 = vld [vmem:[%s7202_s10 + $0x8] sm:$0xff] }
 0x690   : > { %v3395_v23 = vpop.f32.mrb[102].mxu1 }
 0x691   : > { %v3404_v24 = vadd.f32 %v3395_v23, %v3298_v15  ;;  %v6043_v25 = vpop.f32.mrb[103].mxu1 }
 0x696   : > { %v3503_v26 = vpop.f32.mrb[104].mxu1 }
 0x697   : > { %v3512_v27 = vadd.f32 %v3503_v26, %v3401_v21  ;;  %v6048_v28 = vpop.f32.mrb[105].mxu1 }
 0x698   : > { %v3506_v30 = vpop.f32.mrb[106].mxu1 }
 0x699   : > { %v3530_v31 = vadd.f32 %v3521_v29, %v3512_v27  ;;  %v3515_v32 = vadd.f32 %v3506_v30, %v3404_v24  ;;  %v6049_v33 = vpop.f32.mrb[107].mxu1 }
 0x69b   : > { %vm3536_vm14 = vcmp.ge.f32.partialorder %v3530_v31, 0.0  ;;  %v3542_v35 = vmul.f32 0.2, %v3530_v31  ;;  %v3533_v36 = vadd.f32 %v3526_v34, %v3515_v32 }
 0x69d   : > { %v3548_v37 = vsel %vm3536_vm14, %v3530_v31, %v3542_v35  ;;  %vm3539_vm15 = vcmp.ge.f32.partialorder %v3533_v36, 0.0  ;;  %v3545_v38 = vmul.f32 0.2, %v3533_v36 }
 0x69e   : > { %v3554_v40 = vmul.f32 %v3548_v37, %v6456_v18 }
 0x69f   : > { %v3551_v39 = vsel %vm3539_vm15, %v3533_v36, %v3545_v38 }
 0x6a0   : > { %v3557_v41 = vmul.f32 %v3551_v39, %v6456_v18 }
 0x6a2   : > { %v3560_v43 = vpack.c.bf16 %v3557_v41, %v3554_v40 }
 0x6b7   : > { %v3460_v44 = vpop.f32.mrb[8].mxu0 }
 0x6b8   : > { %v3528_v45 = vadd.f32 %v3521_v29, %v3460_v44  ;;  %v3462_v46 = vpop.f32.mrb[9].mxu0 }
 0x6b9   : > { %v3529_v47 = vadd.f32 %v3521_v29, %v3462_v46  ;;  %v3464_v48 = vpop.f32.mrb[10].mxu0 }
 0x6ba   : > { %vm3534_vm13 = vcmp.ge.f32.partialorder %v3528_v45, 0.0  ;;  %v3540_v49 = vmul.f32 0.2, %v3528_v45  ;;  %v3531_v50 = vadd.f32 %v3526_v34, %v3464_v48  ;;  %v3466_v51 = vpop.f32.mrb[11].mxu0 }
 0x6bb   : > { %vm3535_vm1 = vcmp.ge.f32.partialorder %v3529_v47, 0.0  ;;  %v3541_v52 = vmul.f32 0.2, %v3529_v47  ;;  %v3532_v53 = vadd.f32 %v3526_v34, %v3466_v51 }
 0x6bc   : > { %v3546_v54 = vsel %vm3534_vm13, %v3528_v45, %v3540_v49  ;;  %vm3537_vm14 = vcmp.ge.f32.partialorder %v3531_v50, 0.0  ;;  %v3543_v55 = vmul.f32 0.2, %v3531_v50  ;;  %vm7258_vm13 = vcmask 736256  }
 0x6bd   : > { %v3547_v56 = vsel %vm3535_vm1, %v3529_v47, %v3541_v52  ;;  %vm3538_vm15 = vcmp.ge.f32.partialorder %v3532_v53, 0.0  ;;  %v3544_v57 = vmul.f32 0.2, %v3532_v53  ;;  %v3552_v59 = vmul.f32 %v3546_v54, %v6452_v16  ;;  %vm7259_vm1 = vmmov %vm7258_vm13 }
 0x6be   : > { %v3549_v58 = vsel %vm3537_vm14, %v3531_v50, %v3543_v55  ;;  %v3553_v62 = vmul.f32 %v3547_v56, %v6454_v17  ;;  %v6326_v56 = vld [vmem:[%s7197_s5 + $0x4] ss:$8 sps:$4 sm:$0xff]  }
 0x6bf   : > { %v3555_v60 = vmul.f32 %v3549_v58, %v6452_v16  ;;  %v3550_v61 = vsel %vm3538_vm15, %v3532_v53, %v3544_v57 }
 0x6c0   : > { %v3556_v63 = vmul.f32 %v3550_v61, %v6454_v17 }
 0x6c1   : > { %v3558_v0 = vpack.c.bf16 %v3555_v60, %v3552_v59 }
 0x6c2   : > { %v3559_v1 = vpack.c.bf16 %v3556_v63, %v3553_v62 }
 0x6c3   : > { %3564 = vrot.lane.b32.xlu1 %v3558_v0, %s7230_s30 }
 0x6c4   : > { %3566 = vrot.lane.b32.xlu0 %v3559_v1, %s7230_s30 }
 0x6c7   : > { %3568 = vrot.lane.b32.xlu1 %v3560_v43, %s7230_s30  ;;  %s7255_s30 = smov 110  }
 0x735   : > { %v3565_v2 = vpop.permute.xlu1 %3564 }
 0x736   : > { %3575 = vst.msk [vmem:[#allocation2] sm:$0xff] %vm509_vm2, %v3565_v2  ;;  %v3567_v3 = vpop.permute.xlu0 %3566 }
 0x737   : > { %v3570_v4 = vsel %vm417_vm0, %v3565_v2, %v3567_v3 }
 0x738   : > { %3595 = vrot.lane.b32.xlu0 %v3570_v4, %s7234_s13 }
 0x739   : > { %v3569_v7 = vpop.permute.xlu1 %3568 }
 0x73a   : > { %v3571_v8 = vsel %vm417_vm0, %v3567_v3, %v3569_v7 }
 0x73b   : > { %3577 = vst.msk [vmem:[#allocation2 + $0x10] sm:$0xff] %vm512_vm3, %v3571_v8 }
 0x73d   : > { %v3578_v9 = vld [vmem:[#allocation2] sm:$0xff] }
 0x73e   : > { %3593 = vrot.lane.b32.xlu0 %v3578_v9, %s7234_s13 }
 0x742   : > { %v3580_v10 = vld [vmem:[#allocation2 + $0x10] sm:$0xff]  ;;  %3782 = vrot.lane.b32.xlu0 %v3570_v4, %s7253_s18 }
 0x743   : > { %3597 = vrot.lane.b32.xlu1 %v3580_v10, %s7234_s13  ;;  %s7260_s13 = smov 19  }
 0x746   : > { %3780 = vrot.lane.b32.xlu0 %v3578_v9, %s7253_s18 }
 0x747   : > { %3588 = vrot.lane.b32.xlu1 %v6923_v11, %s7254_s17 }
 0x74a   : > { %3888 = vrot.lane.b32.xlu0 %v3570_v4, %s7255_s30 }
 0x74b   : > { %3784 = vrot.lane.b32.xlu1 %v3580_v10, %s7253_s18 }
 0x74e   : > { %3886 = vrot.lane.b32.xlu0 %v3578_v9, %s7255_s30 }
 0x74f   : > { %3778 = vrot.lane.b32.xlu1 %v6923_v11, %s7256_s15 }
 0x752   : > { %3994 = vrot.lane.b32.xlu0 %v3570_v4, %s7247_s20 }
 0x753   : > { %3890 = vrot.lane.b32.xlu1 %v3580_v10, %s7255_s30 }
 0x756   : > { %3992 = vrot.lane.b32.xlu0 %v3578_v9, %s7247_s20 }
 0x757   : > { %3884 = vrot.lane.b32.xlu1 %v6923_v11, %s7248_s23 }
 0x75a   : > { %4100 = vrot.lane.b32.xlu0 %v3570_v4, %s7249_s24 }
 0x75b   : > { %3996 = vrot.lane.b32.xlu1 %v3580_v10, %s7247_s20 }
 0x75e   : > { %4098 = vrot.lane.b32.xlu0 %v3578_v9, %s7249_s24 }
 0x75f   : > { %3990 = vrot.lane.b32.xlu1 %v6923_v11, %s7250_s25 }
 0x762   : > { %4206 = vrot.lane.b32.xlu0 %v3570_v4, %s7241_s26 }
 0x763   : > { %4102 = vrot.lane.b32.xlu1 %v3580_v10, %s7249_s24 }
 0x766   : > { %4204 = vrot.lane.b32.xlu0 %v3578_v9, %s7241_s26 }
 0x767   : > { %4096 = vrot.lane.b32.xlu1 %v6923_v11, %s7242_s27 }
 0x76a   : > { %4312 = vrot.lane.b32.xlu0 %v3570_v4, %s7243_s28 }
 0x76b   : > { %4208 = vrot.lane.b32.xlu1 %v3580_v10, %s7241_s26 }
 0x76e   : > { %4310 = vrot.lane.b32.xlu0 %v3578_v9, %s7243_s28 }
 0x76f   : > { %4202 = vrot.lane.b32.xlu1 %v6923_v11, %s7244_s29 }
 0x772   : > { %4423 = vrot.lane.b32.xlu0 %v3570_v4, %s6353_s14 }
 0x773   : > { %4314 = vrot.lane.b32.xlu1 %v3580_v10, %s7243_s28 }
 0x776   : > { %4421 = vrot.lane.b32.xlu0 %v3578_v9, %s6353_s14 }
 0x777   : > { %4308 = vrot.lane.b32.xlu1 %v6923_v11, %s7257_s19 }
 0x77a   : > { %4534 = vperm.xlu0 %6317, %v4526_v12  }
 0x77b   : > { %4425 = vrot.lane.b32.xlu1 %v3580_v10, %s6353_s14 }
 0x77f   : > { %4529 = vperm.xlu1 %6318, %v4525_v13  }
 0x7aa   : > { %v3596_v14 = vpop.permute.xlu0 %3595 }
 0x7b0   : > { %v3594_v15 = vpop.permute.xlu0 %3593 }
 0x7b1   : > { %v3599_v21 = vsel %vm535_vm5, %v3594_v15, %v3596_v14 }
 0x7b4   : > { %v3783_v23 = vpop.permute.xlu0 %3782 }
 0x7b5   : > { %v3598_v19 = vpop.permute.xlu1 %3597 }
 0x7b6   : > { %6051 = vmatpush3.bf16.msra.mxu1 %v3598_v19  ;;  %v3600_v20 = vsel %vm535_vm5, %v3596_v14, %v3598_v19 }
 0x7b7   : > { %3607 = vmatprep.subr.bf16.mxu0 %v3600_v20  ;;  %6056 = vmatprep.subr.bf16.mxu1 %v6338_v42 }
 0x7b8   : > { %3608 = vmatpush1.bf16.msra.mxu0 %v3599_v21  ;;  %v3781_v26 = vpop.permute.xlu0 %3780 }
 0x7b9   : > { %3694 = vmatprep.subr.bf16.mxu0 %v3570_v4  ;;  %v3589_v22 = vpop.permute.xlu1 %3588  ;;  %v3786_v31 = vsel %vm724_vm7, %v3781_v26, %v3783_v23 }
 0x7ba   : > { %6053 = vmatmul.mubr.msk.bf16.vlgmr.msra.gmra.mrb[108].mxu1 %vm541_vm6, %v3589_v22 }
 0x7bb   : > { %6057 = vmatpush3.bf16.msra.mxu1 %v3580_v10  ;;  %5752 = vmatmul.mubr.msk.bf16.vlgmr.msra.gmra.mrb[12].mxu0 %vm541_vm6, %v3589_v22 }
 0x7bc   : > { %3695 = vmatpush1.bf16.msra.mxu0 %v3578_v9  ;;  %6058 = vmatprep.mubr.msk.bf16.mxu1 %vm6339_vm4, %v6338_v42  ;;  %v3889_v28 = vpop.permute.xlu0 %3888 }
 0x7bd   : > { %v3785_v24 = vpop.permute.xlu1 %3784  ;;  %6062 = vmatprep.subr.bf16.mxu1 %v6338_v42  ;;  %3726 = vmatprep.mubr.bf16.mxu0 %v6336_v6 }
 0x7be   : > { %v3787_v25 = vsel %vm724_vm7, %v3783_v23, %v3785_v24 }
 0x7bf   : > { %3794 = vmatprep.subr.bf16.mxu0 %v3787_v25 }
 0x7c0   : > { %v3887_v33 = vpop.permute.xlu0 %3886 }
 0x7c1   : > { %v3779_v27 = vpop.permute.xlu1 %3778  ;;  %v3892_v36 = vsel %vm831_vm8, %v3887_v33, %v3889_v28 }
 0x7c2   : > { %6059 = vmatmul.mubr.msk.bf16.vlgmr.msra.gmra.mrb[112].mxu1 %vm541_vm6, %v6923_v11 }
 0x7c3   : > { %6063 = vmatpush3.bf16.msra.mxu1 %v3785_v24  ;;  %6064 = vmatprep.mubr.msk.bf16.mxu1 %vm6339_vm4, %v6338_v42 }
 0x7c4   : > { %6068 = vmatprep.subr.bf16.mxu1 %v6338_v42  ;;  %v3995_v37 = vpop.permute.xlu0 %3994 }
 0x7c5   : > { %v3891_v29 = vpop.permute.xlu1 %3890 }
 0x7c6   : > { %v3893_v30 = vsel %vm831_vm8, %v3889_v28, %v3891_v29 }
 0x7c7   : > { %5754 = vmatmul.mubr.msk.bf16.vlgmr.msra.gmra.mrb[12].mxu0 %vm541_vm6, %v6923_v11 }
 0x7c8   : > { %3795 = vmatpush1.bf16.msra.mxu0 %v3786_v31  ;;  %3826 = vmatprep.mubr.bf16.mxu0 %v6336_v6  ;;  %v3993_v40 = vpop.permute.xlu0 %3992 }
 0x7c9   : > { %3900 = vmatprep.subr.bf16.mxu0 %v3893_v30  ;;  %v3885_v32 = vpop.permute.xlu1 %3884  ;;  %v3998_v44 = vsel %vm938_vm9, %v3993_v40, %v3995_v37 }
 0x7ca   : > { %6065 = vmatmul.mubr.msk.bf16.vlgmr.msra.gmra.mrb[116].mxu1 %vm541_vm6, %v3779_v27 }
 0x7cb   : > { %6069 = vmatpush3.bf16.msra.mxu1 %v3891_v29  ;;  %6070 = vmatprep.mubr.msk.bf16.mxu1 %vm6339_vm4, %v6338_v42 }
 0x7cc   : > { %6074 = vmatprep.subr.bf16.mxu1 %v6338_v42  ;;  %v4101_v45 = vpop.permute.xlu0 %4100 }
 0x7cd   : > { %v3997_v34 = vpop.permute.xlu1 %3996 }
 0x7ce   : > { %v3999_v38 = vsel %vm938_vm9, %v3995_v37, %v3997_v34 }
 0x7d0   : > { %v4099_v48 = vpop.permute.xlu0 %4098 }
 0x7d1   : > { %v3991_v35 = vpop.permute.xlu1 %3990  ;;  %v4104_v50 = vsel %vm1045_vm10, %v4099_v48, %v4101_v45 }
 0x7d2   : > { %6071 = vmatmul.mubr.msk.bf16.vlgmr.msra.gmra.mrb[120].mxu1 %vm541_vm6, %v3885_v32 }
 0x7d3   : > { %6075 = vmatpush3.bf16.msra.mxu1 %v3997_v34  ;;  %5756 = vmatmul.mubr.msk.bf16.vlgmr.msra.gmra.mrb[12].mxu0 %vm541_vm6, %v3779_v27 }
 0x7d4   : > { %3901 = vmatpush1.bf16.msra.mxu0 %v3892_v36  ;;  %6076 = vmatprep.mubr.msk.bf16.mxu1 %vm6339_vm4, %v6338_v42  ;;  %v4207_v51 = vpop.permute.xlu0 %4206 }
 0x7d5   : > { %4006 = vmatprep.subr.bf16.mxu0 %v3999_v38  ;;  %v4103_v39 = vpop.permute.xlu1 %4102  ;;  %6080 = vmatprep.subr.bf16.mxu1 %v6338_v42 }
 0x7d6   : > { %3932 = vmatprep.mubr.bf16.mxu0 %v6336_v6  ;;  %v4105_v46 = vsel %vm1045_vm10, %v4101_v45, %v4103_v39 }
 0x7d8   : > { %v4205_v54 = vpop.permute.xlu0 %4204 }
 0x7d9   : > { %v4097_v41 = vpop.permute.xlu1 %4096  ;;  %v4210_v57 = vsel %vm1152_vm11, %v4205_v54, %v4207_v51 }
 0x7da   : > { %6077 = vmatmul.mubr.msk.bf16.vlgmr.msra.gmra.mrb[124].mxu1 %vm541_vm6, %v3991_v35 }
 0x7db   : > { %6081 = vmatpush3.bf16.msra.mxu1 %v4103_v39  ;;  %6082 = vmatprep.mubr.msk.bf16.mxu1 %vm6339_vm4, %v6338_v42 }
 0x7dc   : > { %6086 = vmatprep.subr.bf16.mxu1 %v6338_v42  ;;  %v4313_v58 = vpop.permute.xlu0 %4312 }
 0x7dd   : > { %v4209_v43 = vpop.permute.xlu1 %4208 }
 0x7de   : > { %v4211_v53 = vsel %vm1152_vm11, %v4207_v51, %v4209_v43 }
 0x7df   : > { %5758 = vmatmul.mubr.msk.bf16.vlgmr.msra.gmra.mrb[12].mxu0 %vm541_vm6, %v3885_v32 }
 0x7e0   : > { %4007 = vmatpush1.bf16.msra.mxu0 %v3998_v44  ;;  %4038 = vmatprep.mubr.bf16.mxu0 %v6336_v6  ;;  %v4311_v60 = vpop.permute.xlu0 %4310 }
 0x7e1   : > { %4112 = vmatprep.subr.bf16.mxu0 %v4105_v46  ;;  %v4203_v47 = vpop.permute.xlu1 %4202  ;;  %v4316_v61 = vsel %vm1259_vm12, %v4311_v60, %v4313_v58 }
 0x7e2   : > { %6083 = vmatmul.mubr.msk.bf16.vlgmr.msra.gmra.mrb[128].mxu1 %vm541_vm6, %v4097_v41 }
 0x7e3   : > { %6087 = vmatpush3.bf16.msra.mxu1 %v4209_v43  ;;  %6088 = vmatprep.mubr.msk.bf16.mxu1 %vm6339_vm4, %v6338_v42 }
 0x7e4   : > { %6092 = vmatprep.subr.bf16.mxu1 %v6338_v42  ;;  %v4424_v62 = vpop.permute.xlu0 %4423 }
 0x7e5   : > { %v4315_v49 = vpop.permute.xlu1 %4314 }
 0x7e6   : > { %v4317_v59 = vsel %vm1259_vm12, %v4313_v58, %v4315_v49 }
 0x7e8   : > { %v4422_v0 = vpop.permute.xlu0 %4421 }
 0x7e9   : > { %v4309_v52 = vpop.permute.xlu1 %4308  ;;  %v4427_v1 = vsel %vm7259_vm1, %v4422_v0, %v4424_v62 }
 0x7ea   : > { %6089 = vmatmul.mubr.msk.bf16.vlgmr.msra.gmra.mrb[132].mxu1 %vm541_vm6, %v4203_v47 }
 0x7eb   : > { %6093 = vmatpush3.bf16.msra.mxu1 %v4315_v49  ;;  %5760 = vmatmul.mubr.msk.bf16.vlgmr.msra.gmra.mrb[12].mxu0 %vm541_vm6, %v3991_v35 }
 0x7ec   : > { %4113 = vmatpush1.bf16.msra.mxu0 %v4104_v50  ;;  %6094 = vmatprep.mubr.msk.bf16.mxu1 %vm6339_vm4, %v6338_v42 }
 0x7ed   : > { %4218 = vmatprep.subr.bf16.mxu0 %v4211_v53  ;;  %6098 = vmatprep.subr.bf16.mxu1 %v6338_v42  ;;  %v4426_v55 = vpop.permute.xlu1 %4425 }
 0x7ee   : > { %4144 = vmatprep.mubr.bf16.mxu0 %v6336_v6  ;;  %v4428_v63 = vsel %vm7258_vm13, %v4424_v62, %v4426_v55 }
 0x7f2   : > { %6095 = vmatmul.mubr.msk.bf16.vlgmr.msra.gmra.mrb[136].mxu1 %vm541_vm6, %v4309_v52 }
 0x7f3   : > { %6099 = vmatpush3.bf16.msra.mxu1 %v4426_v55  ;;  %6100 = vmatprep.mubr.msk.bf16.mxu1 %vm6339_vm4, %v6338_v42 }
 0x7f4   : > { %6104 = vmatprep.subr.bf16.mxu1 %v6338_v42 }
 0x7f7   : > { %5762 = vmatmul.mubr.msk.bf16.vlgmr.msra.gmra.mrb[12].mxu0 %vm541_vm6, %v4097_v41 }
 0x7f8   : > { %4219 = vmatpush1.bf16.msra.mxu0 %v4210_v57  ;;  %4250 = vmatprep.mubr.bf16.mxu0 %v6336_v6 }
 0x7f9   : > { %4324 = vmatprep.subr.bf16.mxu0 %v4317_v59  ;;  %v4535_v62 = vpop.permute.xlu0 %4534 }
 0x7fa   : > { %6101 = vmatmul.mubr.msk.bf16.vlgmr.msra.gmra.mrb[140].mxu1 %vm541_vm6, %v6326_v56 }
 0x7fb   : > { %6106 = vmatprep.mubr.msk.bf16.mxu1 %vm6339_vm4, %v6338_v42 }
 0x7fe   : > { %v4530_v57 = vpop.permute.xlu1 %4529 }
 0x803   : > { %5764 = vmatmul.mubr.msk.bf16.vlgmr.msra.gmra.mrb[12].mxu0 %vm541_vm6, %v4203_v47 }
 0x804   : > { %4325 = vmatpush1.bf16.msra.mxu0 %v4316_v61  ;;  %4356 = vmatprep.mubr.bf16.mxu0 %v6336_v6 }
 0x805   : > { %4435 = vmatprep.subr.bf16.mxu0 %v4428_v63 }
 0x80f   : > { %5766 = vmatmul.mubr.msk.bf16.vlgmr.msra.gmra.mrb[12].mxu0 %vm541_vm6, %v4309_v52 }
 0x810   : > { %4436 = vmatpush1.bf16.msra.mxu0 %v4427_v1  ;;  %4467 = vmatprep.mubr.bf16.mxu0 %v6336_v6 }
 0x81b   : > { %5769 = vmatmul.mubr.msk.bf16.vlgmr.msra.gmra.mrb[12].mxu0 %vm541_vm6, %v6326_v56 }
 0x81c   : > { %4650 = vmatprep.mubr.bf16.mxu0 %v6336_v6 }
 0x88d   : > { %v3684_v2 = vpop.f32.mrb[108].mxu1 }
 0x88e   : > { %v6054_v3 = vpop.f32.mrb[109].mxu1 }
 0x88f   : > { %v3687_v4 = vpop.f32.mrb[110].mxu1 }
 0x890   : > { %v6055_v7 = vpop.f32.mrb[111].mxu1 }
 0x895   : > { %v3771_v8 = vpop.f32.mrb[112].mxu1 }
 0x896   : > { %v3772_v9 = vadd.f32 %v3771_v8, %v3684_v2  ;;  %v6060_v10 = vpop.f32.mrb[113].mxu1 }
 0x897   : > { %v3774_v11 = vpop.f32.mrb[114].mxu1 }
 0x898   : > { %v3775_v12 = vadd.f32 %v3774_v11, %v3687_v4  ;;  %v6061_v13 = vpop.f32.mrb[115].mxu1 }
 0x89d   : > { %v3871_v14 = vpop.f32.mrb[116].mxu1 }
 0x89e   : > { %v3880_v15 = vadd.f32 %v3871_v14, %v3772_v9  ;;  %v6066_v19 = vpop.f32.mrb[117].mxu1 }
 0x89f   : > { %v3874_v20 = vpop.f32.mrb[118].mxu1 }
 0x8a0   : > { %v3883_v21 = vadd.f32 %v3874_v20, %v3775_v12  ;;  %v6067_v22 = vpop.f32.mrb[119].mxu1 }
 0x8a5   : > { %v3977_v23 = vpop.f32.mrb[120].mxu1 }
 0x8a6   : > { %v3986_v24 = vadd.f32 %v3977_v23, %v3880_v15  ;;  %v6072_v25 = vpop.f32.mrb[121].mxu1 }
 0x8a7   : > { %v3980_v26 = vpop.f32.mrb[122].mxu1 }
 0x8a8   : > { %v3989_v27 = vadd.f32 %v3980_v26, %v3883_v21  ;;  %v6073_v28 = vpop.f32.mrb[123].mxu1 }
 0x8ad   : > { %v4083_v29 = vpop.f32.mrb[124].mxu1 }
 0x8ae   : > { %v4092_v30 = vadd.f32 %v4083_v29, %v3986_v24  ;;  %v6078_v31 = vpop.f32.mrb[125].mxu1 }
 0x8af   : > { %v4086_v32 = vpop.f32.mrb[126].mxu1 }
 0x8b0   : > { %v4095_v33 = vadd.f32 %v4086_v32, %v3989_v27  ;;  %v6079_v34 = vpop.f32.mrb[127].mxu1 }
 0x8b5   : > { %v4189_v35 = vpop.f32.mrb[128].mxu1 }
 0x8b6   : > { %v4198_v36 = vadd.f32 %v4189_v35, %v4092_v30  ;;  %v6084_v37 = vpop.f32.mrb[129].mxu1 }
 0x8b7   : > { %v4192_v38 = vpop.f32.mrb[130].mxu1 }
 0x8b8   : > { %v4201_v39 = vadd.f32 %v4192_v38, %v4095_v33  ;;  %v6085_v40 = vpop.f32.mrb[131].mxu1 }
 0x8bd   : > { %v4295_v41 = vpop.f32.mrb[132].mxu1 }
 0x8be   : > { %v4304_v43 = vadd.f32 %v4295_v41, %v4198_v36  ;;  %v6090_v44 = vpop.f32.mrb[133].mxu1  ;;  %v7061_v41 = vld [vmem:[%s7198_s6] sm:$0x3] }
 0x8bf   : > { %v4298_v45 = vpop.f32.mrb[134].mxu1 }
 0x8c0   : > { %v4307_v46 = vadd.f32 %v4298_v45, %v4201_v39  ;;  %v6091_v47 = vpop.f32.mrb[135].mxu1  ;;  %v5578_v45 = vld [vmem:[%s7203_s11] sm:$0x7] }
 0x8c5   : > { %v4401_v48 = vpop.f32.mrb[136].mxu1 }
 0x8c6   : > { %v4410_v49 = vadd.f32 %v4401_v48, %v4304_v43  ;;  %v6096_v50 = vpop.f32.mrb[137].mxu1 }
 0x8c7   : > { %v4404_v51 = vpop.f32.mrb[138].mxu1 }
 0x8c8   : > { %v4413_v52 = vadd.f32 %v4404_v51, %v4307_v46  ;;  %v6097_v53 = vpop.f32.mrb[139].mxu1 }
 0x8cd   : > { %v4512_v54 = vpop.f32.mrb[140].mxu1 }
 0x8ce   : > { %v4521_v55 = vadd.f32 %v4512_v54, %v4410_v49  ;;  %v6102_v56 = vpop.f32.mrb[141].mxu1 }
 0x8cf   : > { %v4515_v58 = vpop.f32.mrb[142].mxu1 }
 0x8d0   : > { %v4539_v59 = vadd.f32 %v4530_v57, %v4521_v55  ;;  %v4524_v60 = vadd.f32 %v4515_v58, %v4413_v52  ;;  %v6103_v61 = vpop.f32.mrb[143].mxu1 }
 0x8d2   : > { %vm4545_vm14 = vcmp.ge.f32.partialorder %v4539_v59, 0.0  ;;  %v4551_v63 = vmul.f32 0.2, %v4539_v59  ;;  %v4542_v0 = vadd.f32 %v4535_v62, %v4524_v60 }
 0x8d4   : > { %v4557_v1 = vsel %vm4545_vm14, %v4539_v59, %v4551_v63  ;;  %vm4548_vm15 = vcmp.ge.f32.partialorder %v4542_v0, 0.0  ;;  %v4554_v2 = vmul.f32 0.2, %v4542_v0 }
 0x8d5   : > { %v4563_v4 = vmul.f32 %v4557_v1, %v6456_v18 }
 0x8d6   : > { %v4560_v3 = vsel %vm4548_vm15, %v4542_v0, %v4554_v2 }
 0x8d7   : > { %v4566_v7 = vmul.f32 %v4560_v3, %v6456_v18 }
 0x8d9   : > { %v4569_v8 = vpack.c.bf16 %v4566_v7, %v4563_v4 }
 0x8ee   : > { %v4469_v9 = vpop.f32.mrb[12].mxu0 }
 0x8ef   : > { %v4537_v10 = vadd.f32 %v4530_v57, %v4469_v9  ;;  %v4471_v11 = vpop.f32.mrb[13].mxu0 }
 0x8f0   : > { %v4538_v12 = vadd.f32 %v4530_v57, %v4471_v11  ;;  %v4473_v13 = vpop.f32.mrb[14].mxu0 }
 0x8f1   : > { %vm4543_vm13 = vcmp.ge.f32.partialorder %v4537_v10, 0.0  ;;  %v4549_v14 = vmul.f32 0.2, %v4537_v10  ;;  %v4540_v15 = vadd.f32 %v4535_v62, %v4473_v13  ;;  %v4475_v19 = vpop.f32.mrb[15].mxu0 }
 0x8f2   : > { %vm4544_vm1 = vcmp.ge.f32.partialorder %v4538_v12, 0.0  ;;  %v4550_v20 = vmul.f32 0.2, %v4538_v12  ;;  %v4541_v21 = vadd.f32 %v4535_v62, %v4475_v19 }
 0x8f3   : > { %v4555_v22 = vsel %vm4543_vm13, %v4537_v10, %v4549_v14  ;;  %vm4546_vm14 = vcmp.ge.f32.partialorder %v4540_v15, 0.0  ;;  %v4552_v23 = vmul.f32 0.2, %v4540_v15 }
 0x8f4   : > { %v4556_v24 = vsel %vm4544_vm1, %v4538_v12, %v4550_v20  ;;  %vm4547_vm15 = vcmp.ge.f32.partialorder %v4541_v21, 0.0  ;;  %v4553_v25 = vmul.f32 0.2, %v4541_v21  ;;  %v4561_v26 = vmul.f32 %v4555_v22, %v6452_v16 }
 0x8f5   : > { %v4558_v18 = vsel %vm4546_vm14, %v4540_v15, %v4552_v23  ;;  %v4562_v29 = vmul.f32 %v4556_v24, %v6454_v17 }
 0x8f6   : > { %v4564_v27 = vmul.f32 %v4558_v18, %v6452_v16  ;;  %v4559_v28 = vsel %vm4547_vm15, %v4541_v21, %v4553_v25  ;;  %v6355_v16 = vmov 1983009808  }
 0x8f7   : > { %v4565_v30 = vmul.f32 %v4559_v28, %v6454_v17  ;;  %v4593_v36 = vunpack.c.l.s4 %v6355_v16 }
 0x8f8   : > { %v4567_v31 = vpack.c.bf16 %v4564_v27, %v4561_v26 }
 0x8f9   : > { %v4568_v32 = vpack.c.bf16 %v4565_v30, %v4562_v29  ;;  %v4594_v38 = vunpack.c.0.s8 %v4593_v36 }
 0x8fa   : > { %4573 = vrot.lane.b32.xlu1 %v4567_v31, %s7260_s13 }
 0x8fb   : > { %4575 = vrot.lane.b32.xlu0 %v4568_v32, %s7260_s13  ;;  %v7056_v40 = vsub.s32 %v4594_v38, %v6436_v5  ;;  %v5775_v5 = vld.sshfl [vmem:[%s7198_s6] sm:$0x3 pattern:$0x76325410] }
 0x8fd   : > { %v4598_v44 = vrot.slane %v7061_v41, %v7056_v40 }
 0x8fe   : > { %4577 = vrot.lane.b32.xlu1 %v4569_v8, %s7260_s13 }
 0x96c   : > { %v4574_v33 = vpop.permute.xlu1 %4573 }
 0x96d   : > { %4584 = vst.msk [vmem:[#allocation2] sm:$0xff] %vm509_vm2, %v4574_v33  ;;  %v4576_v34 = vpop.permute.xlu0 %4575 }
 0x96e   : > { %v4579_v35 = vsel %vm417_vm0, %v4574_v33, %v4576_v34  ;;  %v5476_v33 = vld [vmem:[%s7198_s6 + $0x2] sm:$0x3] }
 0x96f   : > { %4606 = vrot.lane.b32.xlu0 %v4579_v35, %s7261_s16 }
 0x970   : > { %v4578_v37 = vpop.permute.xlu1 %4577 }
 0x971   : > { %v4580_v17 = vsel %vm417_vm0, %v4576_v34, %v4578_v37  ;;  %vm7262_vm0 = vcmask 736256  }
 0x972   : > { %4586 = vst.msk [vmem:[#allocation2 + $0x10] sm:$0xff] %vm512_vm3, %v4580_v17  ;;  %vm7263_vm2 = vmmov %vm7262_vm0  ;;  %vm5610_vm3 = vcmask 1041408  }
 0x974   : > { %v4587_v39 = vld [vmem:[#allocation2] sm:$0xff] }
 0x975   : > { %4604 = vrot.lane.b32.xlu0 %v4587_v39, %s7261_s16 }
 0x979   : > { %v4589_v43 = vld [vmem:[#allocation2 + $0x10] sm:$0xff]  ;;  %4802 = vrot.lane.b32.xlu0 %v4579_v35, %s7253_s18 }
 0x97a   : > { %4608 = vrot.lane.b32.xlu1 %v4589_v43, %s7261_s16 }
 0x97d   : > { %4800 = vrot.lane.b32.xlu0 %v4587_v39, %s7253_s18 }
 0x97e   : > { %4599 = vrot.lane.b32.xlu1 %v4598_v44, %s7254_s17 }
 0x981   : > { %4917 = vrot.lane.b32.xlu0 %v4579_v35, %s7255_s30 }
 0x982   : > { %4804 = vrot.lane.b32.xlu1 %v4589_v43, %s7253_s18 }
 0x985   : > { %4915 = vrot.lane.b32.xlu0 %v4587_v39, %s7255_s30 }
 0x986   : > { %4795 = vrot.lane.b32.xlu1 %v5775_v5, %s7256_s15 }
 0x989   : > { %5032 = vrot.lane.b32.xlu0 %v4579_v35, %s7247_s20 }
 0x98a   : > { %4919 = vrot.lane.b32.xlu1 %v4589_v43, %s7255_s30 }
 0x98d   : > { %5030 = vrot.lane.b32.xlu0 %v4587_v39, %s7247_s20 }
 0x98e   : > { %4910 = vrot.lane.b32.xlu1 %v5775_v5, %s7248_s23 }
 0x991   : > { %5147 = vrot.lane.b32.xlu0 %v4579_v35, %s7249_s24 }
 0x992   : > { %5034 = vrot.lane.b32.xlu1 %v4589_v43, %s7247_s20 }
 0x995   : > { %5145 = vrot.lane.b32.xlu0 %v4587_v39, %s7249_s24 }
 0x996   : > { %5025 = vrot.lane.b32.xlu1 %v5775_v5, %s7250_s25 }
 0x999   : > { %5262 = vrot.lane.b32.xlu0 %v4579_v35, %s7241_s26 }
 0x99a   : > { %5149 = vrot.lane.b32.xlu1 %v4589_v43, %s7249_s24 }
 0x99d   : > { %5260 = vrot.lane.b32.xlu0 %v4587_v39, %s7241_s26 }
 0x99e   : > { %5140 = vrot.lane.b32.xlu1 %v5775_v5, %s7242_s27  ;;  %s6287_s27 = smul.u32 6, %s7269_s22 }
 0x9a1   : > { %5377 = vrot.lane.b32.xlu0 %v4579_v35, %s7243_s28 }
 0x9a2   : > { %5264 = vrot.lane.b32.xlu1 %v4589_v43, %s7241_s26 }
 0x9a5   : > { %5375 = vrot.lane.b32.xlu0 %v4587_v39, %s7243_s28 }
 0x9a6   : > { %5255 = vrot.lane.b32.xlu1 %v5775_v5, %s7244_s29  ;;  %s413_s29 = scalar_lea.vmem %s7204_s12, %s6287_s27 }
 0x9a9   : > { %5482 = vrot.lane.b32.xlu0 %v4579_v35, %s6353_s14 }
 0x9aa   : > { %5379 = vrot.lane.b32.xlu1 %v4589_v43, %s7243_s28 }
 0x9ad   : > { %5480 = vrot.lane.b32.xlu0 %v4587_v39, %s6353_s14 }
 0x9ae   : > { %5370 = vrot.lane.b32.xlu1 %v5775_v5, %s7257_s19 }
 0x9b2   : > { %5484 = vrot.lane.b32.xlu1 %v4589_v43, %s6353_s14 }
 0x9b6   : > { %5581 = vperm.xlu1 %6318, %v5578_v45  }
 0x9e1   : > { %v4607_v46 = vpop.permute.xlu0 %4606 }
 0x9e7   : > { %v4605_v47 = vpop.permute.xlu0 %4604 }
 0x9e8   : > { %v4610_v51 = vsel %vm535_vm5, %v4605_v47, %v4607_v46 }
 0x9eb   : > { %v4803_v48 = vpop.permute.xlu0 %4802 }
 0x9ec   : > { %v4609_v49 = vpop.permute.xlu1 %4608 }
 0x9ed   : > { %6105 = vmatpush3.bf16.msra.mxu1 %v4609_v49  ;;  %v4611_v50 = vsel %vm535_vm5, %v4607_v46, %v4609_v49  ;;  %vm5613_vm5 = vcmask 1043458  }
 0x9ee   : > { %4618 = vmatprep.subr.bf16.mxu0 %v4611_v50  ;;  %6110 = vmatprep.subr.bf16.mxu1 %v6338_v42 }
 0x9ef   : > { %4619 = vmatpush1.bf16.msra.mxu0 %v4610_v51  ;;  %v4801_v52 = vpop.permute.xlu0 %4800 }
 0x9f0   : > { %4702 = vmatprep.subr.bf16.mxu0 %v4579_v35  ;;  %v4600_v53 = vpop.permute.xlu1 %4599  ;;  %v4806_v59 = vsel %vm724_vm7, %v4801_v52, %v4803_v48 }
 0x9f1   : > { %6107 = vmatmul.mubr.msk.bf16.vlgmr.msra.gmra.mrb[144].mxu1 %vm541_vm6, %v4600_v53 }
 0x9f2   : > { %6111 = vmatpush3.bf16.msra.mxu1 %v4589_v43  ;;  %5771 = vmatmul.mubr.msk.bf16.vlgmr.msra.gmra.mrb[16].mxu0 %vm541_vm6, %v4600_v53 }
 0x9f3   : > { %4703 = vmatpush1.bf16.msra.mxu0 %v4587_v39  ;;  %6112 = vmatprep.mubr.msk.bf16.mxu1 %vm6339_vm4, %v6338_v42  ;;  %v4918_v54 = vpop.permute.xlu0 %4917 }
 0x9f4   : > { %v4805_v55 = vpop.permute.xlu1 %4804  ;;  %6116 = vmatprep.subr.bf16.mxu1 %v6338_v42  ;;  %4734 = vmatprep.mubr.bf16.mxu0 %v6336_v6 }
 0x9f5   : > { %v4807_v56 = vsel %vm724_vm7, %v4803_v48, %v4805_v55 }
 0x9f6   : > { %4814 = vmatprep.subr.bf16.mxu0 %v4807_v56 }
 0x9f7   : > { %v4916_v57 = vpop.permute.xlu0 %4915 }
 0x9f8   : > { %v4796_v58 = vpop.permute.xlu1 %4795  ;;  %v4921_v1 = vsel %vm831_vm8, %v4916_v57, %v4918_v54 }
 0x9f9   : > { %6113 = vmatmul.mubr.msk.bf16.vlgmr.msra.gmra.mrb[148].mxu1 %vm541_vm6, %v7061_v41 }
 0x9fa   : > { %6117 = vmatpush3.bf16.msra.mxu1 %v4805_v55  ;;  %5773 = vmatmul.mubr.msk.bf16.vlgmr.msra.gmra.mrb[20].mxu0 %vm541_vm6, %v7061_v41 }
 0x9fb   : > { %4815 = vmatpush1.bf16.msra.mxu0 %v4806_v59  ;;  %6118 = vmatprep.mubr.msk.bf16.mxu1 %vm6339_vm4, %v6338_v42  ;;  %v5033_v60 = vpop.permute.xlu0 %5032 }
 0x9fc   : > { %v4920_v61 = vpop.permute.xlu1 %4919  ;;  %6122 = vmatprep.subr.bf16.mxu1 %v6338_v42  ;;  %4846 = vmatprep.mubr.bf16.mxu0 %v6336_v6 }
 0x9fd   : > { %v4922_v62 = vsel %vm831_vm8, %v4918_v54, %v4920_v61 }
 0x9fe   : > { %4929 = vmatprep.subr.bf16.mxu0 %v4922_v62 }
 0x9ff   : > { %v5031_v63 = vpop.permute.xlu0 %5030 }
 0xa00   : > { %v4911_v0 = vpop.permute.xlu1 %4910  ;;  %v5036_v9 = vsel %vm938_vm9, %v5031_v63, %v5033_v60 }
 0xa01   : > { %6119 = vmatmul.mubr.msk.bf16.vlgmr.msra.gmra.mrb[152].mxu1 %vm541_vm6, %v4796_v58 }
 0xa02   : > { %6123 = vmatpush3.bf16.msra.mxu1 %v4920_v61  ;;  %5776 = vmatmul.mubr.msk.bf16.vlgmr.msra.gmra.mrb[24].mxu0 %vm541_vm6, %v4796_v58 }
 0xa03   : > { %4930 = vmatpush1.bf16.msra.mxu0 %v4921_v1  ;;  %6124 = vmatprep.mubr.msk.bf16.mxu1 %vm6339_vm4, %v6338_v42  ;;  %v5148_v2 = vpop.permute.xlu0 %5147 }
 0xa04   : > { %v5035_v3 = vpop.permute.xlu1 %5034  ;;  %6128 = vmatprep.subr.bf16.mxu1 %v6338_v42  ;;  %4961 = vmatprep.mubr.bf16.mxu0 %v6336_v6 }
 0xa05   : > { %v5037_v4 = vsel %vm938_vm9, %v5033_v60, %v5035_v3  ;;  %vm5617_vm9 = vcmask 553988  }
 0xa06   : > { %5044 = vmatprep.subr.bf16.mxu0 %v5037_v4 }
 0xa07   : > { %v5146_v7 = vpop.permute.xlu0 %5145 }
 0xa08   : > { %v5026_v8 = vpop.permute.xlu1 %5025  ;;  %v5151_v15 = vsel %vm1045_vm10, %v5146_v7, %v5148_v2 }
 0xa09   : > { %6125 = vmatmul.mubr.msk.bf16.vlgmr.msra.gmra.mrb[156].mxu1 %vm541_vm6, %v4911_v0 }
 0xa0a   : > { %6129 = vmatpush3.bf16.msra.mxu1 %v5035_v3  ;;  %5779 = vmatmul.mubr.msk.bf16.vlgmr.msra.gmra.mrb[28].mxu0 %vm541_vm6, %v4911_v0 }
 0xa0b   : > { %5045 = vmatpush1.bf16.msra.mxu0 %v5036_v9  ;;  %6130 = vmatprep.mubr.msk.bf16.mxu1 %vm6339_vm4, %v6338_v42  ;;  %v5263_v10 = vpop.permute.xlu0 %5262 }
 0xa0c   : > { %v5150_v11 = vpop.permute.xlu1 %5149  ;;  %6134 = vmatprep.subr.bf16.mxu1 %v6338_v42  ;;  %5076 = vmatprep.mubr.bf16.mxu0 %v6336_v6 }
 0xa0d   : > { %v5152_v12 = vsel %vm1045_vm10, %v5148_v2, %v5150_v11  ;;  %vm5618_vm10 = vsmask.f32 5376 }
 0xa0e   : > { %5159 = vmatprep.subr.bf16.mxu0 %v5152_v12 }
 0xa0f   : > { %v5261_v13 = vpop.permute.xlu0 %5260 }
 0xa10   : > { %v5141_v14 = vpop.permute.xlu1 %5140  ;;  %v5266_v23 = vsel %vm1152_vm11, %v5261_v13, %v5263_v10 }
 0xa11   : > { %6131 = vmatmul.mubr.msk.bf16.vlgmr.msra.gmra.mrb[160].mxu1 %vm541_vm6, %v5026_v8 }
 0xa12   : > { %6135 = vmatpush3.bf16.msra.mxu1 %v5150_v11  ;;  %5782 = vmatmul.mubr.msk.bf16.vlgmr.msra.gmra.mrb[32].mxu0 %vm541_vm6, %v5026_v8 }
 0xa13   : > { %5160 = vmatpush1.bf16.msra.mxu0 %v5151_v15  ;;  %6136 = vmatprep.mubr.msk.bf16.mxu1 %vm6339_vm4, %v6338_v42  ;;  %v5378_v21 = vpop.permute.xlu0 %5377 }
 0xa14   : > { %v5265_v19 = vpop.permute.xlu1 %5264  ;;  %6140 = vmatprep.subr.bf16.mxu1 %v6338_v42  ;;  %5191 = vmatprep.mubr.bf16.mxu0 %v6336_v6 }
 0xa15   : > { %v5267_v20 = vsel %vm1152_vm11, %v5263_v10, %v5265_v19 }
 0xa16   : > { %5274 = vmatprep.subr.bf16.mxu0 %v5267_v20 }
 0xa17   : > { %v5376_v24 = vpop.permute.xlu0 %5375 }
 0xa18   : > { %v5256_v22 = vpop.permute.xlu1 %5255  ;;  %v5381_v28 = vsel %vm1259_vm12, %v5376_v24, %v5378_v21 }
 0xa19   : > { %6137 = vmatmul.mubr.msk.bf16.vlgmr.msra.gmra.mrb[164].mxu1 %vm541_vm6, %v5141_v14 }
 0xa1a   : > { %6141 = vmatpush3.bf16.msra.mxu1 %v5265_v19  ;;  %5785 = vmatmul.mubr.msk.bf16.vlgmr.msra.gmra.mrb[36].mxu0 %vm541_vm6, %v5141_v14 }
 0xa1b   : > { %5275 = vmatpush1.bf16.msra.mxu0 %v5266_v23  ;;  %6142 = vmatprep.mubr.msk.bf16.mxu1 %vm6339_vm4, %v6338_v42  ;;  %v5483_v27 = vpop.permute.xlu0 %5482 }
 0xa1c   : > { %v5380_v25 = vpop.permute.xlu1 %5379  ;;  %6146 = vmatprep.subr.bf16.mxu1 %v6338_v42  ;;  %5306 = vmatprep.mubr.bf16.mxu0 %v6336_v6 }
 0xa1d   : > { %v5382_v18 = vsel %vm1259_vm12, %v5378_v21, %v5380_v25  ;;  %vm5619_vm12 = vmand %vm5617_vm9, %vm5618_vm10 }
 0xa1e   : > { %5389 = vmatprep.subr.bf16.mxu0 %v5382_v18 }
 0xa1f   : > { %v5481_v31 = vpop.permute.xlu0 %5480 }
 0xa20   : > { %v5371_v26 = vpop.permute.xlu1 %5370  ;;  %v5486_v32 = vsel %vm7263_vm2, %v5481_v31, %v5483_v27 }
 0xa21   : > { %6143 = vmatmul.mubr.msk.bf16.vlgmr.msra.gmra.mrb[168].mxu1 %vm541_vm6, %v5256_v22 }
 0xa22   : > { %6147 = vmatpush3.bf16.msra.mxu1 %v5380_v25  ;;  %5788 = vmatmul.mubr.msk.bf16.vlgmr.msra.gmra.mrb[40].mxu0 %vm541_vm6, %v5256_v22 }
 0xa23   : > { %5390 = vmatpush1.bf16.msra.mxu0 %v5381_v28  ;;  %6148 = vmatprep.mubr.msk.bf16.mxu1 %vm6339_vm4, %v6338_v42 }
 0xa24   : > { %v5485_v29 = vpop.permute.xlu1 %5484  ;;  %6152 = vmatprep.subr.bf16.mxu1 %v6338_v42  ;;  %5421 = vmatprep.mubr.bf16.mxu0 %v6336_v6 }
 0xa25   : > { %v5487_v30 = vsel %vm7262_vm0, %v5483_v27, %v5485_v29 }
 0xa26   : > { %5494 = vmatprep.subr.bf16.mxu0 %v5487_v30 }
 0xa29   : > { %6149 = vmatmul.mubr.msk.bf16.vlgmr.msra.gmra.mrb[172].mxu1 %vm541_vm6, %v5371_v26 }
 0xa2a   : > { %6153 = vmatpush3.bf16.msra.mxu1 %v5485_v29  ;;  %5791 = vmatmul.mubr.msk.bf16.vlgmr.msra.gmra.mrb[44].mxu0 %vm541_vm6, %v5371_v26 }
 0xa2b   : > { %5495 = vmatpush1.bf16.msra.mxu0 %v5486_v32  ;;  %6154 = vmatprep.mubr.msk.bf16.mxu1 %vm6339_vm4, %v6338_v42  ;;  %vm5611_vm4 = vsmask.f32 1280 }
 0xa2c   : > { %5526 = vmatprep.mubr.bf16.mxu0 %v6336_v6  ;;  %vm7171_vm7 = vmand %vm5610_vm3, %vm5611_vm4 }
 0xa31   : > { %6155 = vmatmul.mubr.msk.bf16.vlgmr.msra.gmra.mrb[176].mxu1 %vm541_vm6, %v5476_v33 }
 0xa32   : > { %5793 = vmatmul.mubr.msk.bf16.vlgmr.msra.gmra.mrb[48].mxu0 %vm541_vm6, %v5476_v33  ;;  %vm5614_vm6 = vsmask.f32 3328 }
 0xa33   : > { %vm7176_vm8 = vmand %vm5613_vm5, %vm5614_vm6 }
 0xa34   : > { %vm5616_vm11 = vmor %vm7176_vm8, %vm7171_vm7 }
 0xa35   : > { %vm5620_vm13 = vmor %vm5619_vm12, %vm5616_vm11 }
 0xac4   : > { %v4693_v34 = vpop.f32.mrb[144].mxu1 }
 0xac5   : > { %v4652_v35 = vpop.f32.mrb[16].mxu0  ;;  %v6108_v16 = vpop.f32.mrb[145].mxu1 }
 0xac6   : > { %v4654_v36 = vpop.f32.mrb[17].mxu0  ;;  %v4696_v37 = vpop.f32.mrb[146].mxu1 }
 0xac7   : > { %v4656_v17 = vpop.f32.mrb[18].mxu0  ;;  %v6109_v38 = vpop.f32.mrb[147].mxu1 }
 0xac8   : > { %v4657_v39 = vpop.f32.mrb[19].mxu0 }
 0xacc   : > { %v4777_v41 = vpop.f32.mrb[148].mxu1 }
 0xacd   : > { %v4778_v42 = vadd.f32 %v4777_v41, %v4693_v34  ;;  %v4736_v43 = vpop.f32.mrb[20].mxu0  ;;  %v6114_v6 = vpop.f32.mrb[149].mxu1 }
 0xace   : > { %v4737_v44 = vadd.f32 %v4736_v43, %v4652_v35  ;;  %v4738_v5 = vpop.f32.mrb[21].mxu0  ;;  %v4780_v45 = vpop.f32.mrb[150].mxu1 }
 0xacf   : > { %v4739_v46 = vadd.f32 %v4738_v5, %v4654_v36  ;;  %v4740_v47 = vpop.f32.mrb[22].mxu0  ;;  %v6115_v48 = vpop.f32.mrb[151].mxu1 }
 0xad0   : > { %v4741_v49 = vpop.f32.mrb[23].mxu0 }
 0xad4   : > { %v4889_v50 = vpop.f32.mrb[152].mxu1 }
 0xad5   : > { %v4897_v51 = vadd.f32 %v4889_v50, %v4778_v42  ;;  %v4848_v52 = vpop.f32.mrb[24].mxu0  ;;  %v6120_v53 = vpop.f32.mrb[153].mxu1 }
 0xad6   : > { %v4895_v54 = vadd.f32 %v4848_v52, %v4737_v44  ;;  %v4850_v55 = vpop.f32.mrb[25].mxu0  ;;  %v4892_v56 = vpop.f32.mrb[154].mxu1 }
 0xad7   : > { %v4896_v57 = vadd.f32 %v4850_v55, %v4739_v46  ;;  %v4852_v58 = vpop.f32.mrb[26].mxu0  ;;  %v6121_v59 = vpop.f32.mrb[155].mxu1 }
 0xad8   : > { %v4853_v60 = vpop.f32.mrb[27].mxu0  ;;  %v5582_v53 = vpop.permute.xlu1 %5581 }
 0xadc   : > { %v5004_v61 = vpop.f32.mrb[156].mxu1 }
 0xadd   : > { %v5012_v62 = vadd.f32 %v5004_v61, %v4897_v51  ;;  %v4963_v63 = vpop.f32.mrb[28].mxu0  ;;  %v6126_v0 = vpop.f32.mrb[157].mxu1 }
 0xade   : > { %v5010_v1 = vadd.f32 %v4963_v63, %v4895_v54  ;;  %v4965_v2 = vpop.f32.mrb[29].mxu0  ;;  %v5007_v3 = vpop.f32.mrb[158].mxu1 }
 0xadf   : > { %v5011_v4 = vadd.f32 %v4965_v2, %v4896_v57  ;;  %v4967_v7 = vpop.f32.mrb[30].mxu0  ;;  %v6127_v8 = vpop.f32.mrb[159].mxu1 }
 0xae0   : > { %v4968_v9 = vpop.f32.mrb[31].mxu0 }
 0xae4   : > { %v5119_v10 = vpop.f32.mrb[160].mxu1 }
 0xae5   : > { %v5127_v11 = vadd.f32 %v5119_v10, %v5012_v62  ;;  %v5078_v12 = vpop.f32.mrb[32].mxu0  ;;  %v6132_v13 = vpop.f32.mrb[161].mxu1 }
 0xae6   : > { %v5125_v14 = vadd.f32 %v5078_v12, %v5010_v1  ;;  %v5080_v15 = vpop.f32.mrb[33].mxu0  ;;  %v5122_v19 = vpop.f32.mrb[162].mxu1  ;;  %v5621_v12 = vld [vmem:[%s413_s29] sm:$0x3f] }
 0xae7   : > { %v5126_v20 = vadd.f32 %v5080_v15, %v5011_v4  ;;  %v5082_v21 = vpop.f32.mrb[34].mxu0  ;;  %v6133_v22 = vpop.f32.mrb[163].mxu1 }
 0xae8   : > { %v5083_v23 = vpop.f32.mrb[35].mxu0 }
 0xaec   : > { %v5234_v24 = vpop.f32.mrb[164].mxu1 }
 0xaed   : > { %v5242_v25 = vadd.f32 %v5234_v24, %v5127_v11  ;;  %v5193_v18 = vpop.f32.mrb[36].mxu0  ;;  %v6138_v26 = vpop.f32.mrb[165].mxu1 }
 0xaee   : > { %v5240_v27 = vadd.f32 %v5193_v18, %v5125_v14  ;;  %v5195_v28 = vpop.f32.mrb[37].mxu0  ;;  %v5237_v29 = vpop.f32.mrb[166].mxu1 }
 0xaef   : > { %v5241_v30 = vadd.f32 %v5195_v28, %v5126_v20  ;;  %v5197_v31 = vpop.f32.mrb[38].mxu0  ;;  %v6139_v32 = vpop.f32.mrb[167].mxu1 }
 0xaf0   : > { %v5198_v33 = vpop.f32.mrb[39].mxu0 }
 0xaf4   : > { %v5349_v34 = vpop.f32.mrb[168].mxu1 }
 0xaf5   : > { %v5357_v35 = vadd.f32 %v5349_v34, %v5242_v25  ;;  %v5308_v16 = vpop.f32.mrb[40].mxu0  ;;  %v6144_v36 = vpop.f32.mrb[169].mxu1 }
 0xaf6   : > { %v5355_v37 = vadd.f32 %v5308_v16, %v5240_v27  ;;  %v5310_v17 = vpop.f32.mrb[41].mxu0  ;;  %v5352_v38 = vpop.f32.mrb[170].mxu1 }
 0xaf7   : > { %v5356_v39 = vadd.f32 %v5310_v17, %v5241_v30  ;;  %v5312_v41 = vpop.f32.mrb[42].mxu0  ;;  %v6145_v42 = vpop.f32.mrb[171].mxu1 }
 0xaf8   : > { %v5313_v43 = vpop.f32.mrb[43].mxu0 }
 0xafc   : > { %v5464_v6 = vpop.f32.mrb[172].mxu1 }
 0xafd   : > { %v5472_v44 = vadd.f32 %v5464_v6, %v5357_v35  ;;  %v5423_v5 = vpop.f32.mrb[44].mxu0  ;;  %v6150_v45 = vpop.f32.mrb[173].mxu1 }
 0xafe   : > { %v5470_v46 = vadd.f32 %v5423_v5, %v5355_v37  ;;  %v5425_v47 = vpop.f32.mrb[45].mxu0  ;;  %v5467_v48 = vpop.f32.mrb[174].mxu1 }
 0xaff   : > { %v5471_v49 = vadd.f32 %v5425_v47, %v5356_v39  ;;  %v5427_v50 = vpop.f32.mrb[46].mxu0  ;;  %v6151_v51 = vpop.f32.mrb[175].mxu1 }
 0xb00   : > { %v5428_v52 = vpop.f32.mrb[47].mxu0 }
 0xb04   : > { %v5569_v54 = vpop.f32.mrb[176].mxu1 }
 0xb05   : > { %v5577_v55 = vadd.f32 %v5569_v54, %v5472_v44  ;;  %v5528_v56 = vpop.f32.mrb[48].mxu0  ;;  %v6156_v57 = vpop.f32.mrb[177].mxu1 }
 0xb06   : > { %v5575_v58 = vadd.f32 %v5528_v56, %v5470_v46  ;;  %v5530_v59 = vpop.f32.mrb[49].mxu0  ;;  %v5572_v61 = vpop.f32.mrb[178].mxu1 }
 0xb07   : > { %v5586_v62 = vadd.f32 %v5582_v53, %v5577_v55  ;;  %v5576_v63 = vadd.f32 %v5530_v59, %v5471_v49  ;;  %v5532_v1 = vpop.f32.mrb[50].mxu0  ;;  %v6157_v2 = vpop.f32.mrb[179].mxu1 }
 0xb08   : > { %v5584_v3 = vadd.f32 %v5582_v53, %v5575_v58  ;;  %v5533_v4 = vpop.f32.mrb[51].mxu0 }
 0xb09   : > { %v5589_v7 = vpack.c.bf16 %v5586_v62, %v5586_v62  ;;  %v5585_v8 = vadd.f32 %v5582_v53, %v5576_v63 }
 0xb0b   : > { %v5795_v9 = vpack.c.bf16 %v5585_v8, %v5584_v3  ;;  %v5607_v10 = vrot.slane %v5589_v7, %v7056_v40 }
 0xb0d   : > { %v5600_v11 = vrot.slane %v5795_v9, %v7056_v40 }
 0xb0f   : > { %v5608_v13 = vcombine.low %v5600_v11, %v5607_v10 }
 0xb11   : > { %v5622_v14 = vsel %vm5620_vm13, %v5608_v13, %v5621_v12 }
 0xb12   : > { %5623 = vst [vmem:[%s413_s29] sm:$0x3f] %v5622_v14 }
 0xb13 PF: > { %s22_s21 = sadd.s32 1, %s6333_s21  }
 0xb14   : > { %p19_p4 = scmp.ge.s32.totalorder %s22_s21, 4  }
 0xb16   :  { %21 = sbr.rel (!%p19_p4) target bundleno = 3 (0x3), region = 98 }

</bundles_post_ra>
